<compile_context>
chip_gen: v7x
topology: tpu7x:2x2x1
jax: 0.10.0
libtpu: 0.0.40
codegen_flags: <defaults>
</compile_context>

<pallas_src>
import functools

import numpy as np
import jax
import jax.numpy as jnp
from jax import lax
from jax.experimental import pallas as pl
from jax.experimental.pallas import tpu as pltpu

NUM_VIEWS = 300
GHEAD_PAD = 128           # lane padding for the 3-channel graspable head output
MAX_ROW_TILE = 512


def _round_up(x, m):
    return ((x + m - 1) // m) * m


def _row_tile(rows):
    # Biggest tile <= MAX_ROW_TILE; rows produced by these helpers always stay a
    # multiple of the tile chosen here (so downstream kernels agree on the grid).
    return min(MAX_ROW_TILE, _round_up(rows, 8))


# ----------------------------------------------------------------------------- kernels

def _linear_stats_kernel(x_ref, w_ref, b_ref, h_ref, st_ref, *, rows_valid, tr):
    # h = x @ w + b  (Conv1d k=1).  Also emit per-block partial sum / sum-of-squares
    # (rows 0 and 1 of an (8,C) stats block) so BatchNorm batch statistics need no
    # extra HBM pass over h.  Padded rows are masked out of the stats.
    h = jnp.dot(x_ref[...].astype(jnp.bfloat16), w_ref[...],
                preferred_element_type=jnp.float32) + b_ref[...]
    h_ref[...] = h.astype(h_ref.dtype)                       # stored bf16

    row = pl.program_id(0) * tr + lax.broadcasted_iota(jnp.int32, (tr, 1), 0)
    m = (row < rows_valid).astype(jnp.float32)               # (tr, 1)
    hm = h * m
    s = jnp.sum(hm, axis=0, keepdims=True)                   # (1, C)
    ss = jnp.sum(hm * h, axis=0, keepdims=True)               # (1, C)  == sum(m*h*h)
    st_ref[0] = jnp.concatenate(
        [s, ss, jnp.zeros((6, h.shape[1]), jnp.float32)], axis=0)


def linear_with_stats(x, w_bf, b):
    R, Cin = x.shape
    Cout = w_bf.shape[1]
    tr = _row_tile(R)
    Rp = _round_up(R, tr)
    if Rp != R:
        x = jnp.pad(x, ((0, Rp - R), (0, 0)))
    nb = Rp // tr
    h, stats = pl.pallas_call(
        functools.partial(_linear_stats_kernel, rows_valid=R, tr=tr),
        out_shape=(jax.ShapeDtypeStruct((Rp, Cout), jnp.bfloat16),
                   jax.ShapeDtypeStruct((nb, 8, Cout), jnp.float32)),
        grid=(nb,),
        in_specs=[pl.BlockSpec((tr, Cin), lambda i: (i, 0)),
                  pl.BlockSpec((Cin, Cout), lambda i: (0, 0)),
                  pl.BlockSpec((1, Cout), lambda i: (0, 0))],
        out_specs=(pl.BlockSpec((tr, Cout), lambda i: (i, 0)),
                   pl.BlockSpec((1, 8, Cout), lambda i: (i, 0, 0))),
        compiler_params=pltpu.CompilerParams(dimension_semantics=("parallel",)),
    )(x, w_bf, b.reshape(1, Cout))
    # Tiny cross-block reduction in plain JAX (nb x C elements).
    ssum = jnp.sum(stats[:, 0, :], axis=0)
    ssq = jnp.sum(stats[:, 1, :], axis=0)
    mean = ssum / R
    var = jnp.maximum(ssq / R - mean * mean, 0.0)             # biased var (torch BN train)
    return h, mean, var                                       # h is row-padded (Rp, Cout)


def _bn_relu_linear_kernel(h_ref, s_ref, t_ref, w_ref, b_ref, o_ref):
    # o = relu(h * scale + shift) @ w + b   (folded BN + ReLU + Conv1d(k=1))
    h = h_ref[...].astype(jnp.float32) * s_ref[...] + t_ref[...]
    h = jnp.maximum(h, 0.0)
    o_ref[...] = (jnp.dot(h.astype(jnp.bfloat16), w_ref[...],
                          preferred_element_type=jnp.float32) + b_ref[...])


def bn_relu_linear(h_pad, scale, shift, w_bf, b):
    Rp, C = h_pad.shape
    Cout = w_bf.shape[1]
    tr = _row_tile(Rp)
    return pl.pallas_call(
        _bn_relu_linear_kernel,
        out_shape=jax.ShapeDtypeStruct((Rp, Cout), jnp.float32),
        grid=(Rp // tr,),
        in_specs=[pl.BlockSpec((tr, C), lambda i: (i, 0)),
                  pl.BlockSpec((1, C), lambda i: (0, 0)),
                  pl.BlockSpec((1, C), lambda i: (0, 0)),
                  pl.BlockSpec((C, Cout), lambda i: (0, 0)),
                  pl.BlockSpec((1, Cout), lambda i: (0, 0))],
        out_specs=pl.BlockSpec((tr, Cout), lambda i: (i, 0)),
        compiler_params=pltpu.CompilerParams(dimension_semantics=("parallel",)),
    )(h_pad, scale, shift, w_bf, b.reshape(1, Cout))


def _view_head_kernel(h_ref, s_ref, t_ref, w2_ref, b2_ref, wt_ref, bt_ref, o_ref):
    # Fused: BN + ReLU + conv2 (256->3) + template-view matching + rotation matrix.
    # Output is a lane-packed (tr,16) slab: [vp(3) | rot9 | top_idx_as_f32 | pad(3)].
    h = h_ref[...].astype(jnp.float32) * s_ref[...] + t_ref[...]
    h = jnp.maximum(h, 0.0)
    hb = h.astype(jnp.bfloat16)

    vp = jnp.dot(hb, w2_ref[...], preferred_element_type=jnp.float32) + b2_ref[...]
    # dots = vp @ T^T computed directly from h via precomputed W2 @ T^T.
    # Templates are pre-normalized, and argmax(cos) is invariant to the positive
    # per-row |vp| scale, so the divide is dropped entirely.
    dots = jnp.dot(hb, wt_ref[...], preferred_element_type=jnp.float32) + bt_ref[...]
    vmax = jnp.max(dots, axis=1, keepdims=True)
    idx = lax.broadcasted_iota(jnp.int32, dots.shape, 1)
    cand = jnp.where(dots == vmax, idx, dots.shape[1])
    top = jnp.min(cand, axis=1, keepdims=True).astype(jnp.float32)   # first max, like torch

    # batch_viewpoint_params_to_matrix(-vp, angle=0): columns = (axis_x, axis_y, axis_z)
    tw0, tw1, tw2 = -vp[:, 0:1], -vp[:, 1:2], -vp[:, 2:3]
    y0, y1 = -tw1, tw0
    ysq = y0 * y0 + y1 * y1
    deg = ysq == 0.0
    y1 = jnp.where(deg, 1.0, y1)
    ysq = jnp.where(deg, 1.0, ysq)
    inv_y = lax.rsqrt(ysq)
    # TODO(synk): vp == 0 gives inf/nan here, same as the torch reference.
    inv_x = lax.rsqrt(tw0 * tw0 + tw1 * tw1 + tw2 * tw2)
    ax0, ax1, ax2 = tw0 * inv_x, tw1 * inv_x, tw2 * inv_x
    ay0, ay1 = y0 * inv_y, y1 * inv_y
    zcol = jnp.zeros_like(ax0)
    az0 = -ax2 * ay1
    az1 = ax2 * ay0
    az2 = ax0 * ay1 - ax1 * ay0

    # Single lane-packed store (row-major 3x3 with columns axis_x, axis_y, axis_z).
    o_ref[...] = jnp.concatenate(
        [vp[:, 0:1], vp[:, 1:2], vp[:, 2:3],
         ax0, ay0, az0,
         ax1, ay1, az1,
         ax2, zcol, az2,
         top, zcol, zcol, zcol], axis=1)


def view_head(h_pad, scale, shift, w2_bf, b2, wt_bf, bt):
    Rp, C = h_pad.shape
    Vp = wt_bf.shape[1]
    tr = _row_tile(Rp)
    return pl.pallas_call(
        _view_head_kernel,
        out_shape=jax.ShapeDtypeStruct((Rp, 16), jnp.float32),
        grid=(Rp // tr,),
        in_specs=[pl.BlockSpec((tr, C), lambda i: (i, 0)),
                  pl.BlockSpec((1, C), lambda i: (0, 0)),
                  pl.BlockSpec((1, C), lambda i: (0, 0)),
                  pl.BlockSpec((C, 3), lambda i: (0, 0)),
                  pl.BlockSpec((1, 3), lambda i: (0, 0)),
                  pl.BlockSpec((C, Vp), lambda i: (0, 0)),
                  pl.BlockSpec((1, Vp), lambda i: (0, 0))],
        out_specs=pl.BlockSpec((tr, 16), lambda i: (i, 0)),
        compiler_params=pltpu.CompilerParams(dimension_semantics=("parallel",)),
    )(h_pad, scale, shift, w2_bf, b2.reshape(1, 3), wt_bf, bt.reshape(1, Vp))


def _fps_kernel(d_ref, o_ref, *, nsample):
    # Furthest-point sampling over the masked subset, fully VMEM/vreg resident.
    # d_ref[0] rows: 0..2 = x,y,z ; 3 = validity mask (1.0/0.0) ; 4..7 = padding.
    data = d_ref[0]                                           # (8, Np)
    Np = data.shape[1]
    x, y, z = data[0:1, :], data[1:2, :], data[2:3, :]
    valid = data[3:4, :] > 0.5                                # padded cols are invalid
    col = lax.broadcasted_iota(jnp.int32, (1, Np), 1)

    dist0 = jnp.where(valid, jnp.float32(1e10), jnp.float32(-1.0))
    first = jnp.min(jnp.where(valid, col, Np))                # first valid index
    first = jnp.where(first == Np, 0, first).astype(jnp.int32)

    NSp = o_ref.shape[2]
    out_col = lax.broadcasted_iota(jnp.int32, (1, NSp), 1)
    inds0 = jnp.zeros((1, NSp), jnp.int32)

    def body(j, carry):
        dist, last, inds = carry
        inds = jnp.where(out_col == j, last, inds)            # inds[j] = last
        sel = col == last                                     # gather xyz[last]
        xl = jnp.sum(jnp.where(sel, x, 0.0))
        yl = jnp.sum(jnp.where(sel, y, 0.0))
        zl = jnp.sum(jnp.where(sel, z, 0.0))
        dx, dy, dz = x - xl, y - yl, z - zl
        d = dx * dx + dy * dy + dz * dz
        dist = jnp.where(valid, jnp.minimum(dist, d), jnp.float32(-1.0))
        m = jnp.max(dist)
        nxt = jnp.min(jnp.where(dist == m, col, Np)).astype(jnp.int32)
        return dist, nxt, inds

    _, _, inds = lax.fori_loop(0, nsample, body, (dist0, first, inds0))
    o_ref[0] = jnp.broadcast_to(inds, (8, NSp))


def fps_pallas(seed_xyz, mask, nsample):
    B, N, _ = seed_xyz.shape
    Np = _round_up(N, 128)
    NSp = _round_up(nsample, 128)
    data = jnp.concatenate(
        [jnp.transpose(seed_xyz, (0, 2, 1)),                  # (B, 3, N)
         mask.astype(jnp.float32)[:, None, :],                # (B, 1, N)
         jnp.zeros((B, 4, N), jnp.float32)], axis=1)          # -> (B, 8, N)
    if Np != N:
        data = jnp.pad(data, ((0, 0), (0, 0), (0, Np - N)))
    out = pl.pallas_call(
        functools.partial(_fps_kernel, nsample=nsample),
        out_shape=jax.ShapeDtypeStruct((B, 8, NSp), jnp.int32),
        grid=(B,),
        in_specs=[pl.BlockSpec((1, 8, Np), lambda b: (b, 0, 0))],
        out_specs=pl.BlockSpec((1, 8, NSp), lambda b: (b, 0, 0)),
        compiler_params=pltpu.CompilerParams(dimension_semantics=("parallel",)),
    )(data)
    return out[:, 0, :nsample]


# ------------------------------------------------------------------------------- glue

def generate_grasp_views(N=300):
    phi = (np.sqrt(5) - 1) / 2
    i = np.arange(N, dtype=np.float64)
    z = (2 * i + 1) / N - 1
    r = np.sqrt(np.maximum(1 - z * z, 0.0))
    x = r * np.cos(2 * i * np.pi * phi)
    y = r * np.sin(2 * i * np.pi * phi)
    return jnp.asarray(np.stack([x, y, z], axis=1).astype(np.float32))


def _bn_fold(mean, var, gamma, beta, eps=1e-5):
    # PyTorch BatchNorm1d default (training) forward: batch stats, biased variance.
    scale = gamma * lax.rsqrt(var + eps)
    shift = beta - mean * scale
    return scale.reshape(1, -1), shift.reshape(1, -1)


def approachnet_forward(seed_xyz, seed_features, params, nsample=64):
    B, N, _ = seed_xyz.shape
    C = seed_features.shape[1]
    end_points = {}
    end_points['fp2_xyz'] = seed_xyz  # overwritten later, mirroring the torch code

    feat_bnc = jnp.transpose(seed_features, (0, 2, 1))                  # (B, N, C)
    x = feat_bnc.reshape(B * N, C)
    R1 = B * N

    # graspable_head: Conv1d -> BN -> ReLU -> Conv1d (1x1 convs == per-point MLP)
    h1, m1, v1 = linear_with_stats(x, params['gW1'].astype(jnp.bfloat16), params['gb1'])
    s1, t1 = _bn_fold(m1, v1, params['g_gamma'], params['g_beta'])
    gW2p = jnp.pad(params['gW2'], ((0, 0), (0, GHEAD_PAD - 3))).astype(jnp.bfloat16)
    gb2p = jnp.pad(params['gb2'], (0, GHEAD_PAD - 3))
    grasp_pad = bn_relu_linear(h1, s1, t1, gW2p, gb2p)                  # (R1p, 128)
    graspable = grasp_pad[:R1, :3].reshape(B, N, 3)

    objectness_score = jnp.transpose(graspable[:, :, :2], (0, 2, 1))    # (B, 2, N)
    graspness_score = graspable[:, :, 2]                                # (B, N)
    end_points['objectness_score'] = objectness_score
    end_points['graspness_score'] = graspness_score

    objectness_pred = jnp.argmax(objectness_score, axis=1)
    graspness_mask = (graspness_score > 0.1) & (objectness_pred == 1)

    # furthest point sampling over the masked subset (indices into the full point set)
    graspable_inds = fps_pallas(seed_xyz, graspness_mask, nsample)      # (B, ns) i32

    # TODO(synk): data-dependent per-point gathers stay in plain JAX (XLA gather).
    graspable_xyz = jnp.take_along_axis(seed_xyz, graspable_inds[:, :, None], axis=1)
    graspable_feat_bnc = jnp.take_along_axis(feat_bnc, graspable_inds[:, :, None], axis=1)
    end_points['fp2_xyz'] = graspable_xyz
    end_points['fp2_inds'] = graspable_inds
    end_points['fp2_features'] = jnp.transpose(graspable_feat_bnc, (0, 2, 1))
    end_points['fp2_graspness'] = jnp.take_along_axis(graspness_score, graspable_inds, axis=1)

    # conv1 -> bn1 -> relu -> conv2 + view matching + rotation, fused
    x2 = graspable_feat_bnc.reshape(B * nsample, C)
    R2 = B * nsample
    h2, m2, v2 = linear_with_stats(x2, params['W1'].astype(jnp.bfloat16), params['b1'])
    s2, t2 = _bn_fold(m2, v2, params['bn1_gamma'], params['bn1_beta'])

    templates = generate_grasp_views(NUM_VIEWS)
    templates = templates / jnp.linalg.norm(templates, axis=1, keepdims=True)
    W2tT = params['W2'] @ templates.T                                   # (C, V)
    btT = params['b2'] @ templates.T                                    # (V,)
    Vp = _round_up(NUM_VIEWS, 128)
    W2tTp = jnp.pad(W2tT, ((0, 0), (0, Vp - NUM_VIEWS))).astype(jnp.bfloat16)
    btTp = jnp.concatenate([btT, jnp.full((Vp - NUM_VIEWS,), -1e30, jnp.float32)])

    packed = view_head(h2, s2, t2,
                       params['W2'].astype(jnp.bfloat16), params['b2'],
                       W2tTp, btTp)[:R2]                                # (R2, 16)
    vp_xyz = packed[:, 0:3].reshape(B, nsample, 3)
    rot = packed[:, 3:12].reshape(B, nsample, 3, 3)
    top = packed[:, 12].astype(jnp.int32).reshape(B, nsample)

    end_points['view_prediction'] = vp_xyz
    end_points['grasp_top_view_inds'] = top
    end_points['grasp_top_view_xyz'] = vp_xyz
    end_points['grasp_top_view_rot'] = rot
    return end_points


def init_params(key, C=256):
    ks = jax.random.split(key, 6)
    s = 1.0 / np.sqrt(C)
    return {
        # graspable_head: Conv1d(C,C,1), BN(C), ReLU, Conv1d(C,3,1)
        'gW1': jax.random.normal(ks[0], (C, C), jnp.float32) * s,
        'gb1': jnp.zeros((C,), jnp.float32),
        'g_gamma': jnp.ones((C,), jnp.float32),
        'g_beta': jnp.zeros((C,), jnp.float32),
        'gW2': jax.random.normal(ks[1], (C, 3), jnp.float32) * s,
        # biases chosen so most points get objectness==1 and graspness > 0.1
        'gb2': jnp.array([-3.0, 3.0, 3.0], jnp.float32),
        # conv1 / bn1 / conv2
        'W1': jax.random.normal(ks[2], (C, C), jnp.float32) * s,
        'b1': jax.random.normal(ks[3], (C,), jnp.float32) * 0.1,
        'bn1_gamma': jnp.ones((C,), jnp.float32),
        'bn1_beta': jnp.zeros((C,), jnp.float32),
        'W2': jax.random.normal(ks[4], (C, 3), jnp.float32) * s,
        'b2': jax.random.normal(ks[5], (3,), jnp.float32) * 0.1,
    }


if __name__ == "__main__":
    key = jax.random.PRNGKey(0)
    kx, kf, kp = jax.random.split(key, 3)
    B, N, C = 2, 512, 256      # seed_feature_dim=256 is hard-coded by the module's gather
    nsample = 64               # module uses 1024; scaled down for a small synthetic run
    seed_xyz = jax.random.normal(kx, (B, N, 3), jnp.float32)
    seed_features = jax.random.normal(kf, (B, C, N), jnp.float32)
    params = init_params(kp, C)

    fwd = jax.jit(lambda a, b: approachnet_forward(a, b, params, nsample))
    end_points = fwd(seed_xyz, seed_features)
    jax.block_until_ready(end_points)
    print("KERNEL_OK")
</pallas_src>

<mosaic_0001>
module attributes {stable_mosaic.version = 11 : i64} {
  func.func @_linear_stats_kernel(%arg0: i32, %arg1: memref<512x256xf32, #tpu.memory_space<vmem>>, %arg2: memref<256x256xbf16, #tpu.memory_space<vmem>>, %arg3: memref<1x256xf32, #tpu.memory_space<vmem>>, %arg4: memref<512x256xbf16, #tpu.memory_space<vmem>>, %arg5: memref<1x8x256xf32, #tpu.memory_space<vmem>>) attributes {dimension_semantics = [#tpu.dimension_semantics<parallel>], iteration_bounds = array<i64: 2>, scalar_prefetch = 0 : i64, scratch_operands = 0 : i64, tpu.core_type = #tpu.core_type<tc>, window_params = [{transform_indices = @transform_0, window_bounds = array<i64: 512, 256>}, {pipeline_mode = #tpu.pipeline_mode<synchronous>, transform_indices = @transform_1, window_bounds = array<i64: 256, 256>}, {pipeline_mode = #tpu.pipeline_mode<synchronous>, transform_indices = @transform_2, window_bounds = array<i64: 1, 256>}, {transform_indices = @transform_3, window_bounds = array<i64: 512, 256>}, {transform_indices = @transform_4, window_bounds = array<i64: 1, 8, 256>}]} {
    %c0 = arith.constant 0 : index
    %c0_0 = arith.constant 0 : index
    %0 = vector.load %arg1[%c0, %c0_0] : memref<512x256xf32, #tpu.memory_space<vmem>>, vector<512x256xf32>
    %1 = arith.truncf %0 : vector<512x256xf32> to vector<512x256xbf16>
    %c0_1 = arith.constant 0 : index
    %c0_2 = arith.constant 0 : index
    %2 = vector.load %arg2[%c0_1, %c0_2] : memref<256x256xbf16, #tpu.memory_space<vmem>>, vector<256x256xbf16>
    %cst = arith.constant dense<0.000000e+00> : vector<512x256xf32>
    %3 = tpu.matmul %1, %2, %cst {dimension_numbers = #tpu.dot_dimension_numbers<[1], [0], [0], [1], [0, 0, 1, 1], [], []>} : vector<512x256xbf16>, vector<256x256xbf16>, vector<512x256xf32> -> vector<512x256xf32>
    %c0_3 = arith.constant 0 : index
    %c0_4 = arith.constant 0 : index
    %4 = vector.load %arg3[%c0_3, %c0_4] : memref<1x256xf32, #tpu.memory_space<vmem>>, vector<1x256xf32>
    %5 = vector.broadcast %4 : vector<1x256xf32> to vector<512x256xf32>
    %6 = arith.addf %3, %5 : vector<512x256xf32>
    %7 = arith.truncf %6 : vector<512x256xf32> to vector<512x256xbf16>
    %c0_5 = arith.constant 0 : index
    %c0_6 = arith.constant 0 : index
    %8 = vector.load %arg4[%c0_5, %c0_6] : memref<512x256xbf16, #tpu.memory_space<vmem>>, vector<512x256xbf16>
    tpu.vector_store %arg4[%c0_5, %c0_6], %7 {strides = array<i32>} : memref<512x256xbf16, #tpu.memory_space<vmem>>, vector<512x256xbf16>,
    %c512_i32 = arith.constant 512 : i32
    %9 = arith.muli %arg0, %c512_i32 : i32
    %10 = tpu.iota {dimensions = array<i32: 0>} : vector<512x1xi32>
    %11 = vector.broadcast %9 : i32 to vector<512x1xi32>
    %12 = arith.addi %11, %10 : vector<512x1xi32>
    %c1024_i32 = arith.constant 1024 : i32
    %13 = vector.broadcast %c1024_i32 : i32 to vector<512x1xi32>
    %14 = arith.cmpi slt, %12, %13 : vector<512x1xi32>
    %15 = arith.extui %14 : vector<512x1xi1> to vector<512x1xi32>
    %16 = arith.sitofp %15 : vector<512x1xi32> to vector<512x1xf32>
    %17 = vector.broadcast %16 : vector<512x1xf32> to vector<512x256xf32>
    %18 = arith.mulf %6, %17 : vector<512x256xf32>
    %cst_7 = arith.constant dense<0.000000e+00> : vector<256xf32>
    %19 = vector.multi_reduction <add>, %18, %cst_7 [0] : vector<512x256xf32> to vector<256xf32>
    %20 = vector.shape_cast %19 : vector<256xf32> to vector<1x256xf32>
    %21 = arith.mulf %18, %6 : vector<512x256xf32>
    %cst_8 = arith.constant dense<0.000000e+00> : vector<256xf32>
    %22 = vector.multi_reduction <add>, %21, %cst_8 [0] : vector<512x256xf32> to vector<256xf32>
    %23 = vector.shape_cast %22 : vector<256xf32> to vector<1x256xf32>
    %cst_9 = arith.constant 0.000000e+00 : f32
    %24 = vector.broadcast %cst_9 : f32 to vector<6x256xf32>
    %25 = tpu.concatenate %20, %23, %24 in 0 : vector<1x256xf32>, vector<1x256xf32>, vector<6x256xf32> -> vector<8x256xf32>
    %c0_10 = arith.constant 0 : index
    %c0_11 = arith.constant 0 : index
    %c0_12 = arith.constant 0 : index
    %26 = vector.load %arg5[%c0_10, %c0_11, %c0_12] : memref<1x8x256xf32, #tpu.memory_space<vmem>>, vector<1x8x256xf32>
    %27 = vector.shape_cast %26 : vector<1x8x256xf32> to vector<8x256xf32>
    %28 = vector.shape_cast %25 : vector<8x256xf32> to vector<1x8x256xf32>
    tpu.vector_store %arg5[%c0_10, %c0_11, %c0_12], %28 {strides = array<i32>} : memref<1x8x256xf32, #tpu.memory_space<vmem>>, vector<1x8x256xf32>,
    return
  }
  func.func @transform_0(%arg0: i32) -> (i32, i32) {
    %c0_i32 = arith.constant 0 : i32
    %c0_i32_0 = arith.constant 0 : i32
    return %arg0, %c0_i32 : i32, i32
  }
  func.func @transform_1(%arg0: i32) -> (i32, i32) {
    %c0_i32 = arith.constant 0 : i32
    %c0_i32_0 = arith.constant 0 : i32
    %c0_i32_1 = arith.constant 0 : i32
    return %c0_i32, %c0_i32_0 : i32, i32
  }
  func.func @transform_2(%arg0: i32) -> (i32, i32) {
    %c0_i32 = arith.constant 0 : i32
    %c0_i32_0 = arith.constant 0 : i32
    %c0_i32_1 = arith.constant 0 : i32
    return %c0_i32, %c0_i32_0 : i32, i32
  }
  func.func @transform_3(%arg0: i32) -> (i32, i32) {
    %c0_i32 = arith.constant 0 : i32
    %c0_i32_0 = arith.constant 0 : i32
    return %arg0, %c0_i32 : i32, i32
  }
  func.func @transform_4(%arg0: i32) -> (i32, i32, i32) {
    %c0_i32 = arith.constant 0 : i32
    %c0_i32_0 = arith.constant 0 : i32
    %c0_i32_1 = arith.constant 0 : i32
    return %arg0, %c0_i32, %c0_i32_0 : i32, i32, i32
  }
}

module attributes {stable_mosaic.version = 11 : i64} {
  func.func @_bn_relu_linear_kernel(%arg0: i32, %arg1: memref<512x256xbf16, #tpu.memory_space<vmem>>, %arg2: memref<1x256xf32, #tpu.memory_space<vmem>>, %arg3: memref<1x256xf32, #tpu.memory_space<vmem>>, %arg4: memref<256x128xbf16, #tpu.memory_space<vmem>>, %arg5: memref<1x128xf32, #tpu.memory_space<vmem>>, %arg6: memref<512x128xf32, #tpu.memory_space<vmem>>) attributes {dimension_semantics = [#tpu.dimension_semantics<parallel>], iteration_bounds = array<i64: 2>, scalar_prefetch = 0 : i64, scratch_operands = 0 : i64, tpu.core_type = #tpu.core_type<tc>, window_params = [{transform_indices = @transform_0, window_bounds = array<i64: 512, 256>}, {pipeline_mode = #tpu.pipeline_mode<synchronous>, transform_indices = @transform_1, window_bounds = array<i64: 1, 256>}, {pipeline_mode = #tpu.pipeline_mode<synchronous>, transform_indices = @transform_2, window_bounds = array<i64: 1, 256>}, {pipeline_mode = #tpu.pipeline_mode<synchronous>, transform_indices = @transform_3, window_bounds = array<i64: 256, 128>}, {pipeline_mode = #tpu.pipeline_mode<synchronous>, transform_indices = @transform_4, window_bounds = array<i64: 1, 128>}, {transform_indices = @transform_5, window_bounds = array<i64: 512, 128>}]} {
    %c0 = arith.constant 0 : index
    %c0_0 = arith.constant 0 : index
    %0 = vector.load %arg1[%c0, %c0_0] : memref<512x256xbf16, #tpu.memory_space<vmem>>, vector<512x256xbf16>
    %1 = arith.extf %0 : vector<512x256xbf16> to vector<512x256xf32>
    %c0_1 = arith.constant 0 : index
    %c0_2 = arith.constant 0 : index
    %2 = vector.load %arg2[%c0_1, %c0_2] : memref<1x256xf32, #tpu.memory_space<vmem>>, vector<1x256xf32>
    %3 = vector.broadcast %2 : vector<1x256xf32> to vector<512x256xf32>
    %4 = arith.mulf %1, %3 : vector<512x256xf32>
    %c0_3 = arith.constant 0 : index
    %c0_4 = arith.constant 0 : index
    %5 = vector.load %arg3[%c0_3, %c0_4] : memref<1x256xf32, #tpu.memory_space<vmem>>, vector<1x256xf32>
    %6 = vector.broadcast %5 : vector<1x256xf32> to vector<512x256xf32>
    %7 = arith.addf %4, %6 : vector<512x256xf32>
    %cst = arith.constant 0.000000e+00 : f32
    %8 = vector.broadcast %cst : f32 to vector<512x256xf32>
    %9 = arith.maximumf %7, %8 : vector<512x256xf32>
    %10 = arith.truncf %9 : vector<512x256xf32> to vector<512x256xbf16>
    %c0_5 = arith.constant 0 : index
    %c0_6 = arith.constant 0 : index
    %11 = vector.load %arg4[%c0_5, %c0_6] : memref<256x128xbf16, #tpu.memory_space<vmem>>, vector<256x128xbf16>
    %cst_7 = arith.constant dense<0.000000e+00> : vector<512x128xf32>
    %12 = tpu.matmul %10, %11, %cst_7 {dimension_numbers = #tpu.dot_dimension_numbers<[1], [0], [0], [1], [0, 0, 1, 1], [], []>} : vector<512x256xbf16>, vector<256x128xbf16>, vector<512x128xf32> -> vector<512x128xf32>
    %c0_8 = arith.constant 0 : index
    %c0_9 = arith.constant 0 : index
    %13 = vector.load %arg5[%c0_8, %c0_9] : memref<1x128xf32, #tpu.memory_space<vmem>>, vector<1x128xf32>
    %14 = vector.broadcast %13 : vector<1x128xf32> to vector<512x128xf32>
    %15 = arith.addf %12, %14 : vector<512x128xf32>
    %c0_10 = arith.constant 0 : index
    %c0_11 = arith.constant 0 : index
    %16 = vector.load %arg6[%c0_10, %c0_11] : memref<512x128xf32, #tpu.memory_space<vmem>>, vector<512x128xf32>
    tpu.vector_store %arg6[%c0_10, %c0_11], %15 {strides = array<i32>} : memref<512x128xf32, #tpu.memory_space<vmem>>, vector<512x128xf32>,
    return
  }
  func.func @transform_0(%arg0: i32) -> (i32, i32) {
    %c0_i32 = arith.constant 0 : i32
    %c0_i32_0 = arith.constant 0 : i32
    return %arg0, %c0_i32 : i32, i32
  }
  func.func @transform_1(%arg0: i32) -> (i32, i32) {
    %c0_i32 = arith.constant 0 : i32
    %c0_i32_0 = arith.constant 0 : i32
    %c0_i32_1 = arith.constant 0 : i32
    return %c0_i32, %c0_i32_0 : i32, i32
  }
  func.func @transform_2(%arg0: i32) -> (i32, i32) {
    %c0_i32 = arith.constant 0 : i32
    %c0_i32_0 = arith.constant 0 : i32
    %c0_i32_1 = arith.constant 0 : i32
    return %c0_i32, %c0_i32_0 : i32, i32
  }
  func.func @transform_3(%arg0: i32) -> (i32, i32) {
    %c0_i32 = arith.constant 0 : i32
    %c0_i32_0 = arith.constant 0 : i32
    %c0_i32_1 = arith.constant 0 : i32
    return %c0_i32, %c0_i32_0 : i32, i32
  }
  func.func @transform_4(%arg0: i32) -> (i32, i32) {
    %c0_i32 = arith.constant 0 : i32
    %c0_i32_0 = arith.constant 0 : i32
    %c0_i32_1 = arith.constant 0 : i32
    return %c0_i32, %c0_i32_0 : i32, i32
  }
  func.func @transform_5(%arg0: i32) -> (i32, i32) {
    %c0_i32 = arith.constant 0 : i32
    %c0_i32_0 = arith.constant 0 : i32
    return %arg0, %c0_i32 : i32, i32
  }
}

module attributes {stable_mosaic.version = 11 : i64} {
  func.func @_fps_kernel(%arg0: i32, %arg1: memref<1x8x512xf32, #tpu.memory_space<vmem>>, %arg2: memref<1x8x128xi32, #tpu.memory_space<vmem>>) attributes {dimension_semantics = [#tpu.dimension_semantics<parallel>], iteration_bounds = array<i64: 2>, scalar_prefetch = 0 : i64, scratch_operands = 0 : i64, tpu.core_type = #tpu.core_type<tc>, window_params = [{transform_indices = @transform_0, window_bounds = array<i64: 1, 8, 512>}, {transform_indices = @transform_1, window_bounds = array<i64: 1, 8, 128>}]} {
    %c0 = arith.constant 0 : index
    %c0_0 = arith.constant 0 : index
    %c0_1 = arith.constant 0 : index
    %0 = vector.load %arg1[%c0, %c0_0, %c0_1] : memref<1x8x512xf32, #tpu.memory_space<vmem>>, vector<1x8x512xf32>
    %1 = vector.shape_cast %0 : vector<1x8x512xf32> to vector<8x512xf32>
    %2 = vector.extract_strided_slice %1 {offsets = [0, 0], sizes = [1, 512], strides = [1, 1]} : vector<8x512xf32> to vector<1x512xf32>
    %3 = vector.extract_strided_slice %1 {offsets = [1, 0], sizes = [1, 512], strides = [1, 1]} : vector<8x512xf32> to vector<1x512xf32>
    %4 = vector.extract_strided_slice %1 {offsets = [2, 0], sizes = [1, 512], strides = [1, 1]} : vector<8x512xf32> to vector<1x512xf32>
    %5 = vector.extract_strided_slice %1 {offsets = [3, 0], sizes = [1, 512], strides = [1, 1]} : vector<8x512xf32> to vector<1x512xf32>
    %cst = arith.constant 5.000000e-01 : f32
    %6 = vector.broadcast %cst : f32 to vector<1x512xf32>
    %7 = arith.cmpf ogt, %5, %6 : vector<1x512xf32>
    %8 = tpu.iota {dimensions = array<i32: 1>} : vector<1x512xi32>
    %cst_2 = arith.constant 1.000000e+10 : f32
    %cst_3 = arith.constant -1.000000e+00 : f32
    %9 = vector.broadcast %cst_2 : f32 to vector<1x512xf32>
    %10 = vector.broadcast %cst_3 : f32 to vector<1x512xf32>
    %11 = arith.select %7, %9, %10 : vector<1x512xi1>, vector<1x512xf32>
    %c512_i32 = arith.constant 512 : i32
    %12 = vector.broadcast %c512_i32 : i32 to vector<1x512xi32>
    %13 = arith.select %7, %8, %12 : vector<1x512xi1>, vector<1x512xi32>
    %14 = vector.shape_cast %13 : vector<1x512xi32> to vector<1x1x512xi32>
    %cst_4 = arith.constant dense<2147483647> : vector<1xi32>
    %15 = vector.multi_reduction <minsi>, %14, %cst_4 [1, 2] : vector<1x1x512xi32> to vector<1xi32>
    %16 = vector.shape_cast %15 : vector<1xi32> to vector<1x1x1xi32>
    %17 = vector.extract %16[0, 0, 0] : i32 from vector<1x1x1xi32>
    %c512_i32_5 = arith.constant 512 : i32
    %18 = arith.cmpi eq, %17, %c512_i32_5 : i32
    %c0_i32 = arith.constant 0 : i32
    %19 = arith.select %18, %c0_i32, %17 : i32
    %20 = tpu.iota {dimensions = array<i32: 1>} : vector<1x128xi32>
    %c0_i32_6 = arith.constant 0 : i32
    %21 = vector.broadcast %c0_i32_6 : i32 to vector<1x128xi32>
    %c0_i32_7 = arith.constant 0 : i32
    %c64_i32 = arith.constant 64 : i32
    %22 = arith.addi %c0_i32_7, %c64_i32 : i32
    %c1_i32 = arith.constant 1 : i32
    %23:3 = scf.for %arg3 = %c0_i32_7 to %22 step %c1_i32 iter_args(%arg4 = %11, %arg5 = %19, %arg6 = %21) -> (vector<1x512xf32>, i32, vector<1x128xi32>)  : i32 {
      %29 = vector.broadcast %arg3 : i32 to vector<1x128xi32>
      %30 = arith.cmpi eq, %20, %29 : vector<1x128xi32>
      %31 = vector.broadcast %arg5 : i32 to vector<1x128xi32>
      %32 = arith.select %30, %31, %arg6 : vector<1x128xi1>, vector<1x128xi32>
      %33 = vector.broadcast %arg5 : i32 to vector<1x512xi32>
      %34 = arith.cmpi eq, %8, %33 : vector<1x512xi32>
      %cst_12 = arith.constant 0.000000e+00 : f32
      %35 = vector.broadcast %cst_12 : f32 to vector<1x512xf32>
      %36 = arith.select %34, %2, %35 : vector<1x512xi1>, vector<1x512xf32>
      %37 = vector.shape_cast %36 : vector<1x512xf32> to vector<1x1x512xf32>
      %cst_13 = arith.constant dense<0.000000e+00> : vector<1xf32>
      %38 = vector.multi_reduction <add>, %37, %cst_13 [1, 2] : vector<1x1x512xf32> to vector<1xf32>
      %39 = vector.shape_cast %38 : vector<1xf32> to vector<1x1x1xf32>
      %40 = vector.extract %39[0, 0, 0] : f32 from vector<1x1x1xf32>
      %cst_14 = arith.constant 0.000000e+00 : f32
      %41 = vector.broadcast %cst_14 : f32 to vector<1x512xf32>
      %42 = arith.select %34, %3, %41 : vector<1x512xi1>, vector<1x512xf32>
      %43 = vector.shape_cast %42 : vector<1x512xf32> to vector<1x1x512xf32>
      %cst_15 = arith.constant dense<0.000000e+00> : vector<1xf32>
      %44 = vector.multi_reduction <add>, %43, %cst_15 [1, 2] : vector<1x1x512xf32> to vector<1xf32>
      %45 = vector.shape_cast %44 : vector<1xf32> to vector<1x1x1xf32>
      %46 = vector.extract %45[0, 0, 0] : f32 from vector<1x1x1xf32>
      %cst_16 = arith.constant 0.000000e+00 : f32
      %47 = vector.broadcast %cst_16 : f32 to vector<1x512xf32>
      %48 = arith.select %34, %4, %47 : vector<1x512xi1>, vector<1x512xf32>
      %49 = vector.shape_cast %48 : vector<1x512xf32> to vector<1x1x512xf32>
      %cst_17 = arith.constant dense<0.000000e+00> : vector<1xf32>
      %50 = vector.multi_reduction <add>, %49, %cst_17 [1, 2] : vector<1x1x512xf32> to vector<1xf32>
      %51 = vector.shape_cast %50 : vector<1xf32> to vector<1x1x1xf32>
      %52 = vector.extract %51[0, 0, 0] : f32 from vector<1x1x1xf32>
      %53 = vector.broadcast %40 : f32 to vector<1x512xf32>
      %54 = arith.subf %2, %53 : vector<1x512xf32>
      %55 = vector.broadcast %46 : f32 to vector<1x512xf32>
      %56 = arith.subf %3, %55 : vector<1x512xf32>
      %57 = vector.broadcast %52 : f32 to vector<1x512xf32>
      %58 = arith.subf %4, %57 : vector<1x512xf32>
      %59 = arith.mulf %54, %54 : vector<1x512xf32>
      %60 = arith.mulf %56, %56 : vector<1x512xf32>
      %61 = arith.addf %59, %60 : vector<1x512xf32>
      %62 = arith.mulf %58, %58 : vector<1x512xf32>
      %63 = arith.addf %61, %62 : vector<1x512xf32>
      %64 = arith.minimumf %arg4, %63 : vector<1x512xf32>
      %cst_18 = arith.constant -1.000000e+00 : f32
      %65 = vector.broadcast %cst_18 : f32 to vector<1x512xf32>
      %66 = arith.select %7, %64, %65 : vector<1x512xi1>, vector<1x512xf32>
      %67 = vector.shape_cast %66 : vector<1x512xf32> to vector<1x1x512xf32>
      %cst_19 = arith.constant dense<0xFF800000> : vector<1xf32>
      %68 = vector.multi_reduction <maximumf>, %67, %cst_19 [1, 2] : vector<1x1x512xf32> to vector<1xf32>
      %69 = vector.shape_cast %68 : vector<1xf32> to vector<1x1x1xf32>
      %70 = vector.extract %69[0, 0, 0] : f32 from vector<1x1x1xf32>
      %71 = vector.broadcast %70 : f32 to vector<1x512xf32>
      %72 = arith.cmpf oeq, %66, %71 : vector<1x512xf32>
      %c512_i32_20 = arith.constant 512 : i32
      %73 = vector.broadcast %c512_i32_20 : i32 to vector<1x512xi32>
      %74 = arith.select %72, %8, %73 : vector<1x512xi1>, vector<1x512xi32>
      %75 = vector.shape_cast %74 : vector<1x512xi32> to vector<1x1x512xi32>
      %cst_21 = arith.constant dense<2147483647> : vector<1xi32>
      %76 = vector.multi_reduction <minsi>, %75, %cst_21 [1, 2] : vector<1x1x512xi32> to vector<1xi32>
      %77 = vector.shape_cast %76 : vector<1xi32> to vector<1x1x1xi32>
      %78 = vector.extract %77[0, 0, 0] : i32 from vector<1x1x1xi32>
      scf.yield %66, %78, %32 : vector<1x512xf32>, i32, vector<1x128xi32>
    }
    %c64_i32_8 = arith.constant 64 : i32
    %24 = vector.shape_cast %23#2 : vector<1x128xi32> to vector<1x128xi32>
    %25 = vector.broadcast %24 : vector<1x128xi32> to vector<8x128xi32>
    %c0_9 = arith.constant 0 : index
    %c0_10 = arith.constant 0 : index
    %c0_11 = arith.constant 0 : index
    %26 = vector.load %arg2[%c0_9, %c0_10, %c0_11] : memref<1x8x128xi32, #tpu.memory_space<vmem>>, vector<1x8x128xi32>
    %27 = vector.shape_cast %26 : vector<1x8x128xi32> to vector<8x128xi32>
    %28 = vector.shape_cast %25 : vector<8x128xi32> to vector<1x8x128xi32>
    tpu.vector_store %arg2[%c0_9, %c0_10, %c0_11], %28 {strides = array<i32>} : memref<1x8x128xi32, #tpu.memory_space<vmem>>, vector<1x8x128xi32>,
    return
  }
  func.func @transform_0(%arg0: i32) -> (i32, i32, i32) {
    %c0_i32 = arith.constant 0 : i32
    %c0_i32_0 = arith.constant 0 : i32
    %c0_i32_1 = arith.constant 0 : i32
    return %arg0, %c0_i32, %c0_i32_0 : i32, i32, i32
  }
  func.func @transform_1(%arg0: i32) -> (i32, i32, i32) {
    %c0_i32 = arith.constant 0 : i32
    %c0_i32_0 = arith.constant 0 : i32
    %c0_i32_1 = arith.constant 0 : i32
    return %arg0, %c0_i32, %c0_i32_0 : i32, i32, i32
  }
}

module attributes {stable_mosaic.version = 11 : i64} {
  func.func @_linear_stats_kernel(%arg0: i32, %arg1: memref<128x256xf32, #tpu.memory_space<vmem>>, %arg2: memref<256x256xbf16, #tpu.memory_space<vmem>>, %arg3: memref<1x256xf32, #tpu.memory_space<vmem>>, %arg4: memref<128x256xbf16, #tpu.memory_space<vmem>>, %arg5: memref<1x8x256xf32, #tpu.memory_space<vmem>>) attributes {dimension_semantics = [#tpu.dimension_semantics<parallel>], iteration_bounds = array<i64: 1>, scalar_prefetch = 0 : i64, scratch_operands = 0 : i64, tpu.core_type = #tpu.core_type<tc>, window_params = [{transform_indices = @transform_0, window_bounds = array<i64: 128, 256>}, {pipeline_mode = #tpu.pipeline_mode<synchronous>, transform_indices = @transform_1, window_bounds = array<i64: 256, 256>}, {pipeline_mode = #tpu.pipeline_mode<synchronous>, transform_indices = @transform_2, window_bounds = array<i64: 1, 256>}, {transform_indices = @transform_3, window_bounds = array<i64: 128, 256>}, {transform_indices = @transform_4, window_bounds = array<i64: 1, 8, 256>}]} {
    %c0 = arith.constant 0 : index
    %c0_0 = arith.constant 0 : index
    %0 = vector.load %arg1[%c0, %c0_0] : memref<128x256xf32, #tpu.memory_space<vmem>>, vector<128x256xf32>
    %1 = arith.truncf %0 : vector<128x256xf32> to vector<128x256xbf16>
    %c0_1 = arith.constant 0 : index
    %c0_2 = arith.constant 0 : index
    %2 = vector.load %arg2[%c0_1, %c0_2] : memref<256x256xbf16, #tpu.memory_space<vmem>>, vector<256x256xbf16>
    %cst = arith.constant dense<0.000000e+00> : vector<128x256xf32>
    %3 = tpu.matmul %1, %2, %cst {dimension_numbers = #tpu.dot_dimension_numbers<[1], [0], [0], [1], [0, 0, 1, 1], [], []>} : vector<128x256xbf16>, vector<256x256xbf16>, vector<128x256xf32> -> vector<128x256xf32>
    %c0_3 = arith.constant 0 : index
    %c0_4 = arith.constant 0 : index
    %4 = vector.load %arg3[%c0_3, %c0_4] : memref<1x256xf32, #tpu.memory_space<vmem>>, vector<1x256xf32>
    %5 = vector.broadcast %4 : vector<1x256xf32> to vector<128x256xf32>
    %6 = arith.addf %3, %5 : vector<128x256xf32>
    %7 = arith.truncf %6 : vector<128x256xf32> to vector<128x256xbf16>
    %c0_5 = arith.constant 0 : index
    %c0_6 = arith.constant 0 : index
    %8 = vector.load %arg4[%c0_5, %c0_6] : memref<128x256xbf16, #tpu.memory_space<vmem>>, vector<128x256xbf16>
    tpu.vector_store %arg4[%c0_5, %c0_6], %7 {strides = array<i32>} : memref<128x256xbf16, #tpu.memory_space<vmem>>, vector<128x256xbf16>,
    %c128_i32 = arith.constant 128 : i32
    %9 = arith.muli %arg0, %c128_i32 : i32
    %10 = tpu.iota {dimensions = array<i32: 0>} : vector<128x1xi32>
    %11 = vector.broadcast %9 : i32 to vector<128x1xi32>
    %12 = arith.addi %11, %10 : vector<128x1xi32>
    %c128_i32_7 = arith.constant 128 : i32
    %13 = vector.broadcast %c128_i32_7 : i32 to vector<128x1xi32>
    %14 = arith.cmpi slt, %12, %13 : vector<128x1xi32>
    %15 = arith.extui %14 : vector<128x1xi1> to vector<128x1xi32>
    %16 = arith.sitofp %15 : vector<128x1xi32> to vector<128x1xf32>
    %17 = vector.broadcast %16 : vector<128x1xf32> to vector<128x256xf32>
    %18 = arith.mulf %6, %17 : vector<128x256xf32>
    %cst_8 = arith.constant dense<0.000000e+00> : vector<256xf32>
    %19 = vector.multi_reduction <add>, %18, %cst_8 [0] : vector<128x256xf32> to vector<256xf32>
    %20 = vector.shape_cast %19 : vector<256xf32> to vector<1x256xf32>
    %21 = arith.mulf %18, %6 : vector<128x256xf32>
    %cst_9 = arith.constant dense<0.000000e+00> : vector<256xf32>
    %22 = vector.multi_reduction <add>, %21, %cst_9 [0] : vector<128x256xf32> to vector<256xf32>
    %23 = vector.shape_cast %22 : vector<256xf32> to vector<1x256xf32>
    %cst_10 = arith.constant 0.000000e+00 : f32
    %24 = vector.broadcast %cst_10 : f32 to vector<6x256xf32>
    %25 = tpu.concatenate %20, %23, %24 in 0 : vector<1x256xf32>, vector<1x256xf32>, vector<6x256xf32> -> vector<8x256xf32>
    %c0_11 = arith.constant 0 : index
    %c0_12 = arith.constant 0 : index
    %c0_13 = arith.constant 0 : index
    %26 = vector.load %arg5[%c0_11, %c0_12, %c0_13] : memref<1x8x256xf32, #tpu.memory_space<vmem>>, vector<1x8x256xf32>
    %27 = vector.shape_cast %26 : vector<1x8x256xf32> to vector<8x256xf32>
    %28 = vector.shape_cast %25 : vector<8x256xf32> to vector<1x8x256xf32>
    tpu.vector_store %arg5[%c0_11, %c0_12, %c0_13], %28 {strides = array<i32>} : memref<1x8x256xf32, #tpu.memory_space<vmem>>, vector<1x8x256xf32>,
    return
  }
  func.func @transform_0(%arg0: i32) -> (i32, i32) {
    %c0_i32 = arith.constant 0 : i32
    %c0_i32_0 = arith.constant 0 : i32
    return %arg0, %c0_i32 : i32, i32
  }
  func.func @transform_1(%arg0: i32) -> (i32, i32) {
    %c0_i32 = arith.constant 0 : i32
    %c0_i32_0 = arith.constant 0 : i32
    %c0_i32_1 = arith.constant 0 : i32
    return %c0_i32, %c0_i32_0 : i32, i32
  }
  func.func @transform_2(%arg0: i32) -> (i32, i32) {
    %c0_i32 = arith.constant 0 : i32
    %c0_i32_0 = arith.constant 0 : i32
    %c0_i32_1 = arith.constant 0 : i32
    return %c0_i32, %c0_i32_0 : i32, i32
  }
  func.func @transform_3(%arg0: i32) -> (i32, i32) {
    %c0_i32 = arith.constant 0 : i32
    %c0_i32_0 = arith.constant 0 : i32
    return %arg0, %c0_i32 : i32, i32
  }
  func.func @transform_4(%arg0: i32) -> (i32, i32, i32) {
    %c0_i32 = arith.constant 0 : i32
    %c0_i32_0 = arith.constant 0 : i32
    %c0_i32_1 = arith.constant 0 : i32
    return %arg0, %c0_i32, %c0_i32_0 : i32, i32, i32
  }
}

module attributes {stable_mosaic.version = 11 : i64} {
  func.func @_view_head_kernel(%arg0: i32, %arg1: memref<128x256xbf16, #tpu.memory_space<vmem>>, %arg2: memref<1x256xf32, #tpu.memory_space<vmem>>, %arg3: memref<1x256xf32, #tpu.memory_space<vmem>>, %arg4: memref<256x3xbf16, #tpu.memory_space<vmem>>, %arg5: memref<1x3xf32, #tpu.memory_space<vmem>>, %arg6: memref<256x384xbf16, #tpu.memory_space<vmem>>, %arg7: memref<1x384xf32, #tpu.memory_space<vmem>>, %arg8: memref<128x16xf32, #tpu.memory_space<vmem>>) attributes {dimension_semantics = [#tpu.dimension_semantics<parallel>], iteration_bounds = array<i64: 1>, scalar_prefetch = 0 : i64, scratch_operands = 0 : i64, tpu.core_type = #tpu.core_type<tc>, window_params = [{transform_indices = @transform_0, window_bounds = array<i64: 128, 256>}, {pipeline_mode = #tpu.pipeline_mode<synchronous>, transform_indices = @transform_1, window_bounds = array<i64: 1, 256>}, {pipeline_mode = #tpu.pipeline_mode<synchronous>, transform_indices = @transform_2, window_bounds = array<i64: 1, 256>}, {pipeline_mode = #tpu.pipeline_mode<synchronous>, transform_indices = @transform_3, window_bounds = array<i64: 256, 3>}, {pipeline_mode = #tpu.pipeline_mode<synchronous>, transform_indices = @transform_4, window_bounds = array<i64: 1, 3>}, {pipeline_mode = #tpu.pipeline_mode<synchronous>, transform_indices = @transform_5, window_bounds = array<i64: 256, 384>}, {pipeline_mode = #tpu.pipeline_mode<synchronous>, transform_indices = @transform_6, window_bounds = array<i64: 1, 384>}, {transform_indices = @transform_7, window_bounds = array<i64: 128, 16>}]} {
    %c0 = arith.constant 0 : index
    %c0_0 = arith.constant 0 : index
    %0 = vector.load %arg1[%c0, %c0_0] : memref<128x256xbf16, #tpu.memory_space<vmem>>, vector<128x256xbf16>
    %1 = arith.extf %0 : vector<128x256xbf16> to vector<128x256xf32>
    %c0_1 = arith.constant 0 : index
    %c0_2 = arith.constant 0 : index
    %2 = vector.load %arg2[%c0_1, %c0_2] : memref<1x256xf32, #tpu.memory_space<vmem>>, vector<1x256xf32>
    %3 = vector.broadcast %2 : vector<1x256xf32> to vector<128x256xf32>
    %4 = arith.mulf %1, %3 : vector<128x256xf32>
    %c0_3 = arith.constant 0 : index
    %c0_4 = arith.constant 0 : index
    %5 = vector.load %arg3[%c0_3, %c0_4] : memref<1x256xf32, #tpu.memory_space<vmem>>, vector<1x256xf32>
    %6 = vector.broadcast %5 : vector<1x256xf32> to vector<128x256xf32>
    %7 = arith.addf %4, %6 : vector<128x256xf32>
    %cst = arith.constant 0.000000e+00 : f32
    %8 = vector.broadcast %cst : f32 to vector<128x256xf32>
    %9 = arith.maximumf %7, %8 : vector<128x256xf32>
    %10 = arith.truncf %9 : vector<128x256xf32> to vector<128x256xbf16>
    %c0_5 = arith.constant 0 : index
    %c0_6 = arith.constant 0 : index
    %11 = vector.load %arg4[%c0_5, %c0_6] : memref<256x3xbf16, #tpu.memory_space<vmem>>, vector<256x3xbf16>
    %cst_7 = arith.constant dense<0.000000e+00> : vector<128x3xf32>
    %12 = tpu.matmul %10, %11, %cst_7 {dimension_numbers = #tpu.dot_dimension_numbers<[1], [0], [0], [1], [0, 0, 1, 1], [], []>} : vector<128x256xbf16>, vector<256x3xbf16>, vector<128x3xf32> -> vector<128x3xf32>
    %c0_8 = arith.constant 0 : index
    %c0_9 = arith.constant 0 : index
    %13 = vector.load %arg5[%c0_8, %c0_9] : memref<1x3xf32, #tpu.memory_space<vmem>>, vector<1x3xf32>
    %14 = vector.broadcast %13 : vector<1x3xf32> to vector<128x3xf32>
    %15 = arith.addf %12, %14 : vector<128x3xf32>
    %c0_10 = arith.constant 0 : index
    %c0_11 = arith.constant 0 : index
    %16 = vector.load %arg6[%c0_10, %c0_11] : memref<256x384xbf16, #tpu.memory_space<vmem>>, vector<256x384xbf16>
    %cst_12 = arith.constant dense<0.000000e+00> : vector<128x384xf32>
    %17 = tpu.matmul %10, %16, %cst_12 {dimension_numbers = #tpu.dot_dimension_numbers<[1], [0], [0], [1], [0, 0, 1, 1], [], []>} : vector<128x256xbf16>, vector<256x384xbf16>, vector<128x384xf32> -> vector<128x384xf32>
    %c0_13 = arith.constant 0 : index
    %c0_14 = arith.constant 0 : index
    %18 = vector.load %arg7[%c0_13, %c0_14] : memref<1x384xf32, #tpu.memory_space<vmem>>, vector<1x384xf32>
    %19 = vector.broadcast %18 : vector<1x384xf32> to vector<128x384xf32>
    %20 = arith.addf %17, %19 : vector<128x384xf32>
    %cst_15 = arith.constant dense<0xFF800000> : vector<128xf32>
    %21 = vector.multi_reduction <maximumf>, %20, %cst_15 [1] : vector<128x384xf32> to vector<128xf32>
    %22 = vector.shape_cast %21 : vector<128xf32> to vector<128x1xf32>
    %23 = tpu.iota {dimensions = array<i32: 1>} : vector<128x384xi32>
    %24 = vector.broadcast %22 : vector<128x1xf32> to vector<128x384xf32>
    %25 = arith.cmpf oeq, %20, %24 : vector<128x384xf32>
    %c384_i32 = arith.constant 384 : i32
    %26 = vector.broadcast %c384_i32 : i32 to vector<128x384xi32>
    %27 = arith.select %25, %23, %26 : vector<128x384xi1>, vector<128x384xi32>
    %cst_16 = arith.constant dense<2147483647> : vector<128xi32>
    %28 = vector.multi_reduction <minsi>, %27, %cst_16 [1] : vector<128x384xi32> to vector<128xi32>
    %29 = vector.shape_cast %28 : vector<128xi32> to vector<128x1xi32>
    %30 = arith.sitofp %29 : vector<128x1xi32> to vector<128x1xf32>
    %31 = vector.extract_strided_slice %15 {offsets = [0, 0], sizes = [128, 1], strides = [1, 1]} : vector<128x3xf32> to vector<128x1xf32>
    %cst_17 = arith.constant 0.000000e+00 : f32
    %32 = vector.broadcast %cst_17 : f32 to vector<128x1xf32>
    %33 = arith.subf %32, %31 : vector<128x1xf32>
    %34 = vector.extract_strided_slice %15 {offsets = [0, 1], sizes = [128, 1], strides = [1, 1]} : vector<128x3xf32> to vector<128x1xf32>
    %cst_18 = arith.constant 0.000000e+00 : f32
    %35 = vector.broadcast %cst_18 : f32 to vector<128x1xf32>
    %36 = arith.subf %35, %34 : vector<128x1xf32>
    %37 = vector.extract_strided_slice %15 {offsets = [0, 2], sizes = [128, 1], strides = [1, 1]} : vector<128x3xf32> to vector<128x1xf32>
    %cst_19 = arith.constant 0.000000e+00 : f32
    %38 = vector.broadcast %cst_19 : f32 to vector<128x1xf32>
    %39 = arith.subf %38, %37 : vector<128x1xf32>
    %cst_20 = arith.constant 0.000000e+00 : f32
    %40 = vector.broadcast %cst_20 : f32 to vector<128x1xf32>
    %41 = arith.subf %40, %36 : vector<128x1xf32>
    %42 = arith.mulf %41, %41 : vector<128x1xf32>
    %43 = arith.mulf %33, %33 : vector<128x1xf32>
    %44 = arith.addf %42, %43 : vector<128x1xf32>
    %cst_21 = arith.constant 0.000000e+00 : f32
    %45 = vector.broadcast %cst_21 : f32 to vector<128x1xf32>
    %46 = arith.cmpf oeq, %44, %45 : vector<128x1xf32>
    %cst_22 = arith.constant 1.000000e+00 : f32
    %47 = vector.broadcast %cst_22 : f32 to vector<128x1xf32>
    %48 = arith.select %46, %47, %33 : vector<128x1xi1>, vector<128x1xf32>
    %cst_23 = arith.constant 1.000000e+00 : f32
    %49 = vector.broadcast %cst_23 : f32 to vector<128x1xf32>
    %50 = arith.select %46, %49, %44 : vector<128x1xi1>, vector<128x1xf32>
    %51 = math.rsqrt %50 : vector<128x1xf32>
    %52 = arith.mulf %33, %33 : vector<128x1xf32>
    %53 = arith.mulf %36, %36 : vector<128x1xf32>
    %54 = arith.addf %52, %53 : vector<128x1xf32>
    %55 = arith.mulf %39, %39 : vector<128x1xf32>
    %56 = arith.addf %54, %55 : vector<128x1xf32>
    %57 = math.rsqrt %56 : vector<128x1xf32>
    %58 = arith.mulf %33, %57 : vector<128x1xf32>
    %59 = arith.mulf %36, %57 : vector<128x1xf32>
    %60 = arith.mulf %39, %57 : vector<128x1xf32>
    %61 = arith.mulf %41, %51 : vector<128x1xf32>
    %62 = arith.mulf %48, %51 : vector<128x1xf32>
    %cst_24 = arith.constant 0.000000e+00 : f32
    %63 = vector.broadcast %cst_24 : f32 to vector<128x1xf32>
    %cst_25 = arith.constant 0.000000e+00 : f32
    %64 = vector.broadcast %cst_25 : f32 to vector<128x1xf32>
    %65 = arith.subf %64, %60 : vector<128x1xf32>
    %66 = arith.mulf %65, %62 : vector<128x1xf32>
    %67 = arith.mulf %60, %61 : vector<128x1xf32>
    %68 = arith.mulf %58, %62 : vector<128x1xf32>
    %69 = arith.mulf %59, %61 : vector<128x1xf32>
    %70 = arith.subf %68, %69 : vector<128x1xf32>
    %71 = vector.extract_strided_slice %15 {offsets = [0, 0], sizes = [128, 1], strides = [1, 1]} : vector<128x3xf32> to vector<128x1xf32>
    %72 = vector.extract_strided_slice %15 {offsets = [0, 1], sizes = [128, 1], strides = [1, 1]} : vector<128x3xf32> to vector<128x1xf32>
    %73 = vector.extract_strided_slice %15 {offsets = [0, 2], sizes = [128, 1], strides = [1, 1]} : vector<128x3xf32> to vector<128x1xf32>
    %74 = tpu.concatenate %71, %72, %73, %58, %61, %66, %59, %62, %67, %60, %63, %70, %30, %63, %63, %63 in 1 : vector<128x1xf32>, vector<128x1xf32>, vector<128x1xf32>, vector<128x1xf32>, vector<128x1xf32>, vector<128x1xf32>, vector<128x1xf32>, vector<128x1xf32>, vector<128x1xf32>, vector<128x1xf32>, vector<128x1xf32>, vector<128x1xf32>, vector<128x1xf32>, vector<128x1xf32>, vector<128x1xf32>, vector<128x1xf32> -> vector<128x16xf32>
    %c0_26 = arith.constant 0 : index
    %c0_27 = arith.constant 0 : index
    %75 = vector.load %arg8[%c0_26, %c0_27] : memref<128x16xf32, #tpu.memory_space<vmem>>, vector<128x16xf32>
    tpu.vector_store %arg8[%c0_26, %c0_27], %74 {strides = array<i32>} : memref<128x16xf32, #tpu.memory_space<vmem>>, vector<128x16xf32>,
    return
  }
  func.func @transform_0(%arg0: i32) -> (i32, i32) {
    %c0_i32 = arith.constant 0 : i32
    %c0_i32_0 = arith.constant 0 : i32
    return %arg0, %c0_i32 : i32, i32
  }
  func.func @transform_1(%arg0: i32) -> (i32, i32) {
    %c0_i32 = arith.constant 0 : i32
    %c0_i32_0 = arith.constant 0 : i32
    %c0_i32_1 = arith.constant 0 : i32
    return %c0_i32, %c0_i32_0 : i32, i32
  }
  func.func @transform_2(%arg0: i32) -> (i32, i32) {
    %c0_i32 = arith.constant 0 : i32
    %c0_i32_0 = arith.constant 0 : i32
    %c0_i32_1 = arith.constant 0 : i32
    return %c0_i32, %c0_i32_0 : i32, i32
  }
  func.func @transform_3(%arg0: i32) -> (i32, i32) {
    %c0_i32 = arith.constant 0 : i32
    %c0_i32_0 = arith.constant 0 : i32
    %c0_i32_1 = arith.constant 0 : i32
    return %c0_i32, %c0_i32_0 : i32, i32
  }
  func.func @transform_4(%arg0: i32) -> (i32, i32) {
    %c0_i32 = arith.constant 0 : i32
    %c0_i32_0 = arith.constant 0 : i32
    %c0_i32_1 = arith.constant 0 : i32
    return %c0_i32, %c0_i32_0 : i32, i32
  }
  func.func @transform_5(%arg0: i32) -> (i32, i32) {
    %c0_i32 = arith.constant 0 : i32
    %c0_i32_0 = arith.constant 0 : i32
    %c0_i32_1 = arith.constant 0 : i32
    return %c0_i32, %c0_i32_0 : i32, i32
  }
  func.func @transform_6(%arg0: i32) -> (i32, i32) {
    %c0_i32 = arith.constant 0 : i32
    %c0_i32_0 = arith.constant 0 : i32
    %c0_i32_1 = arith.constant 0 : i32
    return %c0_i32, %c0_i32_0 : i32, i32
  }
  func.func @transform_7(%arg0: i32) -> (i32, i32) {
    %c0_i32 = arith.constant 0 : i32
    %c0_i32_0 = arith.constant 0 : i32
    return %arg0, %c0_i32 : i32, i32
  }
}

</mosaic_0001>

<bundles_post_ra>
// kernel: _lambda_.6
= control target key start
LH: loop header
LB: loop body
LE: loop exit
PB: predicated region body
PF: predicated region fallthrough
CT: control target
= control target key end

     0   :  { %s1566_s18 = smov 0   ;;  %s2322_s0 = inlined_call_operand.vmem [shape: bf16[1024,256], index: 0, kind: input, shape index: {}]   ;;  %s2323_s1 = inlined_call_operand.vmem [shape: f32[1,256], index: 1, kind: input, shape index: {}]   ;;  %s2324_s2 = inlined_call_operand.vmem [shape: f32[1,256], index: 2, kind: input, shape index: {}]   ;;  %s2325_s3 = inlined_call_operand.vmem [shape: bf16[256,128], index: 3, kind: input, shape index: {}]   ;;  %s2326_s4 = inlined_call_operand.vmem [shape: f32[1,128], index: 4, kind: input, shape index: {}]   ;;  %s2327_s5 = inlined_call_operand.vmem [shape: f32[1024,128], index: 5, kind: output, shape index: {}]  }
   0x1 LB: > { %s1440_s19 = sadd.s32 4294967295, %s1533_s18   ;;  %p1444_p0 = scmp.ge.s32.totalorder %s1533_s18, 1  ;;  %s1533_s18 = sphi %s1566_s18, %s15_s18  }
   0x2   : > { %p189_p1 = scmp.lt.s32.totalorder %s1533_s18, 3 }
   0x4   : > { %p190_p2 = pnand %p1444_p0, %p189_p1 }
   0x5   : > { %v1511_v0 = vld [vmem:[%s2325_s3] sm:$0xff] (!%p190_p2)   ;;  %v1535_v1 = vmov (!%p190_p2), 0   ;;  %s1445_s22 = sshll.u32 (!%p190_p2), %s1440_s19, 6  ;;  %v1512_v2 = vld [vmem:[%s2325_s3 + $0x8] sm:$0xff] (!%p190_p2)   ;;  %v1513_v3 = vld [vmem:[%s2325_s3 + $0x10] sm:$0xff] (!%p190_p2)   ;;  %v426_v4 = vlaneseq (!%p190_p2) }
   0x6   : > { %193 = sbr.rel (%p190_p2) target bundleno = 407 (0x197), region = 40  ;;  %1031 = vmatprep.subr.bf16.mxu0 (!%p190_p2), %v1535_v1  ;;  %1470 = vmatprep.subr.bf16.mxu1 (!%p190_p2), %v1535_v1  ;;  %p219_p3 = scmp.lt.s32.totalorder (!%p190_p2), %s1445_s22, 127  ;;  %v1514_v5 = vld [vmem:[%s2325_s3 + $0x18] sm:$0xff] (!%p190_p2)   ;;  %v1515_v7 = vld [vmem:[%s2325_s3 + $0x20] sm:$0xff] (!%p190_p2)   ;;  %v1516_v17 = vld [vmem:[%s2325_s3 + $0x28] sm:$0xff] (!%p190_p2)  }
   0x7   : > { %1032 = vmatpush1.bf16.msra.mxu0 (!%p190_p2), %v1511_v0  ;;  %1486 = vmatpush1.bf16.msra.mxu1 (!%p190_p2), %v1511_v0  ;;  %v427_v6 = vshrl.u32 (!%p190_p2), %v426_v4, 7  ;;  %v424_v11 = vld [vmem:[%s2323_s1] sm:$0x3] (!%p190_p2)  ;;  %v1517_v27 = vld [vmem:[%s2325_s3 + $0x30] sm:$0xff] (!%p190_p2)   ;;  %v1518_v39 = vld [vmem:[%s2325_s3 + $0x38] sm:$0xff] (!%p190_p2)  }
   0x8   : > { %1033 = vmatprep.subr.bf16.mxu0 (!%p190_p2), %v1535_v1  ;;  %1471 = vmatprep.subr.bf16.mxu1 (!%p190_p2), %v1535_v1  ;;  %v564_v14 = vld [vmem:[%s2324_s2] sm:$0x3] (!%p190_p2)  ;;  %v1520_v61 = vld [vmem:[%s2325_s3 + $0x48] sm:$0xff] (!%p190_p2)  }
   0x9   : > { %v432_v8 = vsub.s32 (!%p190_p2), 1, %v427_v6  ;;  %v428_v19 = vsub.s32 (!%p190_p2), 0, %v427_v6  ;;  %v1519_v50 = vld [vmem:[%s2325_s3 + $0x40] sm:$0xff] (!%p190_p2)  }
   0xb   : > { %1034 = vmatpush1.bf16.msra.mxu0 (!%p190_p2), %v1512_v2  ;;  %1487 = vmatpush1.bf16.msra.mxu1 (!%p190_p2), %v1512_v2  ;;  %v1624_v18 = vrot.slane (!%p190_p2), %v424_v11, %v432_v8  ;;  %v1628_v20 = vrot.slane (!%p190_p2), %v564_v14, %v432_v8  ;;  %v1642_v31 = vrot.slane (!%p190_p2), %v424_v11, %v428_v19 }
   0xc   : > { %1035 = vmatprep.subr.bf16.mxu0 (!%p190_p2), %v1535_v1  ;;  %1472 = vmatprep.subr.bf16.mxu1 (!%p190_p2), %v1535_v1  ;;  %v1651_v41 = vrot.slane (!%p190_p2), %v564_v14, %v428_v19  ;;  %v1521_v14 = vld [vmem:[%s2325_s3 + $0x50] sm:$0xff] (!%p190_p2)  }
   0xd   : > { %s2329_s22 = smov (!%p219_p3, %s1445_s22), 127 }
   0xe   : > { %s1469_s29 = sshll.u32 %s2329_s22, 3 }
   0xf   : > { %1036 = vmatpush1.bf16.msra.mxu0 %v1513_v3  ;;  %1488 = vmatpush1.bf16.msra.mxu1 %v1513_v3  ;;  %s1602_s7 = scalar_lea.vmem %s2322_s0, %s1469_s29  ;;  %s2189_s19 = scalar_lea.vmem %s2327_s5, %s1469_s29 }
  0x10   : > { %1037 = vmatprep.subr.bf16.mxu0 %v1535_v1  ;;  %1473 = vmatprep.subr.bf16.mxu1 %v1535_v1  ;;  %v232_v9 = vld [vmem:[%s1602_s7] sm:$0xff]  ;;  %v233_v10 = vld [vmem:[%s1602_s7 + $0x8] sm:$0xff]  ;;  %v234_v44 = vld [vmem:[%s1602_s7 + $0x10] sm:$0xff] }
  0x11   : > { %v297_v12 = vunpack.c.h.bf16 %v232_v9  ;;  %v299_v13 = vunpack.c.h.bf16 %v233_v10  ;;  %v264_v15 = vld [vmem:[%s1602_s7 + $0x100] sm:$0xff]  ;;  %v1619_v16 = vld [vmem:[%s1602_s7 + $0x108] sm:$0xff]  ;;  %v296_v30 = vunpack.c.l.bf16 %v232_v9  ;;  %v298_v36 = vunpack.c.l.bf16 %v233_v10  ;;  %v235_v47 = vld [vmem:[%s1602_s7 + $0x18] sm:$0xff] }
  0x12   : > { %v361_v21 = vunpack.c.h.bf16 %v264_v15  ;;  %v363_v22 = vunpack.c.h.bf16 %v1619_v16  ;;  %v360_v45 = vunpack.c.l.bf16 %v264_v15  ;;  %v266_v48 = vld [vmem:[%s1602_s7 + $0x110] sm:$0xff]  ;;  %v267_v49 = vld [vmem:[%s1602_s7 + $0x118] sm:$0xff]  ;;  %v362_v51 = vunpack.c.l.bf16 %v1619_v16  ;;  %v1675_v3 = vld [vmem:[%s1602_s7 + $0x20] sm:$0xff] }
  0x13   : > { %1038 = vmatpush1.bf16.msra.mxu0 %v1514_v5  ;;  %1489 = vmatpush1.bf16.msra.mxu1 %v1514_v5  ;;  %v437_v23 = vmul.f32 %v1624_v18, %v297_v12  ;;  %v439_v24 = vmul.f32 %v1624_v18, %v299_v13  ;;  %v436_v43 = vmul.f32 %v1642_v31, %v296_v30  ;;  %v301_v53 = vunpack.c.h.bf16 %v234_v44  ;;  %v1678_v4 = vld [vmem:[%s1602_s7 + $0x28] sm:$0xff]  ;;  %v1685_v9 = vld [vmem:[%s1602_s7 + $0x120] sm:$0xff] }
  0x14   : > { %1039 = vmatprep.subr.bf16.mxu0 %v1535_v1  ;;  %1474 = vmatprep.subr.bf16.mxu1 %v1535_v1  ;;  %v501_v25 = vmul.f32 %v1624_v18, %v361_v21  ;;  %v503_v26 = vmul.f32 %v1624_v18, %v363_v22  ;;  %v438_v46 = vmul.f32 %v1642_v31, %v298_v36  ;;  %v303_v54 = vunpack.c.h.bf16 %v235_v47 }
  0x15   : > { %v577_v28 = vadd.f32 %v1628_v20, %v437_v23  ;;  %v579_v29 = vadd.f32 %v1628_v20, %v439_v24  ;;  %v576_v52 = vadd.f32 %v1651_v41, %v436_v43  ;;  %v365_v55 = vunpack.c.h.bf16 %v266_v48 }
  0x16   : > { %v641_v32 = vadd.f32 %v1628_v20, %v501_v25  ;;  %v643_v33 = vadd.f32 %v1628_v20, %v503_v26  ;;  %v367_v56 = vunpack.c.h.bf16 %v267_v49  ;;  %v578_v57 = vadd.f32 %v1651_v41, %v438_v46 }
  0x17   : > { %1040 = vmatpush1.bf16.msra.mxu0 %v1515_v7  ;;  %1490 = vmatpush1.bf16.msra.mxu1 %v1515_v7  ;;  %v705_v34 = vmax.f32 %v577_v28, 0.0  ;;  %v707_v35 = vmax.f32 %v579_v29, 0.0  ;;  %v500_v58 = vmul.f32 %v1642_v31, %v360_v45  ;;  %v300_v59 = vunpack.c.l.bf16 %v234_v44 }
  0x18   : > { %1041 = vmatprep.subr.bf16.mxu0 %v1535_v1  ;;  %1475 = vmatprep.subr.bf16.mxu1 %v1535_v1  ;;  %v769_v37 = vmax.f32 %v641_v32, 0.0  ;;  %v771_v38 = vmax.f32 %v643_v33, 0.0  ;;  %v302_v60 = vunpack.c.l.bf16 %v235_v47  ;;  %v502_v62 = vmul.f32 %v1642_v31, %v362_v51  ;;  %v1522_v33 = vld [vmem:[%s2325_s3 + $0x58] sm:$0xff]   ;;  %v1724_v51 = vld [vmem:[%s1602_s7 + $0x30] sm:$0xff] }
  0x19   : > { %v833_v40 = vpack.c.bf16 %v707_v35, %v705_v34  ;;  %v364_v63 = vunpack.c.l.bf16 %v266_v48  ;;  %v704_v0 = vmax.f32 %v576_v52, 0.0  ;;  %v366_v2 = vunpack.c.l.bf16 %v267_v49  ;;  %v1727_v52 = vld [vmem:[%s1602_s7 + $0x38] sm:$0xff] }
  0x1a   : > { %v865_v42 = vpack.c.bf16 %v771_v38, %v769_v37  ;;  %v441_v5 = vmul.f32 %v1624_v18, %v301_v53  ;;  %v443_v6 = vmul.f32 %v1624_v18, %v303_v54  ;;  %v505_v7 = vmul.f32 %v1624_v18, %v365_v55  ;;  %v1523_v53 = vld [vmem:[%s2325_s3 + $0x60] sm:$0xff]  }
  0x1b   : > { %1042 = vmatpush1.bf16.msra.mxu0 %v1516_v17  ;;  %1491 = vmatpush1.bf16.msra.mxu1 %v1516_v17  ;;  %v507_v8 = vmul.f32 %v1624_v18, %v367_v56  ;;  %v706_v10 = vmax.f32 %v578_v57, 0.0  ;;  %v640_v11 = vadd.f32 %v1651_v41, %v500_v58  ;;  %v440_v12 = vmul.f32 %v1642_v31, %v300_v59 }
  0x1c   : > { %1043 = vmatprep.subr.bf16.mxu0 %v1535_v1  ;;  %1476 = vmatprep.subr.bf16.mxu1 %v1535_v1  ;;  %v442_v13 = vmul.f32 %v1642_v31, %v302_v60  ;;  %v642_v15 = vadd.f32 %v1651_v41, %v502_v62  ;;  %v504_v16 = vmul.f32 %v1642_v31, %v364_v63  ;;  %v305_v17 = vunpack.c.h.bf16 %v1675_v3  ;;  %v270_v62 = vld [vmem:[%s1602_s7 + $0x130] sm:$0xff] }
  0x1d   : > { %1063 = vmatprep.mubr.bf16.mxu0 %v833_v40  ;;  %1191 = vmatprep.mubr.bf16.mxu1 %v865_v42  ;;  %v307_v19 = vunpack.c.h.bf16 %v1678_v4  ;;  %v506_v21 = vmul.f32 %v1642_v31, %v366_v2  ;;  %v369_v22 = vunpack.c.h.bf16 %v1685_v9  ;;  %v581_v23 = vadd.f32 %v1628_v20, %v441_v5 }
  0x1e   : > { %v583_v24 = vadd.f32 %v1628_v20, %v443_v6  ;;  %v645_v25 = vadd.f32 %v1628_v20, %v505_v7  ;;  %v647_v26 = vadd.f32 %v1628_v20, %v507_v8  ;;  %v1706_v28 = vpack.c.bf16 %v706_v10, %v704_v0  ;;  %v271_v8 = vld [vmem:[%s1602_s7 + $0x138] sm:$0xff] }
  0x1f   : > { %1044 = vmatpush1.bf16.msra.mxu0 %v1517_v27  ;;  %1492 = vmatpush1.bf16.msra.mxu1 %v1517_v27  ;;  %v269_v27 = vld [vmem:[%s1602_s7 + $0x128] sm:$0xff]  ;;  %v768_v29 = vmax.f32 %v640_v11, 0.0  ;;  %v580_v30 = vadd.f32 %v1651_v41, %v440_v12  ;;  %v582_v32 = vadd.f32 %v1651_v41, %v442_v13  ;;  %v770_v34 = vmax.f32 %v642_v15, 0.0 }
  0x20   : > { %1045 = vmatprep.subr.bf16.mxu0 %v1535_v1  ;;  %1477 = vmatprep.subr.bf16.mxu1 %v1535_v1  ;;  %v644_v35 = vadd.f32 %v1651_v41, %v504_v16  ;;  %v445_v36 = vmul.f32 %v1624_v18, %v305_v17  ;;  %v447_v37 = vmul.f32 %v1624_v18, %v307_v19  ;;  %v304_v42 = vunpack.c.l.bf16 %v1675_v3 }
  0x21   : > { %v646_v38 = vadd.f32 %v1651_v41, %v506_v21  ;;  %v509_v40 = vmul.f32 %v1624_v18, %v369_v22  ;;  %v709_v43 = vmax.f32 %v581_v23, 0.0  ;;  %v711_v44 = vmax.f32 %v583_v24, 0.0  ;;  %v1770_v24 = vld [vmem:[%s1602_s7 + $0x40] sm:$0xff] }
  0x22   : > { %v773_v45 = vmax.f32 %v645_v25, 0.0  ;;  %v775_v46 = vmax.f32 %v647_v26, 0.0  ;;  %v708_v47 = vmax.f32 %v580_v30, 0.0  ;;  %v306_v48 = vunpack.c.l.bf16 %v1678_v4  ;;  %v1773_v25 = vld [vmem:[%s1602_s7 + $0x48] sm:$0xff] }
  0x23   : > { %1046 = vmatpush1.bf16.msra.mxu0 %v1518_v39  ;;  %1493 = vmatpush1.bf16.msra.mxu1 %v1518_v39  ;;  %v371_v39 = vunpack.c.h.bf16 %v269_v27  ;;  %v368_v49 = vunpack.c.l.bf16 %v1685_v9  ;;  %v710_v54 = vmax.f32 %v582_v32, 0.0  ;;  %v772_v55 = vmax.f32 %v644_v35, 0.0  ;;  %v1524_v9 = vld [vmem:[%s2325_s3 + $0x68] sm:$0xff]   ;;  %v1525_v32 = vld [vmem:[%s2325_s3 + $0x70] sm:$0xff]  }
  0x24   : > { %1047 = vmatprep.subr.bf16.mxu0 %v1535_v1  ;;  %1478 = vmatprep.subr.bf16.mxu1 %v1535_v1  ;;  %v585_v56 = vadd.f32 %v1628_v20, %v445_v36  ;;  %v587_v57 = vadd.f32 %v1628_v20, %v447_v37  ;;  %v774_v58 = vmax.f32 %v646_v38, 0.0  ;;  %v1738_v60 = vadd.f32 %v1628_v20, %v509_v40 }
  0x25   : > { %v511_v59 = vmul.f32 %v1624_v18, %v371_v39  ;;  %v1742_v63 = vpack.c.bf16 %v770_v34, %v768_v29  ;;  %v1744_v0 = vpack.c.bf16 %v711_v44, %v709_v43  ;;  %v309_v2 = vunpack.c.h.bf16 %v1724_v51 }
  0x26   : > { %v311_v3 = vunpack.c.h.bf16 %v1727_v52  ;;  %v1748_v4 = vpack.c.bf16 %v775_v46, %v773_v45  ;;  %v446_v5 = vmul.f32 %v1642_v31, %v306_v48  ;;  %v508_v6 = vmul.f32 %v1642_v31, %v368_v49  ;;  %v1794_v46 = vld [vmem:[%s1602_s7 + $0x140] sm:$0xff] }
  0x27   : > { %1048 = vmatpush1.bf16.msra.mxu0 %v1519_v50  ;;  %1494 = vmatpush1.bf16.msra.mxu1 %v1519_v50  ;;  %v370_v50 = vunpack.c.l.bf16 %v269_v27  ;;  %v1757_v10 = vpack.c.bf16 %v710_v54, %v708_v47  ;;  %v713_v11 = vmax.f32 %v585_v56, 0.0  ;;  %v715_v12 = vmax.f32 %v587_v57, 0.0  ;;  %v1797_v47 = vld [vmem:[%s1602_s7 + $0x148] sm:$0xff] }
  0x28   : > { %1049 = vmatprep.subr.bf16.mxu0 %v1535_v1  ;;  %1479 = vmatprep.subr.bf16.mxu1 %v1535_v1  ;;  %v373_v13 = vunpack.c.h.bf16 %v270_v62  ;;  %v651_v15 = vadd.f32 %v1628_v20, %v511_v59  ;;  %v777_v16 = vmax.f32 %v1738_v60, 0.0  ;;  %v449_v19 = vmul.f32 %v1624_v18, %v309_v2 }
  0x29   : > { %v510_v7 = vmul.f32 %v1642_v31, %v370_v50  ;;  %v451_v21 = vmul.f32 %v1624_v18, %v311_v3  ;;  %v375_v22 = vunpack.c.h.bf16 %v271_v8  ;;  %v308_v23 = vunpack.c.l.bf16 %v1724_v51 }
  0x2a   : > { %v586_v26 = vadd.f32 %v1651_v41, %v446_v5  ;;  %v648_v27 = vadd.f32 %v1651_v41, %v508_v6  ;;  %v310_v30 = vunpack.c.l.bf16 %v1727_v52  ;;  %v513_v34 = vmul.f32 %v1624_v18, %v373_v13  ;;  %v1526_v52 = vld [vmem:[%s2325_s3 + $0x78] sm:$0xff]  }
  0x2b   : > { %1050 = vmatpush1.bf16.msra.mxu0 %v1520_v61  ;;  %1495 = vmatpush1.bf16.msra.mxu1 %v1520_v61  ;;  %v444_v61 = vmul.f32 %v1642_v31, %v304_v42  ;;  %v650_v29 = vadd.f32 %v1651_v41, %v510_v7  ;;  %v372_v35 = vunpack.c.l.bf16 %v270_v62  ;;  %v374_v36 = vunpack.c.l.bf16 %v271_v8 }
  0x2c   : > { %1051 = vmatprep.subr.bf16.mxu0 %v1535_v1  ;;  %1480 = vmatprep.subr.bf16.mxu1 %v1535_v1  ;;  %v779_v37 = vmax.f32 %v651_v15, 0.0  ;;  %v313_v39 = vunpack.c.h.bf16 %v1770_v24  ;;  %v315_v40 = vunpack.c.h.bf16 %v1773_v25  ;;  %v589_v42 = vadd.f32 %v1628_v20, %v449_v19  ;;  %v243_v19 = vld [vmem:[%s1602_s7 + $0x58] sm:$0xff] }
  0x2d   : > { %v584_v17 = vadd.f32 %v1651_v41, %v444_v61  ;;  %v591_v43 = vadd.f32 %v1628_v20, %v451_v21  ;;  %v515_v44 = vmul.f32 %v1624_v18, %v375_v22  ;;  %v448_v45 = vmul.f32 %v1642_v31, %v308_v23 }
  0x2e   : > { %v714_v48 = vmax.f32 %v586_v26, 0.0  ;;  %v776_v49 = vmax.f32 %v648_v27, 0.0  ;;  %v778_v50 = vmax.f32 %v650_v29, 0.0  ;;  %v450_v51 = vmul.f32 %v1642_v31, %v310_v30 }
  0x2f   : > { %1052 = vmatpush1.bf16.msra.mxu0 %v1521_v14  ;;  %1496 = vmatpush1.bf16.msra.mxu1 %v1521_v14  ;;  %v1761_v14 = vpack.c.bf16 %v774_v58, %v772_v55  ;;  %v712_v38 = vmax.f32 %v584_v17, 0.0  ;;  %v512_v54 = vmul.f32 %v1642_v31, %v372_v35  ;;  %v514_v55 = vmul.f32 %v1642_v31, %v374_v36 }
  0x30   : > { %1053 = vmatprep.subr.bf16.mxu0 %v1535_v1  ;;  %1481 = vmatprep.subr.bf16.mxu1 %v1535_v1  ;;  %v453_v56 = vmul.f32 %v1624_v18, %v313_v39  ;;  %v455_v57 = vmul.f32 %v1624_v18, %v315_v40  ;;  %v377_v58 = vunpack.c.h.bf16 %v1794_v46  ;;  %v379_v59 = vunpack.c.h.bf16 %v1797_v47 }
  0x31   : > { %v717_v60 = vmax.f32 %v589_v42, 0.0  ;;  %v719_v61 = vmax.f32 %v591_v43, 0.0  ;;  %v655_v62 = vadd.f32 %v1628_v20, %v515_v44  ;;  %v588_v2 = vadd.f32 %v1651_v41, %v448_v45 }
  0x32   : > { %v1814_v3 = vpack.c.bf16 %v779_v37, %v777_v16  ;;  %v1816_v5 = vpack.c.bf16 %v714_v48, %v712_v38  ;;  %v590_v6 = vadd.f32 %v1651_v41, %v450_v51  ;;  %v652_v8 = vadd.f32 %v1651_v41, %v512_v54 }
  0x33   : > { %1054 = vmatpush1.bf16.msra.mxu0 %v1522_v33  ;;  %1497 = vmatpush1.bf16.msra.mxu1 %v1522_v33  ;;  %v1782_v33 = vpack.c.bf16 %v715_v12, %v713_v11  ;;  %v312_v11 = vunpack.c.l.bf16 %v1770_v24  ;;  %v242_v12 = vld [vmem:[%s1602_s7 + $0x50] sm:$0xff]  ;;  %v593_v13 = vadd.f32 %v1628_v20, %v453_v56  ;;  %v595_v15 = vadd.f32 %v1628_v20, %v455_v57 }
  0x34   : > { %1055 = vmatprep.subr.bf16.mxu0 %v1535_v1  ;;  %1482 = vmatprep.subr.bf16.mxu1 %v1535_v1  ;;  %v517_v16 = vmul.f32 %v1624_v18, %v377_v58  ;;  %v519_v17 = vmul.f32 %v1624_v18, %v379_v59  ;;  %v1830_v21 = vpack.c.bf16 %v719_v61, %v717_v60  ;;  %v783_v22 = vmax.f32 %v655_v62, 0.0  ;;  %v244_v59 = vld [vmem:[%s1602_s7 + $0x60] sm:$0xff]  ;;  %v245_v60 = vld [vmem:[%s1602_s7 + $0x68] sm:$0xff] }
  0x35   : > { %v716_v23 = vmax.f32 %v588_v2, 0.0  ;;  %v314_v26 = vunpack.c.l.bf16 %v1773_v25  ;;  %v718_v24 = vmax.f32 %v590_v6, 0.0  ;;  %v376_v27 = vunpack.c.l.bf16 %v1794_v46 }
  0x36   : > { %v378_v29 = vunpack.c.l.bf16 %v1797_v47  ;;  %v317_v30 = vunpack.c.h.bf16 %v242_v12  ;;  %v780_v35 = vmax.f32 %v652_v8, 0.0  ;;  %v452_v25 = vmul.f32 %v1642_v31, %v312_v11  ;;  %v1878_v11 = vld [vmem:[%s1602_s7 + $0x168] sm:$0xff] }
  0x37   : > { %1056 = vmatpush1.bf16.msra.mxu0 %v1523_v53  ;;  %1498 = vmatpush1.bf16.msra.mxu1 %v1523_v53  ;;  %v653_v53 = vadd.f32 %v1628_v20, %v513_v34  ;;  %v1839_v34 = vld [vmem:[%s1602_s7 + $0x158] sm:$0xff]  ;;  %v721_v37 = vmax.f32 %v593_v13, 0.0  ;;  %v657_v38 = vadd.f32 %v1628_v20, %v517_v16  ;;  %v659_v39 = vadd.f32 %v1628_v20, %v519_v17 }
  0x38   : > { %1057 = vmatprep.subr.bf16.mxu0 %v1535_v1  ;;  %1483 = vmatprep.subr.bf16.mxu1 %v1535_v1  ;;  %v454_v42 = vmul.f32 %v1642_v31, %v314_v26  ;;  %v1850_v44 = vpack.c.bf16 %v718_v24, %v716_v23  ;;  %v518_v45 = vmul.f32 %v1642_v31, %v378_v29  ;;  %v321_v13 = vunpack.c.h.bf16 %v244_v59 }
  0x39   : > { %v781_v7 = vmax.f32 %v653_v53, 0.0  ;;  %v457_v46 = vmul.f32 %v1624_v18, %v317_v30  ;;  %v592_v47 = vadd.f32 %v1651_v41, %v452_v25  ;;  %v785_v53 = vmax.f32 %v657_v38, 0.0 }
  0x3a   : > { %v787_v54 = vmax.f32 %v659_v39, 0.0  ;;  %v658_v62 = vadd.f32 %v1651_v41, %v518_v45  ;;  %v387_v26 = vunpack.c.h.bf16 %v1878_v11  ;;  %v246_v45 = vld [vmem:[%s1602_s7 + $0x70] sm:$0xff] }
  0x3b   : > { %1058 = vmatpush1.bf16.msra.mxu0 %v1524_v9  ;;  %1499 = vmatpush1.bf16.msra.mxu1 %v1524_v9  ;;  %v654_v9 = vadd.f32 %v1651_v41, %v514_v55  ;;  %v1846_v40 = vpack.c.bf16 %v783_v22, %v781_v7  ;;  %v594_v55 = vadd.f32 %v1651_v41, %v454_v42  ;;  %v720_v6 = vmax.f32 %v592_v47, 0.0 }
  0x3c   : > { %1059 = vmatprep.subr.bf16.mxu0 %v1535_v1  ;;  %1484 = vmatprep.subr.bf16.mxu1 %v1535_v1  ;;  %v597_v2 = vadd.f32 %v1628_v20, %v457_v46  ;;  %v786_v22 = vmax.f32 %v658_v62, 0.0  ;;  %v527_v42 = vmul.f32 %v1624_v18, %v387_v26 }
  0x3d   : > { %v782_v36 = vmax.f32 %v654_v9, 0.0  ;;  %v722_v16 = vmax.f32 %v594_v55, 0.0 }
  0x3e   : > { %v725_v24 = vmax.f32 %v597_v2, 0.0 }
  0x3f   : > { %1060 = vmatpush1.bf16.msra.mxu0 %v1525_v32  ;;  %1500 = vmatpush1.bf16.msra.mxu1 %v1525_v32  ;;  %v274_v32 = vld [vmem:[%s1602_s7 + $0x150] sm:$0xff]  ;;  %v1857_v51 = vpack.c.bf16 %v782_v36, %v780_v35  ;;  %v320_v36 = vunpack.c.l.bf16 %v244_v59  ;;  %v1895_v38 = vpack.c.bf16 %v722_v16, %v720_v6 }
  0x40   : > { %1061 = vmatprep.subr.bf16.mxu0 %v1535_v1  ;;  %1485 = vmatprep.subr.bf16.mxu1 %v1535_v1  ;;  %v1818_v1 = vpack.c.bf16 %v778_v50, %v776_v49  ;;  %v381_v43 = vunpack.c.h.bf16 %v274_v32  ;;  %v316_v49 = vunpack.c.l.bf16 %v242_v12  ;;  %v318_v50 = vunpack.c.l.bf16 %v243_v19 }
  0x41   : > { %v380_v58 = vunpack.c.l.bf16 %v274_v32  ;;  %v382_v12 = vunpack.c.l.bf16 %v1839_v34 }
  0x42   : > { %v521_v56 = vmul.f32 %v1624_v18, %v381_v43  ;;  %v456_v8 = vmul.f32 %v1642_v31, %v316_v49  ;;  %v458_v9 = vmul.f32 %v1642_v31, %v318_v50  ;;  %v460_v49 = vmul.f32 %v1642_v31, %v320_v36  ;;  %v247_v50 = vld [vmem:[%s1602_s7 + $0x78] sm:$0xff] }
  0x43   : > { %1062 = vmatpush1.bf16.msra.mxu0 %v1526_v52  ;;  %1501 = vmatpush1.bf16.msra.mxu1 %v1526_v52  ;;  %v520_v17 = vmul.f32 %v1642_v31, %v380_v58  ;;  %v522_v32 = vmul.f32 %v1642_v31, %v382_v12  ;;  %v667_v58 = vadd.f32 %v1628_v20, %v527_v42  ;;  %v327_v62 = vunpack.c.h.bf16 %v247_v50 }
  0x44   : > { %v596_v29 = vadd.f32 %v1651_v41, %v456_v8  ;;  %v598_v30 = vadd.f32 %v1651_v41, %v458_v9 }
  0x45   : > { %v662_v46 = vadd.f32 %v1651_v41, %v522_v32  ;;  %v249_v32 = vld [vmem:[%s1602_s7 + $0x88] sm:$0xff] }
  0x46   : > { %1064 = vmatmul.mubr.bf16.vlgmr.msra.gmra.mrb[0].mxu0 %v1706_v28  ;;  %1192 = vmatmul.mubr.bf16.vlgmr.msra.gmra.mrb[0].mxu1 %v1742_v63  ;;  %v319_v28 = vunpack.c.h.bf16 %v243_v19  ;;  %v723_v63 = vmax.f32 %v595_v15, 0.0  ;;  %v323_v15 = vunpack.c.h.bf16 %v245_v60 }
  0x47   : > { %1071 = vmatprep.mubr.bf16.mxu0 %v1744_v0  ;;  %1199 = vmatprep.mubr.bf16.mxu1 %v1748_v4  ;;  %v383_v0 = vunpack.c.h.bf16 %v1839_v34  ;;  %v516_v4 = vmul.f32 %v1642_v31, %v376_v27  ;;  %v461_v34 = vmul.f32 %v1624_v18, %v321_v13  ;;  %v324_v13 = vunpack.c.l.bf16 %v246_v45 }
  0x48   : > { %v459_v48 = vmul.f32 %v1624_v18, %v319_v28  ;;  %v1859_v52 = vpack.c.bf16 %v723_v63, %v721_v37  ;;  %v463_v35 = vmul.f32 %v1624_v18, %v323_v15  ;;  %v660_v37 = vadd.f32 %v1651_v41, %v520_v17 }
  0x49   : > { %v523_v57 = vmul.f32 %v1624_v18, %v383_v0  ;;  %v656_v61 = vadd.f32 %v1651_v41, %v516_v4  ;;  %v322_v63 = vunpack.c.l.bf16 %v245_v60  ;;  %v601_v47 = vadd.f32 %v1628_v20, %v461_v34  ;;  %v280_v34 = vld [vmem:[%s1602_s7 + $0x180] sm:$0xff] }
  0x4a   : > { %v599_v7 = vadd.f32 %v1628_v20, %v459_v48  ;;  %v603_v48 = vadd.f32 %v1628_v20, %v463_v35  ;;  %v325_v60 = vunpack.c.h.bf16 %v246_v45  ;;  %v326_v15 = vunpack.c.l.bf16 %v247_v50 }
  0x4b   : > { %v784_v19 = vmax.f32 %v656_v61, 0.0  ;;  %v462_v55 = vmul.f32 %v1642_v31, %v322_v63  ;;  %v729_v8 = vmax.f32 %v601_v47, 0.0  ;;  %v331_v45 = vunpack.c.h.bf16 %v249_v32 }
  0x4c   : > { %v727_v27 = vmax.f32 %v599_v7, 0.0  ;;  %v790_v7 = vmax.f32 %v662_v46, 0.0  ;;  %v731_v9 = vmax.f32 %v603_v48, 0.0  ;;  %v465_v17 = vmul.f32 %v1624_v18, %v325_v60 }
  0x4d   : > { %v1901_v0 = vpack.c.bf16 %v786_v22, %v784_v19  ;;  %v467_v19 = vmul.f32 %v1624_v18, %v327_v62  ;;  %v393_v46 = vunpack.c.h.bf16 %v280_v34 }
  0x4e   : > { %1072 = vmatmul.mubr.bf16.gmra.mrb[4].mxu0 %v1757_v10  ;;  %1200 = vmatmul.mubr.bf16.gmra.mrb[4].mxu1 %v1761_v14  ;;  %v276_v10 = vld [vmem:[%s1602_s7 + $0x160] sm:$0xff]  ;;  %v1880_v14 = vpack.c.bf16 %v787_v54, %v785_v53  ;;  %v1903_v4 = vpack.c.bf16 %v727_v27, %v725_v24  ;;  %v278_v53 = vld [vmem:[%s1602_s7 + $0x170] sm:$0xff]  ;;  %v1942_v35 = vpack.c.bf16 %v731_v9, %v729_v8 }
  0x4f   : > { %1079 = vmatprep.mubr.bf16.mxu0 %v1782_v33  ;;  %1207 = vmatprep.mubr.bf16.mxu1 %v1814_v3  ;;  %v661_v33 = vadd.f32 %v1628_v20, %v521_v56  ;;  %v663_v3 = vadd.f32 %v1628_v20, %v523_v57  ;;  %v385_v23 = vunpack.c.h.bf16 %v276_v10  ;;  %v384_v43 = vunpack.c.l.bf16 %v276_v10 }
  0x50   : > { %v386_v56 = vunpack.c.l.bf16 %v1878_v11  ;;  %v389_v2 = vunpack.c.h.bf16 %v278_v53  ;;  %v600_v10 = vadd.f32 %v1651_v41, %v460_v49  ;;  %v602_v11 = vadd.f32 %v1651_v41, %v462_v55 }
  0x51   : > { %v789_v25 = vmax.f32 %v661_v33, 0.0  ;;  %v791_v28 = vmax.f32 %v663_v3, 0.0  ;;  %v525_v39 = vmul.f32 %v1624_v18, %v385_v23  ;;  %v524_v59 = vmul.f32 %v1642_v31, %v384_v43  ;;  %v248_v23 = vld [vmem:[%s1602_s7 + $0x80] sm:$0xff]  ;;  %v281_v43 = vld [vmem:[%s1602_s7 + $0x188] sm:$0xff] }
  0x52   : > { %v526_v12 = vmul.f32 %v1642_v31, %v386_v56  ;;  %v795_v33 = vmax.f32 %v667_v58, 0.0  ;;  %v529_v22 = vmul.f32 %v1624_v18, %v389_v2  ;;  %v728_v26 = vmax.f32 %v600_v10, 0.0  ;;  %v250_v2 = vld [vmem:[%s1602_s7 + $0x90] sm:$0xff] }
  0x53   : > { %v1913_v54 = vpack.c.bf16 %v791_v28, %v789_v25  ;;  %v665_v57 = vadd.f32 %v1628_v20, %v525_v39  ;;  %v664_v3 = vadd.f32 %v1651_v41, %v524_v59  ;;  %v388_v24 = vunpack.c.l.bf16 %v278_v53 }
  0x54   : > { %v329_v28 = vunpack.c.h.bf16 %v248_v23  ;;  %v607_v63 = vadd.f32 %v1628_v20, %v467_v19  ;;  %v669_v39 = vadd.f32 %v1628_v20, %v529_v22  ;;  %v330_v55 = vunpack.c.l.bf16 %v249_v32 }
  0x55   : > { %v793_v16 = vmax.f32 %v665_v57, 0.0  ;;  %v792_v25 = vmax.f32 %v664_v3, 0.0  ;;  %v533_v62 = vmul.f32 %v1624_v18, %v393_v46 }
  0x56   : > { %1080 = vmatmul.mubr.bf16.gmra.mrb[8].mxu0 %v1816_v5  ;;  %1208 = vmatmul.mubr.bf16.gmra.mrb[8].mxu1 %v1818_v1  ;;  %v724_v5 = vmax.f32 %v596_v29, 0.0  ;;  %v726_v1 = vmax.f32 %v598_v30, 0.0  ;;  %v730_v29 = vmax.f32 %v602_v11, 0.0  ;;  %v666_v30 = vadd.f32 %v1651_v41, %v526_v12  ;;  %v251_v12 = vld [vmem:[%s1602_s7 + $0x98] sm:$0xff] }
  0x57   : > { %1087 = vmatprep.mubr.bf16.mxu0 %v1830_v21  ;;  %1215 = vmatprep.mubr.bf16.mxu1 %v1846_v40  ;;  %v279_v21 = vld [vmem:[%s1602_s7 + $0x178] sm:$0xff]  ;;  %v788_v40 = vmax.f32 %v660_v37, 0.0  ;;  %v877_v36 = vpack.c.bf16 %v795_v33, %v793_v16  ;;  %v605_v37 = vadd.f32 %v1628_v20, %v465_v17  ;;  %v469_v53 = vmul.f32 %v1624_v18, %v329_v28 }
  0x58   : > { %v1920_v61 = vpack.c.bf16 %v726_v1, %v724_v5  ;;  %v391_v6 = vunpack.c.h.bf16 %v279_v21  ;;  %v390_v27 = vunpack.c.l.bf16 %v279_v21  ;;  %v528_v5 = vmul.f32 %v1642_v31, %v388_v24 }
  0x59   : > { %v1951_v47 = vpack.c.bf16 %v730_v29, %v728_v26  ;;  %v794_v48 = vmax.f32 %v666_v30, 0.0  ;;  %v395_v21 = vunpack.c.h.bf16 %v281_v43  ;;  %v733_v56 = vmax.f32 %v605_v37, 0.0 }
  0x5a   : > { %v530_v1 = vmul.f32 %v1642_v31, %v390_v27  ;;  %v735_v57 = vmax.f32 %v607_v63, 0.0  ;;  %v797_v58 = vmax.f32 %v669_v39, 0.0  ;;  %v668_v60 = vadd.f32 %v1651_v41, %v528_v5 }
  0x5b   : > { %v609_v8 = vadd.f32 %v1628_v20, %v469_v53  ;;  %v535_v9 = vmul.f32 %v1624_v18, %v395_v21  ;;  %v470_v11 = vmul.f32 %v1642_v31, %v330_v55  ;;  %v333_v33 = vunpack.c.h.bf16 %v250_v2  ;;  %v284_v55 = vld [vmem:[%s1602_s7 + $0x1a0] sm:$0xff] }
  0x5c   : > { %v796_v3 = vmax.f32 %v668_v60, 0.0  ;;  %v673_v22 = vadd.f32 %v1628_v20, %v533_v62  ;;  %v335_v29 = vunpack.c.h.bf16 %v251_v12  ;;  %v332_v37 = vunpack.c.l.bf16 %v250_v2  ;;  %v285_v2 = vld [vmem:[%s1602_s7 + $0x1a8] sm:$0xff] }
  0x5d   : > { %v737_v30 = vmax.f32 %v609_v8, 0.0  ;;  %v610_v32 = vadd.f32 %v1651_v41, %v470_v11  ;;  %v334_v39 = vunpack.c.l.bf16 %v251_v12 }
  0x5e   : > { %1088 = vmatmul.mubr.bf16.gmra.mrb[12].mxu0 %v1850_v44  ;;  %1216 = vmatmul.mubr.bf16.gmra.mrb[12].mxu1 %v1857_v51  ;;  %v531_v44 = vmul.f32 %v1624_v18, %v391_v6  ;;  %v1935_v51 = vpack.c.bf16 %v790_v7, %v788_v40  ;;  %v328_v40 = vunpack.c.l.bf16 %v248_v23  ;;  %v283_v23 = vld [vmem:[%s1602_s7 + $0x198] sm:$0xff]  ;;  %v801_v63 = vmax.f32 %v673_v22, 0.0 }
  0x5f   : > { %1095 = vmatprep.mubr.bf16.mxu0 %v1859_v52  ;;  %1223 = vmatprep.mubr.bf16.mxu1 %v1880_v14  ;;  %v464_v52 = vmul.f32 %v1642_v31, %v324_v13  ;;  %v466_v14 = vmul.f32 %v1642_v31, %v326_v15  ;;  %v876_v13 = vpack.c.bf16 %v794_v48, %v792_v25  ;;  %v399_v28 = vunpack.c.h.bf16 %v283_v23 }
  0x60   : > { %v671_v42 = vadd.f32 %v1628_v20, %v531_v44  ;;  %v468_v10 = vmul.f32 %v1642_v31, %v328_v40  ;;  %v847_v15 = vpack.c.bf16 %v735_v57, %v733_v56  ;;  %v282_v44 = vld [vmem:[%s1602_s7 + $0x190] sm:$0xff]  ;;  %v475_v5 = vmul.f32 %v1624_v18, %v335_v29 }
  0x61   : > { %v604_v49 = vadd.f32 %v1651_v41, %v464_v52  ;;  %v606_v50 = vadd.f32 %v1651_v41, %v466_v14  ;;  %v675_v52 = vadd.f32 %v1628_v20, %v535_v9  ;;  %v397_v25 = vunpack.c.h.bf16 %v282_v44 }
  0x62   : > { %v799_v59 = vmax.f32 %v671_v42, 0.0  ;;  %v608_v14 = vadd.f32 %v1651_v41, %v468_v10  ;;  %v738_v48 = vmax.f32 %v610_v32, 0.0  ;;  %v539_v21 = vmul.f32 %v1624_v18, %v399_v28 }
  0x63   : > { %v732_v6 = vmax.f32 %v604_v49, 0.0  ;;  %v734_v7 = vmax.f32 %v606_v50, 0.0  ;;  %v398_v49 = vunpack.c.l.bf16 %v283_v23  ;;  %v537_v53 = vmul.f32 %v1624_v18, %v397_v25 }
  0x64   : > { %v879_v16 = vpack.c.bf16 %v799_v59, %v797_v58  ;;  %v736_v46 = vmax.f32 %v608_v14, 0.0  ;;  %v472_v40 = vmul.f32 %v1642_v31, %v332_v37  ;;  %v474_v57 = vmul.f32 %v1642_v31, %v334_v39  ;;  %v286_v37 = vld [vmem:[%s1602_s7 + $0x1b0] sm:$0xff] }
  0x65   : > { %v1974_v26 = vpack.c.bf16 %v734_v7, %v732_v6  ;;  %v677_v9 = vadd.f32 %v1628_v20, %v537_v53  ;;  %v679_v10 = vadd.f32 %v1628_v20, %v539_v21  ;;  %v400_v23 = vunpack.c.l.bf16 %v284_v55 }
  0x66   : > { %1096 = vmatmul.mubr.bf16.gmra.mrb[16].mxu0 %v1895_v38  ;;  %1224 = vmatmul.mubr.bf16.gmra.mrb[16].mxu1 %v1901_v0  ;;  %v670_v38 = vadd.f32 %v1651_v41, %v530_v1  ;;  %v471_v0 = vmul.f32 %v1624_v18, %v331_v45  ;;  %v396_v1 = vunpack.c.l.bf16 %v282_v44  ;;  %v803_v45 = vmax.f32 %v675_v52, 0.0 }
  0x67   : > { %1103 = vmatprep.mubr.bf16.mxu0 %v1903_v4  ;;  %1231 = vmatprep.mubr.bf16.mxu1 %v1913_v54  ;;  %v392_v4 = vunpack.c.l.bf16 %v280_v34  ;;  %v394_v54 = vunpack.c.l.bf16 %v281_v43  ;;  %v473_v34 = vmul.f32 %v1624_v18, %v333_v33  ;;  %v2007_v7 = vpack.c.bf16 %v738_v48, %v736_v46 }
  0x68   : > { %v798_v17 = vmax.f32 %v670_v38, 0.0  ;;  %v611_v19 = vadd.f32 %v1628_v20, %v471_v0  ;;  %v615_v0 = vadd.f32 %v1628_v20, %v475_v5  ;;  %v536_v62 = vmul.f32 %v1642_v31, %v396_v1 }
  0x69   : > { %v532_v24 = vmul.f32 %v1642_v31, %v392_v4  ;;  %v534_v27 = vmul.f32 %v1642_v31, %v394_v54  ;;  %v1995_v50 = vadd.f32 %v1628_v20, %v473_v34  ;;  %v881_v6 = vpack.c.bf16 %v803_v45, %v801_v63 }
  0x6a   : > { %v538_v4 = vmul.f32 %v1642_v31, %v398_v49  ;;  %v401_v54 = vunpack.c.h.bf16 %v284_v55  ;;  %v612_v11 = vadd.f32 %v1651_v41, %v472_v40  ;;  %v403_v33 = vunpack.c.h.bf16 %v285_v2 }
  0x6b   : > { %v672_v42 = vadd.f32 %v1651_v41, %v532_v24  ;;  %v674_v43 = vadd.f32 %v1651_v41, %v534_v27  ;;  %v741_v8 = vmax.f32 %v1995_v50, 0.0  ;;  %v2024_v24 = vld [vmem:[%s1602_s7 + $0xb0] sm:$0xff]  ;;  %v2027_v27 = vld [vmem:[%s1602_s7 + $0xb8] sm:$0xff]  ;;  %v805_v29 = vmax.f32 %v677_v9, 0.0 }
  0x6c   : > { %v541_v22 = vmul.f32 %v1624_v18, %v401_v54  ;;  %v740_v52 = vmax.f32 %v612_v11, 0.0  ;;  %v402_v14 = vunpack.c.l.bf16 %v285_v2  ;;  %v543_v28 = vmul.f32 %v1624_v18, %v403_v33  ;;  %v288_v33 = vld [vmem:[%s1602_s7 + $0x1c0] sm:$0xff] }
  0x6d   : > { %v800_v60 = vmax.f32 %v672_v42, 0.0  ;;  %v802_v38 = vmax.f32 %v674_v43, 0.0  ;;  %v341_v39 = vunpack.c.h.bf16 %v2024_v24  ;;  %v343_v42 = vunpack.c.h.bf16 %v2027_v27 }
  0x6e   : > { %1104 = vmatmul.mubr.bf16.gmra.mrb[20].mxu0 %v1920_v61  ;;  %1232 = vmatmul.mubr.bf16.gmra.mrb[20].mxu1 %v1935_v51  ;;  %v1985_v61 = vpack.c.bf16 %v798_v17, %v796_v3  ;;  %v739_v51 = vmax.f32 %v611_v19, 0.0  ;;  %v678_v19 = vadd.f32 %v1651_v41, %v538_v4  ;;  %v681_v5 = vadd.f32 %v1628_v20, %v541_v22  ;;  %v2057_v4 = vld [vmem:[%s1602_s7 + $0xc8] sm:$0xff] }
  0x6f   : > { %1111 = vmatprep.mubr.bf16.mxu0 %v1942_v35  ;;  %1239 = vmatprep.mubr.bf16.mxu1 %v877_v36  ;;  %v252_v35 = vld [vmem:[%s1602_s7 + $0xa0] sm:$0xff]  ;;  %v1992_v36 = vld [vmem:[%s1602_s7 + $0xa8] sm:$0xff]  ;;  %v2017_v3 = vpack.c.bf16 %v802_v38, %v800_v60  ;;  %v542_v48 = vmul.f32 %v1642_v31, %v402_v14  ;;  %v405_v49 = vunpack.c.h.bf16 %v286_v37  ;;  %v683_v53 = vadd.f32 %v1628_v20, %v543_v28 }
  0x70   : > { %v849_v56 = vpack.c.bf16 %v739_v51, %v737_v30  ;;  %v337_v58 = vunpack.c.h.bf16 %v252_v35  ;;  %v339_v59 = vunpack.c.h.bf16 %v1992_v36  ;;  %v336_v17 = vunpack.c.l.bf16 %v252_v35 }
  0x71   : > { %v338_v44 = vunpack.c.l.bf16 %v1992_v36  ;;  %v807_v30 = vmax.f32 %v679_v10, 0.0  ;;  %v806_v43 = vmax.f32 %v678_v19, 0.0  ;;  %v540_v35 = vmul.f32 %v1642_v31, %v400_v23  ;;  %v287_v36 = vld [vmem:[%s1602_s7 + $0x1b8] sm:$0xff] }
  0x72   : > { %v477_v12 = vmul.f32 %v1624_v18, %v337_v58  ;;  %v476_v63 = vmul.f32 %v1642_v31, %v336_v17  ;;  %v481_v40 = vmul.f32 %v1624_v18, %v341_v39  ;;  %v483_v55 = vmul.f32 %v1624_v18, %v343_v42 }
  0x73   : > { %v478_v1 = vmul.f32 %v1642_v31, %v338_v44  ;;  %v883_v46 = vpack.c.bf16 %v807_v30, %v805_v29  ;;  %v809_v58 = vmax.f32 %v681_v5, 0.0  ;;  %v680_v60 = vadd.f32 %v1651_v41, %v540_v35 }
  0x74   : > { %v617_v34 = vadd.f32 %v1628_v20, %v477_v12  ;;  %v616_v21 = vadd.f32 %v1651_v41, %v476_v63  ;;  %v682_v38 = vadd.f32 %v1651_v41, %v542_v48  ;;  %v342_v2 = vunpack.c.l.bf16 %v2027_v27 }
  0x75   : > { %v404_v9 = vunpack.c.l.bf16 %v286_v37  ;;  %v406_v10 = vunpack.c.l.bf16 %v287_v36  ;;  %v623_v12 = vadd.f32 %v1628_v20, %v483_v55  ;;  %v808_v17 = vmax.f32 %v680_v60, 0.0 }
  0x76   : > { %1112 = vmatmul.mubr.bf16.gmra.mrb[24].mxu0 %v1951_v47  ;;  %1240 = vmatmul.mubr.bf16.gmra.mrb[24].mxu1 %v876_v13  ;;  %v614_v47 = vadd.f32 %v1651_v41, %v474_v57  ;;  %v479_v13 = vmul.f32 %v1624_v18, %v339_v59  ;;  %v618_v59 = vadd.f32 %v1651_v41, %v478_v1  ;;  %v744_v11 = vmax.f32 %v616_v21, 0.0 }
  0x77   : > { %1119 = vmatprep.mubr.bf16.mxu0 %v847_v15  ;;  %1247 = vmatprep.mubr.bf16.mxu1 %v879_v16  ;;  %v743_v15 = vmax.f32 %v615_v0, 0.0  ;;  %v676_v16 = vadd.f32 %v1651_v41, %v536_v62  ;;  %v545_v0 = vmul.f32 %v1624_v18, %v405_v49  ;;  %v340_v62 = vunpack.c.l.bf16 %v2024_v24 }
  0x78   : > { %v742_v32 = vmax.f32 %v614_v47, 0.0  ;;  %v619_v25 = vadd.f32 %v1628_v20, %v479_v13  ;;  %v621_v47 = vadd.f32 %v1628_v20, %v481_v40  ;;  %v347_v22 = vunpack.c.h.bf16 %v2057_v4 }
  0x79   : > { %v804_v51 = vmax.f32 %v676_v16, 0.0  ;;  %v851_v45 = vpack.c.bf16 %v743_v15, %v741_v8  ;;  %v811_v8 = vmax.f32 %v683_v53, 0.0  ;;  %v2064_v15 = vld [vmem:[%s1602_s7 + $0x1c8] sm:$0xff]  ;;  %v746_v16 = vmax.f32 %v618_v59, 0.0 }
  0x7a   : > { %v2043_v50 = vpack.c.bf16 %v742_v32, %v740_v52  ;;  %v810_v44 = vmax.f32 %v682_v38, 0.0  ;;  %v685_v23 = vadd.f32 %v1628_v20, %v545_v0  ;;  %v480_v24 = vmul.f32 %v1642_v31, %v340_v62 }
  0x7b   : > { %v882_v57 = vpack.c.bf16 %v806_v43, %v804_v51  ;;  %v482_v27 = vmul.f32 %v1642_v31, %v342_v2  ;;  %v544_v29 = vmul.f32 %v1642_v31, %v404_v9  ;;  %v409_v30 = vunpack.c.h.bf16 %v288_v33 }
  0x7c   : > { %v885_v52 = vpack.c.bf16 %v811_v8, %v809_v58  ;;  %v749_v14 = vmax.f32 %v621_v47, 0.0  ;;  %v751_v32 = vmax.f32 %v623_v12, 0.0  ;;  %v487_v37 = vmul.f32 %v1624_v18, %v347_v22  ;;  %v2098_v58 = vld [vmem:[%s1602_s7 + $0x1d8] sm:$0xff] }
  0x7d   : > { %v884_v63 = vpack.c.bf16 %v810_v44, %v808_v17  ;;  %v813_v39 = vmax.f32 %v685_v23, 0.0  ;;  %v620_v42 = vadd.f32 %v1651_v41, %v480_v24  ;;  %v622_v43 = vadd.f32 %v1651_v41, %v482_v27 }
  0x7e   : > { %1120 = vmatmul.mubr.bf16.gmra.mrb[28].mxu0 %v1974_v26  ;;  %1248 = vmatmul.mubr.bf16.gmra.mrb[28].mxu1 %v1985_v61  ;;  %v745_v26 = vmax.f32 %v617_v34, 0.0  ;;  %v747_v61 = vmax.f32 %v619_v25, 0.0  ;;  %v852_v25 = vpack.c.bf16 %v746_v16, %v744_v11  ;;  %v684_v5 = vadd.f32 %v1651_v41, %v544_v29  ;;  %v2116_v29 = vld [vmem:[%s1602_s7 + $0xe0] sm:$0xff] }
  0x7f   : > { %1127 = vmatprep.mubr.bf16.mxu0 %v849_v56  ;;  %1255 = vmatprep.mubr.bf16.mxu1 %v881_v6  ;;  %v407_v56 = vunpack.c.h.bf16 %v287_v36  ;;  %v256_v6 = vld [vmem:[%s1602_s7 + $0xc0] sm:$0xff]  ;;  %v549_v35 = vmul.f32 %v1624_v18, %v409_v30  ;;  %v855_v48 = vpack.c.bf16 %v751_v32, %v749_v14  ;;  %v627_v21 = vadd.f32 %v1628_v20, %v487_v37 }
  0x80   : > { %v853_v54 = vpack.c.bf16 %v747_v61, %v745_v26  ;;  %v345_v19 = vunpack.c.h.bf16 %v256_v6  ;;  %v344_v51 = vunpack.c.l.bf16 %v256_v6  ;;  %v346_v26 = vunpack.c.l.bf16 %v2057_v4 }
  0x81   : > { %v547_v13 = vmul.f32 %v1624_v18, %v407_v56  ;;  %v408_v61 = vunpack.c.l.bf16 %v288_v33  ;;  %v410_v55 = vunpack.c.l.bf16 %v2064_v15  ;;  %v2095_v56 = vld [vmem:[%s1602_s7 + $0x1d0] sm:$0xff]  ;;  %v748_v59 = vmax.f32 %v620_v42, 0.0 }
  0x82   : > { %v485_v28 = vmul.f32 %v1624_v18, %v345_v19  ;;  %v484_v40 = vmul.f32 %v1642_v31, %v344_v51  ;;  %v750_v60 = vmax.f32 %v622_v43, 0.0  ;;  %v689_v62 = vadd.f32 %v1628_v20, %v549_v35  ;;  %v292_v51 = vld [vmem:[%s1602_s7 + $0x1e0] sm:$0xff] }
  0x83   : > { %v687_v34 = vadd.f32 %v1628_v20, %v547_v13  ;;  %v486_v6 = vmul.f32 %v1642_v31, %v346_v26  ;;  %v548_v4 = vmul.f32 %v1642_v31, %v408_v61  ;;  %v413_v8 = vunpack.c.h.bf16 %v2095_v56 }
  0x84   : > { %v625_v53 = vadd.f32 %v1628_v20, %v485_v28  ;;  %v624_v11 = vadd.f32 %v1651_v41, %v484_v40  ;;  %v550_v47 = vmul.f32 %v1642_v31, %v410_v55  ;;  %v854_v16 = vpack.c.bf16 %v750_v60, %v748_v59 }
  0x85   : > { %v815_v49 = vmax.f32 %v687_v34, 0.0  ;;  %v817_v19 = vmax.f32 %v689_v62, 0.0  ;;  %v626_v44 = vadd.f32 %v1651_v41, %v486_v6  ;;  %v688_v23 = vadd.f32 %v1651_v41, %v548_v4  ;;  %v262_v4 = vld [vmem:[%s1602_s7 + $0xf0] sm:$0xff] }
  0x86   : > { %1128 = vmatmul.mubr.bf16.gmra.mrb[32].mxu0 %v2007_v7  ;;  %1256 = vmatmul.mubr.bf16.gmra.mrb[32].mxu1 %v2017_v3  ;;  %v546_v7 = vmul.f32 %v1642_v31, %v406_v10  ;;  %v411_v3 = vunpack.c.h.bf16 %v2064_v15  ;;  %v753_v9 = vmax.f32 %v625_v53, 0.0  ;;  %v755_v10 = vmax.f32 %v627_v21, 0.0 }
  0x87   : > { %1135 = vmatprep.mubr.bf16.mxu0 %v851_v45  ;;  %1263 = vmatprep.mubr.bf16.mxu1 %v883_v46  ;;  %v258_v45 = vld [vmem:[%s1602_s7 + $0xd0] sm:$0xff]  ;;  %v2086_v46 = vld [vmem:[%s1602_s7 + $0xd8] sm:$0xff]  ;;  %v887_v12 = vpack.c.bf16 %v815_v49, %v813_v39  ;;  %v553_v24 = vmul.f32 %v1624_v18, %v413_v8  ;;  %v412_v37 = vunpack.c.l.bf16 %v2095_v56  ;;  %v293_v39 = vld [vmem:[%s1602_s7 + $0x1e8] sm:$0xff]  ;;  %v353_v42 = vunpack.c.h.bf16 %v2116_v29 }
  0x88   : > { %v686_v1 = vadd.f32 %v1651_v41, %v546_v7  ;;  %v551_v36 = vmul.f32 %v1624_v18, %v411_v3  ;;  %v349_v38 = vunpack.c.h.bf16 %v258_v45  ;;  %v348_v15 = vunpack.c.l.bf16 %v258_v45  ;;  %v2119_v7 = vld [vmem:[%s1602_s7 + $0xe8] sm:$0xff] }
  0x89   : > { %v857_v30 = vpack.c.bf16 %v755_v10, %v753_v9  ;;  %v752_v3 = vmax.f32 %v624_v11, 0.0  ;;  %v350_v14 = vunpack.c.l.bf16 %v2086_v46  ;;  %v355_v43 = vunpack.c.h.bf16 %v2119_v7  ;;  %v263_v11 = vld [vmem:[%s1602_s7 + $0xf8] sm:$0xff] }
  0x8a   : > { %v814_v0 = vmax.f32 %v686_v1, 0.0  ;;  %v691_v2 = vadd.f32 %v1628_v20, %v551_v36  ;;  %v489_v13 = vmul.f32 %v1624_v18, %v349_v38  ;;  %v488_v28 = vmul.f32 %v1642_v31, %v348_v15 }
  0x8b   : > { %v816_v1 = vmax.f32 %v688_v23, 0.0  ;;  %v693_v35 = vadd.f32 %v1628_v20, %v553_v24  ;;  %v419_v49 = vunpack.c.h.bf16 %v293_v39  ;;  %v552_v21 = vmul.f32 %v1642_v31, %v412_v37 }
  0x8c   : > { %v819_v22 = vmax.f32 %v691_v2, 0.0  ;;  %v629_v32 = vadd.f32 %v1628_v20, %v489_v13  ;;  %v628_v53 = vadd.f32 %v1651_v41, %v488_v28  ;;  %v493_v55 = vmul.f32 %v1624_v18, %v353_v42 }
  0x8d   : > { %v495_v56 = vmul.f32 %v1624_v18, %v355_v43  ;;  %v821_v59 = vmax.f32 %v693_v35, 0.0  ;;  %v692_v6 = vadd.f32 %v1651_v41, %v552_v21  ;;  %v352_v10 = vunpack.c.l.bf16 %v2116_v29 }
  0x8e   : > { %1136 = vmatmul.mubr.bf16.gmra.mrb[36].mxu0 %v2043_v50  ;;  %1264 = vmatmul.mubr.bf16.gmra.mrb[36].mxu1 %v882_v57  ;;  %v351_v50 = vunpack.c.h.bf16 %v2086_v46  ;;  %v812_v57 = vmax.f32 %v684_v5, 0.0  ;;  %v754_v5 = vmax.f32 %v626_v44, 0.0  ;;  %v490_v46 = vmul.f32 %v1642_v31, %v350_v14 }
  0x8f   : > { %1143 = vmatprep.mubr.bf16.mxu0 %v853_v54  ;;  %1271 = vmatprep.mubr.bf16.mxu1 %v885_v52  ;;  %v415_v54 = vunpack.c.h.bf16 %v2098_v58  ;;  %v690_v52 = vadd.f32 %v1651_v41, %v550_v47  ;;  %v757_v26 = vmax.f32 %v629_v32, 0.0  ;;  %v756_v2 = vmax.f32 %v628_v53, 0.0  ;;  %v294_v47 = vld [vmem:[%s1602_s7 + $0x1f0] sm:$0xff] }
  0x90   : > { %v491_v33 = vmul.f32 %v1624_v18, %v351_v50  ;;  %v886_v17 = vpack.c.bf16 %v814_v0, %v812_v57  ;;  %v630_v38 = vadd.f32 %v1651_v41, %v490_v46  ;;  %v559_v57 = vmul.f32 %v1624_v18, %v419_v49 }
  0x91   : > { %v555_v27 = vmul.f32 %v1624_v18, %v415_v54  ;;  %v818_v45 = vmax.f32 %v690_v52, 0.0  ;;  %v633_v54 = vadd.f32 %v1628_v20, %v493_v55  ;;  %v635_v9 = vadd.f32 %v1628_v20, %v495_v56 }
  0x92   : > { %v631_v34 = vadd.f32 %v1628_v20, %v491_v33  ;;  %v354_v33 = vunpack.c.l.bf16 %v2119_v7  ;;  %v416_v15 = vunpack.c.l.bf16 %v292_v51  ;;  %v357_v44 = vunpack.c.h.bf16 %v262_v4 }
  0x93   : > { %v695_v36 = vadd.f32 %v1628_v20, %v555_v27  ;;  %v888_v0 = vpack.c.bf16 %v818_v45, %v816_v1  ;;  %v820_v23 = vmax.f32 %v692_v6, 0.0  ;;  %v359_v24 = vunpack.c.h.bf16 %v263_v11 }
  0x94   : > { %v759_v61 = vmax.f32 %v631_v34, 0.0  ;;  %v421_v27 = vunpack.c.h.bf16 %v294_v47  ;;  %v761_v29 = vmax.f32 %v633_v54, 0.0  ;;  %v763_v52 = vmax.f32 %v635_v9, 0.0 }
  0x95   : > { %v823_v60 = vmax.f32 %v695_v36, 0.0  ;;  %v492_v14 = vmul.f32 %v1642_v31, %v352_v10  ;;  %v494_v32 = vmul.f32 %v1642_v31, %v354_v33  ;;  %v556_v7 = vmul.f32 %v1642_v31, %v416_v15 }
  0x96   : > { %1144 = vmatmul.mubr.bf16.gmra.mrb[40].mxu0 %v852_v25  ;;  %1272 = vmatmul.mubr.bf16.gmra.mrb[40].mxu1 %v884_v63  ;;  %v889_v25 = vpack.c.bf16 %v819_v22, %v817_v19  ;;  %v414_v63 = vunpack.c.l.bf16 %v2098_v58  ;;  %v856_v58 = vpack.c.bf16 %v754_v5, %v752_v3  ;;  %v859_v62 = vpack.c.bf16 %v759_v61, %v757_v26 }
  0x97   : > { %1151 = vmatprep.mubr.bf16.mxu0 %v855_v48  ;;  %1279 = vmatprep.mubr.bf16.mxu1 %v887_v12  ;;  %v417_v48 = vunpack.c.h.bf16 %v292_v51  ;;  %v295_v12 = vld [vmem:[%s1602_s7 + $0x1f8] sm:$0xff]  ;;  %v891_v13 = vpack.c.bf16 %v823_v60, %v821_v59  ;;  %v699_v22 = vadd.f32 %v1628_v20, %v559_v57  ;;  %v497_v51 = vmul.f32 %v1624_v18, %v357_v44 }
  0x98   : > { %v554_v40 = vmul.f32 %v1642_v31, %v414_v63  ;;  %v861_v5 = vpack.c.bf16 %v763_v52, %v761_v29  ;;  %v632_v1 = vadd.f32 %v1651_v41, %v492_v14  ;;  %v634_v35 = vadd.f32 %v1651_v41, %v494_v32 }
  0x99   : > { %v557_v50 = vmul.f32 %v1624_v18, %v417_v48  ;;  %v827_v37 = vmax.f32 %v699_v22, 0.0  ;;  %v696_v36 = vadd.f32 %v1651_v41, %v556_v7  ;;  %v356_v46 = vunpack.c.l.bf16 %v262_v4 }
  0x9a   : > { %v694_v8 = vadd.f32 %v1651_v41, %v554_v40  ;;  %v358_v49 = vunpack.c.l.bf16 %v263_v11  ;;  %v420_v26 = vunpack.c.l.bf16 %v294_v47  ;;  %v422_v61 = vunpack.c.l.bf16 %v295_v12 }
  0x9b   : > { %v697_v19 = vadd.f32 %v1628_v20, %v557_v50  ;;  %v637_v53 = vadd.f32 %v1628_v20, %v497_v51  ;;  %v760_v55 = vmax.f32 %v632_v1, 0.0  ;;  %v762_v56 = vmax.f32 %v634_v35, 0.0 }
  0x9c   : > { %v822_v3 = vmax.f32 %v694_v8, 0.0  ;;  %v496_v60 = vmul.f32 %v1642_v31, %v356_v46  ;;  %v560_v50 = vmul.f32 %v1642_v31, %v420_v26  ;;  %v562_v57 = vmul.f32 %v1642_v31, %v422_v61 }
  0x9d   : > { %v825_v28 = vmax.f32 %v697_v19, 0.0  ;;  %v860_v6 = vpack.c.bf16 %v762_v56, %v760_v55 }
  0x9e   : > { %1152 = vmatmul.mubr.bf16.gmra.mrb[44].mxu0 %v854_v16  ;;  %1280 = vmatmul.mubr.bf16.gmra.mrb[44].mxu1 %v886_v17  ;;  %v418_v16 = vunpack.c.l.bf16 %v293_v39  ;;  %v758_v17 = vmax.f32 %v630_v38, 0.0  ;;  %v499_v39 = vmul.f32 %v1624_v18, %v359_v24  ;;  %v890_v43 = vpack.c.bf16 %v822_v3, %v820_v23 }
  0x9f   : > { %1159 = vmatprep.mubr.bf16.mxu0 %v857_v30  ;;  %1287 = vmatprep.mubr.bf16.mxu1 %v889_v25  ;;  %v423_v30 = vunpack.c.h.bf16 %v295_v12  ;;  %v561_v25 = vmul.f32 %v1624_v18, %v421_v27  ;;  %v893_v48 = vpack.c.bf16 %v827_v37, %v825_v28  ;;  %v498_v38 = vmul.f32 %v1642_v31, %v358_v49 }
  0xa0   : > { %v558_v34 = vmul.f32 %v1642_v31, %v418_v16  ;;  %v858_v42 = vpack.c.bf16 %v758_v17, %v756_v2  ;;  %v636_v8 = vadd.f32 %v1651_v41, %v496_v60  ;;  %v700_v9 = vadd.f32 %v1651_v41, %v560_v50  ;;  %v2182_v17 = vld [vmem:[%s2326_s4] ss:$0 sm:$0xff] }
  0xa1   : > { %v563_v63 = vmul.f32 %v1624_v18, %v423_v30  ;;  %v639_v18 = vadd.f32 %v1628_v20, %v499_v39  ;;  %v701_v21 = vadd.f32 %v1628_v20, %v561_v25  ;;  %v638_v54 = vadd.f32 %v1651_v41, %v498_v38 }
  0xa2   : > { %v698_v45 = vadd.f32 %v1651_v41, %v558_v34  ;;  %v702_v10 = vadd.f32 %v1651_v41, %v562_v57  ;;  %v764_v31 = vmax.f32 %v636_v8, 0.0 }
  0xa3   : > { %v703_v40 = vadd.f32 %v1628_v20, %v563_v63  ;;  %v829_v2 = vmax.f32 %v701_v21, 0.0  ;;  %v766_v12 = vmax.f32 %v638_v54, 0.0 }
  0xa4   : > { %v826_v59 = vmax.f32 %v698_v45, 0.0  ;;  %v830_v33 = vmax.f32 %v702_v10, 0.0 }
  0xa5   : > { %v831_v20 = vmax.f32 %v703_v40, 0.0  ;;  %v862_v15 = vpack.c.bf16 %v766_v12, %v764_v31 }
  0xa6   : > { %1160 = vmatmul.mubr.bf16.gmra.mrb[48].mxu0 %v856_v58  ;;  %1288 = vmatmul.mubr.bf16.gmra.mrb[48].mxu1 %v888_v0  ;;  %v824_v58 = vmax.f32 %v696_v36, 0.0  ;;  %v765_v0 = vmax.f32 %v637_v53, 0.0 }
  0xa7   : > { %1167 = vmatprep.mubr.bf16.mxu0 %v859_v62  ;;  %1295 = vmatprep.mubr.bf16.mxu1 %v891_v13  ;;  %v767_v62 = vmax.f32 %v639_v18, 0.0  ;;  %v895_v47 = vpack.c.bf16 %v831_v20, %v829_v2  ;;  %v828_v13 = vmax.f32 %v700_v9, 0.0 }
  0xa8   : > { %v892_v4 = vpack.c.bf16 %v826_v59, %v824_v58 }
  0xa9   : > { %v863_v11 = vpack.c.bf16 %v767_v62, %v765_v0  ;;  %v894_v16 = vpack.c.bf16 %v830_v33, %v828_v13 }
  0xae   : > { %1168 = vmatmul.mubr.bf16.gmra.mrb[52].mxu0 %v858_v42  ;;  %1296 = vmatmul.mubr.bf16.gmra.mrb[52].mxu1 %v890_v43 }
  0xaf   : > { %1175 = vmatprep.mubr.bf16.mxu0 %v861_v5  ;;  %1303 = vmatprep.mubr.bf16.mxu1 %v893_v48 }
  0xb6   : > { %1176 = vmatmul.mubr.bf16.gmra.mrb[56].mxu0 %v860_v6  ;;  %1304 = vmatmul.mubr.bf16.gmra.mrb[56].mxu1 %v892_v4 }
  0xb7   : > { %1183 = vmatprep.mubr.bf16.mxu0 %v863_v11  ;;  %1311 = vmatprep.mubr.bf16.mxu1 %v895_v47 }
  0xbe   : > { %1184 = vmatmul.mubr.bf16.gmra.mrb[60].mxu0 %v862_v15  ;;  %1312 = vmatmul.mubr.bf16.gmra.mrb[60].mxu1 %v894_v16 }
 0x119   : > { %v1065_v41 = vpop.f32.mrb[0].mxu0  ;;  %v1193_v19 = vpop.f32.mrb[0].mxu1 }
 0x11a   : > { %v1066_v22 = vadd.f32 %v2182_v17, %v1065_v41  ;;  %v1194_v44 = vadd.f32 %v2182_v17, %v1193_v19  ;;  %v1067_v23 = vpop.f32.mrb[1].mxu0  ;;  %v1195_v24 = vpop.f32.mrb[1].mxu1 }
 0x11b   : > { %v1068_v27 = vpop.f32.mrb[2].mxu0  ;;  %v1196_v30 = vpop.f32.mrb[2].mxu1 }
 0x11c   : > { %1320 = vst [vmem:[%s2189_s19] sm:$0xff] %v1066_v22  ;;  %1352 = vst [vmem:[%s2189_s19 + $0x100] sm:$0xff] %v1194_v44  ;;  %v1069_v3 = vadd.f32 %v2182_v17, %v1068_v27  ;;  %v1197_v29 = vadd.f32 %v2182_v17, %v1196_v30  ;;  %v1070_v52 = vpop.f32.mrb[3].mxu0  ;;  %v1198_v14 = vpop.f32.mrb[3].mxu1 }
 0x11e   : > { %1321 = vst [vmem:[%s2189_s19 + $0x8] sm:$0xff] %v1069_v3  ;;  %1353 = vst [vmem:[%s2189_s19 + $0x108] sm:$0xff] %v1197_v29 }
 0x121   : > { %v1073_v32 = vpop.f32.mrb[4].mxu0  ;;  %v1201_v7 = vpop.f32.mrb[4].mxu1 }
 0x122   : > { %v1074_v34 = vadd.f32 %v2182_v17, %v1073_v32  ;;  %v1202_v28 = vadd.f32 %v2182_v17, %v1201_v7  ;;  %v1075_v37 = vpop.f32.mrb[5].mxu0  ;;  %v1203_v51 = vpop.f32.mrb[5].mxu1 }
 0x123   : > { %v1076_v39 = vpop.f32.mrb[6].mxu0  ;;  %v1204_v25 = vpop.f32.mrb[6].mxu1 }
 0x124   : > { %1322 = vst [vmem:[%s2189_s19 + $0x10] sm:$0xff] %v1074_v34  ;;  %1354 = vst [vmem:[%s2189_s19 + $0x110] sm:$0xff] %v1202_v28  ;;  %v1077_v63 = vadd.f32 %v2182_v17, %v1076_v39  ;;  %v1205_v42 = vadd.f32 %v2182_v17, %v1204_v25  ;;  %v1078_v43 = vpop.f32.mrb[7].mxu0  ;;  %v1206_v5 = vpop.f32.mrb[7].mxu1 }
 0x126   : > { %1323 = vst [vmem:[%s2189_s19 + $0x18] sm:$0xff] %v1077_v63  ;;  %1355 = vst [vmem:[%s2189_s19 + $0x118] sm:$0xff] %v1205_v42 }
 0x129   : > { %v1081_v1 = vpop.f32.mrb[8].mxu0  ;;  %v1209_v35 = vpop.f32.mrb[8].mxu1 }
 0x12a   : > { %v1082_v36 = vadd.f32 %v2182_v17, %v1081_v1  ;;  %v1210_v45 = vadd.f32 %v2182_v17, %v1209_v35  ;;  %v1083_v46 = vpop.f32.mrb[9].mxu0  ;;  %v1211_v48 = vpop.f32.mrb[9].mxu1 }
 0x12b   : > { %v1084_v49 = vpop.f32.mrb[10].mxu0  ;;  %v1212_v26 = vpop.f32.mrb[10].mxu1 }
 0x12c   : > { %1324 = vst [vmem:[%s2189_s19 + $0x20] sm:$0xff] %v1082_v36  ;;  %1356 = vst [vmem:[%s2189_s19 + $0x120] sm:$0xff] %v1210_v45  ;;  %v1085_v61 = vadd.f32 %v2182_v17, %v1084_v49  ;;  %v1213_v53 = vadd.f32 %v2182_v17, %v1212_v26  ;;  %v1086_v18 = vpop.f32.mrb[11].mxu0  ;;  %v1214_v21 = vpop.f32.mrb[11].mxu1 }
 0x12e   : > { %1325 = vst [vmem:[%s2189_s19 + $0x28] sm:$0xff] %v1085_v61  ;;  %1357 = vst [vmem:[%s2189_s19 + $0x128] sm:$0xff] %v1213_v53 }
 0x131   : > { %v1089_v40 = vpop.f32.mrb[12].mxu0  ;;  %v1217_v55 = vpop.f32.mrb[12].mxu1 }
 0x132   : > { %v1090_v56 = vadd.f32 %v2182_v17, %v1089_v40  ;;  %v1218_v58 = vadd.f32 %v2182_v17, %v1217_v55  ;;  %v1091_v59 = vpop.f32.mrb[13].mxu0  ;;  %v1219_v60 = vpop.f32.mrb[13].mxu1 }
 0x133   : > { %v1092_v38 = vpop.f32.mrb[14].mxu0  ;;  %v1220_v50 = vpop.f32.mrb[14].mxu1 }
 0x134   : > { %1326 = vst [vmem:[%s2189_s19 + $0x30] sm:$0xff] %v1090_v56  ;;  %1358 = vst [vmem:[%s2189_s19 + $0x130] sm:$0xff] %v1218_v58  ;;  %v1093_v57 = vadd.f32 %v2182_v17, %v1092_v38  ;;  %v1221_v0 = vadd.f32 %v2182_v17, %v1220_v50  ;;  %v1094_v62 = vpop.f32.mrb[15].mxu0  ;;  %v1222_v2 = vpop.f32.mrb[15].mxu1 }
 0x136   : > { %1327 = vst [vmem:[%s2189_s19 + $0x38] sm:$0xff] %v1093_v57  ;;  %1359 = vst [vmem:[%s2189_s19 + $0x138] sm:$0xff] %v1221_v0 }
 0x139   : > { %v1097_v20 = vpop.f32.mrb[16].mxu0  ;;  %v1225_v6 = vpop.f32.mrb[16].mxu1 }
 0x13a   : > { %v1098_v4 = vadd.f32 %v2182_v17, %v1097_v20  ;;  %v1226_v8 = vadd.f32 %v2182_v17, %v1225_v6  ;;  %v1099_v54 = vpop.f32.mrb[17].mxu0  ;;  %v1227_v9 = vpop.f32.mrb[17].mxu1 }
 0x13b   : > { %v1100_v10 = vpop.f32.mrb[18].mxu0  ;;  %v1228_v11 = vpop.f32.mrb[18].mxu1 }
 0x13c   : > { %1328 = vst [vmem:[%s2189_s19 + $0x40] sm:$0xff] %v1098_v4  ;;  %1360 = vst [vmem:[%s2189_s19 + $0x140] sm:$0xff] %v1226_v8  ;;  %v1101_v47 = vadd.f32 %v2182_v17, %v1100_v10  ;;  %v1229_v31 = vadd.f32 %v2182_v17, %v1228_v11  ;;  %v1102_v12 = vpop.f32.mrb[19].mxu0  ;;  %v1230_v13 = vpop.f32.mrb[19].mxu1 }
 0x13e   : > { %1329 = vst [vmem:[%s2189_s19 + $0x48] sm:$0xff] %v1101_v47  ;;  %1361 = vst [vmem:[%s2189_s19 + $0x148] sm:$0xff] %v1229_v31 }
 0x141   : > { %v1105_v33 = vpop.f32.mrb[20].mxu0  ;;  %v1233_v15 = vpop.f32.mrb[20].mxu1 }
 0x142   : > { %v1106_v16 = vadd.f32 %v2182_v17, %v1105_v33  ;;  %v1234_v41 = vadd.f32 %v2182_v17, %v1233_v15  ;;  %v1107_v19 = vpop.f32.mrb[21].mxu0  ;;  %v1235_v22 = vpop.f32.mrb[21].mxu1 }
 0x143   : > { %v1108_v44 = vpop.f32.mrb[22].mxu0  ;;  %v1236_v23 = vpop.f32.mrb[22].mxu1 }
 0x144   : > { %1330 = vst [vmem:[%s2189_s19 + $0x50] sm:$0xff] %v1106_v16  ;;  %1362 = vst [vmem:[%s2189_s19 + $0x150] sm:$0xff] %v1234_v41  ;;  %v1109_v24 = vadd.f32 %v2182_v17, %v1108_v44  ;;  %v1237_v27 = vadd.f32 %v2182_v17, %v1236_v23  ;;  %v1110_v30 = vpop.f32.mrb[23].mxu0  ;;  %v1238_v3 = vpop.f32.mrb[23].mxu1 }
 0x146   : > { %1331 = vst [vmem:[%s2189_s19 + $0x58] sm:$0xff] %v1109_v24  ;;  %1363 = vst [vmem:[%s2189_s19 + $0x158] sm:$0xff] %v1237_v27 }
 0x149   : > { %v1113_v29 = vpop.f32.mrb[24].mxu0  ;;  %v1241_v52 = vpop.f32.mrb[24].mxu1 }
 0x14a   : > { %v1114_v14 = vadd.f32 %v2182_v17, %v1113_v29  ;;  %v1242_v32 = vadd.f32 %v2182_v17, %v1241_v52  ;;  %v1115_v7 = vpop.f32.mrb[25].mxu0  ;;  %v1243_v34 = vpop.f32.mrb[25].mxu1 }
 0x14b   : > { %v1116_v28 = vpop.f32.mrb[26].mxu0  ;;  %v1244_v37 = vpop.f32.mrb[26].mxu1 }
 0x14c   : > { %1332 = vst [vmem:[%s2189_s19 + $0x60] sm:$0xff] %v1114_v14  ;;  %1364 = vst [vmem:[%s2189_s19 + $0x160] sm:$0xff] %v1242_v32  ;;  %v1117_v51 = vadd.f32 %v2182_v17, %v1116_v28  ;;  %v1245_v39 = vadd.f32 %v2182_v17, %v1244_v37  ;;  %v1118_v25 = vpop.f32.mrb[27].mxu0  ;;  %v1246_v63 = vpop.f32.mrb[27].mxu1 }
 0x14e   : > { %1333 = vst [vmem:[%s2189_s19 + $0x68] sm:$0xff] %v1117_v51  ;;  %1365 = vst [vmem:[%s2189_s19 + $0x168] sm:$0xff] %v1245_v39 }
 0x151   : > { %v1121_v42 = vpop.f32.mrb[28].mxu0  ;;  %v1249_v43 = vpop.f32.mrb[28].mxu1 }
 0x152   : > { %v1122_v5 = vadd.f32 %v2182_v17, %v1121_v42  ;;  %v1250_v1 = vadd.f32 %v2182_v17, %v1249_v43  ;;  %v1123_v35 = vpop.f32.mrb[29].mxu0  ;;  %v1251_v36 = vpop.f32.mrb[29].mxu1 }
 0x153   : > { %v1124_v45 = vpop.f32.mrb[30].mxu0  ;;  %v1252_v46 = vpop.f32.mrb[30].mxu1 }
 0x154   : > { %1334 = vst [vmem:[%s2189_s19 + $0x70] sm:$0xff] %v1122_v5  ;;  %1366 = vst [vmem:[%s2189_s19 + $0x170] sm:$0xff] %v1250_v1  ;;  %v1125_v48 = vadd.f32 %v2182_v17, %v1124_v45  ;;  %v1253_v49 = vadd.f32 %v2182_v17, %v1252_v46  ;;  %v1126_v26 = vpop.f32.mrb[31].mxu0  ;;  %v1254_v61 = vpop.f32.mrb[31].mxu1 }
 0x156   : > { %1335 = vst [vmem:[%s2189_s19 + $0x78] sm:$0xff] %v1125_v48  ;;  %1367 = vst [vmem:[%s2189_s19 + $0x178] sm:$0xff] %v1253_v49 }
 0x159   : > { %v1129_v53 = vpop.f32.mrb[32].mxu0  ;;  %v1257_v18 = vpop.f32.mrb[32].mxu1 }
 0x15a   : > { %v1130_v21 = vadd.f32 %v2182_v17, %v1129_v53  ;;  %v1258_v40 = vadd.f32 %v2182_v17, %v1257_v18  ;;  %v1131_v55 = vpop.f32.mrb[33].mxu0  ;;  %v1259_v56 = vpop.f32.mrb[33].mxu1 }
 0x15b   : > { %v1132_v58 = vpop.f32.mrb[34].mxu0  ;;  %v1260_v59 = vpop.f32.mrb[34].mxu1 }
 0x15c   : > { %1336 = vst [vmem:[%s2189_s19 + $0x80] sm:$0xff] %v1130_v21  ;;  %1368 = vst [vmem:[%s2189_s19 + $0x180] sm:$0xff] %v1258_v40  ;;  %v1133_v60 = vadd.f32 %v2182_v17, %v1132_v58  ;;  %v1261_v38 = vadd.f32 %v2182_v17, %v1260_v59  ;;  %v1134_v50 = vpop.f32.mrb[35].mxu0  ;;  %v1262_v57 = vpop.f32.mrb[35].mxu1 }
 0x15e   : > { %1337 = vst [vmem:[%s2189_s19 + $0x88] sm:$0xff] %v1133_v60  ;;  %1369 = vst [vmem:[%s2189_s19 + $0x188] sm:$0xff] %v1261_v38 }
 0x161   : > { %v1137_v0 = vpop.f32.mrb[36].mxu0  ;;  %v1265_v62 = vpop.f32.mrb[36].mxu1 }
 0x162   : > { %v1138_v2 = vadd.f32 %v2182_v17, %v1137_v0  ;;  %v1266_v20 = vadd.f32 %v2182_v17, %v1265_v62  ;;  %v1139_v6 = vpop.f32.mrb[37].mxu0  ;;  %v1267_v4 = vpop.f32.mrb[37].mxu1 }
 0x163   : > { %v1140_v8 = vpop.f32.mrb[38].mxu0  ;;  %v1268_v54 = vpop.f32.mrb[38].mxu1 }
 0x164   : > { %1338 = vst [vmem:[%s2189_s19 + $0x90] sm:$0xff] %v1138_v2  ;;  %1370 = vst [vmem:[%s2189_s19 + $0x190] sm:$0xff] %v1266_v20  ;;  %v1141_v9 = vadd.f32 %v2182_v17, %v1140_v8  ;;  %v1269_v10 = vadd.f32 %v2182_v17, %v1268_v54  ;;  %v1142_v11 = vpop.f32.mrb[39].mxu0  ;;  %v1270_v47 = vpop.f32.mrb[39].mxu1 }
 0x166   : > { %1339 = vst [vmem:[%s2189_s19 + $0x98] sm:$0xff] %v1141_v9  ;;  %1371 = vst [vmem:[%s2189_s19 + $0x198] sm:$0xff] %v1269_v10 }
 0x169   : > { %v1145_v31 = vpop.f32.mrb[40].mxu0  ;;  %v1273_v12 = vpop.f32.mrb[40].mxu1 }
 0x16a   : > { %v1146_v13 = vadd.f32 %v2182_v17, %v1145_v31  ;;  %v1274_v33 = vadd.f32 %v2182_v17, %v1273_v12  ;;  %v1147_v15 = vpop.f32.mrb[41].mxu0  ;;  %v1275_v16 = vpop.f32.mrb[41].mxu1 }
 0x16b   : > { %v1148_v41 = vpop.f32.mrb[42].mxu0  ;;  %v1276_v19 = vpop.f32.mrb[42].mxu1 }
 0x16c   : > { %1340 = vst [vmem:[%s2189_s19 + $0xa0] sm:$0xff] %v1146_v13  ;;  %1372 = vst [vmem:[%s2189_s19 + $0x1a0] sm:$0xff] %v1274_v33  ;;  %v1149_v22 = vadd.f32 %v2182_v17, %v1148_v41  ;;  %v1277_v44 = vadd.f32 %v2182_v17, %v1276_v19  ;;  %v1150_v23 = vpop.f32.mrb[43].mxu0  ;;  %v1278_v24 = vpop.f32.mrb[43].mxu1 }
 0x16e   : > { %1341 = vst [vmem:[%s2189_s19 + $0xa8] sm:$0xff] %v1149_v22  ;;  %1373 = vst [vmem:[%s2189_s19 + $0x1a8] sm:$0xff] %v1277_v44 }
 0x171   : > { %v1153_v27 = vpop.f32.mrb[44].mxu0  ;;  %v1281_v30 = vpop.f32.mrb[44].mxu1 }
 0x172   : > { %v1154_v3 = vadd.f32 %v2182_v17, %v1153_v27  ;;  %v1282_v29 = vadd.f32 %v2182_v17, %v1281_v30  ;;  %v1155_v52 = vpop.f32.mrb[45].mxu0  ;;  %v1283_v14 = vpop.f32.mrb[45].mxu1 }
 0x173   : > { %v1156_v32 = vpop.f32.mrb[46].mxu0  ;;  %v1284_v7 = vpop.f32.mrb[46].mxu1 }
 0x174   : > { %1342 = vst [vmem:[%s2189_s19 + $0xb0] sm:$0xff] %v1154_v3  ;;  %1374 = vst [vmem:[%s2189_s19 + $0x1b0] sm:$0xff] %v1282_v29  ;;  %v1157_v34 = vadd.f32 %v2182_v17, %v1156_v32  ;;  %v1285_v28 = vadd.f32 %v2182_v17, %v1284_v7  ;;  %v1158_v37 = vpop.f32.mrb[47].mxu0  ;;  %v1286_v51 = vpop.f32.mrb[47].mxu1 }
 0x176   : > { %1343 = vst [vmem:[%s2189_s19 + $0xb8] sm:$0xff] %v1157_v34  ;;  %1375 = vst [vmem:[%s2189_s19 + $0x1b8] sm:$0xff] %v1285_v28 }
 0x179   : > { %v1161_v39 = vpop.f32.mrb[48].mxu0  ;;  %v1289_v25 = vpop.f32.mrb[48].mxu1 }
 0x17a   : > { %v1162_v63 = vadd.f32 %v2182_v17, %v1161_v39  ;;  %v1290_v42 = vadd.f32 %v2182_v17, %v1289_v25  ;;  %v1163_v43 = vpop.f32.mrb[49].mxu0  ;;  %v1291_v5 = vpop.f32.mrb[49].mxu1 }
 0x17b   : > { %v1164_v1 = vpop.f32.mrb[50].mxu0  ;;  %v1292_v35 = vpop.f32.mrb[50].mxu1 }
 0x17c   : > { %1344 = vst [vmem:[%s2189_s19 + $0xc0] sm:$0xff] %v1162_v63  ;;  %1376 = vst [vmem:[%s2189_s19 + $0x1c0] sm:$0xff] %v1290_v42  ;;  %v1165_v36 = vadd.f32 %v2182_v17, %v1164_v1  ;;  %v1293_v45 = vadd.f32 %v2182_v17, %v1292_v35  ;;  %v1166_v46 = vpop.f32.mrb[51].mxu0  ;;  %v1294_v48 = vpop.f32.mrb[51].mxu1 }
 0x17e   : > { %1345 = vst [vmem:[%s2189_s19 + $0xc8] sm:$0xff] %v1165_v36  ;;  %1377 = vst [vmem:[%s2189_s19 + $0x1c8] sm:$0xff] %v1293_v45 }
 0x181   : > { %v1169_v49 = vpop.f32.mrb[52].mxu0  ;;  %v1297_v26 = vpop.f32.mrb[52].mxu1 }
 0x182   : > { %v1170_v61 = vadd.f32 %v2182_v17, %v1169_v49  ;;  %v1298_v53 = vadd.f32 %v2182_v17, %v1297_v26  ;;  %v1171_v18 = vpop.f32.mrb[53].mxu0  ;;  %v1299_v21 = vpop.f32.mrb[53].mxu1 }
 0x183   : > { %v1172_v40 = vpop.f32.mrb[54].mxu0  ;;  %v1300_v55 = vpop.f32.mrb[54].mxu1 }
 0x184   : > { %1346 = vst [vmem:[%s2189_s19 + $0xd0] sm:$0xff] %v1170_v61  ;;  %1378 = vst [vmem:[%s2189_s19 + $0x1d0] sm:$0xff] %v1298_v53  ;;  %v1173_v56 = vadd.f32 %v2182_v17, %v1172_v40  ;;  %v1301_v58 = vadd.f32 %v2182_v17, %v1300_v55  ;;  %v1174_v59 = vpop.f32.mrb[55].mxu0  ;;  %v1302_v60 = vpop.f32.mrb[55].mxu1 }
 0x186   : > { %1347 = vst [vmem:[%s2189_s19 + $0xd8] sm:$0xff] %v1173_v56  ;;  %1379 = vst [vmem:[%s2189_s19 + $0x1d8] sm:$0xff] %v1301_v58 }
 0x189   : > { %v1177_v38 = vpop.f32.mrb[56].mxu0  ;;  %v1305_v50 = vpop.f32.mrb[56].mxu1 }
 0x18a   : > { %v1178_v57 = vadd.f32 %v2182_v17, %v1177_v38  ;;  %v1306_v0 = vadd.f32 %v2182_v17, %v1305_v50  ;;  %v1179_v62 = vpop.f32.mrb[57].mxu0  ;;  %v1307_v2 = vpop.f32.mrb[57].mxu1 }
 0x18b   : > { %v1180_v20 = vpop.f32.mrb[58].mxu0  ;;  %v1308_v6 = vpop.f32.mrb[58].mxu1 }
 0x18c   : > { %1348 = vst [vmem:[%s2189_s19 + $0xe0] sm:$0xff] %v1178_v57  ;;  %1380 = vst [vmem:[%s2189_s19 + $0x1e0] sm:$0xff] %v1306_v0  ;;  %v1181_v4 = vadd.f32 %v2182_v17, %v1180_v20  ;;  %v1309_v8 = vadd.f32 %v2182_v17, %v1308_v6  ;;  %v1182_v54 = vpop.f32.mrb[59].mxu0  ;;  %v1310_v9 = vpop.f32.mrb[59].mxu1 }
 0x18e   : > { %1349 = vst [vmem:[%s2189_s19 + $0xe8] sm:$0xff] %v1181_v4  ;;  %1381 = vst [vmem:[%s2189_s19 + $0x1e8] sm:$0xff] %v1309_v8 }
 0x191   : > { %v1185_v10 = vpop.f32.mrb[60].mxu0  ;;  %v1313_v11 = vpop.f32.mrb[60].mxu1 }
 0x192   : > { %v1186_v47 = vadd.f32 %v2182_v17, %v1185_v10  ;;  %v1314_v31 = vadd.f32 %v2182_v17, %v1313_v11  ;;  %v1187_v12 = vpop.f32.mrb[61].mxu0  ;;  %v1315_v13 = vpop.f32.mrb[61].mxu1 }
 0x193   : > { %v1188_v33 = vpop.f32.mrb[62].mxu0  ;;  %v1316_v15 = vpop.f32.mrb[62].mxu1 }
 0x194   : > { %1350 = vst [vmem:[%s2189_s19 + $0xf0] sm:$0xff] %v1186_v47  ;;  %1382 = vst [vmem:[%s2189_s19 + $0x1f0] sm:$0xff] %v1314_v31  ;;  %v1189_v16 = vadd.f32 %v2182_v17, %v1188_v33  ;;  %v1317_v41 = vadd.f32 %v2182_v17, %v1316_v15  ;;  %v1190_v19 = vpop.f32.mrb[63].mxu0  ;;  %v1318_v22 = vpop.f32.mrb[63].mxu1 }
 0x196   : > { %1351 = vst [vmem:[%s2189_s19 + $0xf8] sm:$0xff] %v1189_v16  ;;  %1383 = vst [vmem:[%s2189_s19 + $0x1f8] sm:$0xff] %v1317_v41 }
 0x197 PF: > { %s15_s18 = sadd.s32 1, %s1533_s18  }
 0x198   : > { %p12_p4 = scmp.ge.s32.totalorder %s15_s18, 4  }
 0x19a   :  { %14 = sbr.rel (!%p12_p4) target bundleno = 1 (0x1), region = 70 }

// kernel: _lambda_.5
= control target key start
LH: loop header
LB: loop body
LE: loop exit
PB: predicated region body
PF: predicated region fallthrough
CT: control target
= control target key end

     0   :  { %s2736_s15 = smov 0   ;;  %s4338_s0 = inlined_call_operand.vmem [shape: f32[1024,256], index: 0, kind: input, shape index: {}]   ;;  %s4339_s1 = inlined_call_operand.vmem [shape: bf16[256,256], index: 1, kind: input, shape index: {}]   ;;  %s4340_s2 = inlined_call_operand.vmem [shape: f32[1,256], index: 2, kind: input, shape index: {}]   ;;  %s4341_s3 = inlined_call_operand.vmem [shape: bf16[1024,256], index: 3, kind: output, shape index: {0}]   ;;  %s4342_s4 = inlined_call_operand.vmem [shape: f32[2,8,256], index: 4, kind: output, shape index: {1}]  }
   0x1 LB: > { %s2742_s16 = sadd.s32 4294967295, %s2708_s15   ;;  %p2374_p0 = scmp.ge.s32.totalorder %s2708_s15, 1  ;;  %s2708_s15 = sphi %s2736_s15, %s15_s15  }
   0x2   : > { %p167_p1 = scmp.lt.s32.totalorder %s2708_s15, 3 }
   0x4   : > { %p168_p2 = pnand %p2374_p0, %p167_p1 }
   0x6   : > { %171 = sbr.rel (%p168_p2) target bundleno = 506 (0x1fa), region = 32 }
   0xd   : > { %v2654_v0 = vld [vmem:[%s4339_s1 + $0x4] ss:$8 sps:$4 sm:$0xff]   ;;  %v2656_v1 = vld [vmem:[%s4339_s1] ss:$8 sps:$4 sm:$0xff]   ;;  %v2657_v2 = vld [vmem:[%s4339_s1 + $0x14] ss:$8 sps:$4 sm:$0xff]  }
   0xe   : > { %615 = vmatprep.subr.bf16.mxu0 %v2654_v0  ;;  %2613 = vmatprep.subr.bf16.mxu1 %v2654_v0  ;;  %v2659_v3 = vld [vmem:[%s4339_s1 + $0x10] ss:$8 sps:$4 sm:$0xff]   ;;  %v2660_v4 = vld [vmem:[%s4339_s1 + $0x24] ss:$8 sps:$4 sm:$0xff]   ;;  %s2375_s27 = sshll.u32 %s2742_s16, 6  ;;  %s2479_s17 = sshll.u32 %s2742_s16, 9 }
   0xf   : > { %616 = vmatpush1.bf16.msra.mxu0 %v2656_v1  ;;  %2629 = vmatpush1.bf16.msra.mxu1 %v2656_v1  ;;  %v2662_v5 = vld [vmem:[%s4339_s1 + $0x20] ss:$8 sps:$4 sm:$0xff]   ;;  %p201_p3 = scmp.lt.s32.totalorder %s2375_s27, 127  ;;  %v2663_v6 = vld [vmem:[%s4339_s1 + $0x34] ss:$8 sps:$4 sm:$0xff]   ;;  %p214_p4 = scmp.lt.s32.totalorder %s2742_s16, 1 }
  0x10   : > { %617 = vmatprep.subr.bf16.mxu0 %v2657_v2  ;;  %2614 = vmatprep.subr.bf16.mxu1 %v2657_v2  ;;  %v2665_v7 = vld [vmem:[%s4339_s1 + $0x30] ss:$8 sps:$4 sm:$0xff]   ;;  %v2666_v8 = vld [vmem:[%s4339_s1 + $0x44] ss:$8 sps:$4 sm:$0xff]   ;;  %v2668_v9 = vld [vmem:[%s4339_s1 + $0x40] ss:$8 sps:$4 sm:$0xff]  }
  0x11   : > { %s4574_s27 = smov (!%p201_p3, %s2375_s27), 127  ;;  %v2669_v10 = vld [vmem:[%s4339_s1 + $0x54] ss:$8 sps:$4 sm:$0xff]   ;;  %v2671_v11 = vld [vmem:[%s4339_s1 + $0x50] ss:$8 sps:$4 sm:$0xff]   ;;  %s4576_s16 = smov (!%p214_p4, %s2742_s16), 1 }
  0x12   : > { %s2546_s12 = sshll.u32 %s4574_s27, 4  ;;  %v2672_v12 = vld [vmem:[%s4339_s1 + $0x64] ss:$8 sps:$4 sm:$0xff]   ;;  %v2674_v16 = vld [vmem:[%s4339_s1 + $0x60] ss:$8 sps:$4 sm:$0xff]   ;;  %s2548_s23 = sshll.u32 %s4576_s16, 4 }
  0x13   : > { %618 = vmatpush1.bf16.msra.mxu0 %v2659_v3  ;;  %2630 = vmatpush1.bf16.msra.mxu1 %v2659_v3  ;;  %s2786_s19 = scalar_lea.vmem %s4338_s0, %s2546_s12  ;;  %v2675_v17 = vld [vmem:[%s4339_s1 + $0x74] ss:$8 sps:$4 sm:$0xff]   ;;  %v2677_v18 = vld [vmem:[%s4339_s1 + $0x70] ss:$8 sps:$4 sm:$0xff]   ;;  %v2678_v19 = vld [vmem:[%s4339_s1 + $0x84] ss:$8 sps:$4 sm:$0xff]   ;;  %s218_s26 = scalar_lea.vmem %s4342_s4, %s2548_s23 }
  0x14   : > { %619 = vmatprep.subr.bf16.mxu0 %v2660_v4  ;;  %2615 = vmatprep.subr.bf16.mxu1 %v2660_v4  ;;  %v220_v13 = vld [vmem:[%s2786_s19 + $0x8] sm:$0xff]  ;;  %v222_v14 = vld [vmem:[%s2786_s19 + $0x18] sm:$0xff]  ;;  %v219_v38 = vld [vmem:[%s2786_s19] sm:$0xff] }
  0x15   : > { %v348_v15 = vpack.c.bf16 %v222_v14, %v220_v13  ;;  %v2680_v20 = vld [vmem:[%s4339_s1 + $0x80] ss:$8 sps:$4 sm:$0xff]   ;;  %v2681_v21 = vld [vmem:[%s4339_s1 + $0x94] ss:$8 sps:$4 sm:$0xff]   ;;  %v2683_v25 = vld [vmem:[%s4339_s1 + $0x90] ss:$8 sps:$4 sm:$0xff]  }
  0x16   : > { %v284_v22 = vld [vmem:[%s2786_s19 + $0x208] sm:$0xff]  ;;  %v286_v23 = vld [vmem:[%s2786_s19 + $0x218] sm:$0xff]  ;;  %v221_v39 = vld [vmem:[%s2786_s19 + $0x10] sm:$0xff] }
  0x17   : > { %620 = vmatpush1.bf16.msra.mxu0 %v2662_v5  ;;  %2631 = vmatpush1.bf16.msra.mxu1 %v2662_v5  ;;  %v380_v24 = vpack.c.bf16 %v286_v23, %v284_v22  ;;  %v2684_v26 = vld [vmem:[%s4339_s1 + $0xa4] ss:$8 sps:$4 sm:$0xff]   ;;  %v2686_v27 = vld [vmem:[%s4339_s1 + $0xa0] ss:$8 sps:$4 sm:$0xff]   ;;  %v2687_v28 = vld [vmem:[%s4339_s1 + $0xb4] ss:$8 sps:$4 sm:$0xff]   ;;  %v347_v46 = vpack.c.bf16 %v221_v39, %v219_v38 }
  0x18   : > { %621 = vmatprep.subr.bf16.mxu0 %v2663_v6  ;;  %2616 = vmatprep.subr.bf16.mxu1 %v2663_v6  ;;  %v2689_v29 = vld [vmem:[%s4339_s1 + $0xb0] ss:$8 sps:$4 sm:$0xff]   ;;  %v2690_v30 = vld [vmem:[%s4339_s1 + $0xc4] ss:$8 sps:$4 sm:$0xff]   ;;  %v2692_v31 = vld [vmem:[%s4339_s1 + $0xc0] ss:$8 sps:$4 sm:$0xff]  }
  0x19   : > { %647 = vmatprep.mubr.bf16.mxu0 %v348_v15  ;;  %807 = vmatprep.mubr.bf16.mxu1 %v380_v24  ;;  %v2693_v32 = vld [vmem:[%s4339_s1 + $0xd4] ss:$8 sps:$4 sm:$0xff]   ;;  %v2695_v33 = vld [vmem:[%s4339_s1 + $0xd0] ss:$8 sps:$4 sm:$0xff]   ;;  %v2696_v34 = vld [vmem:[%s4339_s1 + $0xe4] ss:$8 sps:$4 sm:$0xff]  }
  0x1a   : > { %v2698_v35 = vld [vmem:[%s4339_s1 + $0xe0] ss:$8 sps:$4 sm:$0xff]   ;;  %v2699_v36 = vld [vmem:[%s4339_s1 + $0xf4] ss:$8 sps:$4 sm:$0xff]   ;;  %v2701_v37 = vld [vmem:[%s4339_s1 + $0xf0] ss:$8 sps:$4 sm:$0xff]  }
  0x1b   : > { %622 = vmatpush1.bf16.msra.mxu0 %v2665_v7  ;;  %2632 = vmatpush1.bf16.msra.mxu1 %v2665_v7  ;;  %v224_v40 = vld [vmem:[%s2786_s19 + $0x28] sm:$0xff]  ;;  %v283_v41 = vld [vmem:[%s2786_s19 + $0x200] sm:$0xff]  ;;  %v285_v42 = vld [vmem:[%s2786_s19 + $0x210] sm:$0xff] }
  0x1c   : > { %623 = vmatprep.subr.bf16.mxu0 %v2666_v8  ;;  %2617 = vmatprep.subr.bf16.mxu1 %v2666_v8  ;;  %v226_v43 = vld [vmem:[%s2786_s19 + $0x38] sm:$0xff]  ;;  %v288_v44 = vld [vmem:[%s2786_s19 + $0x228] sm:$0xff]  ;;  %v379_v47 = vpack.c.bf16 %v285_v42, %v283_v41  ;;  %v223_v50 = vld [vmem:[%s2786_s19 + $0x20] sm:$0xff] }
  0x1d   : > { %v290_v45 = vld [vmem:[%s2786_s19 + $0x238] sm:$0xff]  ;;  %v350_v48 = vpack.c.bf16 %v226_v43, %v224_v40  ;;  %v225_v51 = vld [vmem:[%s2786_s19 + $0x30] sm:$0xff]  ;;  %v228_v52 = vld [vmem:[%s2786_s19 + $0x48] sm:$0xff] }
  0x1e   : > { %v382_v49 = vpack.c.bf16 %v290_v45, %v288_v44  ;;  %v287_v53 = vld [vmem:[%s2786_s19 + $0x220] sm:$0xff]  ;;  %v289_v54 = vld [vmem:[%s2786_s19 + $0x230] sm:$0xff]  ;;  %v230_v55 = vld [vmem:[%s2786_s19 + $0x58] sm:$0xff]  ;;  %v349_v58 = vpack.c.bf16 %v225_v51, %v223_v50 }
  0x1f   : > { %624 = vmatpush1.bf16.msra.mxu0 %v2668_v9  ;;  %2633 = vmatpush1.bf16.msra.mxu1 %v2668_v9  ;;  %v292_v56 = vld [vmem:[%s2786_s19 + $0x248] sm:$0xff]  ;;  %v294_v57 = vld [vmem:[%s2786_s19 + $0x258] sm:$0xff]  ;;  %v381_v59 = vpack.c.bf16 %v289_v54, %v287_v53  ;;  %v352_v60 = vpack.c.bf16 %v230_v55, %v228_v52  ;;  %v227_v62 = vld [vmem:[%s2786_s19 + $0x40] sm:$0xff] }
  0x20   : > { %625 = vmatprep.subr.bf16.mxu0 %v2669_v10  ;;  %2618 = vmatprep.subr.bf16.mxu1 %v2669_v10  ;;  %v384_v61 = vpack.c.bf16 %v294_v57, %v292_v56  ;;  %v229_v63 = vld [vmem:[%s2786_s19 + $0x50] sm:$0xff]  ;;  %v232_v0 = vld [vmem:[%s2786_s19 + $0x68] sm:$0xff]  ;;  %v291_v1 = vld [vmem:[%s2786_s19 + $0x240] sm:$0xff] }
  0x21   : > { %v293_v2 = vld [vmem:[%s2786_s19 + $0x250] sm:$0xff]  ;;  %v234_v3 = vld [vmem:[%s2786_s19 + $0x78] sm:$0xff]  ;;  %v296_v4 = vld [vmem:[%s2786_s19 + $0x268] sm:$0xff]  ;;  %v351_v6 = vpack.c.bf16 %v229_v63, %v227_v62 }
  0x22   : > { %v298_v5 = vld [vmem:[%s2786_s19 + $0x278] sm:$0xff]  ;;  %v383_v7 = vpack.c.bf16 %v293_v2, %v291_v1  ;;  %v354_v8 = vpack.c.bf16 %v234_v3, %v232_v0  ;;  %v231_v10 = vld [vmem:[%s2786_s19 + $0x60] sm:$0xff]  ;;  %v297_v14 = vld [vmem:[%s2786_s19 + $0x270] sm:$0xff] }
  0x23   : > { %626 = vmatpush1.bf16.msra.mxu0 %v2671_v11  ;;  %2634 = vmatpush1.bf16.msra.mxu1 %v2671_v11  ;;  %v386_v9 = vpack.c.bf16 %v298_v5, %v296_v4  ;;  %v233_v11 = vld [vmem:[%s2786_s19 + $0x70] sm:$0xff]  ;;  %v295_v13 = vld [vmem:[%s2786_s19 + $0x260] sm:$0xff]  ;;  %v238_v15 = vld [vmem:[%s2786_s19 + $0x98] sm:$0xff] }
  0x24   : > { %627 = vmatprep.subr.bf16.mxu0 %v2672_v12  ;;  %2619 = vmatprep.subr.bf16.mxu1 %v2672_v12  ;;  %v236_v12 = vld [vmem:[%s2786_s19 + $0x88] sm:$0xff]  ;;  %v235_v22 = vld [vmem:[%s2786_s19 + $0x80] sm:$0xff]  ;;  %v237_v23 = vld [vmem:[%s2786_s19 + $0x90] sm:$0xff] }
  0x25   : > { %v240_v24 = vld [vmem:[%s2786_s19 + $0xa8] sm:$0xff]  ;;  %v305_v38 = vld [vmem:[%s2786_s19 + $0x2b0] sm:$0xff]  ;;  %v246_v39 = vld [vmem:[%s2786_s19 + $0xd8] sm:$0xff] }
  0x26   : > { %v308_v40 = vld [vmem:[%s2786_s19 + $0x2c8] sm:$0xff]  ;;  %v310_v41 = vld [vmem:[%s2786_s19 + $0x2d8] sm:$0xff]  ;;  %v309_v50 = vld [vmem:[%s2786_s19 + $0x2d0] sm:$0xff] }
  0x27   : > { %628 = vmatpush1.bf16.msra.mxu0 %v2674_v16  ;;  %2635 = vmatpush1.bf16.msra.mxu1 %v2674_v16  ;;  %v300_v16 = vld [vmem:[%s2786_s19 + $0x288] sm:$0xff]  ;;  %v392_v45 = vpack.c.bf16 %v310_v41, %v308_v40  ;;  %v250_v51 = vld [vmem:[%s2786_s19 + $0xf8] sm:$0xff]  ;;  %v313_v62 = vld [vmem:[%s2786_s19 + $0x2f0] sm:$0xff] }
  0x28   : > { %629 = vmatprep.subr.bf16.mxu0 %v2675_v17  ;;  %2620 = vmatprep.subr.bf16.mxu1 %v2675_v17  ;;  %v302_v17 = vld [vmem:[%s2786_s19 + $0x298] sm:$0xff]  ;;  %v312_v52 = vld [vmem:[%s2786_s19 + $0x2e8] sm:$0xff] }
  0x29   : > { %v314_v53 = vld [vmem:[%s2786_s19 + $0x2f8] sm:$0xff]  ;;  %v316_v0 = vld [vmem:[%s2786_s19 + $0x308] sm:$0xff] }
  0x2a   : > { %v394_v57 = vpack.c.bf16 %v314_v53, %v312_v52  ;;  %v254_v63 = vld [vmem:[%s2786_s19 + $0x118] sm:$0xff] }
  0x2b   : > { %630 = vmatpush1.bf16.msra.mxu0 %v2677_v18  ;;  %2636 = vmatpush1.bf16.msra.mxu1 %v2677_v18  ;;  %v353_v18 = vpack.c.bf16 %v233_v11, %v231_v10  ;;  %v318_v1 = vld [vmem:[%s2786_s19 + $0x318] sm:$0xff]  ;;  %v317_v10 = vld [vmem:[%s2786_s19 + $0x310] sm:$0xff] }
  0x2c   : > { %631 = vmatprep.subr.bf16.mxu0 %v2678_v19  ;;  %2621 = vmatprep.subr.bf16.mxu1 %v2678_v19  ;;  %v385_v19 = vpack.c.bf16 %v297_v14, %v295_v13  ;;  %v396_v5 = vpack.c.bf16 %v318_v1, %v316_v0  ;;  %v258_v11 = vld [vmem:[%s2786_s19 + $0x138] sm:$0xff] }
  0x2d   : > { %v322_v13 = vld [vmem:[%s2786_s19 + $0x338] sm:$0xff] }
  0x2f   : > { %632 = vmatpush1.bf16.msra.mxu0 %v2680_v20  ;;  %2637 = vmatpush1.bf16.msra.mxu1 %v2680_v20  ;;  %v356_v20 = vpack.c.bf16 %v238_v15, %v236_v12  ;;  %v320_v12 = vld [vmem:[%s2786_s19 + $0x328] sm:$0xff] }
  0x30   : > { %633 = vmatprep.subr.bf16.mxu0 %v2681_v21  ;;  %2622 = vmatprep.subr.bf16.mxu1 %v2681_v21  ;;  %v388_v21 = vpack.c.bf16 %v302_v17, %v300_v16  ;;  %v398_v17 = vpack.c.bf16 %v322_v13, %v320_v12 }
  0x33   : > { %634 = vmatpush1.bf16.msra.mxu0 %v2683_v25  ;;  %2638 = vmatpush1.bf16.msra.mxu1 %v2683_v25  ;;  %v299_v25 = vld [vmem:[%s2786_s19 + $0x280] sm:$0xff] }
  0x34   : > { %635 = vmatprep.subr.bf16.mxu0 %v2684_v26  ;;  %2623 = vmatprep.subr.bf16.mxu1 %v2684_v26  ;;  %v301_v26 = vld [vmem:[%s2786_s19 + $0x290] sm:$0xff] }
  0x37   : > { %636 = vmatpush1.bf16.msra.mxu0 %v2686_v27  ;;  %2639 = vmatpush1.bf16.msra.mxu1 %v2686_v27  ;;  %v242_v27 = vld [vmem:[%s2786_s19 + $0xb8] sm:$0xff] }
  0x38   : > { %637 = vmatprep.subr.bf16.mxu0 %v2687_v28  ;;  %2624 = vmatprep.subr.bf16.mxu1 %v2687_v28  ;;  %v304_v28 = vld [vmem:[%s2786_s19 + $0x2a8] sm:$0xff] }
  0x3b   : > { %638 = vmatpush1.bf16.msra.mxu0 %v2689_v29  ;;  %2640 = vmatpush1.bf16.msra.mxu1 %v2689_v29  ;;  %v306_v29 = vld [vmem:[%s2786_s19 + $0x2b8] sm:$0xff] }
  0x3c   : > { %639 = vmatprep.subr.bf16.mxu0 %v2690_v30  ;;  %2625 = vmatprep.subr.bf16.mxu1 %v2690_v30  ;;  %v355_v30 = vpack.c.bf16 %v237_v23, %v235_v22  ;;  %v321_v22 = vld [vmem:[%s2786_s19 + $0x330] sm:$0xff]  ;;  %v262_v23 = vld [vmem:[%s2786_s19 + $0x158] sm:$0xff] }
  0x3f   : > { %640 = vmatpush1.bf16.msra.mxu0 %v2692_v31  ;;  %2641 = vmatpush1.bf16.msra.mxu1 %v2692_v31  ;;  %v387_v31 = vpack.c.bf16 %v301_v26, %v299_v25  ;;  %v326_v25 = vld [vmem:[%s2786_s19 + $0x358] sm:$0xff] }
  0x40   : > { %641 = vmatprep.subr.bf16.mxu0 %v2693_v32  ;;  %2626 = vmatprep.subr.bf16.mxu1 %v2693_v32  ;;  %v358_v32 = vpack.c.bf16 %v242_v27, %v240_v24  ;;  %v324_v24 = vld [vmem:[%s2786_s19 + $0x348] sm:$0xff] }
  0x43   : > { %642 = vmatpush1.bf16.msra.mxu0 %v2695_v33  ;;  %2642 = vmatpush1.bf16.msra.mxu1 %v2695_v33  ;;  %v390_v33 = vpack.c.bf16 %v306_v29, %v304_v28  ;;  %v400_v29 = vpack.c.bf16 %v326_v25, %v324_v24 }
  0x44   : > { %643 = vmatprep.subr.bf16.mxu0 %v2696_v34  ;;  %2627 = vmatprep.subr.bf16.mxu1 %v2696_v34  ;;  %v239_v34 = vld [vmem:[%s2786_s19 + $0xa0] sm:$0xff] }
  0x47   : > { %644 = vmatpush1.bf16.msra.mxu0 %v2698_v35  ;;  %2643 = vmatpush1.bf16.msra.mxu1 %v2698_v35  ;;  %v241_v35 = vld [vmem:[%s2786_s19 + $0xb0] sm:$0xff] }
  0x48   : > { %645 = vmatprep.subr.bf16.mxu0 %v2699_v36  ;;  %2628 = vmatprep.subr.bf16.mxu1 %v2699_v36  ;;  %v244_v36 = vld [vmem:[%s2786_s19 + $0xc8] sm:$0xff]  ;;  %v357_v42 = vpack.c.bf16 %v241_v35, %v239_v34  ;;  %v325_v34 = vld [vmem:[%s2786_s19 + $0x350] sm:$0xff]  ;;  %v266_v35 = vld [vmem:[%s2786_s19 + $0x178] sm:$0xff] }
  0x49   : > { %v360_v44 = vpack.c.bf16 %v246_v39, %v244_v36  ;;  %v328_v36 = vld [vmem:[%s2786_s19 + $0x368] sm:$0xff] }
  0x4b   : > { %646 = vmatpush1.bf16.msra.mxu0 %v2701_v37  ;;  %2644 = vmatpush1.bf16.msra.mxu1 %v2701_v37  ;;  %v303_v37 = vld [vmem:[%s2786_s19 + $0x2a0] sm:$0xff] }
  0x4c   : > { %v389_v43 = vpack.c.bf16 %v305_v38, %v303_v37  ;;  %v330_v37 = vld [vmem:[%s2786_s19 + $0x378] sm:$0xff] }
  0x4d   : > { %v402_v41 = vpack.c.bf16 %v330_v37, %v328_v36 }
  0x4e   : > { %648 = vmatmul.mubr.bf16.vlgmr.msra.gmra.mrb[0].mxu0 %v347_v46  ;;  %808 = vmatmul.mubr.bf16.vlgmr.msra.gmra.mrb[0].mxu1 %v379_v47  ;;  %v243_v46 = vld [vmem:[%s2786_s19 + $0xc0] sm:$0xff]  ;;  %v245_v47 = vld [vmem:[%s2786_s19 + $0xd0] sm:$0xff] }
  0x4f   : > { %657 = vmatprep.mubr.bf16.mxu0 %v350_v48  ;;  %817 = vmatprep.mubr.bf16.mxu1 %v382_v49  ;;  %v248_v48 = vld [vmem:[%s2786_s19 + $0xe8] sm:$0xff]  ;;  %v307_v49 = vld [vmem:[%s2786_s19 + $0x2c0] sm:$0xff]  ;;  %v359_v54 = vpack.c.bf16 %v245_v47, %v243_v46  ;;  %v329_v46 = vld [vmem:[%s2786_s19 + $0x370] sm:$0xff] }
  0x50   : > { %v391_v55 = vpack.c.bf16 %v309_v50, %v307_v49  ;;  %v362_v56 = vpack.c.bf16 %v250_v51, %v248_v48  ;;  %v270_v47 = vld [vmem:[%s2786_s19 + $0x198] sm:$0xff]  ;;  %v332_v48 = vld [vmem:[%s2786_s19 + $0x388] sm:$0xff] }
  0x51   : > { %v334_v49 = vld [vmem:[%s2786_s19 + $0x398] sm:$0xff] }
  0x52   : > { %v404_v53 = vpack.c.bf16 %v334_v49, %v332_v48 }
  0x56   : > { %658 = vmatmul.mubr.bf16.gmra.mrb[4].mxu0 %v349_v58  ;;  %818 = vmatmul.mubr.bf16.gmra.mrb[4].mxu1 %v381_v59  ;;  %v247_v58 = vld [vmem:[%s2786_s19 + $0xe0] sm:$0xff]  ;;  %v249_v59 = vld [vmem:[%s2786_s19 + $0xf0] sm:$0xff] }
  0x57   : > { %667 = vmatprep.mubr.bf16.mxu0 %v352_v60  ;;  %827 = vmatprep.mubr.bf16.mxu1 %v384_v61  ;;  %v252_v60 = vld [vmem:[%s2786_s19 + $0x108] sm:$0xff]  ;;  %v311_v61 = vld [vmem:[%s2786_s19 + $0x2e0] sm:$0xff]  ;;  %v361_v2 = vpack.c.bf16 %v249_v59, %v247_v58  ;;  %v333_v58 = vld [vmem:[%s2786_s19 + $0x390] sm:$0xff] }
  0x58   : > { %v393_v3 = vpack.c.bf16 %v313_v62, %v311_v61  ;;  %v364_v4 = vpack.c.bf16 %v254_v63, %v252_v60  ;;  %v274_v59 = vld [vmem:[%s2786_s19 + $0x1b8] sm:$0xff]  ;;  %v336_v60 = vld [vmem:[%s2786_s19 + $0x3a8] sm:$0xff] }
  0x59   : > { %v338_v61 = vld [vmem:[%s2786_s19 + $0x3b8] sm:$0xff] }
  0x5a   : > { %v406_v1 = vpack.c.bf16 %v338_v61, %v336_v60 }
  0x5e   : > { %668 = vmatmul.mubr.bf16.gmra.mrb[8].mxu0 %v351_v6  ;;  %828 = vmatmul.mubr.bf16.gmra.mrb[8].mxu1 %v383_v7  ;;  %v251_v6 = vld [vmem:[%s2786_s19 + $0x100] sm:$0xff]  ;;  %v253_v7 = vld [vmem:[%s2786_s19 + $0x110] sm:$0xff] }
  0x5f   : > { %677 = vmatprep.mubr.bf16.mxu0 %v354_v8  ;;  %837 = vmatprep.mubr.bf16.mxu1 %v386_v9  ;;  %v256_v8 = vld [vmem:[%s2786_s19 + $0x128] sm:$0xff]  ;;  %v315_v9 = vld [vmem:[%s2786_s19 + $0x300] sm:$0xff]  ;;  %v363_v14 = vpack.c.bf16 %v253_v7, %v251_v6  ;;  %v337_v6 = vld [vmem:[%s2786_s19 + $0x3b0] sm:$0xff] }
  0x60   : > { %v395_v15 = vpack.c.bf16 %v317_v10, %v315_v9  ;;  %v366_v16 = vpack.c.bf16 %v258_v11, %v256_v8  ;;  %v278_v7 = vld [vmem:[%s2786_s19 + $0x1d8] sm:$0xff]  ;;  %v340_v8 = vld [vmem:[%s2786_s19 + $0x3c8] sm:$0xff] }
  0x61   : > { %v342_v9 = vld [vmem:[%s2786_s19 + $0x3d8] sm:$0xff] }
  0x62   : > { %v408_v13 = vpack.c.bf16 %v342_v9, %v340_v8 }
  0x66   : > { %678 = vmatmul.mubr.bf16.gmra.mrb[12].mxu0 %v353_v18  ;;  %838 = vmatmul.mubr.bf16.gmra.mrb[12].mxu1 %v385_v19  ;;  %v255_v18 = vld [vmem:[%s2786_s19 + $0x120] sm:$0xff]  ;;  %v257_v19 = vld [vmem:[%s2786_s19 + $0x130] sm:$0xff] }
  0x67   : > { %687 = vmatprep.mubr.bf16.mxu0 %v356_v20  ;;  %847 = vmatprep.mubr.bf16.mxu1 %v388_v21  ;;  %v260_v20 = vld [vmem:[%s2786_s19 + $0x148] sm:$0xff]  ;;  %v319_v21 = vld [vmem:[%s2786_s19 + $0x320] sm:$0xff]  ;;  %v365_v26 = vpack.c.bf16 %v257_v19, %v255_v18  ;;  %v341_v18 = vld [vmem:[%s2786_s19 + $0x3d0] sm:$0xff] }
  0x68   : > { %v397_v27 = vpack.c.bf16 %v321_v22, %v319_v21  ;;  %v368_v28 = vpack.c.bf16 %v262_v23, %v260_v20  ;;  %v282_v19 = vld [vmem:[%s2786_s19 + $0x1f8] sm:$0xff]  ;;  %v344_v20 = vld [vmem:[%s2786_s19 + $0x3e8] sm:$0xff] }
  0x69   : > { %v346_v21 = vld [vmem:[%s2786_s19 + $0x3f8] sm:$0xff] }
  0x6a   : > { %v410_v25 = vpack.c.bf16 %v346_v21, %v344_v20 }
  0x6e   : > { %688 = vmatmul.mubr.bf16.gmra.mrb[16].mxu0 %v355_v30  ;;  %848 = vmatmul.mubr.bf16.gmra.mrb[16].mxu1 %v387_v31  ;;  %v259_v30 = vld [vmem:[%s2786_s19 + $0x140] sm:$0xff]  ;;  %v261_v31 = vld [vmem:[%s2786_s19 + $0x150] sm:$0xff] }
  0x6f   : > { %697 = vmatprep.mubr.bf16.mxu0 %v358_v32  ;;  %857 = vmatprep.mubr.bf16.mxu1 %v390_v33  ;;  %v264_v32 = vld [vmem:[%s2786_s19 + $0x168] sm:$0xff]  ;;  %v323_v33 = vld [vmem:[%s2786_s19 + $0x340] sm:$0xff]  ;;  %v367_v38 = vpack.c.bf16 %v261_v31, %v259_v30 }
  0x70   : > { %v399_v39 = vpack.c.bf16 %v325_v34, %v323_v33  ;;  %v370_v40 = vpack.c.bf16 %v266_v35, %v264_v32  ;;  %v445_v32 = vlaneseq  ;;  %v2982_v34 = vstv %s2479_s17 }
  0x71   : > { %4391 = vst [vmem:[#allocation2_spill] sm:$0xff] %v2982_v34 }
  0x72   : > { %v2980_v33 = vshrl.u32 %v445_v32, 7 }
  0x74   : > { %v1419_v35 = vadd.s32 8, %v2980_v33  ;;  %v447_v36 = vsub.s32 0, %v2980_v33  ;;  %v1483_v37 = vadd.s32 %v2982_v34, %v2980_v33  ;;  %v451_v48 = vsub.s32 1, %v2980_v33 }
  0x75   : > { %v1430_v60 = vadd.s32 96, %v2980_v33  ;;  %v1431_v61 = vadd.s32 104, %v2980_v33  ;;  %v1433_v8 = vadd.s32 120, %v2980_v33  ;;  %v1434_v21 = vadd.s32 128, %v2980_v33 }
  0x76   : > { %698 = vmatmul.mubr.bf16.gmra.mrb[20].mxu0 %v357_v42  ;;  %858 = vmatmul.mubr.bf16.gmra.mrb[20].mxu1 %v389_v43  ;;  %v263_v42 = vld [vmem:[%s2786_s19 + $0x160] sm:$0xff]  ;;  %v265_v43 = vld [vmem:[%s2786_s19 + $0x170] sm:$0xff]  ;;  %vm1547_vm0 = vcmp.lt.s32.totalorder %v1483_v37, 1024 }
  0x77   : > { %707 = vmatprep.mubr.bf16.mxu0 %v360_v44  ;;  %867 = vmatprep.mubr.bf16.mxu1 %v392_v45  ;;  %v268_v44 = vld [vmem:[%s2786_s19 + $0x188] sm:$0xff]  ;;  %v327_v45 = vld [vmem:[%s2786_s19 + $0x360] sm:$0xff]  ;;  %v369_v50 = vpack.c.bf16 %v265_v43, %v263_v42  ;;  %v1422_v42 = vadd.s32 32, %v2980_v33  ;;  %v1423_v43 = vadd.s32 40, %v2980_v33 }
  0x78   : > { %v401_v51 = vpack.c.bf16 %v329_v46, %v327_v45  ;;  %v372_v52 = vpack.c.bf16 %v270_v47, %v268_v44  ;;  %v1424_v44 = vadd.s32 48, %v2980_v33  ;;  %v1425_v45 = vadd.s32 56, %v2980_v33 }
  0x79   : > { %v1426_v46 = vadd.s32 64, %v2980_v33 }
  0x7e   : > { %708 = vmatmul.mubr.bf16.gmra.mrb[24].mxu0 %v359_v54  ;;  %868 = vmatmul.mubr.bf16.gmra.mrb[24].mxu1 %v391_v55  ;;  %v267_v54 = vld [vmem:[%s2786_s19 + $0x180] sm:$0xff]  ;;  %v269_v55 = vld [vmem:[%s2786_s19 + $0x190] sm:$0xff] }
  0x7f   : > { %717 = vmatprep.mubr.bf16.mxu0 %v362_v56  ;;  %877 = vmatprep.mubr.bf16.mxu1 %v394_v57  ;;  %v272_v56 = vld [vmem:[%s2786_s19 + $0x1a8] sm:$0xff]  ;;  %v331_v57 = vld [vmem:[%s2786_s19 + $0x380] sm:$0xff]  ;;  %v371_v62 = vpack.c.bf16 %v269_v55, %v267_v54  ;;  %v1490_v54 = vadd.s32 %v2982_v34, %v1425_v45  ;;  %v1491_v55 = vadd.s32 %v2982_v34, %v1426_v46  ;;  %v1439_v45 = vadd.s32 168, %v2980_v33 }
  0x80   : > { %v403_v63 = vpack.c.bf16 %v333_v58, %v331_v57  ;;  %v374_v0 = vpack.c.bf16 %v274_v59, %v272_v56  ;;  %v1427_v56 = vadd.s32 72, %v2980_v33  ;;  %v1428_v57 = vadd.s32 80, %v2980_v33 }
  0x81   : > { %v1429_v58 = vadd.s32 88, %v2980_v33  ;;  %vm1554_vm7 = vcmp.lt.s32.totalorder %v1490_v54, 1024  ;;  %vm1555_vm8 = vcmp.lt.s32.totalorder %v1491_v55, 1024  ;;  %v1504_v55 = vadd.s32 %v2982_v34, %v1439_v45 }
  0x82   : > { %v1447_v45 = vadd.s32 232, %v2980_v33 }
  0x86   : > { %718 = vmatmul.mubr.bf16.gmra.mrb[28].mxu0 %v361_v2  ;;  %878 = vmatmul.mubr.bf16.gmra.mrb[28].mxu1 %v393_v3  ;;  %v271_v2 = vld [vmem:[%s2786_s19 + $0x1a0] sm:$0xff]  ;;  %v273_v3 = vld [vmem:[%s2786_s19 + $0x1b0] sm:$0xff] }
  0x87   : > { %727 = vmatprep.mubr.bf16.mxu0 %v364_v4  ;;  %887 = vmatprep.mubr.bf16.mxu1 %v396_v5  ;;  %v276_v4 = vld [vmem:[%s2786_s19 + $0x1c8] sm:$0xff]  ;;  %v335_v5 = vld [vmem:[%s2786_s19 + $0x3a0] sm:$0xff]  ;;  %v373_v10 = vpack.c.bf16 %v273_v3, %v271_v2  ;;  %v1492_v2 = vadd.s32 %v2982_v34, %v1427_v56  ;;  %v1493_v3 = vadd.s32 %v2982_v34, %v1428_v57 }
  0x88   : > { %v405_v11 = vpack.c.bf16 %v337_v6, %v335_v5  ;;  %v376_v12 = vpack.c.bf16 %v278_v7, %v276_v4  ;;  %v1494_v4 = vadd.s32 %v2982_v34, %v1429_v58  ;;  %v1495_v5 = vadd.s32 %v2982_v34, %v1430_v60 }
  0x89   : > { %v1496_v6 = vadd.s32 %v2982_v34, %v1431_v61  ;;  %vm1556_vm9 = vcmp.lt.s32.totalorder %v1492_v2, 1024  ;;  %vm1557_vm10 = vcmp.lt.s32.totalorder %v1493_v3, 1024  ;;  %v1441_v58 = vadd.s32 184, %v2980_v33 }
  0x8a   : > { %vm1558_vm11 = vcmp.lt.s32.totalorder %v1494_v4, 1024  ;;  %vm1559_vm12 = vcmp.lt.s32.totalorder %v1495_v5, 1024  ;;  %v1458_v60 = vadd.s32 320, %v2980_v33  ;;  %v1459_v3 = vadd.s32 328, %v2980_v33 }
  0x8b   : > { %vm1560_vm13 = vcmp.lt.s32.totalorder %v1496_v6, 1024 }
  0x8e   : > { %728 = vmatmul.mubr.bf16.gmra.mrb[32].mxu0 %v363_v14  ;;  %888 = vmatmul.mubr.bf16.gmra.mrb[32].mxu1 %v395_v15  ;;  %v275_v14 = vld [vmem:[%s2786_s19 + $0x1c0] sm:$0xff]  ;;  %v277_v15 = vld [vmem:[%s2786_s19 + $0x1d0] sm:$0xff] }
  0x8f   : > { %737 = vmatprep.mubr.bf16.mxu0 %v366_v16  ;;  %897 = vmatprep.mubr.bf16.mxu1 %v398_v17  ;;  %v280_v16 = vld [vmem:[%s2786_s19 + $0x1e8] sm:$0xff]  ;;  %v339_v17 = vld [vmem:[%s2786_s19 + $0x3c0] sm:$0xff]  ;;  %v375_v22 = vpack.c.bf16 %v277_v15, %v275_v14 }
  0x90   : > { %v407_v23 = vpack.c.bf16 %v341_v18, %v339_v17  ;;  %v378_v24 = vpack.c.bf16 %v282_v19, %v280_v16  ;;  %v1498_v18 = vadd.s32 %v2982_v34, %v1433_v8 }
  0x92   : > { %vm1562_vm15 = vcmp.lt.s32.totalorder %v1498_v18, 1024  ;;  %v1524_v18 = vadd.s32 %v2982_v34, %v1459_v3 }
  0x96   : > { %738 = vmatmul.mubr.bf16.gmra.mrb[36].mxu0 %v365_v26  ;;  %898 = vmatmul.mubr.bf16.gmra.mrb[36].mxu1 %v397_v27  ;;  %v279_v26 = vld [vmem:[%s2786_s19 + $0x1e0] sm:$0xff]  ;;  %v281_v27 = vld [vmem:[%s2786_s19 + $0x1f0] sm:$0xff] }
  0x97   : > { %747 = vmatprep.mubr.bf16.mxu0 %v368_v28  ;;  %907 = vmatprep.mubr.bf16.mxu1 %v400_v29  ;;  %v343_v28 = vld [vmem:[%s2786_s19 + $0x3e0] sm:$0xff]  ;;  %v345_v29 = vld [vmem:[%s2786_s19 + $0x3f0] sm:$0xff]  ;;  %v377_v30 = vpack.c.bf16 %v281_v27, %v279_v26  ;;  %v1437_v26 = vadd.s32 152, %v2980_v33  ;;  %s2547_s19 = sshll.u32 %s4574_s27, 3 }
  0x98   : > { %v409_v31 = vpack.c.bf16 %v345_v29, %v343_v28  ;;  %s3271_s22 = scalar_lea.vmem %s4341_s3, %s2547_s19 }
  0x9e   : > { %748 = vmatmul.mubr.bf16.gmra.mrb[40].mxu0 %v367_v38  ;;  %908 = vmatmul.mubr.bf16.gmra.mrb[40].mxu1 %v399_v39  ;;  %v443_v38 = vld [vmem:[%s4340_s2] sm:$0x3]  ;;  %v1484_v39 = vadd.s32 %v2982_v34, %v1419_v35 }
  0x9f   : > { %757 = vmatprep.mubr.bf16.mxu0 %v370_v40  ;;  %917 = vmatprep.mubr.bf16.mxu1 %v402_v41  ;;  %v1420_v40 = vadd.s32 16, %v2980_v33  ;;  %v1421_v41 = vadd.s32 24, %v2980_v33  ;;  %v2999_v47 = vrot.slane %v443_v38, %v447_v36  ;;  %v3012_v59 = vrot.slane %v443_v38, %v451_v48 }
  0xa0   : > { %vm1548_vm1 = vcmp.lt.s32.totalorder %v1484_v39, 1024  ;;  %v1499_v36 = vadd.s32 %v2982_v34, %v1434_v21 }
  0xa1   : > { %v1485_v49 = vadd.s32 %v2982_v34, %v1420_v40 }
  0xa3   : > { %vm1549_vm2 = vcmp.lt.s32.totalorder %v1485_v49, 1024  ;;  %v1456_v49 = vadd.s32 304, %v2980_v33 }
  0xa5   : > { %v1521_v56 = vadd.s32 %v2982_v34, %v1456_v49 }
  0xa6   : > { %758 = vmatmul.mubr.bf16.gmra.mrb[44].mxu0 %v369_v50  ;;  %918 = vmatmul.mubr.bf16.gmra.mrb[44].mxu1 %v401_v51  ;;  %v1486_v50 = vadd.s32 %v2982_v34, %v1421_v41  ;;  %v1487_v51 = vadd.s32 %v2982_v34, %v1422_v42  ;;  %v1502_v41 = vadd.s32 %v2982_v34, %v1437_v26  ;;  %v1461_v26 = vadd.s32 344, %v2980_v33 }
  0xa7   : > { %767 = vmatprep.mubr.bf16.mxu0 %v372_v52  ;;  %927 = vmatprep.mubr.bf16.mxu1 %v404_v53  ;;  %v1488_v52 = vadd.s32 %v2982_v34, %v1423_v43  ;;  %v1489_v53 = vadd.s32 %v2982_v34, %v1424_v44  ;;  %v1455_v43 = vadd.s32 296, %v2980_v33  ;;  %v1438_v44 = vadd.s32 160, %v2980_v33 }
  0xa8   : > { %vm1550_vm3 = vcmp.lt.s32.totalorder %v1486_v50, 1024  ;;  %vm1551_vm4 = vcmp.lt.s32.totalorder %v1487_v51, 1024  ;;  %v1457_v50 = vadd.s32 312, %v2980_v33  ;;  %v1526_v49 = vadd.s32 %v2982_v34, %v1461_v26 }
  0xa9   : > { %vm1552_vm5 = vcmp.lt.s32.totalorder %v1488_v52, 1024  ;;  %vm1553_vm6 = vcmp.lt.s32.totalorder %v1489_v53, 1024  ;;  %v1440_v52 = vadd.s32 176, %v2980_v33  ;;  %v1520_v53 = vadd.s32 %v2982_v34, %v1455_v43 }
  0xaa   : > { %v1503_v54 = vadd.s32 %v2982_v34, %v1438_v44  ;;  %v1522_v57 = vadd.s32 %v2982_v34, %v1457_v50  ;;  %v1463_v43 = vadd.s32 360, %v2980_v33  ;;  %v1446_v44 = vadd.s32 224, %v2980_v33 }
  0xab   : > { %v1505_v2 = vadd.s32 %v2982_v34, %v1440_v52 }
  0xac   : > { %v1511_v3 = vadd.s32 %v2982_v34, %v1446_v44 }
  0xae   : > { %768 = vmatmul.mubr.bf16.gmra.mrb[48].mxu0 %v371_v62  ;;  %928 = vmatmul.mubr.bf16.gmra.mrb[48].mxu1 %v403_v63  ;;  %v1432_v62 = vadd.s32 112, %v2980_v33  ;;  %v4346_v63 = vmov 0.0  }
  0xaf   : > { %777 = vmatprep.mubr.bf16.mxu0 %v374_v0  ;;  %937 = vmatprep.mubr.bf16.mxu1 %v406_v1  ;;  %v3019_v0 = vsel %vm1547_vm0, 1.0, %v4346_v63  ;;  %v3023_v1 = vsel %vm1548_vm1, 1.0, %v4346_v63  ;;  %v3033_v9 = vsel %vm1549_vm2, 1.0, %v4346_v63  ;;  %v3046_v14 = vsel %vm1552_vm5, 1.0, %v4346_v63 }
  0xb0   : > { %v1497_v7 = vadd.s32 %v2982_v34, %v1432_v62  ;;  %v3050_v15 = vsel %vm1553_vm6, 1.0, %v4346_v63  ;;  %v3054_v16 = vsel %vm1554_vm7, 1.0, %v4346_v63  ;;  %v3058_v17 = vsel %vm1555_vm8, 1.0, %v4346_v63 }
  0xb1   : > { %v3070_v27 = vsel %vm1556_vm9, 1.0, %v4346_v63  ;;  %v3073_v28 = vsel %vm1557_vm10, 1.0, %v4346_v63  ;;  %v3076_v29 = vsel %vm1558_vm11, 1.0, %v4346_v63  ;;  %v3085_v32 = vsel %vm1560_vm13, 1.0, %v4346_v63 }
  0xb2   : > { %vm1561_vm14 = vcmp.lt.s32.totalorder %v1497_v7, 1024  ;;  %v3102_v46 = vsel %vm1562_vm15, 1.0, %v4346_v63  ;;  %vm1563_vm2 = vcmp.lt.s32.totalorder %v1499_v36, 1024  ;;  %vm1566_vm7 = vcmp.lt.s32.totalorder %v1502_v41, 1024 }
  0xb3   : > { %v3089_v35 = vsel %vm1561_vm14, 1.0, %v4346_v63  ;;  %v3121_v61 = vsel %vm1563_vm2, 1.0, %v4346_v63  ;;  %v3142_v7 = vsel %vm1566_vm7, 1.0, %v4346_v63  ;;  %vm1584_vm9 = vcmp.lt.s32.totalorder %v1520_v53, 1024 }
  0xb4   : > { %4392 = vst [vmem:[#allocation3_spill] sm:$0xff] %v3142_v7  ;;  %vm1567_vm10 = vcmp.lt.s32.totalorder %v1503_v54, 1024  ;;  %vm1568_vm11 = vcmp.lt.s32.totalorder %v1504_v55, 1024  ;;  %vm1586_vm13 = vcmp.lt.s32.totalorder %v1522_v57, 1024  ;;  %vm1569_vm14 = vcmp.lt.s32.totalorder %v1505_v2, 1024 }
  0xb5   : > { %v3154_v21 = vsel %vm1584_vm9, 1.0, %v4346_v63  ;;  %v1445_v36 = vadd.s32 216, %v2980_v33  ;;  %v1462_v41 = vadd.s32 352, %v2980_v33  ;;  %v1464_v53 = vadd.s32 368, %v2980_v33 }
  0xb6   : > { %778 = vmatmul.mubr.bf16.gmra.mrb[52].mxu0 %v373_v10  ;;  %938 = vmatmul.mubr.bf16.gmra.mrb[52].mxu1 %v405_v11  ;;  %v3036_v10 = vsel %vm1550_vm3, 1.0, %v4346_v63  ;;  %v1450_v11 = vadd.s32 256, %v2980_v33  ;;  %v1448_v57 = vadd.s32 240, %v2980_v33  ;;  %v1528_v2 = vadd.s32 %v2982_v34, %v1463_v43 }
  0xb7   : > { %787 = vmatprep.mubr.bf16.mxu0 %v376_v12  ;;  %947 = vmatprep.mubr.bf16.mxu1 %v408_v13  ;;  %v1451_v12 = vadd.s32 264, %v2980_v33  ;;  %v3042_v13 = vsel %vm1551_vm4, 1.0, %v4346_v63  ;;  %v1510_v52 = vadd.s32 %v2982_v34, %v1445_v36 }
  0xb8   : > { %v1515_v19 = vadd.s32 %v2982_v34, %v1450_v11  ;;  %v1506_v11 = vadd.s32 %v2982_v34, %v1441_v58  ;;  %vm1592_vm9 = vcmp.lt.s32.totalorder %v1528_v2, 1024 }
  0xb9   : > { %v1516_v20 = vadd.s32 %v2982_v34, %v1451_v12  ;;  %v1523_v12 = vadd.s32 %v2982_v34, %v1458_v60  ;;  %v1527_v60 = vadd.s32 %v2982_v34, %v1462_v41  ;;  %vm1574_vm7 = vcmp.lt.s32.totalorder %v1510_v52, 1024 }
  0xba   : > { %vm1579_vm0 = vcmp.lt.s32.totalorder %v1515_v19, 1024  ;;  %v1442_v19 = vadd.s32 192, %v2980_v33  ;;  %vm1570_vm15 = vcmp.lt.s32.totalorder %v1506_v11, 1024  ;;  %v1512_v11 = vadd.s32 %v2982_v34, %v1447_v45 }
  0xbb   : > { %vm1580_vm1 = vcmp.lt.s32.totalorder %v1516_v20, 1024  ;;  %v3105_v48 = vsel %vm1579_vm0, 1.0, %v4346_v63  ;;  %v1443_v20 = vadd.s32 200, %v2980_v33  ;;  %vm1587_vm0 = vcmp.lt.s32.totalorder %v1523_v12, 1024 }
  0xbc   : > { %v3110_v51 = vsel %vm1580_vm1, 1.0, %v4346_v63  ;;  %vm1588_vm1 = vcmp.lt.s32.totalorder %v1524_v18, 1024  ;;  %v3187_v54 = vsel %vm1570_vm15, 1.0, %v4346_v63  ;;  %v3190_v55 = vsel %vm1587_vm0, 1.0, %v4346_v63 }
  0xbd   : > { %4396 = vst [vmem:[#allocation7_spill] sm:$0xff] %v3187_v54  ;;  %v3196_v58 = vsel %vm1588_vm1, 1.0, %v4346_v63  ;;  %v1529_v12 = vadd.s32 %v2982_v34, %v1464_v53 }
  0xbe   : > { %788 = vmatmul.mubr.bf16.gmra.mrb[56].mxu0 %v375_v22  ;;  %948 = vmatmul.mubr.bf16.gmra.mrb[56].mxu1 %v407_v23  ;;  %v1435_v22 = vadd.s32 136, %v2980_v33  ;;  %v1452_v23 = vadd.s32 272, %v2980_v33 }
  0xbf   : > { %797 = vmatprep.mubr.bf16.mxu0 %v378_v24  ;;  %957 = vmatprep.mubr.bf16.mxu1 %v410_v25  ;;  %v1453_v24 = vadd.s32 280, %v2980_v33  ;;  %v1436_v25 = vadd.s32 144, %v2980_v33 }
  0xc0   : > { %v1500_v37 = vadd.s32 %v2982_v34, %v1435_v22  ;;  %v1517_v38 = vadd.s32 %v2982_v34, %v1452_v23  ;;  %v3157_v22 = vsel %vm1567_vm10, 1.0, %v4346_v63  ;;  %v3160_v23 = vsel %vm1568_vm11, 1.0, %v4346_v63 }
  0xc1   : > { %v1518_v39 = vadd.s32 %v2982_v34, %v1453_v24  ;;  %v1501_v40 = vadd.s32 %v2982_v34, %v1436_v25  ;;  %4393 = vst [vmem:[#allocation4_spill] sm:$0xff] %v3157_v22  ;;  %4394 = vst [vmem:[#allocation5_spill] sm:$0xff] %v3160_v23  ;;  %v1460_v24 = vadd.s32 336, %v2980_v33  ;;  %vm1575_vm10 = vcmp.lt.s32.totalorder %v1511_v3, 1024 }
  0xc2   : > { %vm1564_vm3 = vcmp.lt.s32.totalorder %v1500_v37, 1024  ;;  %vm1581_vm4 = vcmp.lt.s32.totalorder %v1517_v38, 1024  ;;  %v3170_v37 = vsel %vm1586_vm13, 1.0, %v4346_v63  ;;  %v3173_v38 = vsel %vm1569_vm14, 1.0, %v4346_v63 }
  0xc3   : > { %vm1582_vm5 = vcmp.lt.s32.totalorder %v1518_v39, 1024  ;;  %vm1565_vm6 = vcmp.lt.s32.totalorder %v1501_v40, 1024  ;;  %v3124_v62 = vsel %vm1564_vm3, 1.0, %v4346_v63  ;;  %v3130_v4 = vsel %vm1581_vm4, 1.0, %v4346_v63  ;;  %4395 = vst [vmem:[#allocation6_spill] sm:$0xff] %v3173_v38 }
  0xc4   : > { %v3134_v5 = vsel %vm1582_vm5, 1.0, %v4346_v63  ;;  %v3138_v6 = vsel %vm1565_vm6, 1.0, %v4346_v63  ;;  %v1507_v39 = vadd.s32 %v2982_v34, %v1442_v19  ;;  %v1508_v40 = vadd.s32 %v2982_v34, %v1443_v20 }
  0xc5   : > { %vm1590_vm5 = vcmp.lt.s32.totalorder %v1526_v49, 1024  ;;  %v1513_v19 = vadd.s32 %v2982_v34, %v1448_v57  ;;  %v1449_v20 = vadd.s32 248, %v2980_v33  ;;  %vm1576_vm11 = vcmp.lt.s32.totalorder %v1512_v11, 1024 }
  0xc6   : > { %798 = vmatmul.mubr.bf16.gmra.mrb[60].mxu0 %v377_v30  ;;  %958 = vmatmul.mubr.bf16.gmra.mrb[60].mxu1 %v409_v31  ;;  %v1454_v30 = vadd.s32 288, %v2980_v33  ;;  %v3081_v31 = vsel %vm1559_vm12, 1.0, %v4346_v63  ;;  %vm1585_vm12 = vcmp.lt.s32.totalorder %v1521_v56, 1024  ;;  %v1465_v56 = vadd.s32 376, %v2980_v33 }
  0xc7   : > { %v3164_v25 = vsel %vm1585_vm12, 1.0, %v4346_v63  ;;  %vm1571_vm2 = vcmp.lt.s32.totalorder %v1507_v39, 1024  ;;  %vm1572_vm3 = vcmp.lt.s32.totalorder %v1508_v40, 1024  ;;  %v1467_v39 = vadd.s32 392, %v2980_v33 }
  0xc8   : > { %v1519_v42 = vadd.s32 %v2982_v34, %v1454_v30  ;;  %v1444_v30 = vadd.s32 208, %v2980_v33  ;;  %v1530_v18 = vadd.s32 %v2982_v34, %v1465_v56  ;;  %v3208_v26 = vsel %vm1571_vm2, 1.0, %v4346_v63 }
  0xc9   : > { %4397 = vst [vmem:[#allocation8_spill] sm:$0xff] %v3208_v26  ;;  %v3219_v40 = vsel %vm1590_vm5, 1.0, %v4346_v63  ;;  %vm1593_vm12 = vcmp.lt.s32.totalorder %v1529_v12, 1024  ;;  %vm1577_vm14 = vcmp.lt.s32.totalorder %v1513_v19, 1024  ;;  %v1514_v43 = vadd.s32 %v2982_v34, %v1449_v20 }
  0xca   : > { %vm1583_vm8 = vcmp.lt.s32.totalorder %v1519_v42, 1024  ;;  %v1525_v42 = vadd.s32 %v2982_v34, %v1460_v24  ;;  %v1509_v50 = vadd.s32 %v2982_v34, %v1444_v30  ;;  %v1466_v24 = vadd.s32 384, %v2980_v33 }
  0xcb   : > { %v3146_v8 = vsel %vm1583_vm8, 1.0, %v4346_v63  ;;  %v3211_v30 = vsel %vm1572_vm3, 1.0, %v4346_v63  ;;  %vm1591_vm8 = vcmp.lt.s32.totalorder %v1527_v60, 1024  ;;  %vm1594_vm13 = vcmp.lt.s32.totalorder %v1530_v18, 1024 }
  0xcc   : > { %vm1589_vm4 = vcmp.lt.s32.totalorder %v1525_v42, 1024  ;;  %vm1573_vm6 = vcmp.lt.s32.totalorder %v1509_v50, 1024  ;;  %4398 = vst [vmem:[#allocation9_spill] sm:$0xff] %v3211_v30  ;;  %v3227_v42 = vsel %vm1574_vm7, 1.0, %v4346_v63  ;;  %v1531_v44 = vadd.s32 %v2982_v34, %v1466_v24 }
  0xcd   : > { %v3214_v36 = vsel %vm1589_vm4, 1.0, %v4346_v63  ;;  %v3223_v41 = vsel %vm1573_vm6, 1.0, %v4346_v63  ;;  %4400 = vst [vmem:[#allocation11_spill] sm:$0xff] %v3227_v42  ;;  %v3234_v53 = vsel %vm1591_vm8, 1.0, %v4346_v63  ;;  %v3238_v50 = vsel %vm1592_vm9, 1.0, %v4346_v63 }
  0xce   : > { %4399 = vst [vmem:[#allocation10_spill] sm:$0xff] %v3223_v41  ;;  %4401 = vst [vmem:[#allocation12_spill] sm:$0xff] %v3238_v50  ;;  %v3242_v52 = vsel %vm1575_vm10, 1.0, %v4346_v63  ;;  %v3246_v56 = vsel %vm1576_vm11, 1.0, %v4346_v63  ;;  %v3252_v42 = vsel %vm1593_vm12, 1.0, %v4346_v63  ;;  %v1532_v2 = vadd.s32 %v2982_v34, %v1467_v39 }
  0xcf   : > { %4402 = vst [vmem:[#allocation13_spill] sm:$0xff] %v3242_v52  ;;  %4403 = vst [vmem:[#allocation14_spill] sm:$0xff] %v3246_v56  ;;  %vm1578_vm15 = vcmp.lt.s32.totalorder %v1514_v43, 1024  ;;  %vm1595_vm0 = vcmp.lt.s32.totalorder %v1531_v44, 1024  ;;  %v4408_v23 = vmov 0.0  }
  0xd0   : > { %4404 = vst [vmem:[#allocation15_spill] sm:$0xff] %v3252_v42  ;;  %vm1596_vm1 = vcmp.lt.s32.totalorder %v1532_v2, 1024 }
 0x121   : > { %v649_v45 = vpop.f32.mrb[0].mxu0  ;;  %v809_v49 = vpop.f32.mrb[0].mxu1 }
 0x122   : > { %v650_v57 = vadd.f32 %v649_v45, %v2999_v47  ;;  %v651_v20 = vpop.f32.mrb[1].mxu0  ;;  %v810_v24 = vadd.f32 %v809_v49, %v2999_v47  ;;  %v811_v60 = vpop.f32.mrb[1].mxu1  ;;  %v3261_v45 = vsel %vm1594_vm13, 1.0, %v4346_v63  ;;  %v3265_v49 = vsel %vm1577_vm14, 1.0, %v4346_v63 }
 0x123   : > { %v652_v3 = vadd.f32 %v651_v20, %v3012_v59  ;;  %v653_v41 = vpop.f32.mrb[2].mxu0  ;;  %v3257_v52 = vadd.f32 %v811_v60, %v3012_v59  ;;  %v813_v11 = vpop.f32.mrb[2].mxu1  ;;  %4405 = vst [vmem:[#allocation16_spill] sm:$0xff] %v3261_v45  ;;  %4406 = vst [vmem:[#allocation17_spill] sm:$0xff] %v3265_v49 }
 0x124   : > { %v1739_v12 = vmul.f32 %v3019_v0, %v650_v57  ;;  %v654_v39 = vadd.f32 %v653_v41, %v2999_v47  ;;  %v655_v20 = vpop.f32.mrb[3].mxu0  ;;  %v815_v60 = vpop.f32.mrb[3].mxu1  ;;  %v3279_v34 = vmul.f32 %v3105_v48, %v810_v24 }
 0x125   : > { %v2549_v18 = vpack.c.bf16 %v652_v3, %v650_v57  ;;  %v1740_v19 = vmul.f32 %v3019_v0, %v652_v3  ;;  %v656_v63 = vadd.f32 %v655_v20, %v3012_v59  ;;  %v2581_v49 = vpack.c.bf16 %v3257_v52, %v810_v24 }
 0x126   : > { %v2005_v56 = vmul.f32 %v1739_v12, %v650_v57  ;;  %v1741_v30 = vmul.f32 %v3023_v1, %v654_v39  ;;  %4407 = vst [vmem:[#allocation18_spill] sm:$0xff] %v3279_v34  ;;  %v814_v0 = vadd.f32 %v813_v11, %v2999_v47  ;;  %v816_v38 = vadd.f32 %v815_v60, %v3012_v59 }
 0x127   : > { %1352 = vst [vmem:[%s3271_s22] sm:$0xff] %v2549_v18  ;;  %v2006_v41 = vmul.f32 %v1740_v19, %v652_v3  ;;  %v2550_v26 = vpack.c.bf16 %v656_v63, %v654_v39  ;;  %v1742_v54 = vmul.f32 %v3023_v1, %v656_v63  ;;  %1384 = vst [vmem:[%s3271_s22 + $0x100] sm:$0xff] %v2581_v49  ;;  %v3288_v57 = vsel %vm1578_vm15, 1.0, %v4408_v23 }
 0x128   : > { %v1867_v45 = vadd.f32 %v1741_v30, %v1739_v12  ;;  %v2007_v20 = vmul.f32 %v1741_v30, %v654_v39  ;;  %4409 = vst [vmem:[#allocation19_spill] sm:$0xff] %v3288_v57  ;;  %v3293_v3 = vsel %vm1595_vm0, 1.0, %v4408_v23  ;;  %v3297_v1 = vsel %vm1596_vm1, 1.0, %v4408_v23 }
 0x129   : > { %1353 = vst [vmem:[%s3271_s22 + $0x8] sm:$0xff] %v2550_v26  ;;  %v1936_v42 = vadd.f32 %v1742_v54, %v1740_v19  ;;  %v2008_v22 = vmul.f32 %v1742_v54, %v656_v63  ;;  %v659_v50 = vpop.f32.mrb[4].mxu0  ;;  %v819_v18 = vpop.f32.mrb[4].mxu1  ;;  %4410 = vst [vmem:[#allocation20_spill] sm:$0xff] %v3293_v3  ;;  %v3301_v49 = vmul.f32 %v3279_v34, %v810_v24  ;;  %vm2271_vm0 = vcmask 1040384  }
 0x12a   : > { %4411 = vst [vmem:[#allocation21_spill] sm:$0xff] %v3297_v1  ;;  %v2133_v30 = vadd.f32 %v2007_v20, %v2005_v56  ;;  %v660_v11 = vadd.f32 %v659_v50, %v2999_v47  ;;  %v661_v43 = vpop.f32.mrb[5].mxu0  ;;  %v2582_v26 = vpack.c.bf16 %v816_v38, %v814_v0  ;;  %v821_v63 = vpop.f32.mrb[5].mxu1  ;;  %v3306_v39 = vmul.f32 %v3105_v48, %v3257_v52 }
 0x12b   : > { %4412 = vst [vmem:[#allocation22_spill] sm:$0xff] %v3301_v49  ;;  %v2202_v54 = vadd.f32 %v2008_v22, %v2006_v41  ;;  %v662_v12 = vadd.f32 %v661_v43, %v3012_v59  ;;  %v663_v44 = vpop.f32.mrb[6].mxu0  ;;  %v3309_v2 = vmul.f32 %v3110_v51, %v814_v0  ;;  %v823_v56 = vpop.f32.mrb[6].mxu1  ;;  %v3315_v22 = vadd.f32 %v819_v18, %v2999_v47 }
 0x12c   : > { %4413 = vst [vmem:[#allocation23_spill] sm:$0xff] %v3306_v39  ;;  %v1743_v50 = vmul.f32 %v3033_v9, %v660_v11  ;;  %v664_v24 = vadd.f32 %v663_v44, %v2999_v47  ;;  %v665_v60 = vpop.f32.mrb[7].mxu0  ;;  %1385 = vst [vmem:[%s3271_s22 + $0x108] sm:$0xff] %v2582_v26  ;;  %v3318_v19 = vadd.f32 %v821_v63, %v3012_v59  ;;  %v825_v41 = vpop.f32.mrb[7].mxu1  ;;  %vm2274_vm1 = vcmask 1041408  }
 0x12d   : > { %4414 = vst [vmem:[#allocation24_spill] sm:$0xff] %v3309_v2  ;;  %v2551_v48 = vpack.c.bf16 %v662_v12, %v660_v11  ;;  %v1744_v20 = vmul.f32 %v3033_v9, %v662_v12  ;;  %v666_v43 = vadd.f32 %v665_v60, %v3012_v59  ;;  %v3323_v49 = vmul.f32 %v3110_v51, %v816_v38 }
 0x12e   : > { %v1868_v44 = vadd.f32 %v1867_v45, %v1743_v50  ;;  %v2009_v34 = vmul.f32 %v1743_v50, %v660_v11  ;;  %v1745_v26 = vmul.f32 %v3036_v10, %v664_v24  ;;  %v2583_v18 = vpack.c.bf16 %v3318_v19, %v3315_v22 }
 0x12f   : > { %4415 = vst [vmem:[#allocation25_spill] sm:$0xff] %v3323_v49  ;;  %1354 = vst [vmem:[%s3271_s22 + $0x10] sm:$0xff] %v2551_v48  ;;  %v1937_v63 = vadd.f32 %v1936_v42, %v1744_v20  ;;  %v2010_v57 = vmul.f32 %v1744_v20, %v662_v12  ;;  %v2552_v23 = vpack.c.bf16 %v666_v43, %v664_v24 }
 0x130   : > { %v1746_v9 = vmul.f32 %v3036_v10, %v666_v43  ;;  %v2134_v3 = vadd.f32 %v2133_v30, %v2009_v34  ;;  %v1869_v1 = vadd.f32 %v1868_v44, %v1745_v26  ;;  %v2011_v60 = vmul.f32 %v1745_v26, %v664_v24  ;;  %1386 = vst [vmem:[%s3271_s22 + $0x110] sm:$0xff] %v2583_v18 }
 0x131   : > { %v3332_v51 = vmul.f32 %v3306_v39, %v3257_v52  ;;  %v2203_v45 = vadd.f32 %v2202_v54, %v2010_v57  ;;  %1355 = vst [vmem:[%s3271_s22 + $0x18] sm:$0xff] %v2552_v23  ;;  %v669_v7 = vpop.f32.mrb[8].mxu0  ;;  %v3337_v48 = vmul.f32 %v3309_v2, %v814_v0  ;;  %v829_v42 = vpop.f32.mrb[8].mxu1  ;;  %v824_v30 = vadd.f32 %v823_v56, %v2999_v47 }
 0x132   : > { %v1938_v11 = vadd.f32 %v1937_v63, %v1746_v9  ;;  %v2012_v50 = vmul.f32 %v1746_v9, %v666_v43  ;;  %v2135_v12 = vadd.f32 %v2134_v3, %v2011_v60  ;;  %v670_v10 = vadd.f32 %v669_v7, %v2999_v47  ;;  %v671_v34 = vpop.f32.mrb[9].mxu0  ;;  %v831_v52 = vpop.f32.mrb[9].mxu1 }
 0x133   : > { %4416 = vst [vmem:[#allocation26_spill] sm:$0xff] %v3332_v51  ;;  %4417 = vst [vmem:[#allocation27_spill] sm:$0xff] %v3337_v48  ;;  %v3342_v24 = vadd.f32 %v825_v41, %v3012_v59  ;;  %v672_v23 = vadd.f32 %v671_v34, %v3012_v59  ;;  %v673_v57 = vpop.f32.mrb[10].mxu0  ;;  %v3346_v54 = vmul.f32 %v3323_v49, %v816_v38  ;;  %v833_v0 = vpop.f32.mrb[10].mxu1  ;;  %v3349_v3 = vadd.s32 400, %v2980_v33 }
 0x134   : > { %v2204_v20 = vadd.f32 %v2203_v45, %v2012_v50  ;;  %v1747_v7 = vmul.f32 %v3042_v13, %v670_v10  ;;  %v674_v56 = vadd.f32 %v673_v57, %v2999_v47  ;;  %v675_v41 = vpop.f32.mrb[11].mxu0  ;;  %v3355_v43 = vmul.f32 %v3130_v4, %v3315_v22  ;;  %v835_v26 = vpop.f32.mrb[11].mxu1 }
 0x135   : > { %4418 = vst [vmem:[#allocation28_spill] sm:$0xff] %v3346_v54  ;;  %v2584_v44 = vpack.c.bf16 %v3342_v24, %v824_v30  ;;  %v2553_v38 = vpack.c.bf16 %v672_v23, %v670_v10  ;;  %v1748_v18 = vmul.f32 %v3042_v13, %v672_v23  ;;  %v676_v63 = vadd.f32 %v675_v41, %v3012_v59 }
 0x136   : > { %v3362_v9 = vmul.f32 %v3130_v4, %v3318_v19  ;;  %v1870_v60 = vadd.f32 %v1869_v1, %v1747_v7  ;;  %v2013_v45 = vmul.f32 %v1747_v7, %v670_v10  ;;  %v1749_v50 = vmul.f32 %v3046_v14, %v674_v56 }
 0x137   : > { %v3366_v34 = vmul.f32 %v3134_v5, %v824_v30  ;;  %1387 = vst [vmem:[%s3271_s22 + $0x118] sm:$0xff] %v2584_v44  ;;  %1356 = vst [vmem:[%s3271_s22 + $0x20] sm:$0xff] %v2553_v38  ;;  %v1939_v57 = vadd.f32 %v1938_v11, %v1748_v18  ;;  %v2014_v54 = vmul.f32 %v1748_v18, %v672_v23 }
 0x138   : > { %v2554_v48 = vpack.c.bf16 %v676_v63, %v674_v56  ;;  %v1750_v13 = vmul.f32 %v3046_v14, %v676_v63  ;;  %v2136_v41 = vadd.f32 %v2135_v12, %v2013_v45  ;;  %v1871_v51 = vadd.f32 %v1870_v60, %v1749_v50 }
 0x139   : > { %v2015_v49 = vmul.f32 %v1749_v50, %v674_v56  ;;  %v830_v4 = vadd.f32 %v829_v42, %v2999_v47  ;;  %v2205_v2 = vadd.f32 %v2204_v20, %v2014_v54  ;;  %v679_v7 = vpop.f32.mrb[12].mxu0  ;;  %v3375_v39 = vmul.f32 %v3355_v43, %v3315_v22  ;;  %v839_v44 = vpop.f32.mrb[12].mxu1 }
 0x13a   : > { %1357 = vst [vmem:[%s3271_s22 + $0x28] sm:$0xff] %v2554_v48  ;;  %v1940_v1 = vadd.f32 %v1939_v57, %v1750_v13  ;;  %v2016_v10 = vmul.f32 %v1750_v13, %v676_v63  ;;  %v680_v23 = vadd.f32 %v679_v7, %v2999_v47  ;;  %v681_v38 = vpop.f32.mrb[13].mxu0  ;;  %v3380_v14 = vmul.f32 %v3362_v9, %v3318_v19  ;;  %v841_v12 = vpop.f32.mrb[13].mxu1 }
 0x13b   : > { %v2137_v11 = vadd.f32 %v2136_v41, %v2015_v49  ;;  %v832_v42 = vadd.f32 %v831_v52, %v3012_v59  ;;  %v682_v20 = vadd.f32 %v681_v38, %v3012_v59  ;;  %v683_v54 = vpop.f32.mrb[14].mxu0  ;;  %v3385_v56 = vmul.f32 %v3366_v34, %v824_v30  ;;  %v3391_v22 = vpop.f32.mrb[14].mxu1 }
 0x13c   : > { %4419 = vst [vmem:[#allocation29_spill] sm:$0xff] %v3380_v14  ;;  %v2206_v48 = vadd.f32 %v2205_v2, %v2016_v10  ;;  %v3389_v49 = vmul.f32 %v3134_v5, %v3342_v24  ;;  %v1751_v19 = vmul.f32 %v3050_v15, %v680_v23  ;;  %v684_v52 = vadd.f32 %v683_v54, %v2999_v47  ;;  %v685_v18 = vpop.f32.mrb[15].mxu0  ;;  %v3398_v60 = vpop.f32.mrb[15].mxu1 }
 0x13d   : > { %4420 = vst [vmem:[#allocation30_spill] sm:$0xff] %v3385_v56  ;;  %v3396_v2 = vmul.f32 %v3146_v8, %v830_v4  ;;  %v2585_v63 = vpack.c.bf16 %v832_v42, %v830_v4  ;;  %v2555_v30 = vpack.c.bf16 %v682_v20, %v680_v23  ;;  %v1752_v45 = vmul.f32 %v3050_v15, %v682_v20 }
 0x13e   : > { %v686_v5 = vadd.f32 %v685_v18, %v3012_v59  ;;  %v3403_v50 = vadd.f32 %v833_v0, %v2999_v47  ;;  %v1872_v57 = vadd.f32 %v1871_v51, %v1751_v19  ;;  %v2017_v13 = vmul.f32 %v1751_v19, %v680_v23 }
 0x13f   : > { %v1753_v41 = vmul.f32 %v3054_v16, %v684_v52  ;;  %1388 = vst [vmem:[%s3271_s22 + $0x120] sm:$0xff] %v2585_v63  ;;  %v3408_v10 = vadd.f32 %v835_v26, %v3012_v59  ;;  %1358 = vst [vmem:[%s3271_s22 + $0x30] sm:$0xff] %v2555_v30  ;;  %v1941_v7 = vadd.f32 %v1940_v1, %v1752_v45 }
 0x140   : > { %v2018_v38 = vmul.f32 %v1752_v45, %v682_v20  ;;  %v2556_v54 = vpack.c.bf16 %v686_v5, %v684_v52  ;;  %v1754_v15 = vmul.f32 %v3054_v16, %v686_v5  ;;  %v2138_v56 = vadd.f32 %v2137_v11, %v2017_v13 }
 0x141   : > { %v1873_v18 = vadd.f32 %v1872_v57, %v1753_v41  ;;  %v2019_v14 = vmul.f32 %v1753_v41, %v684_v52  ;;  %v3413_v0 = vmul.f32 %v3146_v8, %v832_v42  ;;  %v689_v63 = vpop.f32.mrb[16].mxu0  ;;  %v2586_v26 = vpack.c.bf16 %v3408_v10, %v3403_v50  ;;  %v3418_v1 = vpop.f32.mrb[16].mxu1 }
 0x142   : > { %v2207_v51 = vadd.f32 %v2206_v48, %v2018_v38  ;;  %1359 = vst [vmem:[%s3271_s22 + $0x38] sm:$0xff] %v2556_v54  ;;  %v1942_v23 = vadd.f32 %v1941_v7, %v1754_v15  ;;  %v2020_v19 = vmul.f32 %v1754_v15, %v686_v5  ;;  %v690_v16 = vadd.f32 %v689_v63, %v2999_v47  ;;  %v691_v11 = vpop.f32.mrb[17].mxu0  ;;  %v3428_v48 = vpop.f32.mrb[17].mxu1 }
 0x143   : > { %4421 = vst [vmem:[#allocation31_spill] sm:$0xff] %v3413_v0  ;;  %v2139_v20 = vadd.f32 %v2138_v56, %v2019_v14  ;;  %v3423_v52 = vmul.f32 %v3389_v49, %v3342_v24  ;;  %v3426_v8 = vmul.f32 %v3396_v2, %v830_v4  ;;  %v692_v45 = vadd.f32 %v691_v11, %v3012_v59  ;;  %v693_v5 = vpop.f32.mrb[18].mxu0  ;;  %v3438_v56 = vpop.f32.mrb[18].mxu1 }
 0x144   : > { %v2208_v30 = vadd.f32 %v2207_v51, %v2020_v19  ;;  %1389 = vst [vmem:[%s3271_s22 + $0x128] sm:$0xff] %v2586_v26  ;;  %v3433_v57 = vadd.f32 %v839_v44, %v2999_v47  ;;  %v3436_v14 = vadd.f32 %v841_v12, %v3012_v59  ;;  %v1755_v24 = vmul.f32 %v3058_v17, %v690_v16  ;;  %v695_v13 = vpop.f32.mrb[19].mxu0  ;;  %v3449_v44 = vpop.f32.mrb[19].mxu1 }
 0x145   : > { %4422 = vst [vmem:[#allocation32_spill] sm:$0xff] %v3423_v52  ;;  %4423 = vst [vmem:[#allocation33_spill] sm:$0xff] %v3426_v8  ;;  %v694_v4 = vadd.f32 %v693_v5, %v2999_v47  ;;  %v3443_v41 = vmul.f32 %v3413_v0, %v832_v42  ;;  %v3447_v7 = vmul.f32 %v3154_v21, %v3403_v50 }
 0x146   : > { %v2557_v12 = vpack.c.bf16 %v692_v45, %v690_v16  ;;  %v1756_v38 = vmul.f32 %v3058_v17, %v692_v45  ;;  %v696_v54 = vadd.f32 %v695_v13, %v3012_v59  ;;  %v2587_v15 = vpack.c.bf16 %v3436_v14, %v3433_v57 }
 0x147   : > { %4424 = vst [vmem:[#allocation34_spill] sm:$0xff] %v3443_v41  ;;  %v1874_v51 = vadd.f32 %v1873_v18, %v1755_v24  ;;  %v2021_v19 = vmul.f32 %v1755_v24, %v690_v16  ;;  %v1757_v42 = vmul.f32 %v3070_v27, %v694_v4  ;;  %v3458_v63 = vmul.f32 %v3154_v21, %v3408_v10 }
 0x148   : > { %1360 = vst [vmem:[%s3271_s22 + $0x40] sm:$0xff] %v2557_v12  ;;  %v1943_v26 = vadd.f32 %v1942_v23, %v1756_v38  ;;  %v2022_v11 = vmul.f32 %v1756_v38, %v692_v45  ;;  %v2558_v5 = vpack.c.bf16 %v696_v54, %v694_v4  ;;  %v1758_v17 = vmul.f32 %v3070_v27, %v696_v54 }
 0x149   : > { %1390 = vst [vmem:[%s3271_s22 + $0x130] sm:$0xff] %v2587_v15  ;;  %v2140_v13 = vadd.f32 %v2139_v20, %v2021_v19  ;;  %v1875_v41 = vadd.f32 %v1874_v51, %v1757_v42  ;;  %v2023_v8 = vmul.f32 %v1757_v42, %v694_v4  ;;  %v844_v18 = vadd.f32 %v3391_v22, %v2999_v47  ;;  %v699_v0 = vpop.f32.mrb[20].mxu0  ;;  %v3470_v23 = vpop.f32.mrb[20].mxu1 }
 0x14a   : > { %v2209_v16 = vadd.f32 %v2208_v30, %v2022_v11  ;;  %1361 = vst [vmem:[%s3271_s22 + $0x48] sm:$0xff] %v2558_v5  ;;  %v1944_v24 = vadd.f32 %v1943_v26, %v1758_v17  ;;  %v2024_v52 = vmul.f32 %v1758_v17, %v696_v54  ;;  %v3468_v21 = vmul.f32 %v3447_v7, %v3403_v50  ;;  %v701_v20 = vpop.f32.mrb[21].mxu0  ;;  %v3481_v30 = vpop.f32.mrb[21].mxu1 }
 0x14b   : > { %v2141_v45 = vadd.f32 %v2140_v13, %v2023_v8  ;;  %v700_v27 = vadd.f32 %v699_v0, %v2999_v47  ;;  %v3475_v4 = vmul.f32 %v3164_v25, %v3433_v57  ;;  %v3479_v22 = vadd.f32 %v3398_v60, %v3012_v59  ;;  %v703_v38 = vpop.f32.mrb[22].mxu0  ;;  %v3492_v54 = vpop.f32.mrb[22].mxu1 }
 0x14c   : > { %4425 = vst [vmem:[#allocation35_spill] sm:$0xff] %v3468_v21  ;;  %v2210_v12 = vadd.f32 %v2209_v16, %v2024_v52  ;;  %v702_v50 = vadd.f32 %v701_v20, %v3012_v59  ;;  %v3486_v8 = vmul.f32 %v3458_v63, %v3408_v10  ;;  %v3490_v0 = vmul.f32 %v3164_v25, %v3436_v14  ;;  %v705_v52 = vpop.f32.mrb[23].mxu0  ;;  %v3500_v10 = vpop.f32.mrb[23].mxu1 }
 0x14d   : > { %v1759_v60 = vmul.f32 %v3073_v28, %v700_v27  ;;  %v704_v15 = vadd.f32 %v703_v38, %v2999_v47  ;;  %v3497_v51 = vmul.f32 %v3170_v37, %v844_v18  ;;  %v2588_v19 = vpack.c.bf16 %v3479_v22, %v844_v18 }
 0x14e   : > { %4426 = vst [vmem:[#allocation36_spill] sm:$0xff] %v3486_v8  ;;  %4427 = vst [vmem:[#allocation37_spill] sm:$0xff] %v3490_v0  ;;  %v2559_v42 = vpack.c.bf16 %v702_v50, %v700_v27  ;;  %v1760_v26 = vmul.f32 %v3073_v28, %v702_v50  ;;  %v706_v25 = vadd.f32 %v705_v52, %v3012_v59 }
 0x14f   : > { %4428 = vst [vmem:[#allocation38_spill] sm:$0xff] %v3497_v51  ;;  %v3506_v11 = vadd.f32 %v3418_v1, %v2999_v47  ;;  %v1876_v5 = vadd.f32 %v1875_v41, %v1759_v60  ;;  %v2025_v17 = vmul.f32 %v1759_v60, %v700_v27  ;;  %v1761_v13 = vmul.f32 %v3076_v29, %v704_v15 }
 0x150   : > { %1391 = vst [vmem:[%s3271_s22 + $0x138] sm:$0xff] %v2588_v19  ;;  %v3512_v16 = vadd.f32 %v3428_v48, %v3012_v59  ;;  %1362 = vst [vmem:[%s3271_s22 + $0x50] sm:$0xff] %v2559_v42  ;;  %v1945_v20 = vadd.f32 %v1944_v24, %v1760_v26  ;;  %v2026_v38 = vmul.f32 %v1760_v26, %v702_v50 }
 0x151   : > { %v2560_v28 = vpack.c.bf16 %v706_v25, %v704_v15  ;;  %v1762_v52 = vmul.f32 %v3076_v29, %v706_v25  ;;  %v2142_v8 = vadd.f32 %v2141_v45, %v2025_v17  ;;  %v1877_v21 = vadd.f32 %v1876_v5, %v1761_v13  ;;  %v709_v48 = vpop.f32.mrb[24].mxu0  ;;  %v3523_v50 = vpop.f32.mrb[24].mxu1 }
 0x152   : > { %v2027_v1 = vmul.f32 %v1761_v13, %v704_v15  ;;  %v3518_v41 = vmul.f32 %v3475_v4, %v3433_v57  ;;  %v2211_v27 = vadd.f32 %v2210_v12, %v2026_v38  ;;  %v2589_v24 = vpack.c.bf16 %v3512_v16, %v3506_v11  ;;  %v711_v45 = vpop.f32.mrb[25].mxu0  ;;  %v3533_v12 = vpop.f32.mrb[25].mxu1 }
 0x153   : > { %1363 = vst [vmem:[%s3271_s22 + $0x58] sm:$0xff] %v2560_v28  ;;  %v1946_v60 = vadd.f32 %v1945_v20, %v1762_v52  ;;  %v2028_v19 = vmul.f32 %v1762_v52, %v706_v25  ;;  %v710_v29 = vadd.f32 %v709_v48, %v2999_v47  ;;  %v3528_v15 = vmul.f32 %v3490_v0, %v3436_v14  ;;  %v713_v5 = vpop.f32.mrb[26].mxu0  ;;  %v3543_v14 = vpop.f32.mrb[26].mxu1 }
 0x154   : > { %4429 = vst [vmem:[#allocation39_spill] sm:$0xff] %v3518_v41  ;;  %v2143_v42 = vadd.f32 %v2142_v8, %v2027_v1  ;;  %v3531_v57 = vmul.f32 %v3497_v51, %v844_v18  ;;  %v712_v25 = vadd.f32 %v711_v45, %v3012_v59  ;;  %1392 = vst [vmem:[%s3271_s22 + $0x140] sm:$0xff] %v2589_v24  ;;  %v715_v20 = vpop.f32.mrb[27].mxu0  ;;  %v3555_v28 = vpop.f32.mrb[27].mxu1 }
 0x155   : > { %4430 = vst [vmem:[#allocation40_spill] sm:$0xff] %v3528_v15  ;;  %v2212_v26 = vadd.f32 %v2211_v27, %v2028_v19  ;;  %v854_v8 = vadd.f32 %v3438_v56, %v2999_v47  ;;  %v3541_v17 = vadd.f32 %v3449_v44, %v3012_v59  ;;  %v1763_v18 = vmul.f32 %v3081_v31, %v710_v29 }
 0x156   : > { %4431 = vst [vmem:[#allocation41_spill] sm:$0xff] %v3531_v57  ;;  %v714_v13 = vadd.f32 %v713_v5, %v2999_v47  ;;  %v3549_v38 = vmul.f32 %v3170_v37, %v3479_v22  ;;  %v3553_v56 = vmul.f32 %v3190_v55, %v3506_v11  ;;  %v2561_v44 = vpack.c.bf16 %v712_v25, %v710_v29 }
 0x157   : > { %v1764_v52 = vmul.f32 %v3081_v31, %v712_v25  ;;  %v716_v1 = vadd.f32 %v715_v20, %v3012_v59  ;;  %v2590_v27 = vpack.c.bf16 %v3541_v17, %v854_v8  ;;  %v1878_v19 = vadd.f32 %v1877_v21, %v1763_v18 }
 0x158   : > { %v2029_v48 = vmul.f32 %v1763_v18, %v710_v29  ;;  %v1765_v37 = vmul.f32 %v3085_v32, %v714_v13  ;;  %v3563_v24 = vmul.f32 %v3190_v55, %v3512_v16  ;;  %1364 = vst [vmem:[%s3271_s22 + $0x60] sm:$0xff] %v2561_v44  ;;  %v3569_v51 = vmul.f32 %v3196_v58, %v854_v8 }
 0x159   : > { %v1947_v45 = vadd.f32 %v1946_v60, %v1764_v52  ;;  %v2030_v5 = vmul.f32 %v1764_v52, %v712_v25  ;;  %v2562_v57 = vpack.c.bf16 %v716_v1, %v714_v13  ;;  %v1766_v15 = vmul.f32 %v3085_v32, %v716_v1  ;;  %1393 = vst [vmem:[%s3271_s22 + $0x148] sm:$0xff] %v2590_v27  ;;  %v719_v0 = vpop.f32.mrb[28].mxu0  ;;  %v3576_v60 = vpop.f32.mrb[28].mxu1 }
 0x15a   : > { %4432 = vst [vmem:[#allocation42_spill] sm:$0xff] %v3563_v24  ;;  %v2144_v31 = vadd.f32 %v2143_v42, %v2029_v48  ;;  %v1879_v20 = vadd.f32 %v1878_v19, %v1765_v37  ;;  %v2031_v41 = vmul.f32 %v1765_v37, %v714_v13  ;;  %4433 = vst [vmem:[#allocation43_spill] sm:$0xff] %v3569_v51  ;;  %v721_v42 = vpop.f32.mrb[29].mxu0 }
 0x15b   : > { %v2213_v21 = vadd.f32 %v2212_v26, %v2030_v5  ;;  %1365 = vst [vmem:[%s3271_s22 + $0x68] sm:$0xff] %v2562_v57  ;;  %v1948_v29 = vadd.f32 %v1947_v45, %v1766_v15  ;;  %v2032_v18 = vmul.f32 %v1766_v15, %v716_v1  ;;  %v3574_v55 = vmul.f32 %v3549_v38, %v3479_v22  ;;  %v3585_v57 = vpop.f32.mrb[29].mxu1  ;;  %v723_v22 = vpop.f32.mrb[30].mxu0 }
 0x15c   : > { %v2145_v25 = vadd.f32 %v2144_v31, %v2031_v41  ;;  %v720_v32 = vadd.f32 %v719_v0, %v2999_v47  ;;  %v860_v13 = vadd.f32 %v3470_v23, %v2999_v47  ;;  %v3583_v26 = vadd.f32 %v3481_v30, %v3012_v59  ;;  %v3596_v23 = vpop.f32.mrb[30].mxu1  ;;  %v725_v1 = vpop.f32.mrb[31].mxu0 }
 0x15d   : > { %v2214_v15 = vadd.f32 %v2213_v21, %v2032_v18  ;;  %v722_v44 = vadd.f32 %v721_v42, %v3012_v59  ;;  %v3590_v52 = vmul.f32 %v3553_v56, %v3506_v11  ;;  %v3594_v0 = vmul.f32 %v3563_v24, %v3512_v16  ;;  %v3604_v11 = vpop.f32.mrb[31].mxu1  ;;  %v4469_v24 = vld [vmem:[#allocation21_spill] sm:$0xff] }
 0x15e   : > { %v1767_v30 = vmul.f32 %v3089_v35, %v720_v32  ;;  %v724_v41 = vadd.f32 %v723_v22, %v2999_v47  ;;  %v3601_v27 = vmul.f32 %v3569_v51, %v854_v8  ;;  %v2591_v19 = vpack.c.bf16 %v3583_v26, %v860_v13 }
 0x15f   : > { %4434 = vst [vmem:[#allocation44_spill] sm:$0xff] %v3590_v52  ;;  %4435 = vst [vmem:[#allocation45_spill] sm:$0xff] %v3594_v0  ;;  %v2563_v48 = vpack.c.bf16 %v722_v44, %v720_v32  ;;  %v1768_v16 = vmul.f32 %v3089_v35, %v722_v44  ;;  %v726_v37 = vadd.f32 %v725_v1, %v3012_v59 }
 0x160   : > { %4436 = vst [vmem:[#allocation46_spill] sm:$0xff] %v3601_v27  ;;  %v3610_v45 = vmul.f32 %v3196_v58, %v3541_v17  ;;  %v1880_v5 = vadd.f32 %v1879_v20, %v1767_v30  ;;  %v2033_v31 = vmul.f32 %v1767_v30, %v720_v32  ;;  %v1769_v21 = vmul.f32 %v3102_v46, %v724_v41 }
 0x161   : > { %v3614_v8 = vmul.f32 %v3214_v36, %v860_v13  ;;  %1394 = vst [vmem:[%s3271_s22 + $0x150] sm:$0xff] %v2591_v19  ;;  %1366 = vst [vmem:[%s3271_s22 + $0x70] sm:$0xff] %v2563_v48  ;;  %v1949_v18 = vadd.f32 %v1948_v29, %v1768_v16  ;;  %v2034_v42 = vmul.f32 %v1768_v16, %v722_v44  ;;  %v729_v52 = vpop.f32.mrb[32].mxu0  ;;  %v3624_v48 = vpop.f32.mrb[32].mxu1 }
 0x162   : > { %4437 = vst [vmem:[#allocation47_spill] sm:$0xff] %v3610_v45  ;;  %v2564_v22 = vpack.c.bf16 %v726_v37, %v724_v41  ;;  %v1770_v35 = vmul.f32 %v3102_v46, %v726_v37  ;;  %v2146_v1 = vadd.f32 %v2145_v25, %v2033_v31  ;;  %v1881_v27 = vadd.f32 %v1880_v5, %v1769_v21  ;;  %v731_v46 = vpop.f32.mrb[33].mxu0 }
 0x163   : > { %4438 = vst [vmem:[#allocation48_spill] sm:$0xff] %v3614_v8  ;;  %v2035_v0 = vmul.f32 %v1769_v21, %v724_v41  ;;  %v864_v58 = vadd.f32 %v3492_v54, %v2999_v47  ;;  %v2215_v20 = vadd.f32 %v2214_v15, %v2034_v42  ;;  %v866_v19 = vadd.f32 %v3500_v10, %v3012_v59  ;;  %v3635_v15 = vpop.f32.mrb[33].mxu1  ;;  %v733_v16 = vpop.f32.mrb[34].mxu0 }
 0x164   : > { %1367 = vst [vmem:[%s3271_s22 + $0x78] sm:$0xff] %v2564_v22  ;;  %v1950_v32 = vadd.f32 %v1949_v18, %v1770_v35  ;;  %v2036_v30 = vmul.f32 %v1770_v35, %v726_v37  ;;  %v730_v44 = vadd.f32 %v729_v52, %v2999_v47  ;;  %v3629_v25 = vadd.f32 %v3523_v50, %v2999_v47  ;;  %v3642_v37 = vpop.f32.mrb[34].mxu1  ;;  %v735_v5 = vpop.f32.mrb[35].mxu0 }
 0x165   : > { %v2147_v29 = vadd.f32 %v2146_v1, %v2035_v0  ;;  %v3633_v54 = vadd.f32 %v3533_v12, %v3012_v59  ;;  %v732_v10 = vadd.f32 %v731_v46, %v3012_v59  ;;  %v3640_v0 = vmul.f32 %v3610_v45, %v3541_v17  ;;  %v3651_v18 = vpop.f32.mrb[35].mxu1 }
 0x166   : > { %v2216_v41 = vadd.f32 %v2215_v20, %v2036_v30  ;;  %v2592_v52 = vpack.c.bf16 %v866_v19, %v864_v58  ;;  %v1771_v50 = vmul.f32 %v3121_v61, %v730_v44  ;;  %v734_v12 = vadd.f32 %v733_v16, %v2999_v47 }
 0x167   : > { %4439 = vst [vmem:[#allocation49_spill] sm:$0xff] %v3640_v0  ;;  %v3647_v31 = vmul.f32 %v3614_v8, %v860_v13  ;;  %v2593_v21 = vpack.c.bf16 %v3633_v54, %v3629_v25  ;;  %v2565_v17 = vpack.c.bf16 %v732_v10, %v730_v44  ;;  %v1772_v42 = vmul.f32 %v3121_v61, %v732_v10 }
 0x168   : > { %v736_v22 = vadd.f32 %v735_v5, %v3012_v59  ;;  %v3657_v35 = vmul.f32 %v3214_v36, %v3583_v26  ;;  %1395 = vst [vmem:[%s3271_s22 + $0x158] sm:$0xff] %v2592_v52  ;;  %v1882_v1 = vadd.f32 %v1881_v27, %v1771_v50  ;;  %v2037_v20 = vmul.f32 %v1771_v50, %v730_v44 }
 0x169   : > { %4440 = vst [vmem:[#allocation50_spill] sm:$0xff] %v3647_v31  ;;  %v1773_v13 = vmul.f32 %v3124_v62, %v734_v12  ;;  %v3662_v30 = vmul.f32 %v3219_v40, %v864_v58  ;;  %1396 = vst [vmem:[%s3271_s22 + $0x160] sm:$0xff] %v2593_v21  ;;  %v1951_v46 = vadd.f32 %v1950_v32, %v1772_v42  ;;  %v739_v8 = vpop.f32.mrb[36].mxu0  ;;  %v3675_v32 = vpop.f32.mrb[36].mxu1 }
 0x16a   : > { %4441 = vst [vmem:[#allocation51_spill] sm:$0xff] %v3657_v35  ;;  %1368 = vst [vmem:[%s3271_s22 + $0x80] sm:$0xff] %v2565_v17  ;;  %v2038_v16 = vmul.f32 %v1772_v42, %v732_v10  ;;  %v2566_v61 = vpack.c.bf16 %v736_v22, %v734_v12  ;;  %v1774_v5 = vmul.f32 %v3124_v62, %v736_v22 }
 0x16b   : > { %4442 = vst [vmem:[#allocation52_spill] sm:$0xff] %v3662_v30  ;;  %v2148_v31 = vadd.f32 %v2147_v29, %v2037_v20  ;;  %v1883_v0 = vadd.f32 %v1882_v1, %v1773_v13  ;;  %v2039_v36 = vmul.f32 %v1773_v13, %v734_v12  ;;  %v3668_v52 = vmul.f32 %v3219_v40, %v866_v19  ;;  %v741_v29 = vpop.f32.mrb[37].mxu0 }
 0x16c   : > { %v2217_v27 = vadd.f32 %v2216_v41, %v2038_v16  ;;  %1369 = vst [vmem:[%s3271_s22 + $0x88] sm:$0xff] %v2566_v61  ;;  %v1952_v44 = vadd.f32 %v1951_v46, %v1774_v5  ;;  %v2040_v50 = vmul.f32 %v1774_v5, %v736_v22  ;;  %v3673_v21 = vmul.f32 %v3657_v35, %v3583_v26  ;;  %v3684_v41 = vpop.f32.mrb[37].mxu1  ;;  %v743_v26 = vpop.f32.mrb[38].mxu0 }
 0x16d   : > { %4443 = vst [vmem:[#allocation53_spill] sm:$0xff] %v3668_v52  ;;  %v2149_v10 = vadd.f32 %v2148_v31, %v2039_v36  ;;  %v740_v62 = vadd.f32 %v739_v8, %v2999_v47  ;;  %v874_v12 = vadd.f32 %v3543_v14, %v2999_v47  ;;  %v3682_v40 = vadd.f32 %v3555_v28, %v3012_v59  ;;  %v3694_v31 = vpop.f32.mrb[38].mxu1  ;;  %v745_v1 = vpop.f32.mrb[39].mxu0 }
 0x16e   : > { %4444 = vst [vmem:[#allocation54_spill] sm:$0xff] %v3673_v21  ;;  %v2218_v17 = vadd.f32 %v2217_v27, %v2040_v50  ;;  %v742_v42 = vadd.f32 %v741_v29, %v3012_v59  ;;  %v3688_v22 = vmul.f32 %v3662_v30, %v864_v58  ;;  %v3692_v8 = vmul.f32 %v3234_v53, %v3629_v25  ;;  %v3702_v58 = vpop.f32.mrb[39].mxu1  ;;  %v4449_v50 = vld [vmem:[#allocation3_spill] sm:$0xff] }
 0x16f   : > { %v1775_v14 = vmul.f32 %v3138_v6, %v740_v62  ;;  %v744_v28 = vadd.f32 %v743_v26, %v2999_v47  ;;  %v3699_v20 = vmul.f32 %v3668_v52, %v866_v19  ;;  %v2594_v13 = vpack.c.bf16 %v3682_v40, %v874_v12  ;;  %v4450_v19 = vld [vmem:[#allocation12_spill] sm:$0xff] }
 0x170   : > { %4445 = vst [vmem:[#allocation55_spill] sm:$0xff] %v3688_v22  ;;  %4446 = vst [vmem:[#allocation56_spill] sm:$0xff] %v3692_v8  ;;  %v2567_v46 = vpack.c.bf16 %v742_v42, %v740_v62  ;;  %v1776_v16 = vmul.f32 %v3138_v6, %v742_v42  ;;  %v746_v61 = vadd.f32 %v745_v1, %v3012_v59 }
 0x171   : > { %4447 = vst [vmem:[#allocation57_spill] sm:$0xff] %v3699_v20  ;;  %v3708_v5 = vmul.f32 %v3234_v53, %v3633_v54  ;;  %v1884_v36 = vadd.f32 %v1883_v0, %v1775_v14  ;;  %v2041_v27 = vmul.f32 %v1775_v14, %v740_v62  ;;  %v1777_v29 = vmul.f32 %v4449_v50, %v744_v28  ;;  %v749_v35 = vpop.f32.mrb[40].mxu0 }
 0x172   : > { %v3712_v26 = vmul.f32 %v4450_v19, %v874_v12  ;;  %1397 = vst [vmem:[%s3271_s22 + $0x168] sm:$0xff] %v2594_v13  ;;  %1370 = vst [vmem:[%s3271_s22 + $0x90] sm:$0xff] %v2567_v46  ;;  %v1953_v20 = vadd.f32 %v1952_v44, %v1776_v16  ;;  %v2042_v22 = vmul.f32 %v1776_v16, %v742_v42  ;;  %v3724_v44 = vpop.f32.mrb[40].mxu1 }
 0x173   : > { %4448 = vst [vmem:[#allocation58_spill] sm:$0xff] %v3708_v5  ;;  %v2568_v21 = vpack.c.bf16 %v746_v61, %v744_v28  ;;  %v1778_v6 = vmul.f32 %v4449_v50, %v746_v61  ;;  %v2150_v1 = vadd.f32 %v2149_v10, %v2041_v27  ;;  %v1885_v52 = vadd.f32 %v1884_v36, %v1777_v29  ;;  %v751_v10 = vpop.f32.mrb[41].mxu0  ;;  %v4457_v27 = vld [vmem:[#allocation15_spill] sm:$0xff] }
 0x174   : > { %4451 = vst [vmem:[#allocation3_spill] sm:$0xff] %v3712_v26  ;;  %v2043_v30 = vmul.f32 %v1777_v29, %v744_v28  ;;  %v880_v53 = vadd.f32 %v3576_v60, %v2999_v47  ;;  %v2219_v0 = vadd.f32 %v2218_v17, %v2042_v22  ;;  %v3722_v13 = vadd.f32 %v3585_v57, %v3012_v59  ;;  %v753_v22 = vpop.f32.mrb[42].mxu0 }
 0x175   : > { %1371 = vst [vmem:[%s3271_s22 + $0x98] sm:$0xff] %v2568_v21  ;;  %v1954_v62 = vadd.f32 %v1953_v20, %v1778_v6  ;;  %v2044_v14 = vmul.f32 %v1778_v6, %v746_v61  ;;  %v750_v46 = vadd.f32 %v749_v35, %v2999_v47  ;;  %v3729_v28 = vmul.f32 %v3692_v8, %v3629_v25  ;;  %v3735_v21 = vpop.f32.mrb[41].mxu1  ;;  %v4455_v25 = vld [vmem:[#allocation4_spill] sm:$0xff]  ;;  %v755_v61 = vpop.f32.mrb[43].mxu0 }
 0x176   : > { %v2151_v42 = vadd.f32 %v2150_v1, %v2043_v30  ;;  %v3733_v60 = vmul.f32 %v3708_v5, %v3633_v54  ;;  %v752_v57 = vadd.f32 %v751_v10, %v3012_v59  ;;  %v3740_v30 = vmul.f32 %v4450_v19, %v3682_v40  ;;  %v3743_v20 = vpop.f32.mrb[42].mxu1 }
 0x177   : > { %4452 = vst [vmem:[#allocation12_spill] sm:$0xff] %v3729_v28  ;;  %v2220_v17 = vadd.f32 %v2219_v0, %v2044_v14  ;;  %v2595_v35 = vpack.c.bf16 %v3722_v13, %v880_v53  ;;  %v1779_v16 = vmul.f32 %v4455_v25, %v750_v46  ;;  %v754_v54 = vadd.f32 %v753_v22, %v2999_v47  ;;  %v3753_v29 = vpop.f32.mrb[43].mxu1 }
 0x178   : > { %4453 = vst [vmem:[#allocation59_spill] sm:$0xff] %v3733_v60  ;;  %4454 = vst [vmem:[#allocation60_spill] sm:$0xff] %v3740_v30  ;;  %v3748_v36 = vmul.f32 %v3712_v26, %v874_v12  ;;  %v3751_v50 = vmul.f32 %v4457_v27, %v880_v53  ;;  %v2569_v19 = vpack.c.bf16 %v752_v57, %v750_v46  ;;  %v4459_v12 = vld [vmem:[#allocation5_spill] sm:$0xff] }
 0x179   : > { %v1780_v6 = vmul.f32 %v4455_v25, %v752_v57  ;;  %v756_v1 = vadd.f32 %v755_v61, %v3012_v59  ;;  %1398 = vst [vmem:[%s3271_s22 + $0x170] sm:$0xff] %v2595_v35  ;;  %v3760_v0 = vadd.f32 %v3596_v23, %v2999_v47  ;;  %v1886_v14 = vadd.f32 %v1885_v52, %v1779_v16  ;;  %v759_v8 = vpop.f32.mrb[44].mxu0 }
 0x17a   : > { %4456 = vst [vmem:[#allocation4_spill] sm:$0xff] %v3748_v36  ;;  %4458 = vst [vmem:[#allocation15_spill] sm:$0xff] %v3751_v50  ;;  %v2045_v10 = vmul.f32 %v1779_v16, %v750_v46  ;;  %v1781_v22 = vmul.f32 %v4459_v12, %v754_v54  ;;  %v3765_v36 = vadd.f32 %v3604_v11, %v3012_v59 }
 0x17b   : > { %1372 = vst [vmem:[%s3271_s22 + $0xa0] sm:$0xff] %v2569_v19  ;;  %v1955_v60 = vadd.f32 %v1954_v62, %v1780_v6  ;;  %v2046_v28 = vmul.f32 %v1780_v6, %v752_v57  ;;  %v2570_v25 = vpack.c.bf16 %v756_v1, %v754_v54  ;;  %v1782_v35 = vmul.f32 %v4459_v12, %v756_v1  ;;  %v3776_v62 = vpop.f32.mrb[44].mxu1  ;;  %v4464_v12 = vld [vmem:[#allocation16_spill] sm:$0xff] }
 0x17c   : > { %v2152_v61 = vadd.f32 %v2151_v42, %v2045_v10  ;;  %v1887_v26 = vadd.f32 %v1886_v14, %v1781_v22  ;;  %v2047_v5 = vmul.f32 %v1781_v22, %v754_v54  ;;  %v2596_v23 = vpack.c.bf16 %v3765_v36, %v3760_v0  ;;  %v761_v42 = vpop.f32.mrb[45].mxu0 }
 0x17d   : > { %v2221_v52 = vadd.f32 %v2220_v17, %v2046_v28  ;;  %1373 = vst [vmem:[%s3271_s22 + $0xa8] sm:$0xff] %v2570_v25  ;;  %v1956_v46 = vadd.f32 %v1955_v60, %v1782_v35  ;;  %v2048_v16 = vmul.f32 %v1782_v35, %v756_v1  ;;  %v3774_v11 = vmul.f32 %v3740_v30, %v3682_v40  ;;  %v3788_v60 = vpop.f32.mrb[45].mxu1  ;;  %v763_v6 = vpop.f32.mrb[46].mxu0  ;;  %v4463_v1 = vld [vmem:[#allocation6_spill] sm:$0xff] }
 0x17e   : > { %v2153_v57 = vadd.f32 %v2152_v61, %v2047_v5  ;;  %v760_v19 = vadd.f32 %v759_v8, %v2999_v47  ;;  %1399 = vst [vmem:[%s3271_s22 + $0x178] sm:$0xff] %v2596_v23  ;;  %v3782_v54 = vadd.f32 %v3624_v48, %v2999_v47  ;;  %v3786_v28 = vadd.f32 %v3635_v15, %v3012_v59  ;;  %v3798_v48 = vpop.f32.mrb[46].mxu1  ;;  %v765_v10 = vpop.f32.mrb[47].mxu0 }
 0x17f   : > { %4460 = vst [vmem:[#allocation5_spill] sm:$0xff] %v3774_v11  ;;  %v2222_v17 = vadd.f32 %v2221_v52, %v2048_v16  ;;  %v762_v40 = vadd.f32 %v761_v42, %v3012_v59  ;;  %v3792_v5 = vmul.f32 %v3751_v50, %v880_v53  ;;  %v3796_v8 = vmul.f32 %v4457_v27, %v3722_v13  ;;  %v3808_v25 = vpop.f32.mrb[47].mxu1  ;;  %v4466_v42 = vld [vmem:[#allocation7_spill] sm:$0xff] }
 0x180   : > { %v1783_v15 = vmul.f32 %v4463_v1, %v760_v19  ;;  %v764_v14 = vadd.f32 %v763_v6, %v2999_v47  ;;  %v3804_v22 = vmul.f32 %v4464_v12, %v3760_v0  ;;  %v2597_v53 = vpack.c.bf16 %v3786_v28, %v3782_v54 }
 0x181   : > { %4461 = vst [vmem:[#allocation61_spill] sm:$0xff] %v3792_v5  ;;  %4462 = vst [vmem:[#allocation62_spill] sm:$0xff] %v3796_v8  ;;  %v2571_v27 = vpack.c.bf16 %v762_v40, %v760_v19  ;;  %v1784_v35 = vmul.f32 %v4463_v1, %v762_v40  ;;  %v766_v61 = vadd.f32 %v765_v10, %v3012_v59 }
 0x182   : > { %4465 = vst [vmem:[#allocation6_spill] sm:$0xff] %v3804_v22  ;;  %v894_v23 = vadd.f32 %v3642_v37, %v2999_v47  ;;  %v1888_v52 = vadd.f32 %v1887_v26, %v1783_v15  ;;  %v2049_v16 = vmul.f32 %v1783_v15, %v760_v19  ;;  %v1785_v6 = vmul.f32 %v4466_v42, %v764_v14 }
 0x183   : > { %v3817_v5 = vmul.f32 %v4464_v12, %v3765_v36  ;;  %1400 = vst [vmem:[%s3271_s22 + $0x180] sm:$0xff] %v2597_v53  ;;  %1374 = vst [vmem:[%s3271_s22 + $0xb0] sm:$0xff] %v2571_v27  ;;  %v1957_v11 = vadd.f32 %v1956_v46, %v1784_v35  ;;  %v2050_v50 = vmul.f32 %v1784_v35, %v762_v40  ;;  %v769_v12 = vpop.f32.mrb[48].mxu0  ;;  %v3830_v46 = vpop.f32.mrb[48].mxu1 }
 0x184   : > { %v2572_v30 = vpack.c.bf16 %v766_v61, %v764_v14  ;;  %v1786_v1 = vmul.f32 %v4466_v42, %v766_v61  ;;  %v2154_v10 = vadd.f32 %v2153_v57, %v2049_v16  ;;  %v1889_v45 = vadd.f32 %v1888_v52, %v1785_v6  ;;  %v771_v57 = vpop.f32.mrb[49].mxu0 }
 0x185   : > { %4467 = vst [vmem:[#allocation16_spill] sm:$0xff] %v3817_v5  ;;  %v2051_v51 = vmul.f32 %v1785_v6, %v764_v14  ;;  %v3824_v37 = vmul.f32 %v3796_v8, %v3722_v13  ;;  %v2223_v26 = vadd.f32 %v2222_v17, %v2050_v50  ;;  %v3828_v53 = vmul.f32 %v4469_v24, %v894_v23  ;;  %v773_v17 = vpop.f32.mrb[50].mxu0  ;;  %v4475_v6 = vld [vmem:[#allocation2_spill] sm:$0xff] }
 0x186   : > { %1375 = vst [vmem:[%s3271_s22 + $0xb8] sm:$0xff] %v2572_v30  ;;  %v1958_v19 = vadd.f32 %v1957_v11, %v1786_v1  ;;  %v2052_v15 = vmul.f32 %v1786_v1, %v766_v61  ;;  %v770_v27 = vadd.f32 %v769_v12, %v2999_v47  ;;  %v3835_v14 = vmul.f32 %v3804_v22, %v3760_v0  ;;  %v3841_v30 = vpop.f32.mrb[49].mxu1  ;;  %v4474_v61 = vld [vmem:[#allocation8_spill] sm:$0xff]  ;;  %v775_v16 = vpop.f32.mrb[51].mxu0 }
 0x187   : > { %4468 = vst [vmem:[#allocation7_spill] sm:$0xff] %v3824_v37  ;;  %4470 = vst [vmem:[#allocation21_spill] sm:$0xff] %v3828_v53  ;;  %v2155_v40 = vadd.f32 %v2154_v10, %v2051_v51  ;;  %v3839_v13 = vadd.f32 %v3651_v18, %v3012_v59  ;;  %v772_v11 = vadd.f32 %v771_v57, %v3012_v59  ;;  %v3851_v0 = vpop.f32.mrb[50].mxu1  ;;  %v4476_v12 = vld [vmem:[#allocation20_spill] sm:$0xff] }
 0x188   : > { %4471 = vst [vmem:[#allocation63_spill] sm:$0xff] %v3835_v14  ;;  %v2224_v50 = vadd.f32 %v2223_v26, %v2052_v15  ;;  %v3846_v51 = vmul.f32 %v3817_v5, %v3765_v36  ;;  %v3849_v35 = vmul.f32 %v3828_v53, %v894_v23  ;;  %v1787_v18 = vmul.f32 %v4474_v61, %v770_v27  ;;  %v3858_v10 = vpop.f32.mrb[51].mxu1  ;;  %v4478_v53 = vld [vmem:[#allocation9_spill] sm:$0xff] }
 0x189   : > { %v774_v52 = vadd.f32 %v773_v17, %v2999_v47  ;;  %v2598_v42 = vpack.c.bf16 %v3839_v13, %v894_v23  ;;  %v1533_v1 = vadd.s32 %v4475_v6, %v3349_v3  ;;  %v2573_v36 = vpack.c.bf16 %v772_v11, %v770_v27 }
 0x18a   : > { %4472 = vst [vmem:[#allocation64_spill] sm:$0xff] %v3846_v51  ;;  %4473 = vst [vmem:[#allocation65_spill] sm:$0xff] %v3849_v35  ;;  %v1788_v26 = vmul.f32 %v4474_v61, %v772_v11  ;;  %v776_v15 = vadd.f32 %v775_v16, %v3012_v59  ;;  %v3864_v57 = vmul.f32 %v4476_v12, %v3782_v54 }
 0x18b   : > { %v1890_v35 = vadd.f32 %v1889_v45, %v1787_v18  ;;  %v2053_v17 = vmul.f32 %v1787_v18, %v770_v27  ;;  %v1789_v51 = vmul.f32 %v4478_v53, %v774_v52  ;;  %v3869_v23 = vmul.f32 %v4476_v12, %v3786_v28  ;;  %1401 = vst [vmem:[%s3271_s22 + $0x188] sm:$0xff] %v2598_v42  ;;  %v779_v18 = vpop.f32.mrb[52].mxu0  ;;  %v3879_v42 = vpop.f32.mrb[52].mxu1 }
 0x18c   : > { %4477 = vst [vmem:[#allocation8_spill] sm:$0xff] %v3864_v57  ;;  %1376 = vst [vmem:[%s3271_s22 + $0xc0] sm:$0xff] %v2573_v36  ;;  %v1959_v3 = vadd.f32 %v1958_v19, %v1788_v26  ;;  %v2054_v14 = vmul.f32 %v1788_v26, %v772_v11  ;;  %v2574_v61 = vpack.c.bf16 %v776_v15, %v774_v52  ;;  %vm1597_vm2 = vcmp.lt.s32.totalorder %v1533_v1, 1024  ;;  %v781_v36 = vpop.f32.mrb[53].mxu0 }
 0x18d   : > { %4479 = vst [vmem:[#allocation2_spill] sm:$0xff] %v3869_v23  ;;  %v1790_v16 = vmul.f32 %v4478_v53, %v776_v15  ;;  %v2156_v37 = vadd.f32 %v2155_v40, %v2053_v17  ;;  %v1891_v5 = vadd.f32 %v1890_v35, %v1789_v51  ;;  %v2055_v22 = vmul.f32 %v1789_v51, %v774_v52 }
 0x18e   : > { %v2225_v8 = vadd.f32 %v2224_v50, %v2054_v14  ;;  %1377 = vst [vmem:[%s3271_s22 + $0xc8] sm:$0xff] %v2574_v61  ;;  %v3877_v12 = vmul.f32 %v3864_v57, %v3782_v54  ;;  %v780_v11 = vadd.f32 %v779_v18, %v2999_v47  ;;  %v900_v53 = vadd.f32 %v3675_v32, %v2999_v47  ;;  %v3888_v14 = vpop.f32.mrb[53].mxu1  ;;  %v783_v54 = vpop.f32.mrb[54].mxu0  ;;  %v4485_v32 = vld [vmem:[#allocation10_spill] sm:$0xff] }
 0x18f   : > { %v1960_v45 = vadd.f32 %v1959_v3, %v1790_v16  ;;  %v2056_v27 = vmul.f32 %v1790_v16, %v776_v15  ;;  %v2157_v19 = vadd.f32 %v2156_v37, %v2055_v22  ;;  %v3886_v40 = vadd.f32 %v3684_v41, %v3012_v59  ;;  %4481 = vst [vmem:[#allocation9_spill] sm:$0xff] %v3888_v14  ;;  %v3897_v52 = vpop.f32.mrb[54].mxu1  ;;  %v785_v15 = vpop.f32.mrb[55].mxu0 }
 0x190   : > { %4480 = vst [vmem:[#allocation20_spill] sm:$0xff] %v3877_v12  ;;  %v782_v51 = vadd.f32 %v781_v36, %v3012_v59  ;;  %v3893_v35 = vmul.f32 %v3869_v23, %v3786_v28  ;;  %v4483_v22 = vmov 0.0   ;;  %4484 = vst [vmem:[#allocation67_spill] sm:$0xff] %v3897_v52  ;;  %v1791_v41 = vmul.f32 %v4485_v32, %v780_v11  ;;  %v3906_v28 = vpop.f32.mrb[55].mxu1  ;;  %v4487_v36 = vld [vmem:[#allocation11_spill] sm:$0xff] }
 0x191   : > { %v2226_v50 = vadd.f32 %v2225_v8, %v2056_v27  ;;  %v2530_v37 = vsel %vm1597_vm2, 1.0, %v4483_v22  ;;  %v784_v26 = vadd.f32 %v783_v54, %v2999_v47  ;;  %v3903_v8 = vmul.f32 %v4469_v24, %v3839_v13  ;;  %4486 = vst [vmem:[#allocation10_spill] sm:$0xff] %v3906_v28  ;;  %v789_v14 = vpop.f32.mrb[56].mxu0 }
 0x192   : > { %4482 = vst [vmem:[#allocation66_spill] sm:$0xff] %v3893_v35  ;;  %v2599_v17 = vpack.c.bf16 %v3886_v40, %v900_v53  ;;  %v2575_v3 = vpack.c.bf16 %v782_v51, %v780_v11  ;;  %v1792_v1 = vmul.f32 %v4485_v32, %v782_v51  ;;  %v786_v61 = vadd.f32 %v785_v15, %v3012_v59 }
 0x193   : > { %v1469_v16 = vadd.s32 408, %v2980_v33  ;;  %v1892_v27 = vadd.f32 %v1891_v5, %v1791_v41  ;;  %v2057_v18 = vmul.f32 %v1791_v41, %v780_v11  ;;  %v1793_v54 = vmul.f32 %v4487_v36, %v784_v26 }
 0x194   : > { %v3912_v35 = vmul.f32 %v2530_v37, %v900_v53  ;;  %1402 = vst [vmem:[%s3271_s22 + $0x190] sm:$0xff] %v2599_v17  ;;  %1378 = vst [vmem:[%s3271_s22 + $0xd0] sm:$0xff] %v2575_v3  ;;  %v1961_v24 = vadd.f32 %v1960_v45, %v1792_v1  ;;  %v2058_v12 = vmul.f32 %v1792_v1, %v782_v51  ;;  %v3923_v3 = vpop.f32.mrb[56].mxu1  ;;  %v791_v1 = vpop.f32.mrb[57].mxu0 }
 0x195   : > { %v2576_v23 = vpack.c.bf16 %v786_v61, %v784_v26  ;;  %v1794_v57 = vmul.f32 %v4487_v36, %v786_v61  ;;  %v2158_v28 = vadd.f32 %v2157_v19, %v2057_v18  ;;  %v1893_v32 = vadd.f32 %v1892_v27, %v1793_v54 }
 0x196   : > { %v2059_v52 = vmul.f32 %v1793_v54, %v784_v26  ;;  %v3919_v15 = vmul.f32 %v3903_v8, %v3839_v13  ;;  %v2227_v5 = vadd.f32 %v2226_v50, %v2058_v12  ;;  %v1534_v17 = vadd.s32 %v4475_v6, %v1469_v16  ;;  %v793_v50 = vpop.f32.mrb[58].mxu0 }
 0x197   : > { %1379 = vst [vmem:[%s3271_s22 + $0xd8] sm:$0xff] %v2576_v23  ;;  %v1962_v11 = vadd.f32 %v1961_v24, %v1794_v57  ;;  %v2060_v41 = vmul.f32 %v1794_v57, %v786_v61  ;;  %v790_v51 = vadd.f32 %v789_v14, %v2999_v47  ;;  %v3928_v19 = vadd.f32 %v3694_v31, %v2999_v47  ;;  %v3934_v23 = vpop.f32.mrb[57].mxu1  ;;  %v4492_v31 = vld [vmem:[#allocation13_spill] sm:$0xff]  ;;  %v795_v61 = vpop.f32.mrb[59].mxu0 }
 0x198   : > { %4488 = vst [vmem:[#allocation11_spill] sm:$0xff] %v3919_v15  ;;  %v2159_v45 = vadd.f32 %v2158_v28, %v2059_v52  ;;  %v3932_v13 = vadd.f32 %v3702_v58, %v3012_v59  ;;  %4489 = vst [vmem:[#allocation68_spill] sm:$0xff] %v3934_v23  ;;  %v792_v12 = vadd.f32 %v791_v1, %v3012_v59  ;;  %v1470_v14 = vadd.s32 416, %v2980_v33  ;;  %v3941_v52 = vpop.f32.mrb[58].mxu1 }
 0x199   : > { %v2228_v57 = vadd.f32 %v2227_v5, %v2060_v41  ;;  %v3938_v26 = vmul.f32 %v3912_v35, %v900_v53  ;;  %4491 = vst [vmem:[#allocation70_spill] sm:$0xff] %v3941_v52  ;;  %v1795_v28 = vmul.f32 %v4492_v31, %v790_v51  ;;  %v794_v58 = vadd.f32 %v793_v50, %v2999_v47  ;;  %v3950_v18 = vpop.f32.mrb[59].mxu1  ;;  %v4494_v41 = vld [vmem:[#allocation14_spill] sm:$0xff] }
 0x19a   : > { %v3946_v16 = vmul.f32 %v2530_v37, %v3886_v40  ;;  %v2600_v27 = vpack.c.bf16 %v3932_v13, %v3928_v19  ;;  %4493 = vst [vmem:[#allocation13_spill] sm:$0xff] %v3950_v18  ;;  %v2577_v53 = vpack.c.bf16 %v792_v12, %v790_v51  ;;  %v1796_v36 = vmul.f32 %v4492_v31, %v792_v12 }
 0x19b   : > { %4490 = vst [vmem:[#allocation69_spill] sm:$0xff] %v3938_v26  ;;  %v796_v54 = vadd.f32 %v795_v61, %v3012_v59  ;;  %vm1598_vm3 = vcmp.lt.s32.totalorder %v1534_v17, 1024  ;;  %v1894_v24 = vadd.f32 %v1893_v32, %v1795_v28  ;;  %v2061_v5 = vmul.f32 %v1795_v28, %v790_v51  ;;  %v799_v28 = vpop.f32.mrb[60].mxu0 }
 0x19c   : > { %v1797_v1 = vmul.f32 %v4494_v41, %v794_v58  ;;  %1403 = vst [vmem:[%s3271_s22 + $0x198] sm:$0xff] %v2600_v27  ;;  %v1535_v37 = vadd.s32 %v4475_v6, %v1470_v14  ;;  %1380 = vst [vmem:[%s3271_s22 + $0xe0] sm:$0xff] %v2577_v53  ;;  %v1963_v50 = vadd.f32 %v1962_v11, %v1796_v36  ;;  %v2531_v61 = vsel %vm1598_vm3, 1.0, %v4483_v22  ;;  %v3965_v14 = vpop.f32.mrb[60].mxu1  ;;  %v801_v53 = vpop.f32.mrb[61].mxu0 }
 0x19d   : > { %v2062_v52 = vmul.f32 %v1796_v36, %v792_v12  ;;  %v2578_v26 = vpack.c.bf16 %v796_v54, %v794_v58  ;;  %v1798_v18 = vmul.f32 %v4494_v41, %v796_v54  ;;  %v2160_v15 = vadd.f32 %v2159_v45, %v2061_v5  ;;  %4495 = vst [vmem:[#allocation14_spill] sm:$0xff] %v3965_v14  ;;  %v4499_v36 = vld [vmem:[#allocation17_spill] sm:$0xff] }
 0x19e   : > { %v1895_v23 = vadd.f32 %v1894_v24, %v1797_v1  ;;  %v2063_v31 = vmul.f32 %v1797_v1, %v794_v58  ;;  %v3963_v27 = vadd.f32 %v3724_v44, %v2999_v47  ;;  %v800_v12 = vadd.f32 %v799_v28, %v2999_v47  ;;  %v803_v58 = vpop.f32.mrb[62].mxu0 }
 0x19f   : > { %v2229_v17 = vadd.f32 %v2228_v57, %v2062_v52  ;;  %1381 = vst [vmem:[%s3271_s22 + $0xe8] sm:$0xff] %v2578_v26  ;;  %v1964_v32 = vadd.f32 %v1963_v50, %v1798_v18  ;;  %v2064_v51 = vmul.f32 %v1798_v18, %v796_v54  ;;  %vm1599_vm4 = vcmp.lt.s32.totalorder %v1535_v37, 1024  ;;  %v3972_v57 = vpop.f32.mrb[61].mxu1  ;;  %v805_v24 = vpop.f32.mrb[63].mxu0 }
 0x1a0   : > { %v2161_v11 = vadd.f32 %v2160_v15, %v2063_v31  ;;  %v3970_v45 = vadd.f32 %v3735_v21, %v3012_v59  ;;  %4496 = vst [vmem:[#allocation71_spill] sm:$0xff] %v3972_v57  ;;  %v802_v52 = vadd.f32 %v801_v53, %v3012_v59  ;;  %v3977_v44 = vmul.f32 %v3946_v16, %v3886_v40  ;;  %v3982_v18 = vpop.f32.mrb[62].mxu1  ;;  %v4501_v53 = vld [vmem:[#allocation19_spill] sm:$0xff] }
 0x1a1   : > { %v2230_v26 = vadd.f32 %v2229_v17, %v2064_v51  ;;  %v3980_v15 = vmul.f32 %v2531_v61, %v3928_v19  ;;  %4498 = vst [vmem:[#allocation73_spill] sm:$0xff] %v3982_v18  ;;  %v1799_v21 = vmul.f32 %v4499_v36, %v800_v12  ;;  %v804_v54 = vadd.f32 %v803_v58, %v2999_v47  ;;  %v3991_v40 = vpop.f32.mrb[63].mxu1 }
 0x1a2   : > { %4497 = vst [vmem:[#allocation72_spill] sm:$0xff] %v3977_v44  ;;  %v3987_v5 = vmul.f32 %v2531_v61, %v3932_v13  ;;  %v2601_v41 = vpack.c.bf16 %v3970_v45, %v3963_v27  ;;  %4500 = vst [vmem:[#allocation17_spill] sm:$0xff] %v3991_v40  ;;  %v2579_v1 = vpack.c.bf16 %v802_v52, %v800_v12  ;;  %v2532_v17 = vsel %vm1599_vm4, 1.0, %v4483_v22 }
 0x1a3   : > { %v1800_v50 = vmul.f32 %v4499_v36, %v802_v52  ;;  %v806_v31 = vadd.f32 %v805_v24, %v3012_v59  ;;  %v1896_v51 = vadd.f32 %v1895_v23, %v1799_v21  ;;  %v2065_v28 = vmul.f32 %v1799_v21, %v800_v12 }
 0x1a4   : > { %v1801_v58 = vmul.f32 %v4501_v53, %v804_v54  ;;  %1404 = vst [vmem:[%s3271_s22 + $0x1a0] sm:$0xff] %v2601_v41  ;;  %v4001_v61 = vadd.f32 %v3743_v20, %v2999_v47  ;;  %1382 = vst [vmem:[%s3271_s22 + $0xf0] sm:$0xff] %v2579_v1  ;;  %v1471_v44 = vadd.s32 424, %v2980_v33  ;;  %v4009_v20 = vadd.f32 %v3753_v29, %v3012_v59  ;;  %v4502_v41 = vld [vmem:[#allocation18_spill] sm:$0xff] }
 0x1a5   : > { %v1965_v40 = vadd.f32 %v1964_v32, %v1800_v50  ;;  %v2066_v18 = vmul.f32 %v1800_v50, %v802_v52  ;;  %v2580_v57 = vpack.c.bf16 %v806_v31, %v804_v54  ;;  %v1802_v36 = vmul.f32 %v4501_v53, %v806_v31  ;;  %v4505_v29 = vld [vmem:[#allocation22_spill] sm:$0xff] }
 0x1a6   : > { %v2162_v24 = vadd.f32 %v2161_v11, %v2065_v28  ;;  %v1897_v14 = vadd.f32 %v1896_v51, %v1801_v58  ;;  %v2067_v37 = vmul.f32 %v1801_v58, %v804_v54  ;;  %v4013_v1 = vmul.f32 %v2532_v17, %v3963_v27  ;;  %v4503_v54 = vld [vmem:[#allocation23_spill] sm:$0xff]  ;;  %v4507_v58 = vld [vmem:[#allocation26_spill] sm:$0xff] }
 0x1a7   : > { %v2231_v23 = vadd.f32 %v2230_v26, %v2066_v18  ;;  %1383 = vst [vmem:[%s3271_s22 + $0xf8] sm:$0xff] %v2580_v57  ;;  %v1966_v12 = vadd.f32 %v1965_v40, %v1802_v36  ;;  %v2068_v21 = vmul.f32 %v1802_v36, %v806_v31  ;;  %v1536_v11 = vadd.s32 %v4475_v6, %v1471_v44  ;;  %v4504_v18 = vld [vmem:[#allocation24_spill] sm:$0xff]  ;;  %v4506_v44 = vld [vmem:[#allocation25_spill] sm:$0xff] }
 0x1a8   : > { %v1898_v32 = vadd.f32 %v1897_v14, %v4502_v41  ;;  %v2163_v52 = vadd.f32 %v2162_v24, %v2067_v37  ;;  %v2602_v57 = vpack.c.bf16 %v4009_v20, %v4001_v61  ;;  %v1472_v26 = vadd.s32 432, %v2980_v33  ;;  %v4509_v41 = vld [vmem:[#allocation28_spill] sm:$0xff] }
 0x1a9   : > { %v1967_v50 = vadd.f32 %v1966_v12, %v4503_v54  ;;  %v2232_v51 = vadd.f32 %v2231_v23, %v2068_v21  ;;  %v4023_v14 = vmul.f32 %v2532_v17, %v3970_v45  ;;  %v4027_v28 = vadd.f32 %v3776_v62, %v2999_v47  ;;  %v4508_v12 = vld [vmem:[#allocation27_spill] sm:$0xff] }
 0x1aa   : > { %v1899_v40 = vadd.f32 %v1898_v32, %v4504_v18  ;;  %v2164_v31 = vadd.f32 %v2163_v52, %v4505_v29  ;;  %1405 = vst [vmem:[%s3271_s22 + $0x1a8] sm:$0xff] %v2602_v57  ;;  %v1537_v24 = vadd.s32 %v4475_v6, %v1472_v26  ;;  %v922_v37 = vadd.f32 %v3788_v60, %v3012_v59  ;;  %v4511_v57 = vld [vmem:[#allocation30_spill] sm:$0xff] }
 0x1ab   : > { %v1968_v53 = vadd.f32 %v1967_v50, %v4506_v44  ;;  %v2233_v36 = vadd.f32 %v2232_v51, %v4507_v58  ;;  %v4039_v21 = vmul.f32 %v3980_v15, %v3928_v19  ;;  %vm1600_vm5 = vcmp.lt.s32.totalorder %v1536_v11, 1024  ;;  %v4514_v44 = vld [vmem:[#allocation33_spill] sm:$0xff] }
 0x1ac   : > { %v1900_v23 = vadd.f32 %v1899_v40, %v3355_v43  ;;  %v2165_v17 = vadd.f32 %v2164_v31, %v4508_v12  ;;  %vm1601_vm6 = vcmp.lt.s32.totalorder %v1537_v24, 1024  ;;  %v2603_v52 = vpack.c.bf16 %v922_v37, %v4027_v28  ;;  %v4513_v40 = vld [vmem:[#allocation32_spill] sm:$0xff]  ;;  %v4515_v24 = vld [vmem:[#allocation34_spill] sm:$0xff] }
 0x1ad   : > { %v1969_v62 = vadd.f32 %v1968_v53, %v3362_v9  ;;  %v2234_v32 = vadd.f32 %v2233_v36, %v4509_v41  ;;  %v4048_v43 = vmul.f32 %v3987_v5, %v3932_v13  ;;  %v4052_v19 = vmul.f32 %v4013_v1, %v3963_v27  ;;  %v4510_v9 = vld [vmem:[#allocation29_spill] sm:$0xff] }
 0x1ae   : > { %v1901_v54 = vadd.f32 %v1900_v23, %v3366_v34  ;;  %v2166_v60 = vadd.f32 %v2165_v17, %v3375_v39  ;;  %v4058_v51 = vmul.f32 %v4023_v14, %v3970_v45  ;;  %v2533_v34 = vsel %vm1600_vm5, 1.0, %v4483_v22  ;;  %1406 = vst [vmem:[%s3271_s22 + $0x1b0] sm:$0xff] %v2603_v52  ;;  %v4517_v52 = vld [vmem:[#allocation37_spill] sm:$0xff] }
 0x1af   : > { %v1970_v11 = vadd.f32 %v1969_v62, %v3389_v49  ;;  %v2235_v50 = vadd.f32 %v2234_v32, %v4510_v9  ;;  %v2534_v26 = vsel %vm1601_vm6, 1.0, %v4483_v22  ;;  %v4067_v27 = vadd.f32 %v3798_v48, %v2999_v47  ;;  %v4512_v49 = vld [vmem:[#allocation31_spill] sm:$0xff] }
 0x1b0   : > { %v1902_v39 = vadd.f32 %v1901_v54, %v3396_v2  ;;  %v2167_v13 = vadd.f32 %v2166_v60, %v4511_v57  ;;  %v1473_v45 = vadd.s32 440, %v2980_v33  ;;  %v4074_v31 = vadd.f32 %v3808_v25, %v3012_v59  ;;  %v4518_v60 = vld [vmem:[#allocation36_spill] sm:$0xff] }
 0x1b1   : > { %v1971_v18 = vadd.f32 %v1970_v11, %v4512_v49  ;;  %v2236_v29 = vadd.f32 %v2235_v50, %v4513_v40  ;;  %v4079_v58 = vmul.f32 %v2533_v34, %v4001_v61  ;;  %v4082_v48 = vmul.f32 %v2533_v34, %v4009_v20  ;;  %v4519_v50 = vld [vmem:[#allocation38_spill] sm:$0xff]  ;;  %v4520_v34 = vld [vmem:[#allocation39_spill] sm:$0xff] }
 0x1b2   : > { %v1903_v2 = vadd.f32 %v1902_v39, %v3447_v7  ;;  %v2168_v53 = vadd.f32 %v2167_v13, %v4514_v44  ;;  %v1538_v12 = vadd.s32 %v4475_v6, %v1473_v45  ;;  %v2604_v25 = vpack.c.bf16 %v4074_v31, %v4067_v27  ;;  %v4516_v7 = vld [vmem:[#allocation35_spill] sm:$0xff]  ;;  %v4523_v44 = vld [vmem:[#allocation42_spill] sm:$0xff] }
 0x1b3   : > { %v1972_v36 = vadd.f32 %v1971_v18, %v3458_v63  ;;  %v2237_v23 = vadd.f32 %v2236_v29, %v4515_v24  ;;  %v4092_v41 = vmul.f32 %v2534_v26, %v4027_v28  ;;  %v1474_v32 = vadd.s32 448, %v2980_v33  ;;  %v4521_v18 = vld [vmem:[#allocation40_spill] sm:$0xff] }
 0x1b4   : > { %v1904_v17 = vadd.f32 %v1903_v2, %v3475_v4  ;;  %v2169_v62 = vadd.f32 %v2168_v53, %v4516_v7  ;;  %v4097_v11 = vmul.f32 %v2534_v26, %v922_v37  ;;  %1407 = vst [vmem:[%s3271_s22 + $0x1b8] sm:$0xff] %v2604_v25  ;;  %v4102_v9 = vadd.f32 %v3830_v46, %v2999_v47  ;;  %v4522_v46 = vld [vmem:[#allocation41_spill] sm:$0xff] }
 0x1b5   : > { %v1973_v54 = vadd.f32 %v1972_v36, %v4517_v52  ;;  %v2238_v63 = vadd.f32 %v2237_v23, %v4518_v60  ;;  %v1539_v57 = vadd.s32 %v4475_v6, %v1474_v32  ;;  %v4109_v13 = vadd.f32 %v3841_v30, %v3012_v59  ;;  %v4524_v36 = vld [vmem:[#allocation43_spill] sm:$0xff]  ;;  %v4525_v23 = vld [vmem:[#allocation44_spill] sm:$0xff]  ;;  %v4527_v7 = vld [vmem:[#allocation45_spill] sm:$0xff] }
 0x1b6   : > { %v1905_v4 = vadd.f32 %v1904_v17, %v4519_v50  ;;  %v2170_v39 = vadd.f32 %v2169_v62, %v4520_v34  ;;  %v4115_v40 = vmul.f32 %v4079_v58, %v4001_v61  ;;  %vm1602_vm7 = vcmp.lt.s32.totalorder %v1538_v12, 1024  ;;  %v4528_v32 = vld [vmem:[#allocation48_spill] sm:$0xff]  ;;  %v4530_v50 = vld [vmem:[#allocation51_spill] sm:$0xff]  ;;  %v4531_v34 = vld [vmem:[#allocation49_spill] sm:$0xff] }
 0x1b7   : > { %v1974_v49 = vadd.f32 %v1973_v54, %v3549_v38  ;;  %v2239_v26 = vadd.f32 %v2238_v63, %v4521_v18  ;;  %vm1603_vm8 = vcmp.lt.s32.totalorder %v1539_v57, 1024  ;;  %v2605_v2 = vpack.c.bf16 %v4109_v13, %v4102_v9  ;;  %v4529_v54 = vld [vmem:[#allocation46_spill] sm:$0xff] }
 0x1b8   : > { %v2171_v29 = vadd.f32 %v2170_v39, %v4522_v46  ;;  %v1906_v45 = vadd.f32 %v1905_v4, %v3553_v56  ;;  %v4125_v53 = vmul.f32 %v4082_v48, %v4009_v20  ;;  %v4129_v61 = vmul.f32 %v4092_v41, %v4027_v28 }
 0x1b9   : > { %v2240_v30 = vadd.f32 %v2239_v26, %v3574_v55  ;;  %v1975_v38 = vadd.f32 %v1974_v49, %v4523_v44  ;;  %v4134_v12 = vmul.f32 %v4097_v11, %v922_v37  ;;  %v2535_v25 = vsel %vm1602_vm7, 1.0, %v4483_v22  ;;  %1408 = vst [vmem:[%s3271_s22 + $0x1c0] sm:$0xff] %v2605_v2  ;;  %v4526_v55 = vld [vmem:[#allocation47_spill] sm:$0xff]  ;;  %v4532_v49 = vld [vmem:[#allocation52_spill] sm:$0xff]  ;;  %v4533_v26 = vld [vmem:[#allocation50_spill] sm:$0xff] }
 0x1ba   : > { %v1907_v24 = vadd.f32 %v1906_v45, %v4524_v36  ;;  %v2172_v56 = vadd.f32 %v2171_v29, %v4525_v23  ;;  %v2536_v20 = vsel %vm1603_vm8, 1.0, %v4483_v22  ;;  %v4143_v28 = vadd.f32 %v3851_v0, %v2999_v47  ;;  %v4534_v45 = vld [vmem:[#allocation53_spill] sm:$0xff] }
 0x1bb   : > { %v1976_v17 = vadd.f32 %v1975_v38, %v4526_v55  ;;  %v2241_v62 = vadd.f32 %v2240_v30, %v4527_v7  ;;  %v1475_v37 = vadd.s32 456, %v2980_v33  ;;  %v4150_v63 = vadd.f32 %v3858_v10, %v3012_v59  ;;  %v4535_v30 = vld [vmem:[#allocation54_spill] sm:$0xff] }
 0x1bc   : > { %v1908_v52 = vadd.f32 %v1907_v24, %v4528_v32  ;;  %v2173_v60 = vadd.f32 %v2172_v56, %v4529_v54  ;;  %v4155_v57 = vmul.f32 %v2535_v25, %v4067_v27  ;;  %v4158_v0 = vmul.f32 %v2535_v25, %v4074_v31  ;;  %v4536_v24 = vld [vmem:[#allocation56_spill] sm:$0xff]  ;;  %v4537_v56 = vld [vmem:[#allocation55_spill] sm:$0xff]  ;;  %v4540_v54 = vld [vmem:[#allocation9_spill] sm:$0xff] }
 0x1bd   : > { %v1977_v4 = vadd.f32 %v1976_v17, %v4530_v50  ;;  %v2242_v39 = vadd.f32 %v2241_v62, %v4531_v34  ;;  %v1540_v29 = vadd.s32 %v4475_v6, %v1475_v37  ;;  %v2606_v10 = vpack.c.bf16 %v4150_v63, %v4143_v28  ;;  %v4538_v17 = vld [vmem:[#allocation58_spill] sm:$0xff]  ;;  %v4539_v62 = vld [vmem:[#allocation57_spill] sm:$0xff]  ;;  %v4541_v37 = vld [vmem:[#allocation3_spill] sm:$0xff] }
 0x1be   : > { %v1909_v18 = vadd.f32 %v1908_v52, %v4532_v49  ;;  %v2174_v46 = vadd.f32 %v2173_v60, %v4533_v26  ;;  %v4168_v38 = vmul.f32 %v2536_v20, %v4102_v9  ;;  %v1476_v36 = vadd.s32 464, %v2980_v33  ;;  %v4543_v49 = vld [vmem:[#allocation60_spill] sm:$0xff]  ;;  %v4544_v26 = vld [vmem:[#allocation59_spill] sm:$0xff] }
 0x1bf   : > { %v1978_v2 = vadd.f32 %v1977_v4, %v4534_v45  ;;  %v2243_v44 = vadd.f32 %v2242_v39, %v4535_v30  ;;  %vm1604_vm9 = vcmp.lt.s32.totalorder %v1540_v29, 1024  ;;  %1409 = vst [vmem:[%s3271_s22 + $0x1c8] sm:$0xff] %v2606_v10  ;;  %v940_v55 = vadd.f32 %v3879_v42, %v2999_v47  ;;  %v4542_v4 = vld [vmem:[#allocation12_spill] sm:$0xff]  ;;  %v4545_v10 = vld [vmem:[#allocation15_spill] sm:$0xff] }
 0x1c0   : > { %v1910_v23 = vadd.f32 %v1909_v18, %v4536_v24  ;;  %v2175_v25 = vadd.f32 %v2174_v46, %v4537_v56  ;;  %v1541_v52 = vadd.s32 %v4475_v6, %v1476_v36  ;;  %v942_v60 = vadd.f32 %v4540_v54, %v3012_v59 }
 0x1c1   : > { %v1979_v7 = vadd.f32 %v1978_v2, %v4538_v17  ;;  %v2244_v32 = vadd.f32 %v2243_v44, %v4539_v62  ;;  %v4185_v39 = vmul.f32 %v4155_v57, %v4067_v27  ;;  %v2537_v42 = vsel %vm1604_vm9, 1.0, %v4483_v22  ;;  %v4546_v2 = vld [vmem:[#allocation4_spill] sm:$0xff]  ;;  %v4547_v27 = vld [vmem:[#allocation62_spill] sm:$0xff] }
 0x1c2   : > { %v1911_v50 = vadd.f32 %v1910_v23, %v4541_v37  ;;  %v2176_v34 = vadd.f32 %v2175_v25, %v4542_v4  ;;  %vm1605_vm10 = vcmp.lt.s32.totalorder %v1541_v52, 1024  ;;  %v2607_v29 = vpack.c.bf16 %v942_v60, %v940_v55  ;;  %v4548_v23 = vld [vmem:[#allocation5_spill] sm:$0xff]  ;;  %v4552_v37 = vld [vmem:[#allocation16_spill] sm:$0xff]  ;;  %v4553_v4 = vld [vmem:[#allocation7_spill] sm:$0xff] }
 0x1c3   : > { %v1980_v18 = vadd.f32 %v1979_v7, %v4543_v49  ;;  %v2245_v46 = vadd.f32 %v2244_v32, %v4544_v26  ;;  %v4194_v44 = vmul.f32 %v4158_v0, %v4074_v31  ;;  %v4197_v36 = vmul.f32 %v2536_v20, %v4109_v13  ;;  %v4549_v7 = vld [vmem:[#allocation6_spill] sm:$0xff]  ;;  %v4550_v32 = vld [vmem:[#allocation61_spill] sm:$0xff]  ;;  %v4551_v20 = vld [vmem:[#allocation67_spill] sm:$0xff] }
 0x1c4   : > { %v1912_v45 = vadd.f32 %v1911_v50, %v4545_v10  ;;  %v2177_v30 = vadd.f32 %v2176_v34, %v4546_v2  ;;  %v4203_v25 = vmul.f32 %v4168_v38, %v4102_v9  ;;  %v2538_v17 = vsel %vm1605_vm10, 1.0, %v4483_v22  ;;  %1410 = vst [vmem:[%s3271_s22 + $0x1d0] sm:$0xff] %v2607_v29  ;;  %v4554_v49 = vld [vmem:[#allocation10_spill] sm:$0xff]  ;;  %v4555_v26 = vld [vmem:[#allocation8_spill] sm:$0xff]  ;;  %v4556_v29 = vld [vmem:[#allocation63_spill] sm:$0xff] }
 0x1c5   : > { %v1981_v24 = vadd.f32 %v1980_v18, %v4547_v27  ;;  %v2246_v56 = vadd.f32 %v2245_v46, %v4548_v23  ;;  %v4210_v31 = vmul.f32 %v2537_v42, %v4143_v28  ;;  %v4214_v54 = vadd.f32 %v4551_v20, %v2999_v47 }
 0x1c6   : > { %v1913_v62 = vadd.f32 %v1912_v45, %v4549_v7  ;;  %v2178_v52 = vadd.f32 %v2177_v30, %v4550_v32  ;;  %v1477_v9 = vadd.s32 472, %v2980_v33  ;;  %v4221_v18 = vadd.f32 %v4554_v49, %v3012_v59  ;;  %v4557_v30 = vld [vmem:[#allocation2_spill] sm:$0xff]  ;;  %v4559_v32 = vld [vmem:[#allocation20_spill] sm:$0xff] }
 0x1c7   : > { %v1982_v50 = vadd.f32 %v1981_v24, %v4552_v37  ;;  %v2247_v34 = vadd.f32 %v2246_v56, %v4553_v4  ;;  %v4226_v45 = vmul.f32 %v2537_v42, %v4150_v63  ;;  %v4228_v2 = vmul.f32 %v2538_v17, %v940_v55  ;;  %v4558_v24 = vld [vmem:[#allocation64_spill] sm:$0xff]  ;;  %v4560_v37 = vld [vmem:[#allocation21_spill] sm:$0xff] }
 0x1c8   : > { %v1914_v46 = vadd.f32 %v1913_v62, %v4555_v26  ;;  %v2179_v10 = vadd.f32 %v2178_v52, %v4556_v29  ;;  %v1542_v56 = vadd.s32 %v4475_v6, %v1477_v9  ;;  %v2608_v7 = vpack.c.bf16 %v4221_v18, %v4214_v54  ;;  %v4561_v52 = vld [vmem:[#allocation66_spill] sm:$0xff] }
 0x1c9   : > { %v1983_v27 = vadd.f32 %v1982_v50, %v4557_v30  ;;  %v2248_v23 = vadd.f32 %v2247_v34, %v4558_v24  ;;  %v4237_v4 = vmul.f32 %v2538_v17, %v942_v60  ;;  %v1478_v42 = vadd.s32 480, %v2980_v33  ;;  %v4562_v34 = vld [vmem:[#allocation65_spill] sm:$0xff]  ;;  %v4563_v17 = vld [vmem:[#allocation68_spill] sm:$0xff]  ;;  %v4564_v30 = vld [vmem:[#allocation11_spill] sm:$0xff] }
 0x1ca   : > { %v2180_v20 = vadd.f32 %v2179_v10, %v4559_v32  ;;  %v1915_v62 = vadd.f32 %v1914_v46, %v4560_v37  ;;  %vm1606_vm11 = vcmp.lt.s32.totalorder %v1542_v56, 1024  ;;  %1411 = vst [vmem:[%s3271_s22 + $0x1d8] sm:$0xff] %v2608_v7  ;;  %v4245_v50 = vadd.f32 %v3923_v3, %v2999_v47 }
 0x1cb   : > { %v2249_v49 = vadd.f32 %v2248_v23, %v4561_v52  ;;  %v1984_v26 = vadd.f32 %v1983_v27, %v3903_v8  ;;  %v1543_v46 = vadd.s32 %v4475_v6, %v1478_v42  ;;  %v4252_v10 = vadd.f32 %v4563_v17, %v3012_v59  ;;  %v4565_v23 = vld [vmem:[#allocation69_spill] sm:$0xff] }
 0x1cc   : > { %v2181_v9 = vadd.f32 %v2180_v20, %v4562_v34  ;;  %v1916_v29 = vadd.f32 %v1915_v62, %v3912_v35  ;;  %v2118_v27 = vmul.f32 %v4197_v36, %v4109_v13  ;;  %v2119_v3 = vmul.f32 %v4210_v31, %v4143_v28  ;;  %v4566_v20 = vld [vmem:[#allocation72_spill] sm:$0xff] }
 0x1cd   : > { %v2250_v24 = vadd.f32 %v2249_v49, %v4564_v30  ;;  %v1985_v8 = vadd.f32 %v1984_v26, %v3946_v16  ;;  %v2539_v7 = vsel %vm1606_vm11, 1.0, %v4483_v22  ;;  %v2609_v32 = vpack.c.bf16 %v4252_v10, %v4245_v50 }
 0x1ce   : > { %v2182_v56 = vadd.f32 %v2181_v9, %v4565_v23  ;;  %v1917_v35 = vadd.f32 %v1916_v29, %v3980_v15  ;;  %v2120_v16 = vmul.f32 %v4226_v45, %v4150_v63  ;;  %v2121_v13 = vmul.f32 %v4228_v2, %v940_v55 }
 0x1cf   : > { %v2251_v37 = vadd.f32 %v2250_v24, %v4566_v20  ;;  %v1986_v62 = vadd.f32 %v1985_v8, %v3987_v5  ;;  %v2122_v15 = vmul.f32 %v4237_v4, %v942_v60  ;;  %vm1607_vm12 = vcmp.lt.s32.totalorder %v1543_v46, 1024  ;;  %1412 = vst [vmem:[%s3271_s22 + $0x1e0] sm:$0xff] %v2609_v32  ;;  %v4567_v5 = vld [vmem:[#allocation70_spill] sm:$0xff] }
 0x1d0   : > { %v2183_v28 = vadd.f32 %v2182_v56, %v4039_v21  ;;  %v1918_v42 = vadd.f32 %v1917_v35, %v4013_v1  ;;  %v1857_v26 = vmul.f32 %v2539_v7, %v4214_v54  ;;  %v954_v34 = vadd.f32 %v4567_v5, %v2999_v47  ;;  %v4568_v1 = vld [vmem:[#allocation13_spill] sm:$0xff]  ;;  %v4569_v8 = vld [vmem:[#allocation14_spill] sm:$0xff] }
 0x1d1   : > { %v2252_v52 = vadd.f32 %v2251_v37, %v4048_v43  ;;  %v1987_v49 = vadd.f32 %v1986_v62, %v4023_v14  ;;  %v1479_v21 = vadd.s32 488, %v2980_v33  ;;  %v956_v60 = vadd.f32 %v4568_v1, %v3012_v59 }
 0x1d2   : > { %v2184_v63 = vadd.f32 %v2183_v28, %v4052_v19  ;;  %v1919_v55 = vadd.f32 %v1918_v42, %v4079_v58  ;;  %v1858_v14 = vmul.f32 %v2539_v7, %v4221_v18  ;;  %v2540_v29 = vsel %vm1607_vm12, 1.0, %v4483_v22 }
 0x1d3   : > { %v2253_v9 = vadd.f32 %v2252_v52, %v4058_v51  ;;  %v1988_v43 = vadd.f32 %v1987_v49, %v4082_v48  ;;  %v1544_v58 = vadd.s32 %v4475_v6, %v1479_v21  ;;  %v2610_v17 = vpack.c.bf16 %v956_v60, %v954_v34 }
 0x1d4   : > { %v2185_v46 = vadd.f32 %v2184_v63, %v4115_v40  ;;  %v1920_v19 = vadd.f32 %v1919_v55, %v4092_v41  ;;  %v960_v51 = vadd.f32 %v4569_v8, %v2999_v47  ;;  %v1480_v48 = vadd.s32 496, %v2980_v33  ;;  %v4570_v41 = vld [vmem:[#allocation71_spill] sm:$0xff] }
 0x1d5   : > { %v2254_v30 = vadd.f32 %v2253_v9, %v4125_v53  ;;  %v1989_v24 = vadd.f32 %v1988_v43, %v4097_v11  ;;  %vm1608_vm13 = vcmp.lt.s32.totalorder %v1544_v58, 1024  ;;  %1413 = vst [vmem:[%s3271_s22 + $0x1e8] sm:$0xff] %v2610_v17  ;;  %v962_v40 = vadd.f32 %v4570_v41, %v3012_v59 }
 0x1d6   : > { %v2186_v23 = vadd.f32 %v2185_v46, %v4129_v61  ;;  %v1921_v56 = vadd.f32 %v1920_v19, %v4155_v57  ;;  %v2541_v11 = vsel %vm1608_vm13, 1.0, %v4483_v22  ;;  %v1545_v7 = vadd.s32 %v4475_v6, %v1480_v48 }
 0x1d7   : > { %v2255_v35 = vadd.f32 %v2254_v30, %v4134_v12  ;;  %v1990_v53 = vadd.f32 %v1989_v24, %v4158_v0  ;;  %v1859_v57 = vmul.f32 %v2540_v29, %v4245_v50  ;;  %v1860_v20 = vmul.f32 %v2540_v29, %v4252_v10 }
 0x1d8   : > { %v2187_v32 = vadd.f32 %v2186_v23, %v4185_v39  ;;  %v1922_v61 = vadd.f32 %v1921_v56, %v4168_v38  ;;  %v1861_v12 = vmul.f32 %v2541_v11, %v954_v34  ;;  %v2611_v28 = vpack.c.bf16 %v962_v40, %v960_v51 }
 0x1d9   : > { %v2256_v37 = vadd.f32 %v2255_v35, %v4194_v44  ;;  %v1991_v62 = vadd.f32 %v1990_v53, %v4197_v36  ;;  %v1862_v52 = vmul.f32 %v2541_v11, %v956_v60  ;;  %vm1609_vm14 = vcmp.lt.s32.totalorder %v1545_v7, 1024 }
 0x1da   : > { %v2188_v0 = vadd.f32 %v2187_v32, %v4203_v25  ;;  %v1923_v42 = vadd.f32 %v1922_v61, %v4210_v31  ;;  %v2123_v38 = vmul.f32 %v1857_v26, %v4214_v54  ;;  %v2124_v5 = vmul.f32 %v1858_v14, %v4221_v18  ;;  %1414 = vst [vmem:[%s3271_s22 + $0x1f0] sm:$0xff] %v2611_v28 }
 0x1db   : > { %v2257_v39 = vadd.f32 %v2256_v37, %v2118_v27  ;;  %v1992_v49 = vadd.f32 %v1991_v62, %v4226_v45  ;;  %v2125_v36 = vmul.f32 %v1859_v57, %v4245_v50  ;;  %v2126_v55 = vmul.f32 %v1860_v20, %v4252_v10 }
 0x1dc   : > { %v2189_v63 = vadd.f32 %v2188_v0, %v2119_v3  ;;  %v1924_v44 = vadd.f32 %v1923_v42, %v4228_v2  ;;  %v2542_v21 = vsel %vm1609_vm14, 1.0, %v4483_v22  ;;  %v1481_v27 = vadd.s32 504, %v2980_v33  ;;  %v4571_v3 = vld [vmem:[#allocation73_spill] sm:$0xff] }
 0x1dd   : > { %v2258_v25 = vadd.f32 %v2257_v39, %v2120_v16  ;;  %v1993_v31 = vadd.f32 %v1992_v49, %v4237_v4  ;;  %v2127_v54 = vmul.f32 %v1861_v12, %v954_v34  ;;  %v2128_v9 = vmul.f32 %v1862_v52, %v956_v60  ;;  %v4572_v4 = vld [vmem:[#allocation17_spill] sm:$0xff] }
 0x1de   : > { %v2190_v45 = vadd.f32 %v2189_v63, %v2121_v13  ;;  %v1925_v1 = vadd.f32 %v1924_v44, %v1857_v26  ;;  %v964_v2 = vadd.f32 %v4571_v3, %v2999_v47  ;;  %v1546_v50 = vadd.s32 %v4475_v6, %v1481_v27 }
 0x1df   : > { %v2259_v18 = vadd.f32 %v2258_v25, %v2122_v15  ;;  %v1994_v43 = vadd.f32 %v1993_v31, %v1858_v14  ;;  %v1863_v16 = vmul.f32 %v2542_v21, %v960_v51  ;;  %v966_v46 = vadd.f32 %v4572_v4, %v3012_v59 }
 0x1e0   : > { %v2191_v29 = vadd.f32 %v2190_v45, %v2123_v38  ;;  %v1926_v10 = vadd.f32 %v1925_v1, %v1859_v57  ;;  %v1864_v13 = vmul.f32 %v2542_v21, %v962_v40  ;;  %vm1610_vm15 = vcmp.lt.s32.totalorder %v1546_v50, 1024 }
 0x1e1   : > { %v2260_v19 = vadd.f32 %v2259_v18, %v2124_v5  ;;  %v1995_v33 = vadd.f32 %v1994_v43, %v1860_v20  ;;  %v2543_v15 = vsel %vm1610_vm15, 1.0, %v4483_v22  ;;  %v2612_v60 = vpack.c.bf16 %v966_v46, %v964_v2 }
 0x1e2   : > { %v2192_v26 = vadd.f32 %v2191_v29, %v2125_v36  ;;  %v1927_v34 = vadd.f32 %v1926_v10, %v1861_v12  ;;  %v1865_v58 = vmul.f32 %v2543_v15, %v964_v2  ;;  %v1866_v6 = vmul.f32 %v2543_v15, %v966_v46 }
 0x1e3   : > { %v2261_v14 = vadd.f32 %v2260_v19, %v2126_v55  ;;  %v1996_v47 = vadd.f32 %v1995_v33, %v1862_v52  ;;  %v2129_v24 = vmul.f32 %v1863_v16, %v960_v51  ;;  %1415 = vst [vmem:[%s3271_s22 + $0x1f8] sm:$0xff] %v2612_v60  ;;  %v2130_v48 = vmul.f32 %v1864_v13, %v962_v40 }
 0x1e4   : > { %v2193_v17 = vadd.f32 %v2192_v26, %v2127_v54  ;;  %v1928_v30 = vadd.f32 %v1927_v34, %v1863_v16  ;;  %v2131_v41 = vmul.f32 %v1865_v58, %v964_v2  ;;  %v2132_v22 = vmul.f32 %v1866_v6, %v966_v46 }
 0x1e5   : > { %v2262_v59 = vadd.f32 %v2261_v14, %v2128_v9  ;;  %v1997_v8 = vadd.f32 %v1996_v47, %v1864_v13 }
 0x1e6   : > { %v2194_v23 = vadd.f32 %v2193_v17, %v2129_v24  ;;  %v1929_v56 = vadd.f32 %v1928_v30, %v1865_v58 }
 0x1e7   : > { %v2263_v35 = vadd.f32 %v2262_v59, %v2130_v48  ;;  %v1998_v53 = vadd.f32 %v1997_v8, %v1866_v6 }
 0x1e8   : > { %v1930_v11 = vrot.slane %v1929_v56, 4  ;;  %v2195_v7 = vadd.f32 %v2194_v23, %v2131_v41 }
 0x1e9   : > { %v1999_v32 = vrot.slane %v1998_v53, 4  ;;  %v2264_v61 = vadd.f32 %v2263_v35, %v2132_v22 }
 0x1ea   : > { %v1931_v57 = vadd.f32 %v1930_v11, %v1929_v56  ;;  %v2196_v20 = vrot.slane %v2195_v7, 4 }
 0x1eb   : > { %v2000_v37 = vadd.f32 %v1999_v32, %v1998_v53  ;;  %v2265_v51 = vrot.slane %v2264_v61, 4 }
 0x1ec   : > { %v1932_v62 = vrot.slane %v1931_v57, 2  ;;  %v2197_v12 = vadd.f32 %v2196_v20, %v2195_v7 }
 0x1ed   : > { %v2001_v28 = vrot.slane %v2000_v37, 2  ;;  %v2266_v40 = vadd.f32 %v2265_v51, %v2264_v61 }
 0x1ee   : > { %v1933_v0 = vadd.f32 %v1932_v62, %v1931_v57  ;;  %v2198_v42 = vrot.slane %v2197_v12, 2 }
 0x1ef   : > { %v2002_v52 = vadd.f32 %v2001_v28, %v2000_v37  ;;  %v2267_v39 = vrot.slane %v2266_v40, 2 }
 0x1f0   : > { %v1934_v49 = vrot.slane %v1933_v0, 1  ;;  %v2199_v38 = vadd.f32 %v2198_v42, %v2197_v12 }
 0x1f1   : > { %v2003_v5 = vrot.slane %v2002_v52, 1  ;;  %v2268_v63 = vadd.f32 %v2267_v39, %v2266_v40 }
 0x1f2   : > { %v2200_v44 = vrot.slane %v2199_v38, 1  ;;  %v1935_v55 = vadd.f32 %v1934_v49, %v1933_v0 }
 0x1f3   : > { %v2269_v36 = vrot.slane %v2268_v63, 1  ;;  %v2004_v31 = vadd.f32 %v2003_v5, %v2002_v52 }
 0x1f4   : > { %v2201_v25 = vadd.f32 %v2200_v44, %v2199_v38 }
 0x1f5   : > { %v2270_v21 = vadd.f32 %v2269_v36, %v2268_v63 }
 0x1f6   : > { %v2272_v27 = vsel %vm2271_vm0, %v1935_v55, %v2201_v25 }
 0x1f7   : > { %v2275_v45 = vsel %vm2274_vm1, %v2272_v27, 0.0  ;;  %v2273_v1 = vsel %vm2271_vm0, %v2004_v31, %v2270_v21 }
 0x1f8   : > { %2277 = vst [vmem:[%s218_s26] sm:$0xff] %v2275_v45  ;;  %v2276_v54 = vsel %vm2274_vm1, %v2273_v1, 0.0 }
 0x1f9   : > { %2278 = vst [vmem:[%s218_s26 + $0x8] sm:$0xff] %v2276_v54 }
 0x1fa PF: > { %s15_s15 = sadd.s32 1, %s2708_s15  }
 0x1fb   : > { %p12_p5 = scmp.ge.s32.totalorder %s15_s15, 4  }
 0x1fd   :  { %14 = sbr.rel (!%p12_p5) target bundleno = 1 (0x1), region = 74 }

// kernel: _lambda_.7
= control target key start
LH: loop header
LB: loop body
LE: loop exit
PB: predicated region body
PF: predicated region fallthrough
CT: control target
= control target key end

     0   :  { %s644_s6 = smov 0   ;;  %s839_s0 = inlined_call_operand.vmem [shape: f32[2,8,512], index: 0, kind: input, shape index: {}]   ;;  %s840_s1 = inlined_call_operand.vmem [shape: s32[2,8,128], index: 1, kind: output, shape index: {}]  }
   0x1 LB: > { %s481_s7 = sadd.s32 4294967295, %s603_s6   ;;  %p485_p0 = scmp.ge.s32.totalorder %s603_s6, 1  ;;  %s603_s6 = sphi %s644_s6, %s11_s6  }
   0x2   : > { %p87_p1 = scmp.lt.s32.totalorder %s603_s6, 3 }
   0x4   : > { %p88_p2 = pnand %p485_p0, %p87_p1 }
   0x5   : > { %p106_p3 = scmp.lt.s32.totalorder (!%p88_p2), %s481_s7, 1  ;;  %v123_v0 = vlaneseq (!%p88_p2)  ;;  %vm136_vm3 = vcmask (!%p88_p2), 1043459   ;;  %v633_v9 = vmov (!%p88_p2), -1.0   ;;  %v707_v42 = vmov (!%p88_p2), 0   ;;  %s719_s17 = smov (!%p88_p2), 0  }
   0x6   : > { %91 = sbr.rel (%p88_p2) target bundleno = 1195 (0x4ab), region = 24 }
   0x7   : > { %v652_v1 = vand.u32 (!%p88_p2), 127, %v123_v0 }
   0x9   : > { %v663_v2 = vadd.s32 (!%p88_p2), 128, %v652_v1  ;;  %v666_v3 = vadd.s32 (!%p88_p2), 256, %v652_v1  ;;  %v669_v4 = vadd.s32 (!%p88_p2), 384, %v652_v1 }
   0xd   : > { %s844_s7 = smov (!%p106_p3, %s481_s7), 1 }
   0xe   : > { %s491_s8 = sshll.u32 %s844_s7, 5  ;;  %s488_s9 = sshll.u32 %s844_s7, 3 }
   0xf   : > { %s110_s12 = scalar_lea.vmem %s839_s0, %s491_s8  ;;  %s660_s15 = scalar_lea.vmem %s840_s1, %s488_s9 }
  0x10   : > { %v671_v5 = vld [vmem:[%s110_s12] sm:$0xff]  ;;  %v673_v6 = vld [vmem:[%s110_s12 + $0x8] sm:$0xff]  ;;  %v675_v7 = vld [vmem:[%s110_s12 + $0x10] sm:$0xff] }
  0x11   : > { %v677_v8 = vld [vmem:[%s110_s12 + $0x18] sm:$0xff]  ;;  %vm119_vm0 = vcmp.gt.f32.partialorder %v671_v5, 0.5  ;;  %vm120_vm1 = vcmp.gt.f32.partialorder %v673_v6, 0.5  ;;  %vm121_vm2 = vcmp.gt.f32.partialorder %v675_v7, 0.5 }
  0x12   : > { %vm122_vm4 = vcmp.gt.f32.partialorder %v677_v8, 0.5  ;;  %v129_v10 = vsel %vm120_vm1, 1e+10, %v633_v9   ;;  %v130_v11 = vsel %vm121_vm2, 1e+10, %v633_v9   ;;  %v132_v12 = vsel %vm119_vm0, %v652_v1, 512 }
  0x13   : > { %v131_v13 = vsel %vm122_vm4, 1e+10, %v633_v9   ;;  %v133_v14 = vsel %vm120_vm1, %v663_v2, 512  ;;  %v134_v15 = vsel %vm121_vm2, %v666_v3, 512  ;;  %v135_v16 = vsel %vm122_vm4, %v669_v4, 512 }
  0x14   : > { %v137_v17 = vsel %vm136_vm3, %v132_v12, 2147483647  ;;  %v138_v18 = vsel %vm136_vm3, %v133_v14, 2147483647  ;;  %v139_v19 = vsel %vm136_vm3, %v134_v15, 2147483647 }
  0x15   : > { %v140_v20 = vsel %vm136_vm3, %v135_v16, 2147483647  ;;  %vm141_vm5 = vcmp.lt.s32.totalorder %v137_v17, %v138_v18  ;;  %v128_v21 = vsel %vm119_vm0, 1e+10, %v633_v9  }
  0x16   : > { %v142_v22 = vsel %vm141_vm5, %v137_v17, %v138_v18  ;;  %vm143_vm6 = vcmp.lt.s32.totalorder %v139_v19, %v140_v20 }
  0x17   : > { %v144_v23 = vsel %vm143_vm6, %v139_v19, %v140_v20 }
  0x18   : > { %vm145_vm7 = vcmp.lt.s32.totalorder %v142_v22, %v144_v23 }
  0x19   : > { %v146_v24 = vsel %vm145_vm7, %v142_v22, %v144_v23 }
  0x1a   : > { %v148_v25 = vshra.s32 %v146_v24, 16  ;;  %v147_v27 = vand.u32 65535, %v146_v24 }
  0x1c   : > { %v150_v26 = vcvt.s32.f32 %v148_v25  ;;  %v149_v28 = vcvt.s32.f32 %v147_v27 }
  0x1e   : > { %151 = vmin.xlane.f32.xlu0 %v150_v26 }
  0xab   : > { %v152_v29 = vpop.xlane.xlu0 %151 }
  0xac   : > { %vm153_vm8 = vcmp.eq.f32.partialorder %v150_v26, %v152_v29  ;;  %v158_v31 = vcvt.f32.s32 %v152_v29 }
  0xad   : > { %v154_v30 = vsel %vm153_vm8, %v149_v28, inf }
  0xae   : > { %155 = vmin.xlane.f32.xlu0 %v154_v30  ;;  %v159_v33 = vshll.u32 %v158_v31, 16 }
 0x13b   : > { %v156_v32 = vpop.xlane.xlu0 %155 }
 0x13c   : > { %v157_v34 = vcvt.f32.s32 %v156_v32 }
 0x13e   : > { %v160_v35 = vadd.s32 %v159_v33, %v157_v34 }
 0x140   : > { %v161_v36 = vrot.slane %v160_v35, 4 }
 0x142   : > { %vm162_vm9 = vcmp.lt.s32.totalorder %v160_v35, %v161_v36 }
 0x143   : > { %v163_v37 = vsel %vm162_vm9, %v160_v35, %v161_v36 }
 0x144   : > { %v164_v38 = vrot.slane %v163_v37, 2 }
 0x146   : > { %vm165_vm10 = vcmp.lt.s32.totalorder %v163_v37, %v164_v38 }
 0x147   : > { %v166_v39 = vsel %vm165_vm10, %v163_v37, %v164_v38 }
 0x148   : > { %v167_v40 = vrot.slane %v166_v39, 1 }
 0x14a   : > { %vm168_vm11 = vcmp.lt.s32.totalorder %v166_v39, %v167_v40 }
 0x14b   : > { %v169_v41 = vsel %vm168_vm11, %v166_v39, %v167_v40 }
 0x14c   : > { %492 = vpush %v169_v41 }
 0x17d   : > { %s493_s16 = spop %492 }
 0x17e   : > { %p171_p4 = scmp.eq.s32.totalorder %s493_s16, 512 }
 0x180   : > { %s846_s16 = smov (%p171_p4, %s493_s16), 0 }
 0x181 LB: >> { %v185_v43 = vstv %s631_s17  ;;  %v187_v44 = vstv %s611_s16  ;;  %vm197_vm12 = vcmask 1040384   ;;  %s178_s17 = sadd.s32 1, %s631_s17   ;;  %s631_s17 = sphi %s719_s17, %s178_s17   ;;  %v627_v21 = vphi %v128_v21, %v780_v21   ;;  %v623_v10 = vphi %v129_v10, %v784_v10   ;;  %v619_v11 = vphi %v130_v11, %v788_v11   ;;  %v615_v13 = vphi %v131_v13, %v792_v13   ;;  %s611_s16 = sphi %s846_s16, %s503_s16   ;;  %v607_v42 = vphi %v707_v42, %v842_v42  }
 0x182   : >> { %vm186_vm13 = vcmp.eq.s32.totalorder %v652_v1, %v185_v43  ;;  %vm189_vm14 = vcmp.eq.s32.totalorder %v652_v1, %v187_v44  ;;  %vm190_vm15 = vcmp.eq.s32.totalorder %v663_v2, %v187_v44  ;;  %vm191_vm5 = vcmp.eq.s32.totalorder %v666_v3, %v187_v44  ;;  %p175_p5 = scmp.ge.s32.totalorder %s178_s17, 64  }
 0x183   : >> { %vm192_vm6 = vcmp.eq.s32.totalorder %v669_v4, %v187_v44  ;;  %v193_v45 = vsel %vm189_vm14, %v671_v5, 0.0  ;;  %v194_v46 = vsel %vm190_vm15, %v673_v6, 0.0  ;;  %v195_v47 = vsel %vm191_vm5, %v675_v7, 0.0 }
 0x184   : >> { %v196_v48 = vsel %vm192_vm6, %v677_v8, 0.0  ;;  %v198_v49 = vsel %vm197_vm12, %v193_v45, 0.0  ;;  %v199_v50 = vsel %vm197_vm12, %v194_v46, 0.0  ;;  %v201_v51 = vsel %vm197_vm12, %v195_v47, 0.0 }
 0x185   : >> { %v200_v52 = vadd.f32 %v199_v50, %v198_v49  ;;  %v203_v53 = vsel %vm197_vm12, %v196_v48, 0.0  ;;  %v752_v42 = vsel %vm186_vm13, %v187_v44, %v607_v42   ;;  %v242_v55 = vrot.slane %v193_v45, 2 }
 0x186   : >> { %v841_v54 = vmov %v752_v42  ;;  %v243_v56 = vrot.slane %v194_v46, 2  ;;  %v244_v57 = vrot.slane %v195_v47, 2  ;;  %v245_v58 = vrot.slane %v196_v48, 2 }
 0x187   : >> { %v218_v59 = vrot.slane %v193_v45, 1  ;;  %v202_v60 = vadd.f32 %v201_v51, %v200_v52  ;;  %v250_v61 = vsel %vm197_vm12, %v242_v55, 0.0  ;;  %v219_v62 = vrot.slane %v194_v46, 1  ;;  %404 = vst [vmem:[%s660_s15] sm:$0xff] (%p175_p5), %v841_v54 }
 0x188   : >> { %v220_v63 = vrot.slane %v195_v47, 1  ;;  %v251_v0 = vsel %vm197_vm12, %v243_v56, 0.0  ;;  %v253_v9 = vsel %vm197_vm12, %v244_v57, 0.0  ;;  %v221_v12 = vrot.slane %v196_v48, 1 }
 0x189   : >> { %v204_v14 = vadd.f32 %v203_v53, %v202_v60  ;;  %v252_v15 = vadd.f32 %v251_v0, %v250_v61  ;;  %v226_v16 = vsel %vm197_vm12, %v218_v59, 0.0  ;;  %v227_v17 = vsel %vm197_vm12, %v219_v62, 0.0 }
 0x18a   : >> { %v255_v18 = vsel %vm197_vm12, %v245_v58, 0.0  ;;  %v228_v19 = vadd.f32 %v227_v17, %v226_v16  ;;  %v229_v20 = vsel %vm197_vm12, %v220_v63, 0.0  ;;  %v231_v23 = vsel %vm197_vm12, %v221_v12, 0.0 }
 0x18b   : >> { %205 = vadd.xlane.f32.xlu0 %v204_v14  ;;  %v254_v22 = vadd.f32 %v253_v9, %v252_v15 }
 0x18c   : >> { %v230_v24 = vadd.f32 %v229_v20, %v228_v19 }
 0x18d   : >> { %v256_v25 = vadd.f32 %v255_v18, %v254_v22 }
 0x18e   : >> { %v232_v26 = vadd.f32 %v231_v23, %v230_v24 }
 0x18f   : >> { %257 = vadd.xlane.f32.xlu1 %v256_v25 }
 0x190   : >> { %233 = vadd.xlane.f32.xlu0 %v232_v26 }
 0x218   : >> { %v206_v27 = vpop.xlane.xlu0 %205 }
 0x219   : >> { %v207_v28 = vrot.slane %v206_v27, 4 }
 0x21b   : >> { %v208_v29 = vadd.f32 %v207_v28, %v206_v27 }
 0x21c   : >> { %v258_v30 = vpop.xlane.xlu1 %257 }
 0x21d   : >> { %v209_v31 = vrot.slane %v208_v29, 2  ;;  %v259_v32 = vrot.slane %v258_v30, 4  ;;  %v234_v33 = vpop.xlane.xlu0 %233 }
 0x21e   : >> { %v235_v34 = vrot.slane %v234_v33, 4 }
 0x21f   : >> { %v260_v35 = vadd.f32 %v259_v32, %v258_v30  ;;  %v210_v36 = vadd.f32 %v209_v31, %v208_v29 }
 0x220   : >> { %v236_v37 = vadd.f32 %v235_v34, %v234_v33 }
 0x221   : >> { %v261_v38 = vrot.slane %v260_v35, 2  ;;  %v211_v39 = vrot.slane %v210_v36, 1 }
 0x222   : >> { %v237_v40 = vrot.slane %v236_v37, 2 }
 0x223   : >> { %v212_v41 = vadd.f32 %v211_v39, %v210_v36  ;;  %v262_v42 = vadd.f32 %v261_v38, %v260_v35 }
 0x224   : >> { %v238_v43 = vadd.f32 %v237_v40, %v236_v37 }
 0x225   : >> { %494 = vpush %v212_v41  ;;  %v263_v44 = vrot.slane %v262_v42, 1 }
 0x226   : >> { %v239_v45 = vrot.slane %v238_v43, 1 }
 0x227   : >> { %v264_v47 = vadd.f32 %v263_v44, %v262_v42 }
 0x228   : >> { %v240_v46 = vadd.f32 %v239_v45, %v238_v43 }
 0x22a   : >> { %496 = vpush %v240_v46 }
 0x22b   : >> { %498 = vpush %v264_v47 }
 0x256   : >> { %s495_s18 = spop %494 }
 0x257   : >> { %v266_v48 = vstv %s495_s18 }
 0x258   : >> { %v267_v49 = vsub.f32 %v671_v5, %v266_v48  ;;  %v268_v50 = vsub.f32 %v673_v6, %v266_v48  ;;  %v269_v51 = vsub.f32 %v675_v7, %v266_v48  ;;  %v270_v52 = vsub.f32 %v677_v8, %v266_v48 }
 0x25a   : >> { %v281_v53 = vmul.f32 %v267_v49, %v267_v49  ;;  %v282_v60 = vmul.f32 %v268_v50, %v268_v50  ;;  %v283_v61 = vmul.f32 %v269_v51, %v269_v51  ;;  %v284_v62 = vmul.f32 %v270_v52, %v270_v52 }
 0x25b   : >> { %s497_s19 = spop %496 }
 0x25c   : >> { %v271_v55 = vstv %s497_s19  ;;  %s499_s20 = spop %498 }
 0x25d   : >> { %v272_v56 = vsub.f32 %v671_v5, %v271_v55  ;;  %v273_v57 = vsub.f32 %v673_v6, %v271_v55  ;;  %v274_v58 = vsub.f32 %v675_v7, %v271_v55  ;;  %v275_v59 = vsub.f32 %v677_v8, %v271_v55 }
 0x25e   : >> { %v276_v63 = vstv %s499_s20 }
 0x25f   : >> { %v285_v0 = vmul.f32 %v272_v56, %v272_v56  ;;  %v286_v9 = vmul.f32 %v273_v57, %v273_v57  ;;  %v287_v12 = vmul.f32 %v274_v58, %v274_v58  ;;  %v288_v14 = vmul.f32 %v275_v59, %v275_v59 }
 0x260   : >> { %v277_v15 = vsub.f32 %v671_v5, %v276_v63  ;;  %v278_v16 = vsub.f32 %v673_v6, %v276_v63  ;;  %v279_v17 = vsub.f32 %v675_v7, %v276_v63  ;;  %v280_v18 = vsub.f32 %v677_v8, %v276_v63 }
 0x261   : >> { %v293_v19 = vrot.slane %v285_v0, 1  ;;  %v294_v20 = vrot.slane %v286_v9, 1  ;;  %v295_v22 = vrot.slane %v287_v12, 1  ;;  %v296_v23 = vrot.slane %v288_v14, 1 }
 0x262   : >> { %v305_v24 = vmul.f32 %v277_v15, %v277_v15  ;;  %v306_v25 = vmul.f32 %v278_v16, %v278_v16  ;;  %v307_v26 = vmul.f32 %v279_v17, %v279_v17  ;;  %v308_v27 = vmul.f32 %v280_v18, %v280_v18 }
 0x263   : >> { %v301_v28 = vadd.f32 %v293_v19, %v281_v53  ;;  %v302_v29 = vadd.f32 %v294_v20, %v282_v60  ;;  %v303_v30 = vadd.f32 %v295_v22, %v283_v61  ;;  %v304_v31 = vadd.f32 %v296_v23, %v284_v62 }
 0x264   : >> { %v313_v32 = vrot.slane %v305_v24, 2  ;;  %v314_v33 = vrot.slane %v306_v25, 2  ;;  %v315_v34 = vrot.slane %v307_v26, 2  ;;  %v316_v35 = vrot.slane %v308_v27, 2 }
 0x266   : >> { %v321_v36 = vadd.f32 %v313_v32, %v301_v28  ;;  %v322_v37 = vadd.f32 %v314_v33, %v302_v29  ;;  %v323_v38 = vadd.f32 %v315_v34, %v303_v30  ;;  %v324_v39 = vadd.f32 %v316_v35, %v304_v31 }
 0x268   : >> { %v329_v40 = vrot.slane %v321_v36, 5  ;;  %v330_v41 = vrot.slane %v322_v37, 5  ;;  %v331_v42 = vrot.slane %v323_v38, 5  ;;  %v332_v43 = vrot.slane %v324_v39, 5 }
 0x26a   : >> { %v337_v44 = vmin.f32 %v627_v21, %v329_v40  ;;  %v338_v45 = vmin.f32 %v623_v10, %v330_v41  ;;  %v339_v46 = vmin.f32 %v619_v11, %v331_v42  ;;  %v340_v47 = vmin.f32 %v615_v13, %v332_v43 }
 0x26b   : >> { %v842_v42 = vmov %v841_v54 }
 0x26c   : >> { %v780_v21 = vsel %vm119_vm0, %v337_v44, -1.0   ;;  %v784_v10 = vsel %vm120_vm1, %v338_v45, -1.0   ;;  %v788_v11 = vsel %vm121_vm2, %v339_v46, -1.0   ;;  %v792_v13 = vsel %vm122_vm4, %v340_v47, -1.0  }
 0x26d   : >> { %v345_v48 = vsel %vm136_vm3, %v780_v21, -inf  ;;  %v346_v49 = vsel %vm136_vm3, %v784_v10, -inf  ;;  %v347_v50 = vsel %vm136_vm3, %v788_v11, -inf  ;;  %v348_v51 = vsel %vm136_vm3, %v792_v13, -inf }
 0x26e   : >> { %v349_v52 = vmax.f32 %v345_v48, %v346_v49  ;;  %v350_v53 = vmax.f32 %v347_v50, %v348_v51 }
 0x270   : >> { %v351_v55 = vmax.f32 %v349_v52, %v350_v53 }
 0x272   : >> { %352 = vmax.xlane.f32.xlu1 %v351_v55 }
 0x2ff   : >> { %v353_v56 = vpop.xlane.xlu1 %352 }
 0x300   : >> { %v354_v57 = vrot.slane %v353_v56, 4 }
 0x302   : >> { %v355_v58 = vmax.f32 %v353_v56, %v354_v57 }
 0x304   : >> { %v356_v59 = vrot.slane %v355_v58, 2 }
 0x306   : >> { %v357_v60 = vmax.f32 %v355_v58, %v356_v59 }
 0x308   : >> { %v358_v61 = vrot.slane %v357_v60, 1 }
 0x30a   : >> { %v359_v62 = vmax.f32 %v357_v60, %v358_v61 }
 0x30c   : >> { %500 = vpush %v359_v62 }
 0x33d   : >> { %s501_s21 = spop %500 }
 0x33e   : >> { %v361_v63 = vstv %s501_s21 }
 0x33f   : >> { %vm362_vm7 = vcmp.eq.f32.partialorder %v780_v21, %v361_v63  ;;  %vm363_vm8 = vcmp.eq.f32.partialorder %v784_v10, %v361_v63  ;;  %vm364_vm9 = vcmp.eq.f32.partialorder %v788_v11, %v361_v63  ;;  %vm365_vm10 = vcmp.eq.f32.partialorder %v792_v13, %v361_v63 }
 0x340   : >> { %v366_v0 = vsel %vm362_vm7, %v652_v1, 512  ;;  %v367_v9 = vsel %vm363_vm8, %v663_v2, 512  ;;  %v368_v12 = vsel %vm364_vm9, %v666_v3, 512  ;;  %v369_v14 = vsel %vm365_vm10, %v669_v4, 512 }
 0x341   : >> { %v370_v15 = vsel %vm136_vm3, %v366_v0, 2147483647  ;;  %v371_v16 = vsel %vm136_vm3, %v367_v9, 2147483647  ;;  %v372_v17 = vsel %vm136_vm3, %v368_v12, 2147483647 }
 0x342   : >> { %v373_v18 = vsel %vm136_vm3, %v369_v14, 2147483647  ;;  %vm374_vm11 = vcmp.lt.s32.totalorder %v370_v15, %v371_v16 }
 0x343   : >> { %vm376_vm12 = vcmp.lt.s32.totalorder %v372_v17, %v373_v18  ;;  %v375_v19 = vsel %vm374_vm11, %v370_v15, %v371_v16 }
 0x344   : >> { %v377_v20 = vsel %vm376_vm12, %v372_v17, %v373_v18 }
 0x345   : >> { %vm378_vm13 = vcmp.lt.s32.totalorder %v375_v19, %v377_v20 }
 0x346   : >> { %v379_v22 = vsel %vm378_vm13, %v375_v19, %v377_v20 }
 0x347   : >> { %v381_v23 = vshra.s32 %v379_v22, 16  ;;  %v380_v25 = vand.u32 65535, %v379_v22 }
 0x349   : >> { %v383_v24 = vcvt.s32.f32 %v381_v23  ;;  %v382_v27 = vcvt.s32.f32 %v380_v25 }
 0x34b   : >> { %384 = vmin.xlane.f32.xlu0 %v383_v24 }
 0x3d8   : >> { %v385_v26 = vpop.xlane.xlu0 %384 }
 0x3d9   : >> { %vm386_vm14 = vcmp.eq.f32.partialorder %v383_v24, %v385_v26  ;;  %v391_v29 = vcvt.f32.s32 %v385_v26 }
 0x3da   : >> { %v387_v28 = vsel %vm386_vm14, %v382_v27, inf }
 0x3db   : >> { %388 = vmin.xlane.f32.xlu1 %v387_v28  ;;  %v392_v31 = vshll.u32 %v391_v29, 16 }
 0x468   : >> { %v389_v30 = vpop.xlane.xlu1 %388 }
 0x469   : >> { %v390_v32 = vcvt.f32.s32 %v389_v30 }
 0x46b   : >> { %v393_v33 = vadd.s32 %v392_v31, %v390_v32 }
 0x46d   : >> { %v394_v34 = vrot.slane %v393_v33, 4 }
 0x46f   : >> { %vm395_vm15 = vcmp.lt.s32.totalorder %v393_v33, %v394_v34 }
 0x470   : >> { %v396_v35 = vsel %vm395_vm15, %v393_v33, %v394_v34 }
 0x471   : >> { %v397_v36 = vrot.slane %v396_v35, 2 }
 0x473   : >> { %vm398_vm5 = vcmp.lt.s32.totalorder %v396_v35, %v397_v36 }
 0x474   : >> { %v399_v37 = vsel %vm398_vm5, %v396_v35, %v397_v36 }
 0x475   : >> { %v400_v38 = vrot.slane %v399_v37, 1 }
 0x477   : >> { %vm401_vm6 = vcmp.lt.s32.totalorder %v399_v37, %v400_v38 }
 0x478   : >> { %v402_v39 = vsel %vm401_vm6, %v399_v37, %v400_v38 }
 0x479   : >> { %502 = vpush %v402_v39 }
 0x4a4   : > { %177 = sbr.rel (!%p175_p5) target bundleno = 385 (0x181), region = 61 }
 0x4aa   : >> { %s503_s16 = spop %502  }
 0x4ab PF: > { %s11_s6 = sadd.s32 1, %s603_s6  }
 0x4ac   : > { %p8_p6 = scmp.ge.s32.totalorder %s11_s6, 4  }
 0x4ae   :  { %10 = sbr.rel (!%p8_p6) target bundleno = 1 (0x1), region = 72 }

// kernel: _lambda_.8
= control target key start
LH: loop header
LB: loop body
LE: loop exit
PB: predicated region body
PF: predicated region fallthrough
CT: control target
= control target key end

     0   :  { %vm724_vm0 = vcmask 1040384   ;;  %vm727_vm1 = vcmask 1041408   ;;  %s1278_s1 = inlined_call_operand.vmem [shape: bf16[256,256], index: 1, kind: input, shape index: {}]   ;;  %s1279_s0 = inlined_call_operand.vmem [shape: f32[128,256], index: 0, kind: input, shape index: {}]   ;;  %s1280_s2 = inlined_call_operand.vmem [shape: f32[1,256], index: 2, kind: input, shape index: {}]   ;;  %s1281_s3 = inlined_call_operand.vmem [shape: bf16[128,256], index: 3, kind: output, shape index: {0}]   ;;  %s1282_s4 = inlined_call_operand.vmem [shape: f32[1,8,256], index: 4, kind: output, shape index: {1}]  }
   0x1   :  { %v836_v0 = vld [vmem:[%s1278_s1 + $0x4] ss:$8 sps:$4 sm:$0xff]   ;;  %v838_v1 = vld [vmem:[%s1278_s1] ss:$8 sps:$4 sm:$0xff]   ;;  %v839_v2 = vld [vmem:[%s1278_s1 + $0x14] ss:$8 sps:$4 sm:$0xff]  }
   0x2   :  { %268 = vmatprep.subr.bf16.mxu0 %v836_v0  ;;  %804 = vmatprep.subr.bf16.mxu1 %v836_v0  ;;  %v841_v3 = vld [vmem:[%s1278_s1 + $0x10] ss:$8 sps:$4 sm:$0xff]   ;;  %v842_v4 = vld [vmem:[%s1278_s1 + $0x24] ss:$8 sps:$4 sm:$0xff]   ;;  %v844_v5 = vld [vmem:[%s1278_s1 + $0x20] ss:$8 sps:$4 sm:$0xff]  }
   0x3   :  { %269 = vmatpush1.bf16.msra.mxu0 %v838_v1  ;;  %820 = vmatpush1.bf16.msra.mxu1 %v838_v1  ;;  %v845_v6 = vld [vmem:[%s1278_s1 + $0x34] ss:$8 sps:$4 sm:$0xff]   ;;  %v847_v7 = vld [vmem:[%s1278_s1 + $0x30] ss:$8 sps:$4 sm:$0xff]   ;;  %v848_v8 = vld [vmem:[%s1278_s1 + $0x44] ss:$8 sps:$4 sm:$0xff]  }
   0x4   :  { %270 = vmatprep.subr.bf16.mxu0 %v839_v2  ;;  %805 = vmatprep.subr.bf16.mxu1 %v839_v2  ;;  %v850_v9 = vld [vmem:[%s1278_s1 + $0x40] ss:$8 sps:$4 sm:$0xff]   ;;  %v851_v10 = vld [vmem:[%s1278_s1 + $0x54] ss:$8 sps:$4 sm:$0xff]   ;;  %v853_v11 = vld [vmem:[%s1278_s1 + $0x50] ss:$8 sps:$4 sm:$0xff]  }
   0x5   :  { %v854_v12 = vld [vmem:[%s1278_s1 + $0x64] ss:$8 sps:$4 sm:$0xff]   ;;  %v19_v14 = vld [vmem:[%s1279_s0 + $0x18] sm:$0xff]  ;;  %v856_v16 = vld [vmem:[%s1278_s1 + $0x60] ss:$8 sps:$4 sm:$0xff]  }
   0x6   :  { %v17_v13 = vld [vmem:[%s1279_s0 + $0x8] sm:$0xff]  ;;  %v857_v17 = vld [vmem:[%s1278_s1 + $0x74] ss:$8 sps:$4 sm:$0xff]   ;;  %v859_v21 = vld [vmem:[%s1278_s1 + $0x70] ss:$8 sps:$4 sm:$0xff]  }
   0x7   :  { %271 = vmatpush1.bf16.msra.mxu0 %v841_v3  ;;  %821 = vmatpush1.bf16.msra.mxu1 %v841_v3  ;;  %v49_v15 = vpack.c.bf16 %v19_v14, %v17_v13  ;;  %v33_v18 = vld [vmem:[%s1279_s0 + $0x88] sm:$0xff]  ;;  %v35_v19 = vld [vmem:[%s1279_s0 + $0x98] sm:$0xff]  ;;  %v16_v38 = vld [vmem:[%s1279_s0] sm:$0xff] }
   0x8   :  { %272 = vmatprep.subr.bf16.mxu0 %v842_v4  ;;  %806 = vmatprep.subr.bf16.mxu1 %v842_v4  ;;  %v57_v20 = vpack.c.bf16 %v35_v19, %v33_v18  ;;  %v860_v22 = vld [vmem:[%s1278_s1 + $0x84] ss:$8 sps:$4 sm:$0xff]   ;;  %v862_v23 = vld [vmem:[%s1278_s1 + $0x80] ss:$8 sps:$4 sm:$0xff]   ;;  %v863_v24 = vld [vmem:[%s1278_s1 + $0x94] ss:$8 sps:$4 sm:$0xff]  }
   0x9   :  { %300 = vmatprep.mubr.bf16.mxu0 %v49_v15  ;;  %v865_v25 = vld [vmem:[%s1278_s1 + $0x90] ss:$8 sps:$4 sm:$0xff]   ;;  %v866_v26 = vld [vmem:[%s1278_s1 + $0xa4] ss:$8 sps:$4 sm:$0xff]   ;;  %v868_v27 = vld [vmem:[%s1278_s1 + $0xa0] ss:$8 sps:$4 sm:$0xff]  }
   0xa   :  { %340 = vmatprep.mubr.bf16.mxu1 %v57_v20  ;;  %v869_v28 = vld [vmem:[%s1278_s1 + $0xb4] ss:$8 sps:$4 sm:$0xff]   ;;  %v871_v29 = vld [vmem:[%s1278_s1 + $0xb0] ss:$8 sps:$4 sm:$0xff]   ;;  %v872_v30 = vld [vmem:[%s1278_s1 + $0xc4] ss:$8 sps:$4 sm:$0xff]  }
   0xb   :  { %273 = vmatpush1.bf16.msra.mxu0 %v844_v5  ;;  %822 = vmatpush1.bf16.msra.mxu1 %v844_v5  ;;  %v874_v31 = vld [vmem:[%s1278_s1 + $0xc0] ss:$8 sps:$4 sm:$0xff]   ;;  %v875_v32 = vld [vmem:[%s1278_s1 + $0xd4] ss:$8 sps:$4 sm:$0xff]   ;;  %v877_v33 = vld [vmem:[%s1278_s1 + $0xd0] ss:$8 sps:$4 sm:$0xff]  }
   0xc   :  { %274 = vmatprep.subr.bf16.mxu0 %v845_v6  ;;  %807 = vmatprep.subr.bf16.mxu1 %v845_v6  ;;  %v878_v34 = vld [vmem:[%s1278_s1 + $0xe4] ss:$8 sps:$4 sm:$0xff]   ;;  %v880_v35 = vld [vmem:[%s1278_s1 + $0xe0] ss:$8 sps:$4 sm:$0xff]   ;;  %v881_v36 = vld [vmem:[%s1278_s1 + $0xf4] ss:$8 sps:$4 sm:$0xff]  }
   0xd   :  { %v883_v37 = vld [vmem:[%s1278_s1 + $0xf0] ss:$8 sps:$4 sm:$0xff]   ;;  %v21_v40 = vld [vmem:[%s1279_s0 + $0x28] sm:$0xff]  ;;  %v32_v41 = vld [vmem:[%s1279_s0 + $0x80] sm:$0xff] }
   0xe   :  { %v18_v39 = vld [vmem:[%s1279_s0 + $0x10] sm:$0xff]  ;;  %v23_v43 = vld [vmem:[%s1279_s0 + $0x38] sm:$0xff]  ;;  %v37_v44 = vld [vmem:[%s1279_s0 + $0xa8] sm:$0xff] }
   0xf   :  { %275 = vmatpush1.bf16.msra.mxu0 %v847_v7  ;;  %823 = vmatpush1.bf16.msra.mxu1 %v847_v7  ;;  %v34_v42 = vld [vmem:[%s1279_s0 + $0x90] sm:$0xff]  ;;  %v39_v45 = vld [vmem:[%s1279_s0 + $0xb8] sm:$0xff]  ;;  %v48_v46 = vpack.c.bf16 %v18_v39, %v16_v38  ;;  %v51_v48 = vpack.c.bf16 %v23_v43, %v21_v40  ;;  %v20_v50 = vld [vmem:[%s1279_s0 + $0x20] sm:$0xff] }
  0x10   :  { %276 = vmatprep.subr.bf16.mxu0 %v848_v8  ;;  %808 = vmatprep.subr.bf16.mxu1 %v848_v8  ;;  %v56_v47 = vpack.c.bf16 %v34_v42, %v32_v41  ;;  %v59_v49 = vpack.c.bf16 %v39_v45, %v37_v44  ;;  %v22_v51 = vld [vmem:[%s1279_s0 + $0x30] sm:$0xff]  ;;  %v25_v52 = vld [vmem:[%s1279_s0 + $0x48] sm:$0xff]  ;;  %v36_v53 = vld [vmem:[%s1279_s0 + $0xa0] sm:$0xff] }
  0x11   :  { %v38_v54 = vld [vmem:[%s1279_s0 + $0xb0] sm:$0xff]  ;;  %v27_v55 = vld [vmem:[%s1279_s0 + $0x58] sm:$0xff]  ;;  %v41_v56 = vld [vmem:[%s1279_s0 + $0xc8] sm:$0xff]  ;;  %v50_v58 = vpack.c.bf16 %v22_v51, %v20_v50 }
  0x12   :  { %v43_v57 = vld [vmem:[%s1279_s0 + $0xd8] sm:$0xff]  ;;  %v58_v59 = vpack.c.bf16 %v38_v54, %v36_v53  ;;  %v53_v60 = vpack.c.bf16 %v27_v55, %v25_v52  ;;  %v24_v62 = vld [vmem:[%s1279_s0 + $0x40] sm:$0xff]  ;;  %v26_v63 = vld [vmem:[%s1279_s0 + $0x50] sm:$0xff] }
  0x13   :  { %277 = vmatpush1.bf16.msra.mxu0 %v850_v9  ;;  %824 = vmatpush1.bf16.msra.mxu1 %v850_v9  ;;  %v61_v61 = vpack.c.bf16 %v43_v57, %v41_v56  ;;  %v29_v0 = vld [vmem:[%s1279_s0 + $0x68] sm:$0xff]  ;;  %v40_v1 = vld [vmem:[%s1279_s0 + $0xc0] sm:$0xff]  ;;  %v42_v2 = vld [vmem:[%s1279_s0 + $0xd0] sm:$0xff]  ;;  %v52_v6 = vpack.c.bf16 %v26_v63, %v24_v62 }
  0x14   :  { %278 = vmatprep.subr.bf16.mxu0 %v851_v10  ;;  %809 = vmatprep.subr.bf16.mxu1 %v851_v10  ;;  %v31_v3 = vld [vmem:[%s1279_s0 + $0x78] sm:$0xff]  ;;  %v45_v4 = vld [vmem:[%s1279_s0 + $0xe8] sm:$0xff]  ;;  %v60_v7 = vpack.c.bf16 %v42_v2, %v40_v1  ;;  %v28_v10 = vld [vmem:[%s1279_s0 + $0x60] sm:$0xff] }
  0x15   :  { %v47_v5 = vld [vmem:[%s1279_s0 + $0xf8] sm:$0xff]  ;;  %v55_v8 = vpack.c.bf16 %v31_v3, %v29_v0  ;;  %v46_v13 = vld [vmem:[%s1279_s0 + $0xf0] sm:$0xff]  ;;  %v96_v19 = vld [vmem:[%s1280_s2] sm:$0x3] }
  0x16   :  { %v63_v9 = vpack.c.bf16 %v47_v5, %v45_v4 }
  0x17   :  { %279 = vmatpush1.bf16.msra.mxu0 %v853_v11  ;;  %825 = vmatpush1.bf16.msra.mxu1 %v853_v11  ;;  %v30_v11 = vld [vmem:[%s1279_s0 + $0x70] sm:$0xff] }
  0x18   :  { %280 = vmatprep.subr.bf16.mxu0 %v854_v12  ;;  %810 = vmatprep.subr.bf16.mxu1 %v854_v12  ;;  %v44_v12 = vld [vmem:[%s1279_s0 + $0xe0] sm:$0xff]  ;;  %v54_v14 = vpack.c.bf16 %v30_v11, %v28_v10 }
  0x19   :  { %v62_v15 = vpack.c.bf16 %v46_v13, %v44_v12 }
  0x1b   :  { %281 = vmatpush1.bf16.msra.mxu0 %v856_v16  ;;  %826 = vmatpush1.bf16.msra.mxu1 %v856_v16  ;;  %v98_v16 = vlaneseq }
  0x1c   :  { %282 = vmatprep.subr.bf16.mxu0 %v857_v17  ;;  %811 = vmatprep.subr.bf16.mxu1 %v857_v17 }
  0x1d   :  { %v99_v17 = vshrl.u32 %v98_v16, 7 }
  0x1f   :  { %283 = vmatpush1.bf16.msra.mxu0 %v859_v21  ;;  %827 = vmatpush1.bf16.msra.mxu1 %v859_v21  ;;  %v100_v18 = vsub.s32 0, %v99_v17  ;;  %v104_v20 = vsub.s32 1, %v99_v17 }
  0x20   :  { %284 = vmatprep.subr.bf16.mxu0 %v860_v22  ;;  %812 = vmatprep.subr.bf16.mxu1 %v860_v22 }
  0x21   :  { %v1104_v21 = vrot.slane %v96_v19, %v100_v18  ;;  %v1106_v22 = vrot.slane %v96_v19, %v104_v20 }
  0x23   :  { %285 = vmatpush1.bf16.msra.mxu0 %v862_v23  ;;  %828 = vmatpush1.bf16.msra.mxu1 %v862_v23 }
  0x24   :  { %286 = vmatprep.subr.bf16.mxu0 %v863_v24  ;;  %813 = vmatprep.subr.bf16.mxu1 %v863_v24 }
  0x27   :  { %287 = vmatpush1.bf16.msra.mxu0 %v865_v25  ;;  %829 = vmatpush1.bf16.msra.mxu1 %v865_v25 }
  0x28   :  { %288 = vmatprep.subr.bf16.mxu0 %v866_v26  ;;  %814 = vmatprep.subr.bf16.mxu1 %v866_v26 }
  0x2b   :  { %289 = vmatpush1.bf16.msra.mxu0 %v868_v27  ;;  %830 = vmatpush1.bf16.msra.mxu1 %v868_v27 }
  0x2c   :  { %290 = vmatprep.subr.bf16.mxu0 %v869_v28  ;;  %815 = vmatprep.subr.bf16.mxu1 %v869_v28 }
  0x2f   :  { %291 = vmatpush1.bf16.msra.mxu0 %v871_v29  ;;  %831 = vmatpush1.bf16.msra.mxu1 %v871_v29 }
  0x30   :  { %292 = vmatprep.subr.bf16.mxu0 %v872_v30  ;;  %816 = vmatprep.subr.bf16.mxu1 %v872_v30 }
  0x33   :  { %293 = vmatpush1.bf16.msra.mxu0 %v874_v31  ;;  %832 = vmatpush1.bf16.msra.mxu1 %v874_v31 }
  0x34   :  { %294 = vmatprep.subr.bf16.mxu0 %v875_v32  ;;  %817 = vmatprep.subr.bf16.mxu1 %v875_v32 }
  0x37   :  { %295 = vmatpush1.bf16.msra.mxu0 %v877_v33  ;;  %833 = vmatpush1.bf16.msra.mxu1 %v877_v33 }
  0x38   :  { %296 = vmatprep.subr.bf16.mxu0 %v878_v34  ;;  %818 = vmatprep.subr.bf16.mxu1 %v878_v34 }
  0x3b   :  { %297 = vmatpush1.bf16.msra.mxu0 %v880_v35  ;;  %834 = vmatpush1.bf16.msra.mxu1 %v880_v35 }
  0x3c   :  { %298 = vmatprep.subr.bf16.mxu0 %v881_v36  ;;  %819 = vmatprep.subr.bf16.mxu1 %v881_v36 }
  0x3f   :  { %299 = vmatpush1.bf16.msra.mxu0 %v883_v37  ;;  %835 = vmatpush1.bf16.msra.mxu1 %v883_v37 }
  0x42   :  { %301 = vmatmul.mubr.bf16.vlgmr.msra.gmra.mrb[0].mxu0 %v48_v46  ;;  %341 = vmatmul.mubr.bf16.vlgmr.msra.gmra.mrb[0].mxu1 %v56_v47 }
  0x43   :  { %310 = vmatprep.mubr.bf16.mxu0 %v51_v48  ;;  %350 = vmatprep.mubr.bf16.mxu1 %v59_v49 }
  0x4a   :  { %311 = vmatmul.mubr.bf16.gmra.mrb[4].mxu0 %v50_v58  ;;  %351 = vmatmul.mubr.bf16.gmra.mrb[4].mxu1 %v58_v59 }
  0x4b   :  { %320 = vmatprep.mubr.bf16.mxu0 %v53_v60  ;;  %360 = vmatprep.mubr.bf16.mxu1 %v61_v61 }
  0x52   :  { %321 = vmatmul.mubr.bf16.gmra.mrb[8].mxu0 %v52_v6  ;;  %361 = vmatmul.mubr.bf16.gmra.mrb[8].mxu1 %v60_v7 }
  0x53   :  { %330 = vmatprep.mubr.bf16.mxu0 %v55_v8  ;;  %370 = vmatprep.mubr.bf16.mxu1 %v63_v9 }
  0x5a   :  { %331 = vmatmul.mubr.bf16.gmra.mrb[12].mxu0 %v54_v14  ;;  %371 = vmatmul.mubr.bf16.gmra.mrb[12].mxu1 %v62_v15 }
 0x115   :  { %v302_v23 = vpop.f32.mrb[0].mxu0  ;;  %v342_v24 = vpop.f32.mrb[0].mxu1 }
 0x116   :  { %v303_v25 = vadd.f32 %v302_v23, %v1104_v21  ;;  %v304_v26 = vpop.f32.mrb[1].mxu0  ;;  %v1110_v27 = vadd.f32 %v342_v24, %v1104_v21  ;;  %v344_v28 = vpop.f32.mrb[1].mxu1 }
 0x117   :  { %v305_v29 = vadd.f32 %v304_v26, %v1106_v22  ;;  %v306_v30 = vpop.f32.mrb[2].mxu0  ;;  %v1114_v31 = vadd.f32 %v344_v28, %v1106_v22  ;;  %v346_v32 = vpop.f32.mrb[2].mxu1 }
 0x118   :  { %v307_v33 = vadd.f32 %v306_v30, %v1104_v21  ;;  %v308_v34 = vpop.f32.mrb[3].mxu0  ;;  %v348_v35 = vpop.f32.mrb[3].mxu1  ;;  %v1121_v39 = vadd.f32 %v346_v32, %v1104_v21  ;;  %v650_v40 = vmul.f32 %v303_v25, %v303_v25 }
 0x119   :  { %v788_v36 = vpack.c.bf16 %v305_v29, %v303_v25  ;;  %v309_v37 = vadd.f32 %v308_v34, %v1106_v22  ;;  %v796_v38 = vpack.c.bf16 %v1114_v31, %v1110_v27  ;;  %v651_v41 = vmul.f32 %v305_v29, %v305_v29 }
 0x11a   :  { %v608_v42 = vadd.f32 %v307_v33, %v303_v25  ;;  %v652_v43 = vmul.f32 %v307_v33, %v307_v33  ;;  %v1130_v47 = vadd.f32 %v348_v35, %v1106_v22 }
 0x11b   :  { %477 = vst [vmem:[%s1281_s3] sm:$0xff] %v788_v36  ;;  %v789_v44 = vpack.c.bf16 %v309_v37, %v307_v33  ;;  %v629_v45 = vadd.f32 %v309_v37, %v305_v29  ;;  %v653_v46 = vmul.f32 %v309_v37, %v309_v37  ;;  %485 = vst [vmem:[%s1281_s3 + $0x40] sm:$0xff] %v796_v38 }
 0x11c   :  { %v682_v48 = vadd.f32 %v652_v43, %v650_v40  ;;  %v797_v51 = vpack.c.bf16 %v1130_v47, %v1121_v39 }
 0x11d   :  { %478 = vst [vmem:[%s1281_s3 + $0x8] sm:$0xff] %v789_v44  ;;  %v703_v49 = vadd.f32 %v653_v46, %v651_v41  ;;  %v312_v50 = vpop.f32.mrb[4].mxu0  ;;  %v352_v52 = vpop.f32.mrb[4].mxu1 }
 0x11e   :  { %v313_v53 = vadd.f32 %v312_v50, %v1104_v21  ;;  %v314_v54 = vpop.f32.mrb[5].mxu0  ;;  %v1139_v55 = vadd.f32 %v352_v52, %v1104_v21  ;;  %v354_v56 = vpop.f32.mrb[5].mxu1  ;;  %486 = vst [vmem:[%s1281_s3 + $0x48] sm:$0xff] %v797_v51 }
 0x11f   :  { %v315_v57 = vadd.f32 %v314_v54, %v1106_v22  ;;  %v316_v58 = vpop.f32.mrb[6].mxu0  ;;  %v1146_v59 = vadd.f32 %v354_v56, %v1106_v22  ;;  %v356_v60 = vpop.f32.mrb[6].mxu1 }
 0x120   :  { %v609_v61 = vadd.f32 %v608_v42, %v313_v53  ;;  %v654_v62 = vmul.f32 %v313_v53, %v313_v53  ;;  %v317_v63 = vadd.f32 %v316_v58, %v1104_v21  ;;  %v318_v0 = vpop.f32.mrb[7].mxu0  ;;  %v358_v1 = vpop.f32.mrb[7].mxu1  ;;  %v1159_v15 = vadd.f32 %v356_v60, %v1104_v21 }
 0x121   :  { %v790_v2 = vpack.c.bf16 %v315_v57, %v313_v53  ;;  %v630_v3 = vadd.f32 %v629_v45, %v315_v57  ;;  %v655_v4 = vmul.f32 %v315_v57, %v315_v57  ;;  %v319_v5 = vadd.f32 %v318_v0, %v1106_v22 }
 0x122   :  { %v683_v6 = vadd.f32 %v682_v48, %v654_v62  ;;  %v610_v7 = vadd.f32 %v609_v61, %v317_v63  ;;  %v656_v8 = vmul.f32 %v317_v63, %v317_v63  ;;  %v798_v9 = vpack.c.bf16 %v1146_v59, %v1139_v55 }
 0x123   :  { %479 = vst [vmem:[%s1281_s3 + $0x10] sm:$0xff] %v790_v2  ;;  %v704_v10 = vadd.f32 %v703_v49, %v655_v4  ;;  %v791_v11 = vpack.c.bf16 %v319_v5, %v317_v63  ;;  %v631_v12 = vadd.f32 %v630_v3, %v319_v5  ;;  %v657_v13 = vmul.f32 %v319_v5, %v319_v5 }
 0x124   :  { %v684_v14 = vadd.f32 %v683_v6, %v656_v8  ;;  %487 = vst [vmem:[%s1281_s3 + $0x50] sm:$0xff] %v798_v9  ;;  %v1162_v16 = vadd.f32 %v358_v1, %v1106_v22 }
 0x125   :  { %480 = vst [vmem:[%s1281_s3 + $0x18] sm:$0xff] %v791_v11  ;;  %v705_v17 = vadd.f32 %v704_v10, %v657_v13  ;;  %v322_v18 = vpop.f32.mrb[8].mxu0  ;;  %v362_v19 = vpop.f32.mrb[8].mxu1 }
 0x126   :  { %v323_v20 = vadd.f32 %v322_v18, %v1104_v21  ;;  %v324_v23 = vpop.f32.mrb[9].mxu0  ;;  %v799_v24 = vpack.c.bf16 %v1162_v16, %v1159_v15  ;;  %v364_v25 = vpop.f32.mrb[9].mxu1  ;;  %v1172_v29 = vadd.f32 %v362_v19, %v1104_v21 }
 0x127   :  { %v325_v26 = vadd.f32 %v324_v23, %v1106_v22  ;;  %v326_v28 = vpop.f32.mrb[10].mxu0  ;;  %v366_v30 = vpop.f32.mrb[10].mxu1  ;;  %v1179_v36 = vadd.f32 %v364_v25, %v1106_v22 }
 0x128   :  { %v611_v32 = vadd.f32 %v610_v7, %v323_v20  ;;  %v658_v33 = vmul.f32 %v323_v20, %v323_v20  ;;  %v327_v34 = vadd.f32 %v326_v28, %v1104_v21  ;;  %v328_v35 = vpop.f32.mrb[11].mxu0  ;;  %488 = vst [vmem:[%s1281_s3 + $0x58] sm:$0xff] %v799_v24  ;;  %v368_v37 = vpop.f32.mrb[11].mxu1  ;;  %v1183_v46 = vadd.f32 %v366_v30, %v1104_v21 }
 0x129   :  { %v792_v38 = vpack.c.bf16 %v325_v26, %v323_v20  ;;  %v632_v40 = vadd.f32 %v631_v12, %v325_v26  ;;  %v659_v41 = vmul.f32 %v325_v26, %v325_v26  ;;  %v329_v42 = vadd.f32 %v328_v35, %v1106_v22 }
 0x12a   :  { %v685_v43 = vadd.f32 %v684_v14, %v658_v33  ;;  %v612_v44 = vadd.f32 %v611_v32, %v327_v34  ;;  %v660_v45 = vmul.f32 %v327_v34, %v327_v34  ;;  %v800_v53 = vpack.c.bf16 %v1179_v36, %v1172_v29 }
 0x12b   :  { %481 = vst [vmem:[%s1281_s3 + $0x20] sm:$0xff] %v792_v38  ;;  %v706_v48 = vadd.f32 %v705_v17, %v659_v41  ;;  %v793_v49 = vpack.c.bf16 %v329_v42, %v327_v34  ;;  %v633_v50 = vadd.f32 %v632_v40, %v329_v42  ;;  %v661_v51 = vmul.f32 %v329_v42, %v329_v42 }
 0x12c   :  { %v686_v52 = vadd.f32 %v685_v43, %v660_v45  ;;  %v1194_v57 = vadd.f32 %v368_v37, %v1106_v22  ;;  %489 = vst [vmem:[%s1281_s3 + $0x60] sm:$0xff] %v800_v53  ;;  %v666_v26 = vmul.f32 %v1110_v27, %v1110_v27  ;;  %v667_v33 = vmul.f32 %v1114_v31, %v1114_v31 }
 0x12d   :  { %482 = vst [vmem:[%s1281_s3 + $0x28] sm:$0xff] %v793_v49  ;;  %v707_v54 = vadd.f32 %v706_v48, %v661_v51  ;;  %v332_v56 = vpop.f32.mrb[12].mxu0  ;;  %v372_v58 = vpop.f32.mrb[12].mxu1  ;;  %v673_v51 = vmul.f32 %v1162_v16, %v1162_v16 }
 0x12e   :  { %v333_v60 = vadd.f32 %v332_v56, %v1104_v21  ;;  %v334_v61 = vpop.f32.mrb[13].mxu0  ;;  %v1201_v62 = vadd.f32 %v372_v58, %v1104_v21  ;;  %v374_v63 = vpop.f32.mrb[13].mxu1  ;;  %v801_v2 = vpack.c.bf16 %v1194_v57, %v1183_v46  ;;  %v675_v58 = vmul.f32 %v1179_v36, %v1179_v36 }
 0x12f   :  { %v335_v0 = vadd.f32 %v334_v61, %v1106_v22  ;;  %v336_v1 = vpop.f32.mrb[14].mxu0  ;;  %v1207_v3 = vadd.f32 %v374_v63, %v1106_v22  ;;  %v376_v4 = vpop.f32.mrb[14].mxu1  ;;  %v676_v63 = vmul.f32 %v1183_v46, %v1183_v46 }
 0x130   :  { %v613_v5 = vadd.f32 %v612_v44, %v333_v60  ;;  %v662_v6 = vmul.f32 %v333_v60, %v333_v60  ;;  %v337_v7 = vadd.f32 %v336_v1, %v1104_v21  ;;  %v338_v8 = vpop.f32.mrb[15].mxu0  ;;  %v378_v9 = vpop.f32.mrb[15].mxu1  ;;  %490 = vst [vmem:[%s1281_s3 + $0x68] sm:$0xff] %v801_v2  ;;  %v377_v32 = vadd.f32 %v376_v4, %v1104_v21 }
 0x131   :  { %v794_v10 = vpack.c.bf16 %v335_v0, %v333_v60  ;;  %v634_v11 = vadd.f32 %v633_v50, %v335_v0  ;;  %v663_v12 = vmul.f32 %v335_v0, %v335_v0  ;;  %v339_v13 = vadd.f32 %v338_v8, %v1106_v22 }
 0x132   :  { %v687_v14 = vadd.f32 %v686_v52, %v662_v6  ;;  %v614_v17 = vadd.f32 %v613_v5, %v337_v7  ;;  %v664_v18 = vmul.f32 %v337_v7, %v337_v7  ;;  %v802_v19 = vpack.c.bf16 %v1207_v3, %v1201_v62 }
 0x133   :  { %483 = vst [vmem:[%s1281_s3 + $0x30] sm:$0xff] %v794_v10  ;;  %v708_v20 = vadd.f32 %v707_v54, %v663_v12  ;;  %v795_v23 = vpack.c.bf16 %v339_v13, %v337_v7  ;;  %v635_v24 = vadd.f32 %v634_v11, %v339_v13  ;;  %v665_v25 = vmul.f32 %v339_v13, %v339_v13 }
 0x134   :  { %v615_v28 = vadd.f32 %v614_v17, %v1110_v27  ;;  %v688_v30 = vadd.f32 %v687_v14, %v664_v18  ;;  %491 = vst [vmem:[%s1281_s3 + $0x70] sm:$0xff] %v802_v19  ;;  %v379_v37 = vadd.f32 %v378_v9, %v1106_v22  ;;  %v668_v27 = vmul.f32 %v1121_v39, %v1121_v39 }
 0x135   :  { %484 = vst [vmem:[%s1281_s3 + $0x38] sm:$0xff] %v795_v23  ;;  %v636_v34 = vadd.f32 %v635_v24, %v1114_v31  ;;  %v709_v35 = vadd.f32 %v708_v20, %v665_v25  ;;  %v669_v21 = vmul.f32 %v1130_v47, %v1130_v47  ;;  %v670_v44 = vmul.f32 %v1139_v55, %v1139_v55 }
 0x136   :  { %v616_v38 = vadd.f32 %v615_v28, %v1121_v39  ;;  %v689_v40 = vadd.f32 %v688_v30, %v666_v26  ;;  %v803_v43 = vpack.c.bf16 %v379_v37, %v377_v32  ;;  %v671_v22 = vmul.f32 %v1146_v59, %v1146_v59 }
 0x137   :  { %v637_v41 = vadd.f32 %v636_v34, %v1130_v47  ;;  %v710_v42 = vadd.f32 %v709_v35, %v667_v33  ;;  %v672_v47 = vmul.f32 %v1159_v15, %v1159_v15  ;;  %v679_v2 = vmul.f32 %v1207_v3, %v1207_v3 }
 0x138   :  { %v690_v31 = vadd.f32 %v689_v40, %v668_v27  ;;  %v617_v45 = vadd.f32 %v616_v38, %v1139_v55  ;;  %492 = vst [vmem:[%s1281_s3 + $0x78] sm:$0xff] %v803_v43  ;;  %v680_v8 = vmul.f32 %v377_v32, %v377_v32  ;;  %v681_v11 = vmul.f32 %v379_v37, %v379_v37 }
 0x139   :  { %v711_v48 = vadd.f32 %v710_v42, %v669_v21  ;;  %v638_v39 = vadd.f32 %v637_v41, %v1146_v59  ;;  %v674_v59 = vmul.f32 %v1172_v29, %v1172_v29 }
 0x13a   :  { %v618_v49 = vadd.f32 %v617_v45, %v1159_v15  ;;  %v691_v50 = vadd.f32 %v690_v31, %v670_v44 }
 0x13b   :  { %v639_v55 = vadd.f32 %v638_v39, %v1162_v16  ;;  %v712_v52 = vadd.f32 %v711_v48, %v671_v22  ;;  %v678_v16 = vmul.f32 %v1201_v62, %v1201_v62 }
 0x13c   :  { %v619_v53 = vadd.f32 %v618_v49, %v1172_v29  ;;  %v692_v54 = vadd.f32 %v691_v50, %v672_v47  ;;  %v677_v29 = vmul.f32 %v1194_v57, %v1194_v57 }
 0x13d   :  { %v640_v56 = vadd.f32 %v639_v55, %v1179_v36  ;;  %v713_v60 = vadd.f32 %v712_v52, %v673_v51 }
 0x13e   :  { %v693_v15 = vadd.f32 %v692_v54, %v674_v59  ;;  %v620_v61 = vadd.f32 %v619_v53, %v1183_v46 }
 0x13f   :  { %v714_v0 = vadd.f32 %v713_v60, %v675_v58  ;;  %v641_v1 = vadd.f32 %v640_v56, %v1194_v57 }
 0x140   :  { %v694_v36 = vadd.f32 %v693_v15, %v676_v63  ;;  %v621_v4 = vadd.f32 %v620_v61, %v1201_v62 }
 0x141   :  { %v715_v5 = vadd.f32 %v714_v0, %v677_v29  ;;  %v642_v6 = vadd.f32 %v641_v1, %v1207_v3 }
 0x142   :  { %v695_v7 = vadd.f32 %v694_v36, %v678_v16  ;;  %v622_v46 = vadd.f32 %v621_v4, %v377_v32 }
 0x143   :  { %v716_v9 = vadd.f32 %v715_v5, %v679_v2  ;;  %v643_v10 = vadd.f32 %v642_v6, %v379_v37 }
 0x144   :  { %v623_v12 = vrot.slane %v622_v46, 4  ;;  %v696_v13 = vadd.f32 %v695_v7, %v680_v8 }
 0x145   :  { %v644_v14 = vrot.slane %v643_v10, 4  ;;  %v717_v17 = vadd.f32 %v716_v9, %v681_v11 }
 0x146   :  { %v624_v57 = vadd.f32 %v623_v12, %v622_v46  ;;  %v697_v18 = vrot.slane %v696_v13, 4 }
 0x147   :  { %v645_v19 = vadd.f32 %v644_v14, %v643_v10  ;;  %v718_v20 = vrot.slane %v717_v17, 4 }
 0x148   :  { %v625_v23 = vrot.slane %v624_v57, 2  ;;  %v698_v24 = vadd.f32 %v697_v18, %v696_v13 }
 0x149   :  { %v646_v62 = vrot.slane %v645_v19, 2  ;;  %v719_v25 = vadd.f32 %v718_v20, %v717_v17 }
 0x14a   :  { %v626_v26 = vadd.f32 %v625_v23, %v624_v57  ;;  %v699_v3 = vrot.slane %v698_v24, 2 }
 0x14b   :  { %v647_v28 = vadd.f32 %v646_v62, %v645_v19  ;;  %v720_v30 = vrot.slane %v719_v25, 2 }
 0x14c   :  { %v627_v32 = vrot.slane %v626_v26, 1  ;;  %v700_v33 = vadd.f32 %v699_v3, %v698_v24 }
 0x14d   :  { %v648_v34 = vrot.slane %v647_v28, 1  ;;  %v721_v35 = vadd.f32 %v720_v30, %v719_v25 }
 0x14e   :  { %v701_v37 = vrot.slane %v700_v33, 1  ;;  %v628_v38 = vadd.f32 %v627_v32, %v626_v26 }
 0x14f   :  { %v722_v27 = vrot.slane %v721_v35, 1  ;;  %v649_v21 = vadd.f32 %v648_v34, %v647_v28 }
 0x150   :  { %v702_v40 = vadd.f32 %v701_v37, %v700_v33 }
 0x151   :  { %v723_v41 = vadd.f32 %v722_v27, %v721_v35 }
 0x152   :  { %v725_v42 = vsel %vm724_vm0, %v628_v38, %v702_v40 }
 0x153   :  { %v728_v43 = vsel %vm727_vm1, %v725_v42, 0.0  ;;  %v726_v44 = vsel %vm724_vm0, %v649_v21, %v723_v41 }
 0x154   :  { %730 = vst [vmem:[%s1282_s4] sm:$0xff] %v728_v43  ;;  %v729_v31 = vsel %vm727_vm1, %v726_v44, 0.0 }
 0x155   :  { %731 = vst [vmem:[%s1282_s4 + $0x8] sm:$0xff] %v729_v31 }

// kernel: _lambda_.9
= control target key start
LH: loop header
LB: loop body
LE: loop exit
PB: predicated region body
PF: predicated region fallthrough
CT: control target
= control target key end

     0   :  { %v6780_v5 = vlaneseq  ;;  %s3488_s13 = smov 126   ;;  %s3491_s15 = smov 6   ;;  %s6772_s3 = inlined_call_operand.vmem [shape: bf16[256,3], index: 3, kind: input, shape index: {}]   ;;  %s6773_s0 = inlined_call_operand.vmem [shape: bf16[128,256], index: 0, kind: input, shape index: {}]   ;;  %s6774_s1 = inlined_call_operand.vmem [shape: f32[1,256], index: 1, kind: input, shape index: {}]   ;;  %s6775_s2 = inlined_call_operand.vmem [shape: f32[1,256], index: 2, kind: input, shape index: {}]   ;;  %s6776_s5 = inlined_call_operand.vmem [shape: bf16[256,384], index: 5, kind: input, shape index: {}]   ;;  %s6777_s4 = inlined_call_operand.vmem [shape: f32[1,3], index: 4, kind: input, shape index: {}]   ;;  %s6778_s6 = inlined_call_operand.vmem [shape: f32[1,384], index: 6, kind: input, shape index: {}]   ;;  %s6779_s7 = inlined_call_operand.vmem [shape: f32[128,16], index: 7, kind: output, shape index: {}]  }
   0x1   :  { %v3342_v0 = vld [vmem:[%s6772_s3 + $0x40] sm:$0xff]   ;;  %v3344_v2 = vld [vmem:[%s6772_s3 + $0x48] sm:$0xff]   ;;  %v3346_v4 = vld [vmem:[%s6772_s3 + $0x50] sm:$0xff]   ;;  %s3492_s16 = smov 5   ;;  %s3494_s17 = smov 11  }
   0x2   :  { %v3343_v1 = vld [vmem:[%s6772_s3] sm:$0xff]   ;;  %3189 = vmatprep.subr.bf16.mxu0 %v3342_v0  ;;  %v3345_v3 = vld [vmem:[%s6772_s3 + $0x8] sm:$0xff]   ;;  %v3347_v6 = vld [vmem:[%s6772_s3 + $0x10] sm:$0xff]   ;;  %v3557_v8 = vshrl.u32 %v6780_v5, 7 }
   0x3   :  { %3190 = vmatpush3.bf16.msra.mxu0 %v3343_v1  ;;  %v3348_v7 = vld [vmem:[%s6772_s3 + $0x58] sm:$0xff]   ;;  %v3350_v10 = vld [vmem:[%s6772_s3 + $0x60] sm:$0xff]   ;;  %v3352_v14 = vld [vmem:[%s6772_s3 + $0x68] sm:$0xff]  }
   0x4   :  { %3191 = vmatprep.subr.bf16.mxu0 %v3344_v2  ;;  %v3349_v9 = vld [vmem:[%s6772_s3 + $0x18] sm:$0xff]   ;;  %v3566_v11 = vsub.s32 1, %v3557_v8  ;;  %v3351_v12 = vld [vmem:[%s6772_s3 + $0x20] sm:$0xff]   ;;  %v3572_v13 = vsub.s32 0, %v3557_v8  ;;  %v28_v16 = vld [vmem:[%s6773_s0 + $0x8] sm:$0xff] }
   0x5   :  { %v27_v15 = vld [vmem:[%s6773_s0] sm:$0xff]  ;;  %v46_v19 = vunpack.c.h.bf16 %v28_v16  ;;  %v29_v23 = vld [vmem:[%s6773_s0 + $0x10] sm:$0xff]  ;;  %v30_v24 = vld [vmem:[%s6773_s0 + $0x18] sm:$0xff]  ;;  %v45_v28 = vunpack.c.l.bf16 %v28_v16 }
   0x6   :  { %v75_v17 = vld [vmem:[%s6774_s1] sm:$0x3]  ;;  %v44_v18 = vunpack.c.h.bf16 %v27_v15  ;;  %v43_v22 = vunpack.c.l.bf16 %v27_v15  ;;  %v3353_v25 = vld [vmem:[%s6772_s3 + $0x28] sm:$0xff]   ;;  %v3354_v26 = vld [vmem:[%s6772_s3 + $0x70] sm:$0xff]   ;;  %v48_v33 = vunpack.c.h.bf16 %v29_v23  ;;  %v50_v34 = vunpack.c.h.bf16 %v30_v24  ;;  %s3486_s1 = smov 1  }
   0x7   :  { %3192 = vmatpush3.bf16.msra.mxu0 %v3345_v3  ;;  %v3587_v20 = vrot.slane %v75_v17, %v3566_v11  ;;  %v119_v21 = vld [vmem:[%s6775_s2] sm:$0x3]  ;;  %v3608_v29 = vrot.slane %v75_v17, %v3572_v13  ;;  %v3358_v35 = vld [vmem:[%s6776_s5 + $0x4] ss:$12 sps:$4 sm:$0xff]   ;;  %v47_v39 = vunpack.c.l.bf16 %v29_v23  ;;  %v49_v40 = vunpack.c.l.bf16 %v30_v24  ;;  %v3361_v41 = vld [vmem:[%s6776_s5 + $0x1c] ss:$12 sps:$4 sm:$0xff]  }
   0x8   :  { %3193 = vmatprep.subr.bf16.mxu0 %v3346_v4  ;;  %v3605_v27 = vrot.slane %v119_v21, %v3566_v11  ;;  %v3611_v30 = vrot.slane %v119_v21, %v3572_v13  ;;  %v3360_v36 = vld [vmem:[%s6776_s5] ss:$12 sps:$4 sm:$0xff]   ;;  %780 = vmatprep.subr.bf16.mxu1 %v3358_v35  ;;  %v3363_v49 = vld [vmem:[%s6776_s5 + $0x18] ss:$12 sps:$4 sm:$0xff]   ;;  %v3355_v50 = vld [vmem:[%s6772_s3 + $0x30] sm:$0xff]  }
   0x9   :  { %v88_v31 = vmul.f32 %v3587_v20, %v44_v18  ;;  %v90_v32 = vmul.f32 %v3587_v20, %v46_v19  ;;  %v87_v37 = vmul.f32 %v3608_v29, %v43_v22  ;;  %v89_v38 = vmul.f32 %v3608_v29, %v45_v28  ;;  %v31_v48 = vld [vmem:[%s6773_s0 + $0x20] sm:$0xff]  ;;  %781 = vmatpush1.bf16.msra.mxu1 %v3360_v36  ;;  %v32_v55 = vld [vmem:[%s6773_s0 + $0x28] sm:$0xff]  ;;  %v3356_v56 = vld [vmem:[%s6772_s3 + $0x78] sm:$0xff]  }
   0xa   :  { %v92_v44 = vmul.f32 %v3587_v20, %v48_v33  ;;  %v94_v45 = vmul.f32 %v3587_v20, %v50_v34  ;;  %782 = vmatprep.subr.bf16.mxu1 %v3361_v41  ;;  %v91_v57 = vmul.f32 %v3608_v29, %v47_v39  ;;  %v3364_v58 = vld [vmem:[%s6776_s5 + $0x34] ss:$12 sps:$4 sm:$0xff]   ;;  %v93_v61 = vmul.f32 %v3608_v29, %v49_v40  ;;  %v3366_v63 = vld [vmem:[%s6776_s5 + $0x30] ss:$12 sps:$4 sm:$0xff]   ;;  %v3709_v41 = vld [vmem:[%s6773_s0 + $0x48] sm:$0xff] }
   0xb   :  { %3194 = vmatpush3.bf16.msra.mxu0 %v3347_v6  ;;  %v132_v42 = vadd.f32 %v3605_v27, %v88_v31  ;;  %v134_v43 = vadd.f32 %v3605_v27, %v90_v32  ;;  %v131_v46 = vadd.f32 %v3611_v30, %v87_v37  ;;  %v133_v47 = vadd.f32 %v3611_v30, %v89_v38  ;;  %v3357_v4 = vld [vmem:[%s6772_s3 + $0x38] sm:$0xff]   ;;  %v3369_v21 = vld [vmem:[%s6776_s5 + $0x48] ss:$12 sps:$4 sm:$0xff]   ;;  %v3372_v34 = vld [vmem:[%s6776_s5 + $0x60] ss:$12 sps:$4 sm:$0xff]   ;;  %s3493_s3 = smov 7  }
   0xc   :  { %3195 = vmatprep.subr.bf16.mxu0 %v3348_v7  ;;  %v136_v53 = vadd.f32 %v3605_v27, %v92_v44  ;;  %v138_v54 = vadd.f32 %v3605_v27, %v94_v45  ;;  %v52_v62 = vunpack.c.h.bf16 %v31_v48  ;;  %v54_v3 = vunpack.c.h.bf16 %v32_v55  ;;  %v3367_v7 = vld [vmem:[%s6776_s5 + $0x4c] ss:$12 sps:$4 sm:$0xff]   ;;  %v3373_v35 = vld [vmem:[%s6776_s5 + $0x7c] ss:$12 sps:$4 sm:$0xff]   ;;  %v3701_v36 = vld [vmem:[%s6773_s0 + $0x40] sm:$0xff] }
   0xd   :  { %v164_v51 = vmax.f32 %v132_v42, 0.0  ;;  %v166_v52 = vmax.f32 %v134_v43, 0.0  ;;  %v163_v60 = vmax.f32 %v131_v46, 0.0  ;;  %v165_v0 = vmax.f32 %v133_v47, 0.0  ;;  %783 = vmatpush1.bf16.msra.mxu1 %v3363_v49  ;;  %v3717_v47 = vld [vmem:[%s6776_s5 + $0xc8] ss:$12 sps:$4 sm:$0xff]  }
   0xe   :  { %v168_v1 = vmax.f32 %v136_v53, 0.0  ;;  %v170_v2 = vmax.f32 %v138_v54, 0.0  ;;  %v96_v6 = vmul.f32 %v3587_v20, %v52_v62  ;;  %784 = vmatprep.subr.bf16.mxu1 %v3364_v58  ;;  %v51_v15 = vunpack.c.l.bf16 %v31_v48  ;;  %v3375_v49 = vld [vmem:[%s6776_s5 + $0x78] ss:$12 sps:$4 sm:$0xff]  }
   0xf   :  { %3196 = vmatpush3.bf16.msra.mxu0 %v3349_v9  ;;  %v3653_v59 = vpack.c.bf16 %v166_v52, %v164_v51  ;;  %v98_v9 = vmul.f32 %v3587_v20, %v54_v3  ;;  %v53_v16 = vunpack.c.l.bf16 %v32_v55  ;;  %v3676_v17 = vpack.c.bf16 %v165_v0, %v163_v60  ;;  %v3728_v51 = vld [vmem:[%s6776_s5 + $0x8] ss:$12 sps:$4 sm:$0xff]   ;;  %v3379_v62 = vld [vmem:[%s6776_s5 + $0xac] ss:$12 sps:$4 sm:$0xff]  }
  0x10   :  { %3197 = vmatprep.subr.bf16.mxu0 %v3350_v10  ;;  %v33_v10 = vld [vmem:[%s6773_s0 + $0x30] sm:$0xff]  ;;  %v3678_v18 = vpack.c.bf16 %v170_v2, %v168_v1  ;;  %v137_v19 = vadd.f32 %v3611_v30, %v93_v61  ;;  %v140_v22 = vadd.f32 %v3605_v27, %v96_v6  ;;  %v95_v31 = vmul.f32 %v3608_v29, %v51_v15  ;;  %v3758_v2 = vld [vmem:[%s6776_s5 + $0xe0] ss:$12 sps:$4 sm:$0xff]   ;;  %v38_v6 = vld [vmem:[%s6773_s0 + $0x58] sm:$0xff] }
  0x11   :  { %378 = vmatprep.mubr.bf16.mxu0 %v3653_v59  ;;  %812 = vmatprep.mubr.bf16.mxu1 %v3653_v59  ;;  %v142_v23 = vadd.f32 %v3605_v27, %v98_v9  ;;  %v56_v24 = vunpack.c.h.bf16 %v33_v10  ;;  %v97_v32 = vmul.f32 %v3608_v29, %v53_v16  ;;  %v55_v42 = vunpack.c.l.bf16 %v33_v10  ;;  %v3376_v55 = vld [vmem:[%s6776_s5 + $0x94] ss:$12 sps:$4 sm:$0xff]  }
  0x12   :  { %785 = vmatpush1.bf16.msra.mxu1 %v3366_v63  ;;  %v169_v33 = vmax.f32 %v137_v19, 0.0  ;;  %v172_v37 = vmax.f32 %v140_v22, 0.0  ;;  %v139_v43 = vadd.f32 %v3611_v30, %v95_v31  ;;  %v60_v46 = vunpack.c.h.bf16 %v3701_v36  ;;  %v3753_v1 = vld [vmem:[%s6773_s0 + $0x50] sm:$0xff]  ;;  %v3769_v9 = vld [vmem:[%s6776_s5 + $0x20] ss:$12 sps:$4 sm:$0xff]  }
  0x13   :  { %3198 = vmatpush3.bf16.msra.mxu0 %v3351_v12  ;;  %v34_v12 = vld [vmem:[%s6773_s0 + $0x38] sm:$0xff]  ;;  %786 = vmatprep.subr.bf16.mxu1 %v3367_v7  ;;  %v174_v38 = vmax.f32 %v142_v23, 0.0  ;;  %v100_v39 = vmul.f32 %v3587_v20, %v56_v24  ;;  %v141_v44 = vadd.f32 %v3611_v30, %v97_v32  ;;  %v59_v15 = vunpack.c.l.bf16 %v3701_v36  ;;  %v3381_v16 = vld [vmem:[%s6776_s5 + $0xa8] ss:$12 sps:$4 sm:$0xff]   ;;  %v3384_v31 = vld [vmem:[%s6776_s5 + $0xc0] ss:$12 sps:$4 sm:$0xff]  }
  0x14   :  { %3199 = vmatprep.subr.bf16.mxu0 %v3352_v14  ;;  %v135_v14 = vadd.f32 %v3611_v30, %v91_v57  ;;  %v57_v45 = vunpack.c.l.bf16 %v34_v12  ;;  %v3378_v57 = vld [vmem:[%s6776_s5 + $0x90] ss:$12 sps:$4 sm:$0xff]   ;;  %v171_v58 = vmax.f32 %v139_v43, 0.0  ;;  %v104_v63 = vmul.f32 %v3587_v20, %v60_v46  ;;  %v3786_v24 = vld [vmem:[%s6776_s5 + $0xf8] ss:$12 sps:$4 sm:$0xff]  }
  0x15   :  { %v3730_v52 = vpack.c.bf16 %v174_v38, %v172_v37  ;;  %v144_v53 = vadd.f32 %v3605_v27, %v100_v39  ;;  %v173_v60 = vmax.f32 %v141_v44, 0.0  ;;  %v64_v22 = vunpack.c.h.bf16 %v3753_v1  ;;  %v3800_v32 = vld [vmem:[%s6776_s5 + $0x38] ss:$12 sps:$4 sm:$0xff]   ;;  %v3385_v36 = vld [vmem:[%s6776_s5 + $0xdc] ss:$12 sps:$4 sm:$0xff]  }
  0x16   :  { %v167_v28 = vmax.f32 %v135_v14, 0.0  ;;  %787 = vmatpush1.bf16.msra.mxu1 %v3369_v21  ;;  %v101_v61 = vmul.f32 %v3608_v29, %v57_v45  ;;  %v148_v14 = vadd.f32 %v3605_v27, %v104_v63  ;;  %v61_v21 = vunpack.c.l.bf16 %v3709_v41  ;;  %v3809_v37 = vld [vmem:[%s6776_s5 + $0x110] ss:$12 sps:$4 sm:$0xff]   ;;  %v3830_v44 = vld [vmem:[%s6773_s0 + $0x68] sm:$0xff] }
  0x17   :  { %3200 = vmatpush3.bf16.msra.mxu0 %v3353_v25  ;;  %v58_v25 = vunpack.c.h.bf16 %v34_v12  ;;  %v176_v3 = vmax.f32 %v144_v53, 0.0  ;;  %v3771_v10 = vpack.c.bf16 %v173_v60, %v171_v58  ;;  %v66_v23 = vunpack.c.h.bf16 %v38_v6  ;;  %v3824_v43 = vld [vmem:[%s6776_s5 + $0x50] ss:$12 sps:$4 sm:$0xff]   ;;  %v3388_v60 = vld [vmem:[%s6776_s5 + $0xf4] ss:$12 sps:$4 sm:$0xff]  }
  0x18   :  { %3201 = vmatprep.subr.bf16.mxu0 %v3354_v26  ;;  %v3370_v26 = vld [vmem:[%s6776_s5 + $0x64] ss:$12 sps:$4 sm:$0xff]   ;;  %v3719_v48 = vpack.c.bf16 %v169_v33, %v167_v28  ;;  %v145_v12 = vadd.f32 %v3611_v30, %v101_v61  ;;  %v105_v39 = vmul.f32 %v3608_v29, %v61_v21  ;;  %v63_v46 = vunpack.c.l.bf16 %v3753_v1  ;;  %v3391_v1 = vld [vmem:[%s6776_s5 + $0x10c] ss:$12 sps:$4 sm:$0xff]  }
  0x19   :  { %v102_v40 = vmul.f32 %v3587_v20, %v58_v25  ;;  %788 = vmatprep.subr.bf16.mxu1 %v3370_v26  ;;  %v3382_v26 = vld [vmem:[%s6776_s5 + $0xc4] ss:$12 sps:$4 sm:$0xff]   ;;  %v3882_v21 = vld [vmem:[%s6776_s5 + $0x80] ss:$12 sps:$4 sm:$0xff]  }
  0x1a   :  { %789 = vmatpush1.bf16.msra.mxu1 %v3372_v34  ;;  %v177_v33 = vmax.f32 %v145_v12, 0.0  ;;  %v180_v34 = vmax.f32 %v148_v14, 0.0  ;;  %v3390_v63 = vld [vmem:[%s6776_s5 + $0xf0] ss:$12 sps:$4 sm:$0xff]  }
  0x1b   :  { %3202 = vmatpush3.bf16.msra.mxu0 %v3355_v50  ;;  %v62_v50 = vunpack.c.h.bf16 %v3709_v41  ;;  %v146_v54 = vadd.f32 %v3605_v27, %v102_v40  ;;  %790 = vmatprep.subr.bf16.mxu1 %v3373_v35  ;;  %v103_v35 = vmul.f32 %v3608_v29, %v59_v15  ;;  %v108_v40 = vmul.f32 %v3587_v20, %v64_v22  ;;  %v41_v22 = vld [vmem:[%s6773_s0 + $0x70] sm:$0xff] }
  0x1c   :  { %3203 = vmatprep.subr.bf16.mxu0 %v3356_v56  ;;  %v99_v56 = vmul.f32 %v3608_v29, %v55_v42  ;;  %v110_v41 = vmul.f32 %v3587_v20, %v66_v23  ;;  %v3818_v42 = vld [vmem:[%s6773_s0 + $0x60] sm:$0xff]  ;;  %v42_v23 = vld [vmem:[%s6773_s0 + $0x78] sm:$0xff]  ;;  %s3490_s0 = smov 3  }
  0x1d   :  { %v106_v0 = vmul.f32 %v3587_v20, %v62_v50  ;;  %v3839_v50 = vld [vmem:[%s6776_s5 + $0x128] ss:$12 sps:$4 sm:$0xff]   ;;  %v147_v53 = vadd.f32 %v3611_v30, %v103_v35  ;;  %v68_v61 = vunpack.c.h.bf16 %v3818_v42 }
  0x1e   :  { %791 = vmatpush1.bf16.msra.mxu1 %v3375_v49  ;;  %v143_v7 = vadd.f32 %v3611_v30, %v99_v56  ;;  %v65_v49 = vunpack.c.l.bf16 %v38_v6  ;;  %v152_v56 = vadd.f32 %v3605_v27, %v108_v40  ;;  %v3873_v6 = vld [vmem:[%s6776_s5 + $0x140] ss:$12 sps:$4 sm:$0xff]  }
  0x1f   :  { %3204 = vmatpush3.bf16.msra.mxu0 %v3357_v4  ;;  %v178_v4 = vmax.f32 %v146_v54, 0.0  ;;  %792 = vmatprep.subr.bf16.mxu1 %v3376_v55  ;;  %v150_v19 = vadd.f32 %v3605_v27, %v106_v0  ;;  %v149_v54 = vadd.f32 %v3611_v30, %v105_v39  ;;  %v3387_v55 = vld [vmem:[%s6776_s5 + $0xd8] ss:$12 sps:$4 sm:$0xff]   ;;  %v3862_v0 = vld [vmem:[%s6776_s5 + $0x68] ss:$12 sps:$4 sm:$0xff]  }
  0x20   :  { %3253 = vmatprep.subr.bf16.mxu0 %v3717_v47  ;;  %v175_v28 = vmax.f32 %v143_v7, 0.0  ;;  %v179_v7 = vmax.f32 %v147_v53, 0.0  ;;  %v184_v14 = vmax.f32 %v152_v56, 0.0  ;;  %v3396_v39 = vld [vmem:[%s6776_s5 + $0x124] ss:$12 sps:$4 sm:$0xff]  }
  0x21   :  { %v3788_v25 = vpack.c.bf16 %v178_v4, %v176_v3  ;;  %v182_v38 = vmax.f32 %v150_v19, 0.0  ;;  %v107_v3 = vmul.f32 %v3608_v29, %v63_v46  ;;  %v109_v4 = vmul.f32 %v3608_v29, %v65_v49  ;;  %v3917_v53 = vld [vmem:[%s6776_s5 + $0x98] ss:$12 sps:$4 sm:$0xff]  }
  0x22   :  { %379 = vmatmul.mubr.bf16.vlgmr.msra.gmra.mrb[0].mxu0 %v3676_v17  ;;  %793 = vmatpush1.bf16.msra.mxu1 %v3378_v57  ;;  %v3832_v45 = vpack.c.bf16 %v177_v33, %v175_v28  ;;  %v154_v57 = vadd.f32 %v3605_v27, %v110_v41  ;;  %v181_v12 = vmax.f32 %v149_v54, 0.0  ;;  %v72_v46 = vunpack.c.h.bf16 %v41_v22  ;;  %v3923_v54 = vld [vmem:[%s6776_s5 + $0x170] ss:$12 sps:$4 sm:$0xff]  }
  0x23   :  { %386 = vmatprep.mubr.bf16.mxu0 %v3678_v18  ;;  %3254 = vmatpush3.bf16.msra.mxu0 %v3728_v51  ;;  %v3848_v58 = vpack.c.bf16 %v182_v38, %v180_v34  ;;  %v153_v28 = vadd.f32 %v3611_v30, %v109_v4  ;;  %v3393_v34 = vld [vmem:[%s6776_s5 + $0x108] ss:$12 sps:$4 sm:$0xff]   ;;  %v69_v38 = vunpack.c.l.bf16 %v3830_v44  ;;  %v74_v49 = vunpack.c.h.bf16 %v42_v23 }
  0x24   :  { %3255 = vmatprep.subr.bf16.mxu0 %v3758_v2  ;;  %794 = vmatprep.subr.bf16.mxu1 %v3379_v62  ;;  %v70_v62 = vunpack.c.h.bf16 %v3830_v44  ;;  %v186_v15 = vmax.f32 %v154_v57, 0.0  ;;  %v3899_v33 = vpack.c.bf16 %v181_v12, %v179_v7  ;;  %v3402_v7 = vld [vmem:[%s6776_s5 + $0x138] ss:$12 sps:$4 sm:$0xff]  }
  0x25   :  { %v185_v44 = vmax.f32 %v153_v28, 0.0  ;;  %v113_v57 = vmul.f32 %v3608_v29, %v69_v38 }
  0x26   :  { %795 = vmatpush1.bf16.msra.mxu1 %v3381_v16  ;;  %v112_v16 = vmul.f32 %v3587_v20, %v68_v61  ;;  %v114_v19 = vmul.f32 %v3587_v20, %v70_v62  ;;  %v3904_v35 = vpack.c.bf16 %v186_v15, %v184_v14  ;;  %v71_v14 = vunpack.c.l.bf16 %v41_v22  ;;  %v3407_v22 = vld [vmem:[%s6776_s5 + $0x150] ss:$12 sps:$4 sm:$0xff]  }
  0x27   :  { %3256 = vmatpush3.bf16.msra.mxu0 %v3769_v9  ;;  %796 = vmatprep.subr.bf16.mxu1 %v3382_v26  ;;  %v151_v26 = vadd.f32 %v3611_v30, %v107_v3  ;;  %v3941_v3 = vld [vmem:[%s6776_s5 + $0xb0] ss:$12 sps:$4 sm:$0xff]   ;;  %v73_v15 = vunpack.c.l.bf16 %v42_v23 }
  0x28   :  { %3257 = vmatprep.subr.bf16.mxu0 %v3786_v24  ;;  %v156_v40 = vadd.f32 %v3605_v27, %v112_v16  ;;  %v158_v41 = vadd.f32 %v3605_v27, %v114_v19  ;;  %v3404_v16 = vld [vmem:[%s6776_s5 + $0x154] ss:$12 sps:$4 sm:$0xff]  }
  0x29   :  { %v117_v38 = vmul.f32 %v3608_v29, %v73_v15 }
  0x2a   :  { %387 = vmatmul.mubr.bf16.gmra.mrb[4].mxu0 %v3719_v48  ;;  %797 = vmatpush1.bf16.msra.mxu1 %v3384_v31  ;;  %v3897_v31 = vld [vmem:[%s6776_s5 + $0x158] ss:$12 sps:$4 sm:$0xff]   ;;  %v188_v61 = vmax.f32 %v156_v40, 0.0  ;;  %v190_v62 = vmax.f32 %v158_v41, 0.0  ;;  %v3412_v41 = vld [vmem:[%s6776_s5 + $0x168] ss:$12 sps:$4 sm:$0xff]  }
  0x2b   :  { %394 = vmatprep.mubr.bf16.mxu0 %v3730_v52  ;;  %3258 = vmatpush3.bf16.msra.mxu0 %v3800_v32 }
  0x2c   :  { %3259 = vmatprep.subr.bf16.mxu0 %v3809_v37  ;;  %798 = vmatprep.subr.bf16.mxu1 %v3385_v36  ;;  %v67_v36 = vunpack.c.l.bf16 %v3818_v42  ;;  %v183_v42 = vmax.f32 %v151_v26, 0.0  ;;  %v3954_v19 = vpack.c.bf16 %v190_v62, %v188_v61 }
  0x2e   :  { %799 = vmatpush1.bf16.msra.mxu1 %v3387_v55  ;;  %v3398_v55 = vld [vmem:[%s6776_s5 + $0x120] ss:$12 sps:$4 sm:$0xff]   ;;  %v111_v56 = vmul.f32 %v3608_v29, %v67_v36  ;;  %v3943_v4 = vpack.c.bf16 %v185_v44, %v183_v42  ;;  %v115_v36 = vmul.f32 %v3608_v29, %v71_v14  ;;  %v161_v42 = vadd.f32 %v3611_v30, %v117_v38 }
  0x2f   :  { %3260 = vmatpush3.bf16.msra.mxu0 %v3824_v43  ;;  %800 = vmatprep.subr.bf16.mxu1 %v3388_v60  ;;  %v3399_v60 = vld [vmem:[%s6776_s5 + $0x13c] ss:$12 sps:$4 sm:$0xff]  }
  0x30   :  { %3261 = vmatprep.subr.bf16.mxu0 %v3839_v50  ;;  %v155_v12 = vadd.f32 %v3611_v30, %v111_v56 }
  0x32   :  { %395 = vmatmul.mubr.bf16.gmra.mrb[8].mxu0 %v3771_v10  ;;  %801 = vmatpush1.bf16.msra.mxu1 %v3390_v63  ;;  %v116_v63 = vmul.f32 %v3587_v20, %v72_v46  ;;  %v187_v23 = vmax.f32 %v155_v12, 0.0 }
  0x33   :  { %402 = vmatprep.mubr.bf16.mxu0 %v3788_v25  ;;  %3262 = vmatpush3.bf16.msra.mxu0 %v3862_v0 }
  0x34   :  { %3263 = vmatprep.subr.bf16.mxu0 %v3873_v6  ;;  %802 = vmatprep.subr.bf16.mxu1 %v3391_v1  ;;  %v118_v1 = vmul.f32 %v3587_v20, %v74_v49  ;;  %v157_v20 = vadd.f32 %v3611_v30, %v113_v57  ;;  %v160_v26 = vadd.f32 %v3605_v27, %v116_v63 }
  0x35   :  { %v159_v49 = vadd.f32 %v3611_v30, %v115_v36 }
  0x36   :  { %803 = vmatpush1.bf16.msra.mxu1 %v3393_v34  ;;  %v162_v28 = vadd.f32 %v3605_v27, %v118_v1  ;;  %v189_v34 = vmax.f32 %v157_v20, 0.0  ;;  %v3409_v27 = vld [vmem:[%s6776_s5 + $0x16c] ss:$12 sps:$4 sm:$0xff]  }
  0x37   :  { %3264 = vmatpush3.bf16.msra.mxu0 %v3882_v21  ;;  %804 = vmatprep.subr.bf16.mxu1 %v3396_v39  ;;  %v192_v39 = vmax.f32 %v160_v26, 0.0  ;;  %v191_v44 = vmax.f32 %v159_v49, 0.0 }
  0x38   :  { %3265 = vmatprep.subr.bf16.mxu0 %v3897_v31  ;;  %v194_v40 = vmax.f32 %v162_v28, 0.0  ;;  %v207_v46 = vpack.c.bf16 %v189_v34, %v187_v23 }
  0x3a   :  { %403 = vmatmul.mubr.bf16.gmra.mrb[12].mxu0 %v3832_v45  ;;  %805 = vmatpush1.bf16.msra.mxu1 %v3398_v55  ;;  %v210_v29 = vpack.c.bf16 %v194_v40, %v192_v39  ;;  %v193_v55 = vmax.f32 %v161_v42, 0.0 }
  0x3b   :  { %410 = vmatprep.mubr.bf16.mxu0 %v3848_v58  ;;  %3266 = vmatpush3.bf16.msra.mxu0 %v3917_v53 }
  0x3c   :  { %3267 = vmatprep.subr.bf16.mxu0 %v3923_v54  ;;  %806 = vmatprep.subr.bf16.mxu1 %v3399_v60  ;;  %v209_v56 = vpack.c.bf16 %v193_v55, %v191_v44 }
  0x3e   :  { %807 = vmatpush1.bf16.msra.mxu1 %v3402_v7 }
  0x3f   :  { %3268 = vmatpush3.bf16.msra.mxu0 %v3941_v3  ;;  %808 = vmatprep.subr.bf16.mxu1 %v3404_v16 }
  0x42   :  { %411 = vmatmul.mubr.bf16.gmra.mrb[16].mxu0 %v3899_v33  ;;  %809 = vmatpush1.bf16.msra.mxu1 %v3407_v22 }
  0x43   :  { %418 = vmatprep.mubr.bf16.mxu0 %v3904_v35  ;;  %810 = vmatprep.subr.bf16.mxu1 %v3409_v27 }
  0x46   :  { %811 = vmatpush1.bf16.msra.mxu1 %v3412_v41 }
  0x47   :  { %3317 = vmatprep.subr.bf16.mxu1 %v3717_v47 }
  0x49   :  { %813 = vmatmul.mubr.bf16.vlgmr.msra.gmra.mrb[0].mxu1 %v3676_v17 }
  0x4a   :  { %419 = vmatmul.mubr.bf16.gmra.mrb[20].mxu0 %v3943_v4  ;;  %822 = vmatprep.mubr.bf16.mxu1 %v3678_v18 }
  0x4b   :  { %426 = vmatprep.mubr.bf16.mxu0 %v3954_v19  ;;  %3325 = vmatpush3.bf16.msra.mxu1 %v3728_v51 }
  0x4c   :  { %3318 = vmatprep.subr.bf16.mxu1 %v3758_v2 }
  0x4f   :  { %3326 = vmatpush3.bf16.msra.mxu1 %v3769_v9 }
  0x50   :  { %3319 = vmatprep.subr.bf16.mxu1 %v3786_v24 }
  0x51   :  { %823 = vmatmul.mubr.bf16.gmra.mrb[4].mxu1 %v3719_v48 }
  0x52   :  { %427 = vmatmul.mubr.bf16.gmra.mrb[24].mxu0 %v207_v46  ;;  %832 = vmatprep.mubr.bf16.mxu1 %v3730_v52 }
  0x53   :  { %434 = vmatprep.mubr.bf16.mxu0 %v210_v29  ;;  %3327 = vmatpush3.bf16.msra.mxu1 %v3800_v32 }
  0x54   :  { %3320 = vmatprep.subr.bf16.mxu1 %v3809_v37 }
  0x57   :  { %3328 = vmatpush3.bf16.msra.mxu1 %v3824_v43 }
  0x58   :  { %3321 = vmatprep.subr.bf16.mxu1 %v3839_v50 }
  0x59   :  { %833 = vmatmul.mubr.bf16.gmra.mrb[8].mxu1 %v3771_v10 }
  0x5a   :  { %435 = vmatmul.mubr.bf16.gmra.mrb[28].mxu0 %v209_v56  ;;  %842 = vmatprep.mubr.bf16.mxu1 %v3788_v25 }
  0x5b   :  { %925 = vmatprep.mubr.bf16.mxu0 %v3653_v59  ;;  %3329 = vmatpush3.bf16.msra.mxu1 %v3862_v0  ;;  %v4018_v59 = vld [vmem:[%s6777_s4] ss:$0 sm:$0xff]  ;;  %s3487_s4 = smov 127  }
  0x5c   :  { %3322 = vmatprep.subr.bf16.mxu1 %v3873_v6 }
  0x5f   :  { %3330 = vmatpush3.bf16.msra.mxu1 %v3882_v21 }
  0x60   :  { %3323 = vmatprep.subr.bf16.mxu1 %v3897_v31 }
  0x61   :  { %843 = vmatmul.mubr.bf16.gmra.mrb[12].mxu1 %v3832_v45 }
  0x62   :  { %926 = vmatmul.mubr.bf16.vlgmr.msra.gmra.mrb[32].mxu0 %v3676_v17  ;;  %852 = vmatprep.mubr.bf16.mxu1 %v3848_v58 }
  0x63   :  { %933 = vmatprep.mubr.bf16.mxu0 %v3678_v18  ;;  %3331 = vmatpush3.bf16.msra.mxu1 %v3917_v53 }
  0x64   :  { %3324 = vmatprep.subr.bf16.mxu1 %v3923_v54 }
  0x67   :  { %3332 = vmatpush3.bf16.msra.mxu1 %v3941_v3 }
  0x69   :  { %853 = vmatmul.mubr.bf16.gmra.mrb[16].mxu1 %v3899_v33 }
  0x6a   :  { %934 = vmatmul.mubr.bf16.gmra.mrb[36].mxu0 %v3719_v48  ;;  %862 = vmatprep.mubr.bf16.mxu1 %v3904_v35 }
  0x6b   :  { %941 = vmatprep.mubr.bf16.mxu0 %v3730_v52 }
  0x71   :  { %863 = vmatmul.mubr.bf16.gmra.mrb[20].mxu1 %v3943_v4 }
  0x72   :  { %942 = vmatmul.mubr.bf16.gmra.mrb[40].mxu0 %v3771_v10  ;;  %872 = vmatprep.mubr.bf16.mxu1 %v3954_v19 }
  0x73   :  { %949 = vmatprep.mubr.bf16.mxu0 %v3788_v25 }
  0x79   :  { %873 = vmatmul.mubr.bf16.gmra.mrb[24].mxu1 %v207_v46 }
  0x7a   :  { %950 = vmatmul.mubr.bf16.gmra.mrb[44].mxu0 %v3832_v45  ;;  %882 = vmatprep.mubr.bf16.mxu1 %v210_v29 }
  0x7b   :  { %957 = vmatprep.mubr.bf16.mxu0 %v3848_v58 }
  0x81   :  { %883 = vmatmul.mubr.bf16.gmra.mrb[28].mxu1 %v209_v56 }
  0x82   :  { %958 = vmatmul.mubr.bf16.gmra.mrb[48].mxu0 %v3899_v33  ;;  %973 = vmatprep.mubr.bf16.mxu1 %v3954_v19 }
  0x83   :  { %965 = vmatprep.mubr.bf16.mxu0 %v3904_v35 }
  0x89   :  { %974 = vmatmul.mubr.bf16.vlgmr.msra.gmra.mrb[32].mxu1 %v207_v46 }
  0x8a   :  { %966 = vmatmul.mubr.bf16.gmra.mrb[52].mxu0 %v3943_v4  ;;  %981 = vmatprep.mubr.bf16.mxu1 %v210_v29 }
  0x91   :  { %982 = vmatmul.mubr.bf16.gmra.mrb[36].mxu1 %v209_v56 }
  0xf5   :  { %v3205_v30 = vpop.f32.mrb[0].mxu0 }
  0xf6   :  { %v3206_v17 = vpop.f32.mrb[1].mxu0 }
  0xf7   :  { %v3207_v18 = vadd.f32 %v3206_v17, %v3205_v30  ;;  %v3208_v47 = vpop.f32.mrb[2].mxu0 }
  0xf8   :  { %v3209_v48 = vpop.f32.mrb[3].mxu0 }
  0xf9   :  { %v4021_v51 = vadd.f32 %v3207_v18, %v4018_v59  ;;  %v3210_v52 = vadd.f32 %v3209_v48, %v3208_v47 }
  0xfb   :  { %6953 = vst [vmem:[#allocation2_spill] sm:$0xff] %v4021_v51  ;;  %v4024_v2 = vsub.f32 0.0, %v4021_v51  ;;  %v4027_v9 = vadd.f32 %v3210_v52, %v4018_v59 }
  0xfd   :  { %6954 = vst [vmem:[#allocation3_spill] sm:$0xff] %v4024_v2  ;;  %6955 = vst [vmem:[#allocation4_spill] sm:$0xff] %v4027_v9  ;;  %v4030_v10 = vsub.f32 0.0, %v4027_v9  ;;  %1634 = vrot.lane.b32.xlu0 %v4024_v2, %s3486_s1  ;;  %v3211_v24 = vpop.f32.mrb[4].mxu0  ;;  %v4038_v32 = vmul.f32 %v4024_v2, %v4024_v2 }
  0xfe   :  { %v3212_v25 = vpop.f32.mrb[5].mxu0 }
  0xff   :  { %6956 = vst [vmem:[#allocation5_spill] sm:$0xff] %v4030_v10  ;;  %1636 = vrot.lane.b32.xlu1 %v4030_v10, %s3486_s1  ;;  %v3213_v37 = vadd.f32 %v3212_v25, %v3211_v24  ;;  %v3214_v43 = vpop.f32.mrb[6].mxu0  ;;  %v4044_v50 = vmul.f32 %v4030_v10, %v4030_v10 }
 0x100   :  { %v3215_v45 = vpop.f32.mrb[7].mxu0 }
 0x101   :  { %1538 = vrot.lane.b32.xlu0 %v4038_v32, %s3486_s1  ;;  %6957 = vst [vmem:[#allocation6_spill] sm:$0xff] %v4044_v50  ;;  %v3216_v58 = vadd.f32 %v3215_v45, %v3214_v43  ;;  %v4047_v0 = vadd.f32 %v3213_v37, %v4018_v59 }
 0x103   :  { %6958 = vst [vmem:[#allocation7_spill] sm:$0xff] %v4047_v0  ;;  %1540 = vrot.lane.b32.xlu1 %v4044_v50, %s3486_s1  ;;  %v4054_v31 = vsub.f32 0.0, %v4047_v0  ;;  %v4067_v60 = vadd.f32 %v3216_v58, %v4018_v59 }
 0x105   :  { %1730 = vrot.lane.b32.xlu0 %v4038_v32, %s3487_s4  ;;  %v3217_v6 = vpop.f32.mrb[8].mxu0  ;;  %6959 = vst [vmem:[#allocation8_spill] sm:$0xff] %v4054_v31  ;;  %v4064_v57 = vmul.f32 %v4054_v31, %v4054_v31  ;;  %6961 = vst [vmem:[#allocation10_spill] sm:$0xff] %v4067_v60  ;;  %v4074_v4 = vsub.f32 0.0, %v4067_v60 }
 0x106   :  { %v3218_v21 = vpop.f32.mrb[9].mxu0 }
 0x107   :  { %1732 = vrot.lane.b32.xlu1 %v4044_v50, %s3487_s4  ;;  %v3219_v33 = vadd.f32 %v3218_v21, %v3217_v6  ;;  %v3220_v35 = vpop.f32.mrb[10].mxu0  ;;  %6960 = vst [vmem:[#allocation9_spill] sm:$0xff] %v4064_v57  ;;  %6962 = vst [vmem:[#allocation11_spill] sm:$0xff] %v4074_v4  ;;  %v4090_v14 = vmul.f32 %v4074_v4, %v4074_v4 }
 0x108   :  { %v3221_v53 = vpop.f32.mrb[11].mxu0 }
 0x109   :  { %1794 = vrot.lane.b32.xlu0 %v4038_v32, %s3488_s13  ;;  %v3222_v54 = vadd.f32 %v3221_v53, %v3220_v35  ;;  %v4077_v7 = vadd.f32 %v3219_v33, %v4018_v59  ;;  %6965 = vst [vmem:[#allocation14_spill] sm:$0xff] %v4090_v14 }
 0x10b   :  { %1796 = vrot.lane.b32.xlu1 %v4044_v50, %s3488_s13  ;;  %6963 = vst [vmem:[#allocation12_spill] sm:$0xff] %v4077_v7  ;;  %v4084_v20 = vsub.f32 0.0, %v4077_v7  ;;  %v4106_v36 = vadd.f32 %v3222_v54, %v4018_v59 }
 0x10d   :  { %1638 = vrot.lane.b32.xlu0 %v4054_v31, %s3486_s1  ;;  %v3223_v61 = vpop.f32.mrb[12].mxu0  ;;  %6964 = vst [vmem:[#allocation13_spill] sm:$0xff] %v4084_v20  ;;  %v4100_v23 = vmul.f32 %v4084_v20, %v4084_v20  ;;  %6968 = vst [vmem:[#allocation17_spill] sm:$0xff] %v4106_v36  ;;  %v4113_v46 = vsub.f32 0.0, %v4106_v36 }
 0x10e   :  { %v3224_v62 = vpop.f32.mrb[13].mxu0 }
 0x10f   :  { %1542 = vrot.lane.b32.xlu1 %v4064_v57, %s3486_s1  ;;  %v3225_v63 = vadd.f32 %v3224_v62, %v3223_v61  ;;  %v3226_v1 = vpop.f32.mrb[14].mxu0  ;;  %6966 = vst [vmem:[#allocation15_spill] sm:$0xff] %v4100_v23  ;;  %6969 = vst [vmem:[#allocation18_spill] sm:$0xff] %v4113_v46  ;;  %v4135_v56 = vmul.f32 %v4113_v46, %v4113_v46 }
 0x110   :  { %v3227_v3 = vpop.f32.mrb[15].mxu0 }
 0x111   :  { %1734 = vrot.lane.b32.xlu0 %v4064_v57, %s3487_s4  ;;  %v3228_v12 = vadd.f32 %v3227_v3, %v3226_v1  ;;  %v4116_v49 = vadd.f32 %v3225_v63, %v4018_v59  ;;  %6974 = vst [vmem:[#allocation23_spill] sm:$0xff] %v4135_v56 }
 0x113   :  { %1640 = vrot.lane.b32.xlu1 %v4074_v4, %s3486_s1  ;;  %6970 = vst [vmem:[#allocation19_spill] sm:$0xff] %v4116_v49  ;;  %v4129_v55 = vsub.f32 0.0, %v4116_v49  ;;  %v4162_v21 = vadd.f32 %v3228_v12, %v4018_v59 }
 0x115   :  { %1798 = vrot.lane.b32.xlu0 %v4064_v57, %s3488_s13  ;;  %v3229_v15 = vpop.f32.mrb[16].mxu0  ;;  %6973 = vst [vmem:[#allocation22_spill] sm:$0xff] %v4129_v55  ;;  %v4154_v45 = vmul.f32 %v4129_v55, %v4129_v55  ;;  %6978 = vst [vmem:[#allocation27_spill] sm:$0xff] %v4162_v21  ;;  %v4171_v63 = vsub.f32 0.0, %v4162_v21 }
 0x116   :  { %v3230_v16 = vpop.f32.mrb[17].mxu0 }
 0x117   :  { %1544 = vrot.lane.b32.xlu1 %v4090_v14, %s3486_s1  ;;  %v3231_v19 = vadd.f32 %v3230_v16, %v3229_v15  ;;  %v3232_v26 = vpop.f32.mrb[18].mxu0  ;;  %6976 = vst [vmem:[#allocation25_spill] sm:$0xff] %v4154_v45  ;;  %6979 = vst [vmem:[#allocation28_spill] sm:$0xff] %v4171_v63 }
 0x118   :  { %v3233_v28 = vpop.f32.mrb[19].mxu0 }
 0x119   :  { %1642 = vrot.lane.b32.xlu0 %v4084_v20, %s3486_s1  ;;  %v3234_v22 = vadd.f32 %v3233_v28, %v3232_v26  ;;  %v4174_v1 = vadd.f32 %v3231_v19, %v4018_v59 }
 0x11b   :  { %1736 = vrot.lane.b32.xlu1 %v4090_v14, %s3487_s4  ;;  %v4103_v34 = vadd.f32 %v3234_v22, %v4018_v59  ;;  %6980 = vst [vmem:[#allocation29_spill] sm:$0xff] %v4174_v1  ;;  %v4193_v19 = vsub.f32 0.0, %v4174_v1  ;;  %v4199_v22 = vmul.f32 %v4171_v63, %v4171_v63 }
 0x11c   :  { %v4139_v52 = vpop.f32.mrb[0].mxu1 }
 0x11d   :  { %6967 = vst [vmem:[#allocation16_spill] sm:$0xff] %v4103_v34  ;;  %1546 = vrot.lane.b32.xlu0 %v4100_v23, %s3486_s1  ;;  %v3235_v38 = vpop.f32.mrb[20].mxu0  ;;  %v4146_v37 = vpop.f32.mrb[1].mxu1  ;;  %6983 = vst [vmem:[#allocation32_spill] sm:$0xff] %v4193_v19 }
 0x11e   :  { %v3236_v27 = vpop.f32.mrb[21].mxu0  ;;  %v4148_v43 = vpop.f32.mrb[2].mxu1  ;;  %6984 = vst [vmem:[#allocation33_spill] sm:$0xff] %v4199_v22 }
 0x11f   :  { %1800 = vrot.lane.b32.xlu1 %v4090_v14, %s3488_s13  ;;  %v3237_v39 = vadd.f32 %v3236_v27, %v3235_v38  ;;  %v3238_v40 = vpop.f32.mrb[22].mxu0  ;;  %v4159_v6 = vpop.f32.mrb[3].mxu1 }
 0x120   :  { %v3239_v41 = vpop.f32.mrb[23].mxu0 }
 0x121   :  { %1738 = vrot.lane.b32.xlu0 %v4100_v23, %s3487_s4  ;;  %v4121_v42 = vadd.f32 %v3237_v39, %v4018_v59  ;;  %v3240_v29 = vadd.f32 %v3239_v41, %v3238_v40 }
 0x123   :  { %6971 = vst [vmem:[#allocation20_spill] sm:$0xff] %v4121_v42  ;;  %1644 = vrot.lane.b32.xlu1 %v4113_v46, %s3486_s1  ;;  %v4126_v44 = vadd.f32 %v3240_v29, %v4018_v59 }
 0x124   :  { %v4168_v62 = vpop.f32.mrb[4].mxu1 }
 0x125   :  { %6972 = vst [vmem:[#allocation21_spill] sm:$0xff] %v4126_v44  ;;  %1802 = vrot.lane.b32.xlu0 %v4100_v23, %s3488_s13  ;;  %v3241_v30 = vpop.f32.mrb[24].mxu0  ;;  %v4181_v15 = vpop.f32.mrb[5].mxu1  ;;  %v4286_v21 = vsub.f32 0.0, %v4126_v44 }
 0x126   :  { %v3242_v17 = vpop.f32.mrb[25].mxu0  ;;  %v4183_v16 = vpop.f32.mrb[6].mxu1 }
 0x127   :  { %1548 = vrot.lane.b32.xlu1 %v4135_v56, %s3486_s1  ;;  %v3243_v18 = vadd.f32 %v3242_v17, %v3241_v30  ;;  %v3244_v47 = vpop.f32.mrb[26].mxu0  ;;  %v4190_v28 = vpop.f32.mrb[7].mxu1  ;;  %6990 = vst [vmem:[#allocation39_spill] sm:$0xff] %v4286_v21  ;;  %v4307_v44 = vmul.f32 %v4286_v21, %v4286_v21 }
 0x128   :  { %v3245_v48 = vpop.f32.mrb[27].mxu0 }
 0x129   :  { %1646 = vrot.lane.b32.xlu0 %v4129_v55, %s3486_s1  ;;  %v4144_v24 = vadd.f32 %v3243_v18, %v4018_v59  ;;  %v3246_v25 = vadd.f32 %v3245_v48, %v3244_v47  ;;  %v4219_v18 = vmul.f32 %v4193_v19, %v4193_v19  ;;  %6992 = vst [vmem:[#allocation41_spill] sm:$0xff] %v4307_v44 }
 0x12b   :  { %6975 = vst [vmem:[#allocation24_spill] sm:$0xff] %v4144_v24  ;;  %1740 = vrot.lane.b32.xlu1 %v4135_v56, %s3487_s4  ;;  %v4157_v58 = vadd.f32 %v3246_v25, %v4018_v59  ;;  %6985 = vst [vmem:[#allocation34_spill] sm:$0xff] %v4219_v18 }
 0x12c   :  { %v4205_v41 = vpop.f32.mrb[8].mxu1 }
 0x12d   :  { %6977 = vst [vmem:[#allocation26_spill] sm:$0xff] %v4157_v58  ;;  %1550 = vrot.lane.b32.xlu0 %v4154_v45, %s3486_s1  ;;  %v3247_v33 = vpop.f32.mrb[28].mxu0  ;;  %v4211_v30 = vpop.f32.mrb[9].mxu1  ;;  %v4340_v46 = vsub.f32 0.0, %v4157_v58 }
 0x12e   :  { %v3248_v35 = vpop.f32.mrb[29].mxu0  ;;  %v4213_v17 = vpop.f32.mrb[10].mxu1 }
 0x12f   :  { %1804 = vrot.lane.b32.xlu1 %v4135_v56, %s3488_s13  ;;  %v3249_v53 = vadd.f32 %v3248_v35, %v3247_v33  ;;  %v3250_v54 = vpop.f32.mrb[30].mxu0  ;;  %v4221_v47 = vpop.f32.mrb[11].mxu1  ;;  %6994 = vst [vmem:[#allocation43_spill] sm:$0xff] %v4340_v46  ;;  %v4361_v58 = vmul.f32 %v4340_v46, %v4340_v46 }
 0x130   :  { %v3251_v61 = vpop.f32.mrb[31].mxu0 }
 0x131   :  { %1742 = vrot.lane.b32.xlu0 %v4154_v45, %s3487_s4  ;;  %v4179_v3 = vadd.f32 %v3249_v53, %v4018_v59  ;;  %v3252_v12 = vadd.f32 %v3251_v61, %v3250_v54  ;;  %v4232_v61 = vsub.f32 0.0, %v4103_v34  ;;  %6996 = vst [vmem:[#allocation45_spill] sm:$0xff] %v4361_v58 }
 0x133   :  { %6981 = vst [vmem:[#allocation30_spill] sm:$0xff] %v4179_v3  ;;  %1648 = vrot.lane.b32.xlu1 %v4171_v63, %s3486_s1  ;;  %v4188_v26 = vadd.f32 %v3252_v12, %v4018_v59  ;;  %6986 = vst [vmem:[#allocation35_spill] sm:$0xff] %v4232_v61 }
 0x134   :  { %v4229_v54 = vpop.f32.mrb[12].mxu1 }
 0x135   :  { %6982 = vst [vmem:[#allocation31_spill] sm:$0xff] %v4188_v26  ;;  %1806 = vrot.lane.b32.xlu0 %v4154_v45, %s3488_s13  ;;  %v3269_v38 = vpop.f32.mrb[32].mxu0 }
 0x136   :  { %v3270_v27 = vpop.f32.mrb[33].mxu0 }
 0x137   :  { %1552 = vrot.lane.b32.xlu1 %v4199_v22, %s3486_s1  ;;  %v4203_v39 = vadd.f32 %v3270_v27, %v3269_v38  ;;  %v3272_v59 = vpop.f32.mrb[34].mxu0  ;;  %v4238_v38 = vpop.f32.mrb[13].mxu1 }
 0x138   :  { %v3273_v40 = vpop.f32.mrb[35].mxu0  ;;  %v4240_v27 = vpop.f32.mrb[14].mxu1 }
 0x139   :  { %1650 = vrot.lane.b32.xlu0 %v4193_v19, %s3486_s1  ;;  %v4209_v29 = vadd.f32 %v3273_v40, %v3272_v59  ;;  %v4244_v59 = vpop.f32.mrb[15].mxu1  ;;  %v4247_v40 = vsub.f32 0.0, %v4121_v42 }
 0x13b   :  { %1744 = vrot.lane.b32.xlu1 %v4199_v22, %s3487_s4  ;;  %6987 = vst [vmem:[#allocation36_spill] sm:$0xff] %v4247_v40 }
 0x13c   :  { %v4259_v51 = vpop.f32.mrb[16].mxu1 }
 0x13d   :  { %1554 = vrot.lane.b32.xlu0 %v4219_v18, %s3486_s1  ;;  %v3275_v48 = vpop.f32.mrb[36].mxu0  ;;  %v4265_v1 = vpop.f32.mrb[17].mxu1 }
 0x13e   :  { %v3276_v25 = vpop.f32.mrb[37].mxu0  ;;  %v4267_v49 = vpop.f32.mrb[18].mxu1 }
 0x13f   :  { %1808 = vrot.lane.b32.xlu1 %v4199_v22, %s3488_s13  ;;  %v4227_v33 = vadd.f32 %v3276_v25, %v3275_v48  ;;  %v3278_v35 = vpop.f32.mrb[38].mxu0  ;;  %v4253_v48 = vmul.f32 %v4232_v61, %v4232_v61 }
 0x140   :  { %v3279_v53 = vpop.f32.mrb[39].mxu0 }
 0x141   :  { %1746 = vrot.lane.b32.xlu0 %v4219_v18, %s3487_s4  ;;  %v4236_v12 = vadd.f32 %v3279_v53, %v3278_v35  ;;  %6988 = vst [vmem:[#allocation37_spill] sm:$0xff] %v4253_v48 }
 0x143   :  { %1652 = vrot.lane.b32.xlu1 %v4232_v61, %s3486_s1 }
 0x145   :  { %1810 = vrot.lane.b32.xlu0 %v4219_v18, %s3488_s13  ;;  %v3281_v25 = vpop.f32.mrb[40].mxu0 }
 0x146   :  { %v3282_v35 = vpop.f32.mrb[41].mxu0 }
 0x147   :  { %1556 = vrot.lane.b32.xlu1 %v4253_v48, %s3486_s1  ;;  %v4257_v53 = vadd.f32 %v3282_v35, %v3281_v25  ;;  %v3284_v5 = vpop.f32.mrb[42].mxu0  ;;  %v4273_v25 = vmul.f32 %v4247_v40, %v4247_v40  ;;  %v4275_v35 = vpop.f32.mrb[19].mxu1 }
 0x148   :  { %v3285_v0 = vpop.f32.mrb[43].mxu0  ;;  %v4283_v34 = vpop.f32.mrb[20].mxu1 }
 0x149   :  { %1654 = vrot.lane.b32.xlu0 %v4247_v40, %s3486_s1  ;;  %v4263_v42 = vadd.f32 %v3285_v0, %v3284_v5  ;;  %6989 = vst [vmem:[#allocation38_spill] sm:$0xff] %v4273_v25  ;;  %v4292_v40 = vpop.f32.mrb[21].mxu1 }
 0x14a   :  { %v4294_v18 = vpop.f32.mrb[22].mxu1 }
 0x14b   :  { %1748 = vrot.lane.b32.xlu1 %v4253_v48, %s3487_s4 }
 0x14d   :  { %1558 = vrot.lane.b32.xlu0 %v4273_v25, %s3486_s1  ;;  %v3287_v7 = vpop.f32.mrb[44].mxu0 }
 0x14e   :  { %v3288_v9 = vpop.f32.mrb[45].mxu0 }
 0x14f   :  { %1812 = vrot.lane.b32.xlu1 %v4253_v48, %s3488_s13  ;;  %v4281_v5 = vadd.f32 %v3288_v9, %v3287_v7  ;;  %v3290_v0 = vpop.f32.mrb[46].mxu0  ;;  %v4298_v9 = vpop.f32.mrb[23].mxu1  ;;  %v4301_v7 = vsub.f32 0.0, %v4144_v24 }
 0x150   :  { %v3291_v60 = vpop.f32.mrb[47].mxu0  ;;  %v4313_v22 = vpop.f32.mrb[24].mxu1 }
 0x151   :  { %1750 = vrot.lane.b32.xlu0 %v4273_v25, %s3487_s4  ;;  %v4290_v36 = vadd.f32 %v3291_v60, %v3290_v0  ;;  %6991 = vst [vmem:[#allocation40_spill] sm:$0xff] %v4301_v7 }
 0x153   :  { %1656 = vrot.lane.b32.xlu1 %v4286_v21, %s3486_s1 }
 0x155   :  { %1814 = vrot.lane.b32.xlu0 %v4273_v25, %s3488_s13  ;;  %v3293_v60 = vpop.f32.mrb[48].mxu0  ;;  %v4319_v25 = vpop.f32.mrb[25].mxu1 }
 0x156   :  { %v3294_v0 = vpop.f32.mrb[49].mxu0  ;;  %v4321_v21 = vpop.f32.mrb[26].mxu1 }
 0x157   :  { %1560 = vrot.lane.b32.xlu1 %v4307_v44, %s3486_s1  ;;  %v4311_v48 = vadd.f32 %v3294_v0, %v3293_v60  ;;  %v3296_v61 = vpop.f32.mrb[50].mxu0  ;;  %v4327_v60 = vmul.f32 %v4301_v7, %v4301_v7  ;;  %v4329_v0 = vpop.f32.mrb[27].mxu1 }
 0x158   :  { %v3297_v19 = vpop.f32.mrb[51].mxu0  ;;  %v4337_v56 = vpop.f32.mrb[28].mxu1 }
 0x159   :  { %1658 = vrot.lane.b32.xlu0 %v4301_v7, %s3486_s1  ;;  %v4317_v24 = vadd.f32 %v3297_v19, %v3296_v61  ;;  %6993 = vst [vmem:[#allocation42_spill] sm:$0xff] %v4327_v60  ;;  %v4346_v23 = vpop.f32.mrb[29].mxu1 }
 0x15a   :  { %v4348_v20 = vpop.f32.mrb[30].mxu1 }
 0x15b   :  { %1752 = vrot.lane.b32.xlu1 %v4307_v44, %s3487_s4 }
 0x15d   :  { %1562 = vrot.lane.b32.xlu0 %v4327_v60, %s3486_s1  ;;  %v3299_v63 = vpop.f32.mrb[52].mxu0 }
 0x15e   :  { %v3300_v45 = vpop.f32.mrb[53].mxu0 }
 0x15f   :  { %1816 = vrot.lane.b32.xlu1 %v4307_v44, %s3488_s13  ;;  %v4335_v19 = vadd.f32 %v3300_v45, %v3299_v63  ;;  %v3302_v61 = vpop.f32.mrb[54].mxu0  ;;  %v4352_v45 = vpop.f32.mrb[31].mxu1  ;;  %v4355_v63 = vsub.f32 0.0, %v4179_v3 }
 0x160   :  { %v3303_v55 = vpop.f32.mrb[55].mxu0 }
 0x161   :  { %1754 = vrot.lane.b32.xlu0 %v4327_v60, %s3487_s4  ;;  %v4344_v7 = vadd.f32 %v3303_v55, %v3302_v61  ;;  %6995 = vst [vmem:[#allocation44_spill] sm:$0xff] %v4355_v63  ;;  %v3305_v55 = vpop.f32.mrb[32].mxu1  ;;  %v4373_v3 = vmul.f32 %v4355_v63, %v4355_v63 }
 0x162   :  { %v3306_v61 = vpop.f32.mrb[33].mxu1 }
 0x163   :  { %1660 = vrot.lane.b32.xlu1 %v4340_v46, %s3486_s1  ;;  %v4367_v44 = vadd.f32 %v3306_v61, %v3305_v55  ;;  %v3308_v14 = vpop.f32.mrb[34].mxu1  ;;  %6997 = vst [vmem:[#allocation46_spill] sm:$0xff] %v4373_v3  ;;  %v4384_v61 = vsub.f32 0.0, %v4188_v26 }
 0x164   :  { %v3309_v46 = vpop.f32.mrb[35].mxu1 }
 0x165   :  { %1818 = vrot.lane.b32.xlu0 %v4327_v60, %s3488_s13  ;;  %v4375_v60 = vadd.f32 %v3309_v46, %v3308_v14  ;;  %v3311_v55 = vpop.f32.mrb[36].mxu1  ;;  %6999 = vst [vmem:[#allocation48_spill] sm:$0xff] %v4384_v61  ;;  %v4404_v26 = vmul.f32 %v4384_v61, %v4384_v61 }
 0x167   :  { %1564 = vrot.lane.b32.xlu1 %v4361_v58, %s3486_s1  ;;  %7003 = vst [vmem:[#allocation52_spill] sm:$0xff] %v4404_v26 }
 0x169   :  { %1662 = vrot.lane.b32.xlu0 %v4355_v63, %s3486_s1  ;;  %v3312_v63 = vpop.f32.mrb[37].mxu1 }
 0x16a   :  { %v4390_v14 = vadd.f32 %v3312_v63, %v3311_v55  ;;  %v3314_v46 = vpop.f32.mrb[38].mxu1 }
 0x16b   :  { %1756 = vrot.lane.b32.xlu1 %v4361_v58, %s3487_s4 }
 0x16d   :  { %1566 = vrot.lane.b32.xlu0 %v4373_v3, %s3486_s1 }
 0x16f   :  { %1820 = vrot.lane.b32.xlu1 %v4361_v58, %s3488_s13  ;;  %v4381_v4 = vpop.permute.xlu0 %1634  ;;  %v3315_v58 = vpop.f32.mrb[39].mxu1 }
 0x170   :  { %6998 = vst [vmem:[#allocation47_spill] sm:$0xff] %v4381_v4  ;;  %v4396_v4 = vadd.f32 %v3315_v58, %v3314_v46 }
 0x171   :  { %v4386_v57 = vpop.permute.xlu1 %1636  ;;  %1758 = vrot.lane.b32.xlu0 %v4373_v3, %s3487_s4 }
 0x172   :  { %7000 = vst [vmem:[#allocation49_spill] sm:$0xff] %v4386_v57  ;;  %7001 = vst [vmem:[#allocation50_spill] sm:$0xff] %v4396_v4  ;;  %v519_v4 = vsub.s32 2, %v3557_v8 }
 0x173   :  { %1664 = vrot.lane.b32.xlu1 %v4384_v61, %s3486_s1  ;;  %v4394_v31 = vpop.permute.xlu0 %1538  ;;  %v507_v61 = vld [vmem:[%s6778_s6] sm:$0x7]  ;;  %s3489_s6 = smov 2  }
 0x174   :  { %v4444_v10 = vrot.slane %v507_v61, %v519_v4 }
 0x175   :  { %v4398_v50 = vpop.permute.xlu1 %1540  ;;  %1822 = vrot.lane.b32.xlu0 %v4373_v3, %s3488_s13 }
 0x176   :  { %7002 = vst [vmem:[#allocation51_spill] sm:$0xff] %v4398_v50  ;;  %v4431_v50 = vrot.slane %v507_v61, %v3566_v11  ;;  %v4454_v8 = vadd.f32 %v4203_v39, %v4444_v10 }
 0x177   :  { %1568 = vrot.lane.b32.xlu1 %v4404_v26, %s3486_s1  ;;  %v4408_v63 = vpop.permute.xlu0 %1730 }
 0x178   :  { %7011 = vst [vmem:[#allocation60_spill] sm:$0xff] %v4454_v8 }
 0x179   :  { %v4410_v55 = vpop.permute.xlu1 %1732 }
 0x17a   :  { %7004 = vst [vmem:[#allocation53_spill] sm:$0xff] %v4410_v55  ;;  %v4428_v55 = vrot.slane %v507_v61, %v3572_v13 }
 0x17b   :  { %1760 = vrot.lane.b32.xlu1 %v4404_v26, %s3487_s4  ;;  %v4414_v58 = vpop.permute.xlu0 %1794 }
 0x17c   :  { %v4468_v61 = vadd.f32 %v4205_v41, %v4428_v55 }
 0x17d   :  { %v4416_v46 = vpop.permute.xlu1 %1796 }
 0x17e   :  { %7005 = vst [vmem:[#allocation54_spill] sm:$0xff] %v4416_v46  ;;  %7014 = vst [vmem:[#allocation63_spill] sm:$0xff] %v4468_v61 }
 0x17f   :  { %1824 = vrot.lane.b32.xlu1 %v4404_v26, %s3488_s13  ;;  %v4420_v3 = vpop.permute.xlu0 %1638  ;;  %v4438_v26 = vadd.f32 %v4139_v52, %v4428_v55  ;;  %v4458_v52 = vadd.f32 %v4148_v43, %v4428_v55  ;;  %v4478_v43 = vadd.f32 %v4209_v29, %v4444_v10  ;;  %v4495_v29 = vadd.f32 %v4238_v38, %v4431_v50 }
 0x180   :  { %7006 = vst [vmem:[#allocation55_spill] sm:$0xff] %v4420_v3  ;;  %v4442_v3 = vadd.f32 %v4146_v37, %v4431_v50  ;;  %v4462_v37 = vadd.f32 %v4159_v6, %v4431_v50  ;;  %v4514_v38 = vadd.f32 %v4265_v1, %v4431_v50 }
 0x181   :  { %v4425_v57 = vpop.permute.xlu1 %1542  ;;  %7008 = vst [vmem:[#allocation57_spill] sm:$0xff] %v4438_v26  ;;  %7012 = vst [vmem:[#allocation61_spill] sm:$0xff] %v4458_v52 }
 0x182   :  { %7007 = vst [vmem:[#allocation56_spill] sm:$0xff] %v4425_v57  ;;  %7009 = vst [vmem:[#allocation58_spill] sm:$0xff] %v4442_v3  ;;  %v990_v11 = vmax.f32 %v4438_v26, %v4442_v3  ;;  %v4472_v3 = vadd.f32 %v4211_v30, %v4431_v50  ;;  %v994_v39 = vmax.f32 %v4458_v52, %v4462_v37 }
 0x183   :  { %v4434_v46 = vpop.permute.xlu0 %1734  ;;  %7013 = vst [vmem:[#allocation62_spill] sm:$0xff] %v4462_v37  ;;  %7016 = vst [vmem:[#allocation65_spill] sm:$0xff] %v4478_v43  ;;  %v4491_v30 = vadd.f32 %v4229_v54, %v4428_v55  ;;  %v4510_v54 = vadd.f32 %v4259_v51, %v4428_v55  ;;  %v4531_v51 = vadd.f32 %v4190_v28, %v4431_v50 }
 0x184   :  { %7015 = vst [vmem:[#allocation64_spill] sm:$0xff] %v4472_v3  ;;  %v991_v6 = vmax.f32 %v990_v11, %v4454_v8  ;;  %v1006_v41 = vmax.f32 %v4468_v61, %v4472_v3  ;;  %7019 = vst [vmem:[#allocation68_spill] sm:$0xff] %v4495_v29  ;;  %v995_v11 = vmax.f32 %v994_v39, %v4478_v43 }
 0x185   :  { %v4446_v57 = vpop.permute.xlu1 %1640  ;;  %7018 = vst [vmem:[#allocation67_spill] sm:$0xff] %v4491_v30  ;;  %7022 = vst [vmem:[#allocation71_spill] sm:$0xff] %v4510_v54  ;;  %v1014_v39 = vmax.f32 %v4491_v30, %v4495_v29  ;;  %v4549_v28 = vadd.f32 %v4313_v22, %v4428_v55  ;;  %v4570_v22 = vadd.f32 %v4236_v12, %v4444_v10 }
 0x186   :  { %7010 = vst [vmem:[#allocation59_spill] sm:$0xff] %v4446_v57  ;;  %v4487_v57 = vadd.f32 %v4257_v53, %v4444_v10  ;;  %v4506_v53 = vadd.f32 %v4181_v15, %v4431_v50  ;;  %7023 = vst [vmem:[#allocation72_spill] sm:$0xff] %v4514_v38 }
 0x187   :  { %v4448_v13 = vpop.permute.xlu0 %1798  ;;  %7026 = vst [vmem:[#allocation75_spill] sm:$0xff] %v4531_v51  ;;  %7029 = vst [vmem:[#allocation78_spill] sm:$0xff] %v4549_v28 }
 0x188   :  { %7017 = vst [vmem:[#allocation66_spill] sm:$0xff] %v4487_v57  ;;  %7021 = vst [vmem:[#allocation70_spill] sm:$0xff] %v4506_v53  ;;  %v1007_v15 = vmax.f32 %v1006_v41, %v4487_v57  ;;  %v1022_v41 = vmax.f32 %v4510_v54, %v4514_v38  ;;  %v4562_v38 = vadd.f32 %v4213_v17, %v4428_v55 }
 0x189   :  { %v4464_v4 = vpop.permute.xlu1 %1544  ;;  %7033 = vst [vmem:[#allocation82_spill] sm:$0xff] %v4570_v22  ;;  %v7051_v43 = vld [vmem:[#allocation56_spill] sm:$0xff] }
 0x18a   :  { %7031 = vst [vmem:[#allocation80_spill] sm:$0xff] %v4562_v38 }
 0x18b   :  { %v4481_v26 = vpop.permute.xlu0 %1642 }
 0x18d   :  { %v4497_v37 = vpop.permute.xlu1 %1736 }
 0x18f   :  { %v4516_v3 = vpop.permute.xlu0 %1546 }
 0x191   :  { %v4533_v1 = vpop.permute.xlu1 %1800 }
 0x193   :  { %v4556_v57 = vpop.permute.xlu0 %1738 }
 0x194   :  { %992 = vmax.xlane.f32.xlu0 %v991_v6  ;;  %v4502_v6 = vadd.f32 %v4168_v62, %v4428_v55  ;;  %v4522_v62 = vadd.f32 %v4281_v5, %v4444_v10  ;;  %v4539_v5 = vadd.f32 %v4227_v33, %v4444_v10 }
 0x196   :  { %7020 = vst [vmem:[#allocation69_spill] sm:$0xff] %v4502_v6  ;;  %7024 = vst [vmem:[#allocation73_spill] sm:$0xff] %v4522_v62  ;;  %v998_v29 = vmax.f32 %v4502_v6, %v4506_v53  ;;  %v1015_v30 = vmax.f32 %v1014_v39, %v4522_v62  ;;  %v4578_v39 = vadd.f32 %v4292_v40, %v4431_v50  ;;  %v7052_v6 = vld [vmem:[#allocation9_spill] sm:$0xff] }
 0x197   :  { %7027 = vst [vmem:[#allocation76_spill] sm:$0xff] %v4539_v5  ;;  %v4594_v40 = vadd.f32 %v4240_v27, %v4428_v55  ;;  %v4611_v27 = vadd.f32 %v4335_v19, %v4444_v10  ;;  %v1780_v8 = vadd.f32 %v4434_v46, %v7052_v6 }
 0x198   :  { %996 = vmax.xlane.f32.xlu0 %v995_v11  ;;  %v4527_v11 = vadd.f32 %v4183_v16, %v4428_v55  ;;  %v4545_v16 = vadd.f32 %v4311_v48, %v4444_v10  ;;  %v4566_v48 = vadd.f32 %v4221_v47, %v4431_v50  ;;  %v999_v17 = vmax.f32 %v998_v29, %v4539_v5 }
 0x199   :  { %v4585_v47 = vadd.f32 %v4367_v44, %v4444_v10  ;;  %7035 = vst [vmem:[#allocation84_spill] sm:$0xff] %v4594_v40  ;;  %v4598_v29 = vadd.f32 %v4263_v42, %v4444_v10  ;;  %v4602_v44 = vadd.f32 %v4244_v59, %v4431_v50  ;;  %v4619_v42 = vadd.f32 %v4346_v23, %v4431_v50 }
 0x19a   :  { %7025 = vst [vmem:[#allocation74_spill] sm:$0xff] %v4527_v11  ;;  %7028 = vst [vmem:[#allocation77_spill] sm:$0xff] %v4545_v16  ;;  %v1002_v33 = vmax.f32 %v4527_v11, %v4531_v51  ;;  %v1023_v12 = vmax.f32 %v1022_v41, %v4545_v16  ;;  %v4636_v23 = vadd.f32 %v4290_v36, %v4444_v10 }
 0x19b   :  { %7032 = vst [vmem:[#allocation81_spill] sm:$0xff] %v4566_v48  ;;  %7034 = vst [vmem:[#allocation83_spill] sm:$0xff] %v4585_v47  ;;  %v4652_v36 = vadd.f32 %v4317_v24, %v4444_v10  ;;  %v4669_v24 = vadd.f32 %v4294_v18, %v4428_v55 }
 0x19c   :  { %1008 = vmax.xlane.f32.xlu0 %v1007_v15  ;;  %v4553_v15 = vadd.f32 %v4319_v25, %v4431_v50  ;;  %v4574_v25 = vadd.f32 %v4283_v34, %v4428_v55  ;;  %v1010_v34 = vmax.f32 %v4562_v38, %v4566_v48  ;;  %7036 = vst [vmem:[#allocation85_spill] sm:$0xff] %v4598_v29  ;;  %7037 = vst [vmem:[#allocation86_spill] sm:$0xff] %v4602_v44  ;;  %v7044_v48 = vld [vmem:[#allocation6_spill] sm:$0xff]  ;;  %v7045_v38 = vld [vmem:[#allocation53_spill] sm:$0xff] }
 0x19d   :  { %v1003_v16 = vmax.f32 %v1002_v33, %v4570_v22  ;;  %v4628_v33 = vadd.f32 %v4275_v35, %v4431_v50  ;;  %7038 = vst [vmem:[#allocation87_spill] sm:$0xff] %v4636_v23 }
 0x19e   :  { %7030 = vst [vmem:[#allocation79_spill] sm:$0xff] %v4553_v15  ;;  %v1038_v54 = vmax.f32 %v4549_v28, %v4553_v15  ;;  %v1030_v41 = vmax.f32 %v4574_v25, %v4578_v39  ;;  %v4624_v15 = vadd.f32 %v4267_v49, %v4428_v55 }
 0x1a0   :  { %1016 = vmax.xlane.f32.xlu0 %v1015_v30  ;;  %v4587_v30 = vpop.permute.xlu1 %1644  ;;  %v1039_v59 = vmax.f32 %v1038_v54, %v4585_v47  ;;  %v1011_v54 = vmax.f32 %v1010_v34, %v4598_v29  ;;  %v1031_v35 = vmax.f32 %v1030_v41, %v4611_v27  ;;  %v4656_v34 = vadd.f32 %v4321_v21, %v4428_v55 }
 0x1a1   :  { %v4673_v21 = vadd.f32 %v4298_v9, %v4431_v50  ;;  %v4688_v9 = vadd.f32 %v4344_v7, %v4444_v10 }
 0x1a3   :  { %1000 = vmax.xlane.f32.xlu1 %v999_v17  ;;  %v4606_v17 = vpop.permute.xlu0 %1802  ;;  %v1034_v18 = vmax.f32 %v4669_v24, %v4673_v21  ;;  %7039 = vst [vmem:[#allocation88_spill] sm:$0xff] %v4688_v9 }
 0x1a4   :  { %1024 = vmax.xlane.f32.xlu0 %v1023_v12  ;;  %v4615_v12 = vadd.f32 %v4337_v56, %v4428_v55  ;;  %v4630_v19 = vpop.permute.xlu1 %1548  ;;  %v1018_v56 = vmax.f32 %v4594_v40, %v4602_v44 }
 0x1a6   :  { %v1046_v49 = vmax.f32 %v4615_v12, %v4619_v42  ;;  %v1019_v41 = vmax.f32 %v1018_v56, %v4636_v23  ;;  %v4679_v56 = vadd.f32 %v4375_v60, %v4444_v10 }
 0x1a7   :  { %1004 = vmax.xlane.f32.xlu1 %v1003_v16  ;;  %v4643_v16 = vadd.f32 %v4390_v14, %v4444_v10  ;;  %v4646_v47 = vpop.permute.xlu0 %1646  ;;  %v4660_v14 = vadd.f32 %v4329_v0, %v4431_v50 }
 0x1a8   :  { %1040 = vmax.xlane.f32.xlu0 %v1039_v59  ;;  %v1026_v59 = vmax.f32 %v4624_v15, %v4628_v33  ;;  %v4663_v28 = vpop.permute.xlu1 %1740 }
 0x1a9   :  { %v1042_v0 = vmax.f32 %v4656_v34, %v4660_v14 }
 0x1ab   :  { %1012 = vmax.xlane.f32.xlu1 %v1011_v54  ;;  %v1047_v54 = vmax.f32 %v1046_v49, %v4643_v16  ;;  %v4681_v49 = vpop.permute.xlu0 %1550  ;;  %v1043_v44 = vmax.f32 %v1042_v0, %v4679_v56 }
 0x1ac   :  { %1032 = vmax.xlane.f32.xlu0 %v1031_v35  ;;  %v1474_v35 = vsub.f32 0.0, %v4024_v2  ;;  %v4694_v62 = vpop.permute.xlu1 %1804 }
 0x1ae   :  { %v1490_v23 = vmul.f32 %v1474_v35, %v1474_v35 }
 0x1af   :  { %1020 = vmax.xlane.f32.xlu1 %v1019_v41  ;;  %v1027_v41 = vmax.f32 %v1026_v59, %v4652_v36  ;;  %v1778_v59 = vadd.f32 %v4408_v63, %v4038_v32  ;;  %v4705_v40 = vpop.permute.xlu0 %1742 }
 0x1b0   :  { %1048 = vmax.xlane.f32.xlu0 %v1047_v54  ;;  %v4692_v54 = vadd.f32 %v4348_v20, %v4428_v55  ;;  %v1586_v60 = vadd.f32 %v4394_v31, %v1490_v23  ;;  %v7040_v20 = vld [vmem:[#allocation5_spill] sm:$0xff]  ;;  %v7041_v23 = vld [vmem:[#allocation50_spill] sm:$0xff] }
 0x1b1   :  { %v1842_v7 = vadd.f32 %v4414_v58, %v1778_v59  ;;  %v1475_v55 = vsub.f32 0.0, %v7040_v20  ;;  %v4712_v32 = vadd.f32 %v7041_v23, %v4444_v10  ;;  %v7043_v59 = vld [vmem:[#allocation51_spill] sm:$0xff]  ;;  %v1779_v10 = vadd.f32 %v7045_v38, %v7044_v48 }
 0x1b2   :  { %vm1602_vm0 = vcmp.eq.f32.partialorder %v1586_v60, 0.0  ;;  %v7047_v38 = vld [vmem:[#allocation47_spill] sm:$0xff] }
 0x1b3   :  { %1028 = vmax.xlane.f32.xlu1 %v1027_v41  ;;  %v4701_v41 = vadd.f32 %v4352_v45, %v4431_v50  ;;  %7042 = vst [vmem:[#allocation50_spill] sm:$0xff] %v4712_v32  ;;  %v1035_v50 = vmax.f32 %v1034_v18, %v4688_v9  ;;  %v4715_v45 = vpop.permute.xlu1 %1648  ;;  %3422 = vrsqrt.f32 %v1842_v7  ;;  %v1698_v63 = vsel %vm1602_vm0, 1.0, %v1586_v60  ;;  %v7046_v18 = vld [vmem:[#allocation54_spill] sm:$0xff] }
 0x1b4   :  { %v1491_v58 = vmul.f32 %v1475_v55, %v1475_v55  ;;  %3424 = vrsqrt.f32 %v1698_v63  ;;  %v1843_v22 = vadd.f32 %v7046_v18, %v1779_v10  ;;  %v1682_v48 = vsel %vm1602_vm0, 1.0, %v7047_v38 }
 0x1b5   :  { %v1050_v31 = vmax.f32 %v4692_v54, %v4701_v41 }
 0x1b6   :  { %v1587_v29 = vadd.f32 %v7043_v59, %v1491_v58  ;;  %3426 = vrsqrt.f32 %v1843_v22  ;;  %v7048_v59 = vld [vmem:[#allocation8_spill] sm:$0xff] }
 0x1b7   :  { %1044 = vmax.xlane.f32.xlu1 %v1043_v44  ;;  %v4718_v44 = vpop.permute.xlu0 %1806  ;;  %v1051_v0 = vmax.f32 %v1050_v31, %v4712_v32  ;;  %v4724_v23 = vpop.permute.xlu1 %1552  ;;  %v1476_v10 = vsub.f32 0.0, %v7048_v59 }
 0x1b8   :  { %vm1603_vm1 = vcmp.eq.f32.partialorder %v1587_v29, 0.0 }
 0x1b9   :  { %v1699_v5 = vsel %vm1603_vm1, 1.0, %v1587_v29  ;;  %v1492_v38 = vmul.f32 %v1476_v10, %v1476_v10  ;;  %v7054_v29 = vld [vmem:[#allocation11_spill] sm:$0xff] }
 0x1ba   :  { %3428 = vrsqrt.f32 %v1699_v5 }
 0x1bb   :  { %1036 = vmax.xlane.f32.xlu1 %v1035_v50  ;;  %v4727_v7 = vpop.permute.xlu0 %1650  ;;  %v4730_v61 = vpop.permute.xlu1 %1744  ;;  %v1588_v53 = vadd.f32 %v7051_v43, %v1492_v38  ;;  %v1477_v43 = vsub.f32 0.0, %v7054_v29  ;;  %v7057_v38 = vld [vmem:[#allocation14_spill] sm:$0xff] }
 0x1bd   :  { %v3423_v50 = vpop.eup %3422  ;;  %vm1604_vm2 = vcmp.eq.f32.partialorder %v1588_v53, 0.0 }
 0x1be   :  { %v3425_v31 = vpop.eup %3424  ;;  %v4765_v9 = vmul.f32 %v3423_v50, %v4024_v2 }
 0x1bf   :  { %1052 = vmax.xlane.f32.xlu1 %v1051_v0  ;;  %v4733_v63 = vpop.permute.xlu0 %1554  ;;  %v4738_v58 = vpop.permute.xlu1 %1808  ;;  %v2050_v0 = vmul.f32 %v3425_v31, %v1682_v48  ;;  %v4745_v5 = vmul.f32 %v3425_v31, %v1474_v35  ;;  %v7050_v48 = vld [vmem:[#allocation49_spill] sm:$0xff]  ;;  %v1844_v31 = vadd.f32 %v4448_v13, %v1780_v8  ;;  %v1700_v13 = vsel %vm1604_vm2, 1.0, %v1588_v53 }
 0x1c0   :  { %v3427_v22 = vpop.eup %3426  ;;  %v1683_v11 = vsel %vm1603_vm1, 1.0, %v7050_v48  ;;  %7053 = vst [vmem:[#allocation6_spill] sm:$0xff] %v4765_v9  ;;  %v1493_v8 = vmul.f32 %v1477_v43, %v1477_v43 }
 0x1c1   :  { %7049 = vst [vmem:[#allocation51_spill] sm:$0xff] %v4745_v5  ;;  %3430 = vrsqrt.f32 %v1844_v31  ;;  %v4790_v31 = vmul.f32 %v3427_v22, %v7040_v20 }
 0x1c2   :  { %3432 = vrsqrt.f32 %v1700_v13  ;;  %v7060_v13 = vld [vmem:[#allocation55_spill] sm:$0xff] }
 0x1c3   :  { %v4742_v18 = vpop.permute.xlu0 %1746  ;;  %v4747_v51 = vpop.permute.xlu1 %1652  ;;  %7058 = vst [vmem:[#allocation47_spill] sm:$0xff] %v4790_v31 }
 0x1c4   :  { %v3429_v60 = vpop.eup %3428 }
 0x1c5   :  { %v2051_v35 = vmul.f32 %v3429_v60, %v1683_v11  ;;  %v4770_v46 = vmul.f32 %v3429_v60, %v1475_v55  ;;  %v1781_v55 = vadd.f32 %v4497_v37, %v7057_v38 }
 0x1c6   :  { %1906 = vrot.lane.b32.xlu0 %v3423_v50, %s3486_s1 }
 0x1c7   :  { %v4757_v52 = vpop.permute.xlu0 %1810  ;;  %v4761_v32 = vpop.permute.xlu1 %1556  ;;  %7055 = vst [vmem:[#allocation53_spill] sm:$0xff] %v4770_v46  ;;  %v1845_v60 = vadd.f32 %v4533_v1, %v1781_v55 }
 0x1c9   :  { %3434 = vrsqrt.f32 %v1845_v60 }
 0x1ca   :  { %1970 = vrot.lane.b32.xlu0 %v3423_v50, %s3489_s6  ;;  %v1589_v50 = vadd.f32 %v4464_v4, %v1493_v8  ;;  %v1684_v8 = vsel %vm1604_vm2, 1.0, %v7060_v13 }
 0x1cb   :  { %v4772_v6 = vpop.permute.xlu0 %1654  ;;  %v4777_v11 = vpop.permute.xlu1 %1748 }
 0x1cc   :  { %7056 = vst [vmem:[#allocation54_spill] sm:$0xff] %v4772_v6  ;;  %vm1605_vm3 = vcmp.eq.f32.partialorder %v1589_v50, 0.0  ;;  %v3431_v4 = vpop.eup %3430 }
 0x1cd   :  { %v1701_v37 = vsel %vm1605_vm3, 1.0, %v1589_v50  ;;  %v7068_v50 = vld [vmem:[#allocation18_spill] sm:$0xff] }
 0x1ce   :  { %2098 = vrot.lane.b32.xlu0 %v2050_v0, %s3486_s1  ;;  %3436 = vrsqrt.f32 %v1701_v37 }
 0x1cf   :  { %v4786_v48 = vpop.permute.xlu0 %1558 }
 0x1d0   :  { %1908 = vrot.lane.b32.xlu1 %v3427_v22, %s3486_s1 }
 0x1d2   :  { %2178 = vrot.lane.b32.xlu0 %v4745_v5, %s3486_s1 }
 0x1d3   :  { %v4798_v1 = vpop.permute.xlu0 %1750 }
 0x1d4   :  { %1972 = vrot.lane.b32.xlu1 %v3427_v22, %s3489_s6 }
 0x1d6   :  { %2242 = vrot.lane.b32.xlu0 %v2050_v0, %s3487_s4 }
 0x1d7   :  { %v4808_v55 = vpop.permute.xlu0 %1814 }
 0x1d8   :  { %2100 = vrot.lane.b32.xlu1 %v2051_v35, %s3486_s1 }
 0x1da   :  { %2418 = vrot.lane.b32.xlu0 %v4765_v9, %s3490_s0  ;;  %v4792_v9 = vpop.permute.xlu1 %1812 }
 0x1dc   :  { %2180 = vrot.lane.b32.xlu1 %v4770_v46, %s3486_s1 }
 0x1de   :  { %2466 = vrot.lane.b32.xlu0 %v4745_v5, %s3490_s0  ;;  %v4802_v22 = vpop.permute.xlu1 %1656 }
 0x1df   :  { %7059 = vst [vmem:[#allocation49_spill] sm:$0xff] %v4802_v22  ;;  %v7066_v22 = vld [vmem:[#allocation15_spill] sm:$0xff] }
 0x1e0   :  { %2244 = vrot.lane.b32.xlu1 %v2051_v35, %s3487_s4  ;;  %v1782_v6 = vadd.f32 %v4556_v57, %v7066_v22  ;;  %v7070_v22 = vld [vmem:[#allocation23_spill] sm:$0xff] }
 0x1e2   :  { %2642 = vrot.lane.b32.xlu0 %v2050_v0, %s3491_s15  ;;  %v3433_v0 = vpop.eup %3432  ;;  %v4812_v2 = vpop.permute.xlu1 %1560 }
 0x1e3   :  { %v2052_v38 = vmul.f32 %v3433_v0, %v1684_v8  ;;  %v3435_v60 = vpop.eup %3434  ;;  %7062 = vst [vmem:[#allocation56_spill] sm:$0xff] %v4812_v2  ;;  %v4815_v37 = vmul.f32 %v3433_v0, %v1476_v10  ;;  %v4819_v8 = vpop.permute.xlu0 %1658  ;;  %v1846_v0 = vadd.f32 %v4606_v17, %v1782_v6 }
 0x1e4   :  { %2420 = vrot.lane.b32.xlu1 %v4790_v31, %s3490_s0  ;;  %v7061_v31 = vld [vmem:[#allocation13_spill] sm:$0xff]  ;;  %v3437_v53 = vpop.eup %3436  ;;  %7064 = vst [vmem:[#allocation14_spill] sm:$0xff] %v4819_v8  ;;  %v4833_v8 = vmul.f32 %v3431_v4, %v7048_v59 }
 0x1e5   :  { %v1478_v5 = vsub.f32 0.0, %v7061_v31  ;;  %7063 = vst [vmem:[#allocation9_spill] sm:$0xff] %v4815_v37  ;;  %v4842_v57 = vmul.f32 %v3437_v53, %v1477_v43  ;;  %3438 = vrsqrt.f32 %v1846_v0  ;;  %v1783_v43 = vadd.f32 %v4663_v28, %v7070_v22  ;;  %v7076_v59 = vld [vmem:[#allocation25_spill] sm:$0xff] }
 0x1e6   :  { %1910 = vrot.lane.b32.xlu0 %v3431_v4, %s3486_s1  ;;  %v4827_v10 = vpop.permute.xlu1 %1752  ;;  %7067 = vst [vmem:[#allocation55_spill] sm:$0xff] %v4833_v8 }
 0x1e7   :  { %v1494_v13 = vmul.f32 %v1478_v5, %v1478_v5 }
 0x1e8   :  { %2468 = vrot.lane.b32.xlu1 %v4770_v46, %s3490_s0 }
 0x1e9   :  { %v1590_v20 = vadd.f32 %v4516_v3, %v1494_v13  ;;  %v4838_v3 = vpop.permute.xlu0 %1562  ;;  %v1847_v13 = vadd.f32 %v4694_v62, %v1783_v43 }
 0x1ea   :  { %1974 = vrot.lane.b32.xlu0 %v3431_v4, %s3489_s6  ;;  %v4845_v17 = vpop.permute.xlu1 %1816 }
 0x1eb   :  { %vm1606_vm4 = vcmp.eq.f32.partialorder %v1590_v20, 0.0 }
 0x1ec   :  { %2644 = vrot.lane.b32.xlu1 %v2051_v35, %s3491_s15  ;;  %v7065_v35 = vld [vmem:[#allocation59_spill] sm:$0xff] }
 0x1ed   :  { %v1685_v46 = vsel %vm1605_vm3, 1.0, %v7065_v35  ;;  %v4836_v35 = vsub.f32 0.0, %v7068_v50  ;;  %7069 = vst [vmem:[#allocation59_spill] sm:$0xff] %v4842_v57 }
 0x1ee   :  { %2102 = vrot.lane.b32.xlu0 %v2052_v38, %s3486_s1  ;;  %v2053_v2 = vmul.f32 %v3437_v53, %v1685_v46  ;;  %v1702_v46 = vsel %vm1606_vm4, 1.0, %v1590_v20  ;;  %v4856_v53 = vpop.permute.xlu0 %1754  ;;  %v4860_v0 = vpop.permute.xlu1 %1660 }
 0x1ef   :  { %v1495_v6 = vmul.f32 %v4836_v35, %v4836_v35  ;;  %3440 = vrsqrt.f32 %v1702_v46 }
 0x1f0   :  { %1912 = vrot.lane.b32.xlu1 %v3435_v60, %s3486_s1  ;;  %3442 = vrsqrt.f32 %v1847_v13 }
 0x1f1   :  { %v1591_v4 = vadd.f32 %v4630_v19, %v1495_v6  ;;  %v3439_v19 = vpop.eup %3438  ;;  %v7072_v6 = vld [vmem:[#allocation22_spill] sm:$0xff] }
 0x1f2   :  { %2182 = vrot.lane.b32.xlu0 %v4815_v37, %s3486_s1  ;;  %v4868_v28 = vpop.permute.xlu0 %1818  ;;  %v4872_v62 = vpop.permute.xlu1 %1564  ;;  %v4880_v22 = vsub.f32 0.0, %v7072_v6 }
 0x1f3   :  { %vm1607_vm5 = vcmp.eq.f32.partialorder %v1591_v4, 0.0 }
 0x1f4   :  { %1976 = vrot.lane.b32.xlu1 %v3435_v60, %s3489_s6  ;;  %v1703_v46 = vsel %vm1607_vm5, 1.0, %v1591_v4  ;;  %v4922_v4 = vmul.f32 %v3439_v19, %v7061_v31 }
 0x1f5   :  { %3444 = vrsqrt.f32 %v1703_v46 }
 0x1f6   :  { %2246 = vrot.lane.b32.xlu0 %v2052_v38, %s3487_s4  ;;  %v4882_v43 = vpop.permute.xlu0 %1662  ;;  %7079 = vst [vmem:[#allocation91_spill] sm:$0xff] %v4922_v4 }
 0x1f7   :  { %7073 = vst [vmem:[#allocation23_spill] sm:$0xff] %v4882_v43 }
 0x1f8   :  { %2104 = vrot.lane.b32.xlu1 %v2053_v2, %s3486_s1 }
 0x1fa   :  { %2422 = vrot.lane.b32.xlu0 %v4833_v8, %s3490_s0  ;;  %v4864_v8 = vmul.f32 %v3435_v60, %v7054_v29  ;;  %v1686_v60 = vsel %vm1606_vm4, 1.0, %v4481_v26 }
 0x1fc   :  { %2184 = vrot.lane.b32.xlu1 %v4842_v57, %s3486_s1  ;;  %7071 = vst [vmem:[#allocation15_spill] sm:$0xff] %v4864_v8 }
 0x1fe   :  { %2470 = vrot.lane.b32.xlu0 %v4815_v37, %s3490_s0  ;;  %v1496_v37 = vmul.f32 %v4880_v22, %v4880_v22 }
 0x200   :  { %2248 = vrot.lane.b32.xlu1 %v2053_v2, %s3487_s4  ;;  %v1592_v20 = vadd.f32 %v4681_v49, %v1496_v37  ;;  %v7077_v49 = vld [vmem:[#allocation28_spill] sm:$0xff] }
 0x201   :  { %v4910_v37 = vsub.f32 0.0, %v7077_v49 }
 0x202   :  { %2646 = vrot.lane.b32.xlu0 %v2052_v38, %s3491_s15  ;;  %v3441_v38 = vpop.eup %3440  ;;  %vm1608_vm6 = vcmp.eq.f32.partialorder %v1592_v20, 0.0 }
 0x203   :  { %v4884_v13 = vmul.f32 %v3441_v38, %v1686_v60  ;;  %v3443_v46 = vpop.eup %3442  ;;  %v4894_v26 = vmul.f32 %v3441_v38, %v1478_v5  ;;  %v1784_v60 = vadd.f32 %v4705_v40, %v7076_v59  ;;  %v1687_v5 = vsel %vm1607_vm5, 1.0, %v4587_v30 }
 0x204   :  { %2424 = vrot.lane.b32.xlu1 %v4864_v8, %s3490_s0  ;;  %v4887_v8 = vpop.permute.xlu1 %1756  ;;  %v1497_v30 = vmul.f32 %v4910_v37, %v4910_v37 }
 0x205   :  { %7074 = vst [vmem:[#allocation89_spill] sm:$0xff] %v4884_v13  ;;  %7075 = vst [vmem:[#allocation90_spill] sm:$0xff] %v4894_v26  ;;  %v1848_v29 = vadd.f32 %v4718_v44, %v1784_v60  ;;  %v1704_v44 = vsel %vm1608_vm6, 1.0, %v1592_v20 }
 0x206   :  { %1914 = vrot.lane.b32.xlu0 %v3439_v19, %s3486_s1  ;;  %v1593_v60 = vadd.f32 %v4724_v23, %v1497_v30  ;;  %v1688_v30 = vsel %vm1608_vm6, 1.0, %v4646_v47 }
 0x207   :  { %3446 = vrsqrt.f32 %v1848_v29 }
 0x208   :  { %2472 = vrot.lane.b32.xlu1 %v4842_v57, %s3490_s0  ;;  %v4899_v57 = vpop.permute.xlu0 %1566  ;;  %v4904_v43 = vpop.permute.xlu1 %1820  ;;  %3448 = vrsqrt.f32 %v1704_v44  ;;  %vm1609_vm7 = vcmp.eq.f32.partialorder %v1593_v60, 0.0 }
 0x20a   :  { %1978 = vrot.lane.b32.xlu0 %v3439_v19, %s3489_s6 }
 0x20c   :  { %2648 = vrot.lane.b32.xlu1 %v2053_v2, %s3491_s15  ;;  %v3445_v2 = vpop.eup %3444  ;;  %v4916_v59 = vpop.permute.xlu0 %1758 }
 0x20d   :  { %v4912_v40 = vmul.f32 %v3445_v2, %v1687_v5  ;;  %v4926_v38 = vpop.permute.xlu1 %1664  ;;  %v4931_v29 = vmul.f32 %v3445_v2, %v4836_v35  ;;  %v7082_v5 = vld [vmem:[#allocation33_spill] sm:$0xff] }
 0x20e   :  { %2106 = vrot.lane.b32.xlu0 %v4884_v13, %s3486_s1  ;;  %7080 = vst [vmem:[#allocation92_spill] sm:$0xff] %v4926_v38 }
 0x20f   :  { %7078 = vst [vmem:[#allocation25_spill] sm:$0xff] %v4912_v40  ;;  %7081 = vst [vmem:[#allocation93_spill] sm:$0xff] %v4931_v29 }
 0x210   :  { %1916 = vrot.lane.b32.xlu1 %v3443_v46, %s3486_s1  ;;  %v4939_v31 = vpop.permute.xlu0 %1822 }
 0x211   :  { %v3447_v23 = vpop.eup %3446 }
 0x212   :  { %2186 = vrot.lane.b32.xlu0 %v4894_v26, %s3486_s1 }
 0x214   :  { %1980 = vrot.lane.b32.xlu1 %v3443_v46, %s3489_s6 }
 0x216   :  { %2250 = vrot.lane.b32.xlu0 %v4884_v13, %s3487_s4  ;;  %v1785_v13 = vadd.f32 %v4730_v61, %v7082_v5  ;;  %v1705_v61 = vsel %vm1609_vm7, 1.0, %v1593_v60  ;;  %v7087_v5 = vld [vmem:[#allocation32_spill] sm:$0xff] }
 0x218   :  { %2108 = vrot.lane.b32.xlu1 %v4912_v40, %s3486_s1  ;;  %v1849_v19 = vadd.f32 %v4738_v58, %v1785_v13  ;;  %v4952_v58 = vmul.f32 %v3443_v46, %v7068_v50  ;;  %v3449_v13 = vpop.eup %3448  ;;  %v7093_v50 = vld [vmem:[#allocation34_spill] sm:$0xff] }
 0x21a   :  { %2426 = vrot.lane.b32.xlu0 %v4922_v4, %s3490_s0  ;;  %v4943_v4 = vpop.permute.xlu1 %1568  ;;  %3450 = vrsqrt.f32 %v1849_v19  ;;  %7084 = vst [vmem:[#allocation94_spill] sm:$0xff] %v4952_v58  ;;  %v4964_v19 = vsub.f32 0.0, %v7087_v5 }
 0x21b   :  { %3452 = vrsqrt.f32 %v1705_v61 }
 0x21c   :  { %2188 = vrot.lane.b32.xlu1 %v4931_v29, %s3486_s1 }
 0x21e   :  { %2474 = vrot.lane.b32.xlu0 %v4894_v26, %s3490_s0  ;;  %v4958_v44 = vpop.permute.xlu1 %1760  ;;  %v4966_v26 = vmul.f32 %v3449_v13, %v1688_v30  ;;  %v4983_v30 = vmul.f32 %v3449_v13, %v4880_v22 }
 0x21f   :  { %7086 = vst [vmem:[#allocation96_spill] sm:$0xff] %v4958_v44 }
 0x220   :  { %2252 = vrot.lane.b32.xlu1 %v4912_v40, %s3487_s4  ;;  %7088 = vst [vmem:[#allocation97_spill] sm:$0xff] %v4966_v26  ;;  %v7090_v40 = vld [vmem:[#allocation35_spill] sm:$0xff]  ;;  %7092 = vst [vmem:[#allocation99_spill] sm:$0xff] %v4983_v30 }
 0x221   :  { %v4947_v35 = vpop.xlane.xlu0 %992  ;;  %v4977_v20 = vsub.f32 0.0, %v7090_v40 }
 0x222   :  { %7083 = vst [vmem:[#allocation33_spill] sm:$0xff] %v4947_v35  ;;  %1918 = vrot.lane.b32.xlu0 %v3447_v23, %s3486_s1  ;;  %v4979_v47 = vpop.permute.xlu1 %1824 }
 0x223   :  { %7091 = vst [vmem:[#allocation35_spill] sm:$0xff] %v4979_v47  ;;  %v1499_v47 = vmul.f32 %v4977_v20, %v4977_v20 }
 0x224   :  { %2428 = vrot.lane.b32.xlu1 %v4952_v58, %s3490_s0  ;;  %v3451_v61 = vpop.eup %3450  ;;  %v1498_v58 = vmul.f32 %v4964_v19, %v4964_v19 }
 0x225   :  { %v4956_v2 = vpop.xlane.xlu0 %996  ;;  %v3453_v35 = vpop.eup %3452  ;;  %v1595_v22 = vadd.f32 %v4761_v32, %v1499_v47 }
 0x226   :  { %7085 = vst [vmem:[#allocation95_spill] sm:$0xff] %v4956_v2  ;;  %1982 = vrot.lane.b32.xlu0 %v3447_v23, %s3489_s6  ;;  %v5020_v32 = vmul.f32 %v3453_v35, %v4910_v37 }
 0x227   :  { %vm1611_vm9 = vcmp.eq.f32.partialorder %v1595_v22, 0.0 }
 0x228   :  { %2476 = vrot.lane.b32.xlu1 %v4931_v29, %s3490_s0  ;;  %v1594_v29 = vadd.f32 %v4733_v63, %v1498_v58  ;;  %v1689_v63 = vsel %vm1609_vm7, 1.0, %v4715_v45  ;;  %v5013_v45 = vmul.f32 %v3447_v23, %v7072_v6  ;;  %7098 = vst [vmem:[#allocation103_spill] sm:$0xff] %v5020_v32  ;;  %v1707_v23 = vsel %vm1611_vm9, 1.0, %v1595_v22 }
 0x229   :  { %v4970_v46 = vpop.xlane.xlu0 %1008 }
 0x22a   :  { %7089 = vst [vmem:[#allocation98_spill] sm:$0xff] %v4970_v46  ;;  %2110 = vrot.lane.b32.xlu0 %v4966_v26, %s3486_s1  ;;  %v1786_v46 = vadd.f32 %v4742_v18, %v7093_v50  ;;  %vm1610_vm8 = vcmp.eq.f32.partialorder %v1594_v29, 0.0  ;;  %v5002_v50 = vmul.f32 %v3453_v35, %v1689_v63  ;;  %7096 = vst [vmem:[#allocation101_spill] sm:$0xff] %v5013_v45 }
 0x22c   :  { %1920 = vrot.lane.b32.xlu1 %v3451_v61, %s3486_s1  ;;  %v1850_v38 = vadd.f32 %v4757_v52, %v1786_v46  ;;  %7095 = vst [vmem:[#allocation100_spill] sm:$0xff] %v5002_v50  ;;  %v1706_v52 = vsel %vm1610_vm8, 1.0, %v1594_v29  ;;  %v7100_v46 = vld [vmem:[#allocation36_spill] sm:$0xff]  ;;  %v1691_v29 = vsel %vm1611_vm9, 1.0, %v4747_v51 }
 0x22d   :  { %v4988_v2 = vpop.xlane.xlu0 %1016  ;;  %v5025_v47 = vsub.f32 0.0, %v7100_v46 }
 0x22e   :  { %2190 = vrot.lane.b32.xlu0 %v4983_v30, %s3486_s1  ;;  %3454 = vrsqrt.f32 %v1850_v38  ;;  %v7099_v38 = vld [vmem:[#allocation37_spill] sm:$0xff] }
 0x22f   :  { %3456 = vrsqrt.f32 %v1706_v52  ;;  %v1787_v13 = vadd.f32 %v4777_v11, %v7099_v38  ;;  %v1500_v11 = vmul.f32 %v5025_v47, %v5025_v47  ;;  %v5050_v38 = vmul.f32 %v3451_v61, %v7077_v49 }
 0x230   :  { %v4995_v44 = vpop.xlane.xlu1 %1000  ;;  %1984 = vrot.lane.b32.xlu1 %v3451_v61, %s3489_s6  ;;  %3458 = vrsqrt.f32 %v1707_v23 }
 0x231   :  { %v5000_v18 = vpop.xlane.xlu0 %1024  ;;  %7101 = vst [vmem:[#allocation37_spill] sm:$0xff] %v5050_v38 }
 0x232   :  { %7094 = vst [vmem:[#allocation34_spill] sm:$0xff] %v5000_v18  ;;  %2254 = vrot.lane.b32.xlu0 %v4966_v26, %s3487_s4  ;;  %v1851_v26 = vadd.f32 %v4792_v9, %v1787_v13  ;;  %v5046_v9 = vadd.f32 %v4786_v48, %v1500_v11  ;;  %v7102_v13 = vlaneseq  ;;  %v1690_v48 = vsel %vm1610_vm8, 1.0, %v4727_v7 }
 0x234   :  { %v5008_v58 = vpop.xlane.xlu1 %1004  ;;  %2112 = vrot.lane.b32.xlu1 %v5002_v50, %s3486_s1  ;;  %3460 = vrsqrt.f32 %v1851_v26  ;;  %v5053_v23 = vand.u32 127, %v7102_v13  ;;  %vm1612_vm10 = vcmp.eq.f32.partialorder %v5046_v9, 0.0 }
 0x235   :  { %v5015_v60 = vpop.xlane.xlu0 %1040 }
 0x236   :  { %7097 = vst [vmem:[#allocation102_spill] sm:$0xff] %v5015_v60  ;;  %2430 = vrot.lane.b32.xlu0 %v5013_v45, %s3490_s0  ;;  %v5071_v11 = vadd.s32 128, %v5053_v23 }
 0x238   :  { %v5027_v63 = vpop.xlane.xlu1 %1012  ;;  %2192 = vrot.lane.b32.xlu1 %v5020_v32, %s3486_s1  ;;  %v3455_v35 = vpop.eup %3454 }
 0x239   :  { %v5033_v45 = vpop.xlane.xlu0 %1032  ;;  %v3457_v6 = vpop.eup %3456 }
 0x23a   :  { %2478 = vrot.lane.b32.xlu0 %v4983_v30, %s3490_s0  ;;  %v5068_v61 = vmul.f32 %v3457_v6, %v1690_v48  ;;  %v5087_v48 = vadd.s32 256, %v5053_v23  ;;  %v5100_v51 = vmul.f32 %v3457_v6, %v4964_v19  ;;  %vm1088_vm15 = vcmp.eq.f32.partialorder %v4574_v25, %v5033_v45 }
 0x23b   :  { %vm1089_vm0 = vcmp.eq.f32.partialorder %v4578_v39, %v5033_v45  ;;  %vm1090_vm9 = vcmp.eq.f32.partialorder %v4611_v27, %v5033_v45 }
 0x23c   :  { %v5039_v37 = vpop.xlane.xlu1 %1020  ;;  %2256 = vrot.lane.b32.xlu1 %v5002_v50, %s3487_s4  ;;  %v7103_v50 = vld [vmem:[#allocation39_spill] sm:$0xff]  ;;  %7105 = vst [vmem:[#allocation104_spill] sm:$0xff] %v5068_v61 }
 0x23d   :  { %v5043_v52 = vpop.xlane.xlu0 %1048  ;;  %v5058_v26 = vsub.f32 0.0, %v7103_v50 }
 0x23e   :  { %1922 = vrot.lane.b32.xlu0 %v3455_v35, %s3486_s1  ;;  %vm1100_vm1 = vcmp.eq.f32.partialorder %v4615_v12, %v5043_v52  ;;  %vm1101_vm2 = vcmp.eq.f32.partialorder %v4619_v42, %v5043_v52  ;;  %v1137_v12 = vsel %vm1089_vm0, %v5071_v11, 384  ;;  %vm1102_vm0 = vcmp.eq.f32.partialorder %v4643_v16, %v5043_v52 }
 0x23f   :  { %v1501_v7 = vmul.f32 %v5058_v26, %v5058_v26  ;;  %v1148_v42 = vsel %vm1100_vm1, %v5053_v23, 384  ;;  %v1149_v19 = vsel %vm1101_vm2, %v5071_v11, 384 }
 0x240   :  { %v1029_v30 = vpop.xlane.xlu1 %1028  ;;  %2432 = vrot.lane.b32.xlu1 %v5050_v38, %s3490_s0  ;;  %v1708_v38 = vsel %vm1612_vm10, 1.0, %v5046_v9 }
 0x241   :  { %v5060_v60 = vpop.permute.xlu0 %1906  ;;  %vm1085_vm11 = vcmp.eq.f32.partialorder %v4624_v15, %v1029_v30  ;;  %vm1086_vm12 = vcmp.eq.f32.partialorder %v4628_v33, %v1029_v30  ;;  %v3459_v33 = vpop.eup %3458  ;;  %3462 = vrsqrt.f32 %v1708_v38  ;;  %vm1087_vm4 = vcmp.eq.f32.partialorder %v4652_v36, %v1029_v30  ;;  %v7111_v30 = vld [vmem:[#allocation88_spill] sm:$0xff] }
 0x242   :  { %7104 = vst [vmem:[#allocation39_spill] sm:$0xff] %v5060_v60  ;;  %1986 = vrot.lane.b32.xlu0 %v3455_v35, %s3489_s6  ;;  %v1133_v60 = vsel %vm1085_vm11, %v5053_v23, 384  ;;  %v5093_v49 = vpop.eup %3460  ;;  %v5118_v6 = vmul.f32 %v3459_v33, %v1691_v29  ;;  %v5124_v39 = vmul.f32 %v3459_v33, %v4977_v20 }
 0x244   :  { %v1045_v13 = vpop.xlane.xlu1 %1044  ;;  %2480 = vrot.lane.b32.xlu1 %v5020_v32, %s3490_s0  ;;  %v1134_v32 = vsel %vm1086_vm12, %v5071_v11, 384 }
 0x245   :  { %vm1097_vm13 = vcmp.eq.f32.partialorder %v4656_v34, %v1045_v13  ;;  %vm1098_vm14 = vcmp.eq.f32.partialorder %v4660_v14, %v1045_v13  ;;  %v5082_v15 = vpop.permute.xlu0 %1970  ;;  %v7107_v34 = vld [vmem:[#allocation38_spill] sm:$0xff]  ;;  %vm1316_vm3 = vcmp.lt.s32.totalorder %v1133_v60, %v1134_v32  ;;  %vm1099_vm8 = vcmp.eq.f32.partialorder %v4679_v56, %v1045_v13 }
 0x246   :  { %7106 = vst [vmem:[#allocation105_spill] sm:$0xff] %v5082_v15  ;;  %2114 = vrot.lane.b32.xlu0 %v5068_v61, %s3486_s1  ;;  %v1788_v14 = vadd.f32 %v4798_v1, %v7107_v34  ;;  %v1145_v15 = vsel %vm1097_vm13, %v5053_v23, 384  ;;  %v1146_v22 = vsel %vm1098_vm14, %v5071_v11, 384  ;;  %7108 = vst [vmem:[#allocation38_spill] sm:$0xff] %v5100_v51  ;;  %v5109_v1 = vmul.f32 %v3455_v35, %v7087_v5 }
 0x247   :  { %vm1388_vm5 = vcmp.lt.s32.totalorder %v1145_v15, %v1146_v22  ;;  %v1317_v20 = vsel %vm1316_vm3, %v1133_v60, %v1134_v32  ;;  %vm1406_vm14 = vcmp.lt.s32.totalorder %v1148_v42, %v1149_v19  ;;  %v1147_v36 = vsel %vm1099_vm8, %v5087_v48, 384 }
 0x248   :  { %v1037_v18 = vpop.xlane.xlu1 %1036  ;;  %1924 = vrot.lane.b32.xlu1 %v5093_v49, %s3486_s1  ;;  %7109 = vst [vmem:[#allocation106_spill] sm:$0xff] %v5109_v1  ;;  %v1852_v34 = vadd.f32 %v4808_v55, %v1788_v14  ;;  %v1136_v55 = vsel %vm1088_vm15, %v5053_v23, 384 }
 0x249   :  { %v5116_v25 = vpop.permute.xlu0 %2098  ;;  %vm1091_vm6 = vcmp.eq.f32.partialorder %v4669_v24, %v1037_v18  ;;  %vm1092_vm7 = vcmp.eq.f32.partialorder %v4673_v21, %v1037_v18  ;;  %v1135_v24 = vsel %vm1087_vm4, %v5087_v48, 384  ;;  %v1389_v21 = vsel %vm1388_vm5, %v1145_v15, %v1146_v22  ;;  %v7113_v15 = vld [vmem:[#allocation56_spill] sm:$0xff] }
 0x24a   :  { %2194 = vrot.lane.b32.xlu0 %v5100_v51, %s3486_s1  ;;  %3464 = vrsqrt.f32 %v1852_v34  ;;  %v1139_v38 = vsel %vm1091_vm6, %v5053_v23, 384  ;;  %v1140_v33 = vsel %vm1092_vm7, %v5071_v11, 384  ;;  %vm1334_vm13 = vcmp.lt.s32.totalorder %v1136_v55, %v1137_v12  ;;  %v7114_v34 = vld [vmem:[#allocation41_spill] sm:$0xff] }
 0x24b   :  { %vm1318_vm15 = vcmp.lt.s32.totalorder %v1317_v20, %v1135_v24  ;;  %vm1093_vm1 = vcmp.eq.f32.partialorder %v7111_v30, %v1037_v18  ;;  %vm1390_vm2 = vcmp.lt.s32.totalorder %v1389_v21, %v1147_v36  ;;  %v5163_v14 = vadd.f32 %v7113_v15, %v1501_v7  ;;  %v3463_v22 = vpop.eup %3462  ;;  %v7124_v15 = vld [vmem:[#allocation54_spill] sm:$0xff] }
 0x24c   :  { %v1053_v35 = vpop.xlane.xlu1 %1052  ;;  %1988 = vrot.lane.b32.xlu1 %v5093_v49, %s3489_s6  ;;  %v5160_v32 = vsel %vm1318_vm15, %v1317_v20, %v1135_v24  ;;  %vm1352_vm3 = vcmp.lt.s32.totalorder %v1139_v38, %v1140_v33  ;;  %v5175_v20 = vsel %vm1390_vm2, %v1389_v21, %v1147_v36  ;;  %v1335_v7 = vsel %vm1334_vm13, %v1136_v55, %v1137_v12  ;;  %v7116_v21 = vld [vmem:[#allocation50_spill] sm:$0xff] }
 0x24d   :  { %vm1103_vm11 = vcmp.eq.f32.partialorder %v4692_v54, %v1053_v35  ;;  %vm1104_vm12 = vcmp.eq.f32.partialorder %v4701_v41, %v1053_v35  ;;  %v5146_v29 = vpop.permute.xlu0 %2178  ;;  %7112 = vst [vmem:[#allocation88_spill] sm:$0xff] %v5160_v32  ;;  %7115 = vst [vmem:[#allocation56_spill] sm:$0xff] %v5175_v20  ;;  %v1407_v24 = vsel %vm1406_vm14, %v1148_v42, %v1149_v19  ;;  %v1138_v54 = vsel %vm1090_vm9, %v5087_v48, 384 }
 0x24e   :  { %7110 = vst [vmem:[#allocation107_spill] sm:$0xff] %v5146_v29  ;;  %2258 = vrot.lane.b32.xlu0 %v5068_v61, %s3487_s4  ;;  %v1151_v56 = vsel %vm1103_vm11, %v5053_v23, 384  ;;  %v1152_v13 = vsel %vm1104_vm12, %v5071_v11, 384  ;;  %v1789_v29 = vadd.f32 %v4827_v10, %v7114_v34  ;;  %v1150_v41 = vsel %vm1102_vm0, %v5087_v48, 384 }
 0x24f   :  { %v1141_v10 = vsel %vm1093_vm1, %v5087_v48, 384  ;;  %vm1105_vm4 = vcmp.eq.f32.partialorder %v7116_v21, %v1053_v35  ;;  %vm1424_vm5 = vcmp.lt.s32.totalorder %v1151_v56, %v1152_v13  ;;  %vm1336_vm6 = vcmp.lt.s32.totalorder %v1335_v7, %v1138_v54 }
 0x250   :  { %v5156_v60 = vpop.permute.xlu1 %1908  ;;  %2116 = vrot.lane.b32.xlu1 %v5118_v6, %s3486_s1  ;;  %vm1408_vm7 = vcmp.lt.s32.totalorder %v1407_v24, %v1150_v41  ;;  %v1353_v27 = vsel %vm1352_vm3, %v1139_v38, %v1140_v33  ;;  %v1853_v16 = vadd.f32 %v4845_v17, %v1789_v29  ;;  %v5199_v45 = vsel %vm1336_vm6, %v1335_v7, %v1138_v54 }
 0x251   :  { %v5191_v55 = vpop.permute.xlu0 %2242  ;;  %7118 = vst [vmem:[#allocation50_spill] sm:$0xff] %v5199_v45  ;;  %v5201_v18 = vsel %vm1408_vm7, %v1407_v24, %v1150_v41  ;;  %vm1354_vm8 = vcmp.lt.s32.totalorder %v1353_v27, %v1141_v10  ;;  %vm1613_vm9 = vcmp.eq.f32.partialorder %v5163_v14, 0.0  ;;  %v1153_v42 = vsel %vm1105_vm4, %v5087_v48, 384 }
 0x252   :  { %2434 = vrot.lane.b32.xlu0 %v5109_v1, %s3490_s0  ;;  %7117 = vst [vmem:[#allocation41_spill] sm:$0xff] %v5191_v55  ;;  %7119 = vst [vmem:[#allocation108_spill] sm:$0xff] %v5201_v18  ;;  %v5207_v19 = vsel %vm1354_vm8, %v1353_v27, %v1141_v10  ;;  %v1425_v35 = vsel %vm1424_vm5, %v1151_v56, %v1152_v13  ;;  %3466 = vrsqrt.f32 %v1853_v16  ;;  %v1709_v33 = vsel %vm1613_vm9, 1.0, %v5163_v14  ;;  %v7125_v13 = vld [vmem:[#allocation40_spill] sm:$0xff]  ;;  %v7131_v27 = vld [vmem:[#allocation42_spill] sm:$0xff] }
 0x253   :  { %7120 = vst [vmem:[#allocation109_spill] sm:$0xff] %v5207_v19  ;;  %vm1426_vm11 = vcmp.lt.s32.totalorder %v1425_v35, %v1153_v42  ;;  %v5224_v36 = vmul.f32 %v5093_v49, %v7090_v40  ;;  %3468 = vrsqrt.f32 %v1709_v33  ;;  %v1692_v56 = vsel %vm1612_vm10, 1.0, %v7124_v15 }
 0x254   :  { %v5193_v12 = vpop.permute.xlu1 %1972  ;;  %2196 = vrot.lane.b32.xlu1 %v5124_v39, %s3486_s1  ;;  %v3465_v52 = vpop.eup %3464  ;;  %v5214_v38 = vsel %vm1426_vm11, %v1425_v35, %v1153_v42  ;;  %v5235_v34 = vsub.f32 0.0, %v7125_v13  ;;  %v5237_v7 = vmul.f32 %v3463_v22, %v1692_v56  ;;  %v5253_v10 = vmul.f32 %v3463_v22, %v5025_v47  ;;  %v7134_v56 = vld [vmem:[#allocation49_spill] sm:$0xff] }
 0x255   :  { %7121 = vst [vmem:[#allocation110_spill] sm:$0xff] %v5214_v38  ;;  %v5219_v29 = vpop.permute.xlu0 %2418  ;;  %7123 = vst [vmem:[#allocation112_spill] sm:$0xff] %v5224_v36  ;;  %v1790_v16 = vadd.f32 %v4856_v53, %v7131_v27  ;;  %v1693_v47 = vsel %vm1613_vm9, 1.0, %v7134_v56  ;;  %v5284_v14 = vmul.f32 %v3465_v52, %v7100_v46 }
 0x256   :  { %2482 = vrot.lane.b32.xlu0 %v5100_v51, %s3490_s0  ;;  %7122 = vst [vmem:[#allocation111_spill] sm:$0xff] %v5219_v29  ;;  %7126 = vst [vmem:[#allocation54_spill] sm:$0xff] %v5237_v7  ;;  %v1502_v9 = vmul.f32 %v5235_v34, %v5235_v34  ;;  %v7181_v51 = vld [vmem:[#allocation62_spill] sm:$0xff] }
 0x257   :  { %7130 = vst [vmem:[#allocation116_spill] sm:$0xff] %v5253_v10  ;;  %v1854_v33 = vadd.f32 %v4868_v28, %v1790_v16 }
 0x258   :  { %2260 = vrot.lane.b32.xlu1 %v5118_v6, %s3487_s4  ;;  %v5212_v17 = vpop.permute.xlu1 %2100  ;;  %v1598_v21 = vadd.f32 %v4838_v3, %v1502_v9  ;;  %v7135_v3 = vld [vmem:[#allocation43_spill] sm:$0xff] }
 0x259   :  { %v5239_v24 = vpop.permute.xlu0 %2466  ;;  %v5270_v22 = vsub.f32 0.0, %v7135_v3  ;;  %3470 = vrsqrt.f32 %v1854_v33  ;;  %7137 = vst [vmem:[#allocation43_spill] sm:$0xff] %v5284_v14 }
 0x25a   :  { %1926 = vrot.lane.b32.xlu0 %v3465_v52, %s3486_s1  ;;  %7127 = vst [vmem:[#allocation113_spill] sm:$0xff] %v5239_v24  ;;  %vm1614_vm10 = vcmp.eq.f32.partialorder %v1598_v21, 0.0 }
 0x25b   :  { %v1710_v28 = vsel %vm1614_vm10, 1.0, %v1598_v21  ;;  %v1503_v16 = vmul.f32 %v5270_v22, %v5270_v22 }
 0x25c   :  { %2436 = vrot.lane.b32.xlu1 %v5224_v36, %s3490_s0  ;;  %v5228_v30 = vpop.permute.xlu1 %2180  ;;  %v3467_v54 = vpop.eup %3466  ;;  %3472 = vrsqrt.f32 %v1710_v28  ;;  %v7148_v36 = vld [vmem:[#allocation46_spill] sm:$0xff] }
 0x25d   :  { %v5258_v42 = vpop.permute.xlu0 %2642  ;;  %v3469_v35 = vpop.eup %3468  ;;  %v1599_v56 = vadd.f32 %v4872_v62, %v1503_v16  ;;  %v7142_v16 = vld [vmem:[#allocation14_spill] sm:$0xff] }
 0x25e   :  { %1990 = vrot.lane.b32.xlu0 %v3465_v52, %s3489_s6  ;;  %7132 = vst [vmem:[#allocation42_spill] sm:$0xff] %v5258_v42  ;;  %v5272_v53 = vmul.f32 %v3469_v35, %v1693_v47  ;;  %v5291_v33 = vmul.f32 %v3469_v35, %v5058_v26  ;;  %v7138_v47 = vld [vmem:[#allocation45_spill] sm:$0xff]  ;;  %v5312_v35 = vmul.f32 %v3467_v54, %v7103_v50 }
 0x25f   :  { %v1791_v42 = vadd.f32 %v4887_v8, %v7138_v47  ;;  %vm1615_vm12 = vcmp.eq.f32.partialorder %v1599_v56, 0.0  ;;  %v7143_v47 = vld [vmem:[#allocation44_spill] sm:$0xff] }
 0x260   :  { %2484 = vrot.lane.b32.xlu1 %v5124_v39, %s3490_s0  ;;  %v5243_v49 = vpop.permute.xlu1 %2244  ;;  %v1711_v8 = vsel %vm1615_vm12, 1.0, %v1599_v56  ;;  %7140 = vst [vmem:[#allocation118_spill] sm:$0xff] %v5312_v35 }
 0x261   :  { %7128 = vst [vmem:[#allocation114_spill] sm:$0xff] %v5243_v49  ;;  %v5277_v9 = vpop.permute.xlu0 %1910  ;;  %v1855_v24 = vadd.f32 %v4904_v43, %v1791_v42 }
 0x262   :  { %2118 = vrot.lane.b32.xlu0 %v5237_v7, %s3486_s1 }
 0x263   :  { %v3471_v26 = vpop.eup %3470  ;;  %3474 = vrsqrt.f32 %v1855_v24  ;;  %v1694_v24 = vsel %vm1614_vm10, 1.0, %v7142_v16 }
 0x264   :  { %1928 = vrot.lane.b32.xlu1 %v3467_v54, %s3486_s1  ;;  %v5250_v41 = vpop.permute.xlu1 %2420  ;;  %3476 = vrsqrt.f32 %v1711_v8 }
 0x265   :  { %7129 = vst [vmem:[#allocation115_spill] sm:$0xff] %v5250_v41  ;;  %v5301_v29 = vpop.permute.xlu0 %1974 }
 0x266   :  { %2198 = vrot.lane.b32.xlu0 %v5253_v10, %s3486_s1  ;;  %7139 = vst [vmem:[#allocation45_spill] sm:$0xff] %v5301_v29  ;;  %v3473_v28 = vpop.eup %3472 }
 0x267   :  { %v5326_v1 = vmul.f32 %v3473_v28, %v1694_v24  ;;  %v5342_v24 = vmul.f32 %v3473_v28, %v5235_v34  ;;  %v1695_v34 = vsel %vm1615_vm12, 1.0, %v4860_v0 }
 0x268   :  { %1992 = vrot.lane.b32.xlu1 %v3467_v54, %s3489_s6  ;;  %v5264_v15 = vpop.permute.xlu1 %2468 }
 0x269   :  { %7133 = vst [vmem:[#allocation117_spill] sm:$0xff] %v5264_v15  ;;  %v5314_v43 = vpop.permute.xlu0 %2102  ;;  %7144 = vst [vmem:[#allocation14_spill] sm:$0xff] %v5326_v1 }
 0x26a   :  { %2262 = vrot.lane.b32.xlu0 %v5237_v7, %s3487_s4  ;;  %7141 = vst [vmem:[#allocation119_spill] sm:$0xff] %v5314_v43  ;;  %7147 = vst [vmem:[#allocation122_spill] sm:$0xff] %v5342_v24 }
 0x26c   :  { %2120 = vrot.lane.b32.xlu1 %v5272_v53, %s3486_s1  ;;  %v5281_v27 = vpop.permute.xlu1 %2644 }
 0x26d   :  { %7136 = vst [vmem:[#allocation49_spill] sm:$0xff] %v5281_v27  ;;  %v5332_v55 = vpop.permute.xlu0 %2182  ;;  %v3475_v8 = vpop.eup %3474  ;;  %v1792_v27 = vadd.f32 %v4916_v59, %v7148_v36  ;;  %v5368_v36 = vmul.f32 %v3471_v26, %v7125_v13 }
 0x26e   :  { %2438 = vrot.lane.b32.xlu0 %v5284_v14, %s3490_s0  ;;  %v5324_v14 = vsub.f32 0.0, %v7143_v47  ;;  %7145 = vst [vmem:[#allocation120_spill] sm:$0xff] %v5332_v55  ;;  %v3477_v15 = vpop.eup %3476 }
 0x26f   :  { %v1856_v41 = vadd.f32 %v4939_v31, %v1792_v27  ;;  %7153 = vst [vmem:[#allocation124_spill] sm:$0xff] %v5368_v36  ;;  %v5375_v56 = vmul.f32 %v3477_v15, %v5270_v22  ;;  %v5396_v22 = vmul.f32 %v3475_v8, %v7135_v3 }
 0x270   :  { %2200 = vrot.lane.b32.xlu1 %v5291_v33, %s3486_s1  ;;  %v5298_v52 = vpop.permute.xlu1 %1912  ;;  %v1504_v21 = vmul.f32 %v5324_v14, %v5324_v14 }
 0x271   :  { %v5350_v55 = vpop.permute.xlu0 %2246  ;;  %3478 = vrsqrt.f32 %v1856_v41 }
 0x272   :  { %2486 = vrot.lane.b32.xlu0 %v5253_v10, %s3490_s0  ;;  %7149 = vst [vmem:[#allocation46_spill] sm:$0xff] %v5350_v55  ;;  %v7156_v55 = vld [vmem:[#allocation96_spill] sm:$0xff] }
 0x274   :  { %2264 = vrot.lane.b32.xlu1 %v5272_v53, %s3487_s4  ;;  %v5307_v62 = vpop.permute.xlu1 %1976 }
 0x275   :  { %v5370_v27 = vpop.permute.xlu0 %2422 }
 0x276   :  { %1930 = vrot.lane.b32.xlu0 %v3471_v26, %s3486_s1  ;;  %7154 = vst [vmem:[#allocation125_spill] sm:$0xff] %v5370_v27 }
 0x278   :  { %2440 = vrot.lane.b32.xlu1 %v5312_v35, %s3490_s0  ;;  %v5318_v42 = vpop.permute.xlu1 %2104  ;;  %v1600_v35 = vadd.f32 %v4899_v57, %v1504_v21  ;;  %v7151_v57 = vld [vmem:[#allocation48_spill] sm:$0xff]  ;;  %v5358_v21 = vmul.f32 %v3477_v15, %v1695_v34 }
 0x279   :  { %v1489_v28 = vsub.f32 0.0, %v7151_v57  ;;  %v7155_v34 = vld [vmem:[#allocation52_spill] sm:$0xff]  ;;  %v5387_v27 = vpop.permute.xlu0 %2470 }
 0x27a   :  { %1994 = vrot.lane.b32.xlu0 %v3471_v26, %s3489_s6  ;;  %vm1616_vm13 = vcmp.eq.f32.partialorder %v1600_v35, 0.0  ;;  %7159 = vst [vmem:[#allocation96_spill] sm:$0xff] %v5387_v27 }
 0x27b   :  { %v1712_v31 = vsel %vm1616_vm13, 1.0, %v1600_v35  ;;  %v1505_v0 = vmul.f32 %v1489_v28, %v1489_v28  ;;  %v3479_v15 = vpop.eup %3478 }
 0x27c   :  { %2488 = vrot.lane.b32.xlu1 %v5291_v33, %s3490_s0  ;;  %v5330_v54 = vpop.permute.xlu1 %2184  ;;  %3480 = vrsqrt.f32 %v1712_v31 }
 0x27d   :  { %v1601_v41 = vadd.f32 %v4943_v4, %v1505_v0  ;;  %v5402_v31 = vpop.permute.xlu0 %2646  ;;  %v7162_v0 = vld [vmem:[#allocation23_spill] sm:$0xff] }
 0x27e   :  { %2122 = vrot.lane.b32.xlu0 %v5326_v1, %s3486_s1  ;;  %7161 = vst [vmem:[#allocation126_spill] sm:$0xff] %v5402_v31  ;;  %v7167_v31 = vld [vmem:[#allocation92_spill] sm:$0xff] }
 0x27f   :  { %vm1617_vm14 = vcmp.eq.f32.partialorder %v1601_v41, 0.0 }
 0x280   :  { %1932 = vrot.lane.b32.xlu1 %v3475_v8, %s3486_s1  ;;  %v5339_v16 = vpop.permute.xlu1 %2248 }
 0x281   :  { %7146 = vst [vmem:[#allocation121_spill] sm:$0xff] %v5339_v16  ;;  %v1793_v16 = vadd.f32 %v7156_v55, %v7155_v34  ;;  %v1713_v55 = vsel %vm1617_vm14, 1.0, %v1601_v41 }
 0x282   :  { %2202 = vrot.lane.b32.xlu0 %v5342_v24, %s3486_s1 }
 0x284   :  { %1996 = vrot.lane.b32.xlu1 %v3475_v8, %s3489_s6  ;;  %v5353_v7 = vpop.permute.xlu1 %2424 }
 0x285   :  { %7150 = vst [vmem:[#allocation123_spill] sm:$0xff] %v5353_v7 }
 0x286   :  { %2266 = vrot.lane.b32.xlu0 %v5326_v1, %s3487_s4  ;;  %v7158_v1 = vld [vmem:[#allocation35_spill] sm:$0xff] }
 0x287   :  { %v1857_v61 = vadd.f32 %v7158_v1, %v1793_v16  ;;  %7160 = vst [vmem:[#allocation35_spill] sm:$0xff] %v5396_v22  ;;  %v3481_v16 = vpop.eup %3480 }
 0x288   :  { %2124 = vrot.lane.b32.xlu1 %v5358_v21, %s3486_s1  ;;  %v5365_v59 = vpop.permute.xlu1 %2472  ;;  %v5421_v35 = vmul.f32 %v3481_v16, %v5324_v14 }
 0x289   :  { %7152 = vst [vmem:[#allocation48_spill] sm:$0xff] %v5365_v59  ;;  %3482 = vrsqrt.f32 %v1857_v61  ;;  %v1696_v61 = vsel %vm1616_vm13, 1.0, %v7162_v0 }
 0x28a   :  { %2442 = vrot.lane.b32.xlu0 %v5368_v36, %s3490_s0  ;;  %3484 = vrsqrt.f32 %v1713_v55  ;;  %v5407_v34 = vmul.f32 %v3481_v16, %v1696_v61  ;;  %v5415_v36 = vpop.permute.xlu0 %1914  ;;  %7165 = vst [vmem:[#allocation128_spill] sm:$0xff] %v5421_v35  ;;  %v5441_v16 = vmul.f32 %v3479_v15, %v7143_v47 }
 0x28b   :  { %7164 = vst [vmem:[#allocation127_spill] sm:$0xff] %v5415_v36 }
 0x28c   :  { %2204 = vrot.lane.b32.xlu1 %v5375_v56, %s3486_s1  ;;  %v5382_v26 = vpop.permute.xlu1 %2648  ;;  %7163 = vst [vmem:[#allocation23_spill] sm:$0xff] %v5407_v34  ;;  %7170 = vst [vmem:[#allocation131_spill] sm:$0xff] %v5441_v16 }
 0x28d   :  { %7157 = vst [vmem:[#allocation52_spill] sm:$0xff] %v5382_v26 }
 0x28e   :  { %2490 = vrot.lane.b32.xlu0 %v5342_v24, %s3490_s0  ;;  %v5432_v13 = vpop.permute.xlu0 %1978 }
 0x28f   :  { %7168 = vst [vmem:[#allocation92_spill] sm:$0xff] %v5432_v13 }
 0x290   :  { %2268 = vrot.lane.b32.xlu1 %v5358_v21, %s3487_s4  ;;  %v5391_v4 = vpop.permute.xlu1 %1916 }
 0x292   :  { %1934 = vrot.lane.b32.xlu0 %v3479_v15, %s3486_s1 }
 0x293   :  { %v3483_v27 = vpop.eup %3482 }
 0x294   :  { %2444 = vrot.lane.b32.xlu1 %v5396_v22, %s3490_s0  ;;  %v5400_v1 = vpop.permute.xlu1 %1980  ;;  %v3485_v0 = vpop.eup %3484  ;;  %v1697_v22 = vsel %vm1617_vm14, 1.0, %v7167_v31 }
 0x295   :  { %v5430_v24 = vmul.f32 %v3485_v0, %v1697_v22  ;;  %v5445_v41 = vmul.f32 %v3485_v0, %v1489_v28  ;;  %v5447_v22 = vpop.permute.xlu0 %2106  ;;  %v5462_v28 = vmul.f32 %v3483_v27, %v7151_v57 }
 0x296   :  { %1998 = vrot.lane.b32.xlu0 %v3479_v15, %s3489_s6  ;;  %7171 = vst [vmem:[#allocation132_spill] sm:$0xff] %v5447_v22 }
 0x297   :  { %7174 = vst [vmem:[#allocation135_spill] sm:$0xff] %v5462_v28 }
 0x298   :  { %2492 = vrot.lane.b32.xlu1 %v5375_v56, %s3490_s0  ;;  %v5411_v8 = vpop.permute.xlu1 %2108 }
 0x29a   :  { %2126 = vrot.lane.b32.xlu0 %v5407_v34, %s3486_s1 }
 0x29c   :  { %1936 = vrot.lane.b32.xlu1 %v3483_v27, %s3486_s1  ;;  %v5418_v55 = vpop.permute.xlu1 %2188 }
 0x29e   :  { %2206 = vrot.lane.b32.xlu0 %v5421_v35, %s3486_s1 }
 0x2a0   :  { %2000 = vrot.lane.b32.xlu1 %v3483_v27, %s3489_s6  ;;  %v5426_v61 = vpop.permute.xlu1 %2252 }
 0x2a1   :  { %7166 = vst [vmem:[#allocation129_spill] sm:$0xff] %v5426_v61  ;;  %v5459_v61 = vpop.permute.xlu0 %2186 }
 0x2a2   :  { %2270 = vrot.lane.b32.xlu0 %v5407_v34, %s3487_s4  ;;  %7173 = vst [vmem:[#allocation134_spill] sm:$0xff] %v5459_v61  ;;  %v7176_v34 = vld [vmem:[#allocation57_spill] sm:$0xff] }
 0x2a3   :  { %v7180_v61 = vld [vmem:[#allocation61_spill] sm:$0xff] }
 0x2a4   :  { %2128 = vrot.lane.b32.xlu1 %v5430_v24, %s3486_s1  ;;  %v5438_v14 = vpop.permute.xlu1 %2428 }
 0x2a5   :  { %7169 = vst [vmem:[#allocation130_spill] sm:$0xff] %v5438_v14  ;;  %v5474_v46 = vpop.permute.xlu0 %2250 }
 0x2a6   :  { %2446 = vrot.lane.b32.xlu0 %v5441_v16, %s3490_s0  ;;  %v7175_v16 = vld [vmem:[#allocation33_spill] sm:$0xff] }
 0x2a7   :  { %vm1058_vm15 = vcmp.eq.f32.partialorder %v7176_v34, %v7175_v16  ;;  %7178 = vst [vmem:[#allocation33_spill] sm:$0xff] %v5474_v46  ;;  %v7182_v34 = vld [vmem:[#allocation5_spill] sm:$0xff] }
 0x2a8   :  { %2208 = vrot.lane.b32.xlu1 %v5445_v41, %s3486_s1  ;;  %v5451_v31 = vpop.permute.xlu1 %2476  ;;  %v1106_v47 = vsel %vm1058_vm15, %v5053_v23, 384  ;;  %v5488_v26 = vmul.f32 %v5193_v12, %v7182_v34  ;;  %v7186_v12 = vld [vmem:[#allocation53_spill] sm:$0xff] }
 0x2a9   :  { %7172 = vst [vmem:[#allocation133_spill] sm:$0xff] %v5451_v31  ;;  %v5503_v22 = vpop.permute.xlu0 %2426 }
 0x2aa   :  { %2494 = vrot.lane.b32.xlu0 %v5421_v35, %s3490_s0  ;;  %v7177_v35 = vld [vmem:[#allocation58_spill] sm:$0xff]  ;;  %v2067_v7 = vsub.f32 0.0, %v5488_v26  ;;  %7187 = vst [vmem:[#allocation57_spill] sm:$0xff] %v5503_v22 }
 0x2ab   :  { %vm1059_vm0 = vcmp.eq.f32.partialorder %v7177_v35, %v7175_v16  ;;  %v1955_v35 = vmul.f32 %v5156_v60, %v7182_v34  ;;  %v7185_v60 = vld [vmem:[#allocation70_spill] sm:$0xff] }
 0x2ac   :  { %2272 = vrot.lane.b32.xlu1 %v5430_v24, %s3487_s4  ;;  %v5457_v15 = vpop.permute.xlu1 %1920  ;;  %v1107_v10 = vsel %vm1059_vm0, %v5071_v11, 384  ;;  %vm1065_vm6 = vcmp.eq.f32.partialorder %v7185_v60, %v4995_v44  ;;  %v7191_v60 = vld [vmem:[#allocation75_spill] sm:$0xff] }
 0x2ad   :  { %vm1154_vm3 = vcmp.lt.s32.totalorder %v1106_v47, %v1107_v10  ;;  %v2307_v34 = vmul.f32 %v7186_v12, %v1955_v35  ;;  %vm1068_vm11 = vcmp.eq.f32.partialorder %v7191_v60, %v5008_v58  ;;  %v5521_v22 = vpop.permute.xlu0 %2474  ;;  %v7195_v60 = vld [vmem:[#allocation63_spill] sm:$0xff] }
 0x2ae   :  { %v1155_v49 = vsel %vm1154_vm3, %v1106_v47, %v1107_v10  ;;  %v2147_v10 = vmul.f32 %v5212_v17, %v2067_v7  ;;  %v7198_v17 = vld [vmem:[#allocation11_spill] sm:$0xff] }
 0x2af   :  { %v1957_v7 = vmul.f32 %v5298_v52, %v7198_v17  ;;  %v7200_v52 = vld [vmem:[#allocation82_spill] sm:$0xff] }
 0x2b0   :  { %2448 = vrot.lane.b32.xlu1 %v5462_v28, %s3490_s0  ;;  %v5466_v0 = vpop.permute.xlu1 %1984  ;;  %v7179_v28 = vld [vmem:[#allocation95_spill] sm:$0xff] }
 0x2b1   :  { %vm1061_vm1 = vcmp.eq.f32.partialorder %v7180_v61, %v7179_v28  ;;  %vm1062_vm2 = vcmp.eq.f32.partialorder %v7181_v51, %v7179_v28  ;;  %v7183_v61 = vld [vmem:[#allocation60_spill] sm:$0xff]  ;;  %v7184_v51 = vld [vmem:[#allocation69_spill] sm:$0xff]  ;;  %7192 = vst [vmem:[#allocation95_spill] sm:$0xff] %v5521_v22  ;;  %v5557_v31 = vpop.permute.xlu0 %1918 }
 0x2b2   :  { %v1109_v46 = vsel %vm1061_vm1, %v5053_v23, 384  ;;  %v1110_v5 = vsel %vm1062_vm2, %v5071_v11, 384  ;;  %vm1060_vm4 = vcmp.eq.f32.partialorder %v7183_v61, %v7175_v16  ;;  %vm1064_vm5 = vcmp.eq.f32.partialorder %v7184_v51, %v4995_v44  ;;  %v7189_v51 = vld [vmem:[#allocation65_spill] sm:$0xff]  ;;  %7204 = vst [vmem:[#allocation5_spill] sm:$0xff] %v5557_v31 }
 0x2b3   :  { %vm1172_vm7 = vcmp.lt.s32.totalorder %v1109_v46, %v1110_v5  ;;  %v1108_v13 = vsel %vm1060_vm4, %v5087_v48, 384  ;;  %v1112_v36 = vsel %vm1064_vm5, %v5053_v23, 384  ;;  %v1113_v16 = vsel %vm1065_vm6, %v5071_v11, 384 }
 0x2b4   :  { %2496 = vrot.lane.b32.xlu1 %v5445_v41, %s3490_s0  ;;  %v5478_v27 = vpop.permute.xlu1 %2112  ;;  %vm1063_vm8 = vcmp.eq.f32.partialorder %v7189_v51, %v7179_v28  ;;  %vm1156_vm10 = vcmp.lt.s32.totalorder %v1155_v49, %v1108_v13  ;;  %v1173_v47 = vsel %vm1172_vm7, %v1109_v46, %v1110_v5  ;;  %vm1190_vm12 = vcmp.lt.s32.totalorder %v1112_v36, %v1113_v16  ;;  %v7196_v5 = vld [vmem:[#allocation64_spill] sm:$0xff] }
 0x2b5   :  { %v1111_v12 = vsel %vm1063_vm8, %v5087_v48, 384  ;;  %v5526_v51 = vsel %vm1156_vm10, %v1155_v49, %v1108_v13  ;;  %v7197_v46 = vld [vmem:[#allocation76_spill] sm:$0xff]  ;;  %v1191_v22 = vsel %vm1190_vm12, %v1112_v36, %v1113_v16  ;;  %vm1069_vm2 = vcmp.eq.f32.partialorder %v7200_v52, %v5008_v58  ;;  %v7202_v36 = vld [vmem:[#allocation81_spill] sm:$0xff]  ;;  %v7203_v16 = vld [vmem:[#allocation59_spill] sm:$0xff] }
 0x2b6   :  { %vm1066_vm15 = vcmp.eq.f32.partialorder %v7197_v46, %v4995_v44  ;;  %vm1174_vm0 = vcmp.lt.s32.totalorder %v1173_v47, %v1111_v12  ;;  %v1159_v13 = vshra.s32 %v5526_v51, 16  ;;  %vm1074_vm4 = vcmp.eq.f32.partialorder %v7202_v36, %v5027_v63 }
 0x2b7   :  { %v5547_v46 = vsel %vm1174_vm0, %v1173_v47, %v1111_v12 }
 0x2b8   :  { %2596 = vrot.lane.b32.xlu1 %v1955_v35, %s3492_s16  ;;  %v5493_v59 = vpop.permute.xlu1 %2192  ;;  %v7190_v35 = vld [vmem:[#allocation74_spill] sm:$0xff]  ;;  %v5559_v47 = vcvt.s32.f32 %v1159_v13  ;;  %v1177_v12 = vshra.s32 %v5547_v46, 16 }
 0x2b9   :  { %vm1067_vm9 = vcmp.eq.f32.partialorder %v7190_v35, %v5008_v58  ;;  %v7194_v35 = vld [vmem:[#allocation98_spill] sm:$0xff]  ;;  %v1117_v58 = vsel %vm1069_vm2, %v5087_v48, 384 }
 0x2ba   :  { %vm1070_vm13 = vcmp.eq.f32.partialorder %v7195_v60, %v7194_v35  ;;  %vm1071_vm14 = vcmp.eq.f32.partialorder %v7196_v5, %v7194_v35  ;;  %v1114_v5 = vsel %vm1066_vm15, %v5087_v48, 384 }
 0x2bb   :  { %v1118_v49 = vsel %vm1070_vm13, %v5053_v23, 384  ;;  %v1119_v60 = vsel %vm1071_vm14, %v5071_v11, 384  ;;  %vm1192_vm5 = vcmp.lt.s32.totalorder %v1191_v22, %v1114_v5 }
 0x2bc   :  { %2340 = vrot.lane.b32.xlu1 %v2307_v34, %s3487_s4  ;;  %v5509_v61 = vpop.permute.xlu1 %2256  ;;  %v1115_v34 = vsel %vm1067_vm9, %v5053_v23, 384  ;;  %vm1226_vm6 = vcmp.lt.s32.totalorder %v1118_v49, %v1119_v60 }
 0x2bd   :  { %7188 = vst [vmem:[#allocation58_spill] sm:$0xff] %v5509_v61  ;;  %v1116_v61 = vsel %vm1068_vm11, %v5071_v11, 384  ;;  %v1227_v31 = vsel %vm1226_vm6, %v1118_v49, %v1119_v60  ;;  %v7213_v49 = vld [vmem:[#allocation86_spill] sm:$0xff] }
 0x2be   :  { %vm1208_vm1 = vcmp.lt.s32.totalorder %v1115_v34, %v1116_v61  ;;  %vm1080_vm14 = vcmp.eq.f32.partialorder %v7213_v49, %v5039_v37  ;;  %v7214_v60 = vld [vmem:[#allocation18_spill] sm:$0xff] }
 0x2bf   :  { %v1209_v43 = vsel %vm1208_vm1, %v1115_v34, %v1116_v61  ;;  %v7207_v61 = vld [vmem:[#allocation67_spill] sm:$0xff]  ;;  %v7208_v34 = vld [vmem:[#allocation68_spill] sm:$0xff]  ;;  %v1128_v49 = vsel %vm1080_vm14, %v5071_v11, 384 }
 0x2c0   :  { %2532 = vrot.lane.b32.xlu1 %v2147_v10, %s3490_s0  ;;  %v5524_v28 = vpop.permute.xlu1 %2432  ;;  %v5538_v10 = vmul.f32 %v5307_v62, %v7198_v17  ;;  %v7201_v62 = vld [vmem:[#allocation80_spill] sm:$0xff]  ;;  %v2309_v17 = vmul.f32 %v7203_v16, %v1957_v7  ;;  %v7206_v16 = vld [vmem:[#allocation66_spill] sm:$0xff]  ;;  %vm1076_vm8 = vcmp.eq.f32.partialorder %v7207_v61, %v4988_v2  ;;  %vm1077_vm9 = vcmp.eq.f32.partialorder %v7208_v34, %v4988_v2  ;;  %v5584_v61 = vpop.permute.xlu0 %1982 }
 0x2c1   :  { %7193 = vst [vmem:[#allocation61_spill] sm:$0xff] %v5524_v28  ;;  %vm1073_vm3 = vcmp.eq.f32.partialorder %v7201_v62, %v5027_v63  ;;  %v1122_v62 = vsel %vm1074_vm4, %v5071_v11, 384  ;;  %vm1072_vm7 = vcmp.eq.f32.partialorder %v7206_v16, %v7194_v35  ;;  %vm1210_vm11 = vcmp.lt.s32.totalorder %v1209_v43, %v1117_v58  ;;  %7209 = vst [vmem:[#allocation69_spill] sm:$0xff] %v5584_v61 }
 0x2c2   :  { %v2069_v28 = vsub.f32 0.0, %v5538_v10  ;;  %v1121_v52 = vsel %vm1073_vm3, %v5053_v23, 384  ;;  %v1124_v35 = vsel %vm1076_vm8, %v5053_v23, 384  ;;  %v1125_v16 = vsel %vm1077_vm9, %v5071_v11, 384 }
 0x2c3   :  { %vm1244_vm10 = vcmp.lt.s32.totalorder %v1121_v52, %v1122_v62  ;;  %vm1262_vm0 = vcmp.lt.s32.totalorder %v1124_v35, %v1125_v16 }
 0x2c4   :  { %2600 = vrot.lane.b32.xlu1 %v1957_v7, %s3492_s16  ;;  %v5545_v44 = vpop.permute.xlu1 %2480  ;;  %v5568_v7 = vsel %vm1192_vm5, %v1191_v22, %v1114_v5  ;;  %v2149_v13 = vmul.f32 %v5318_v42, %v2069_v28  ;;  %v1120_v5 = vsel %vm1072_vm7, %v5087_v48, 384  ;;  %v7211_v42 = vld [vmem:[#allocation85_spill] sm:$0xff]  ;;  %v7212_v28 = vld [vmem:[#allocation84_spill] sm:$0xff] }
 0x2c5   :  { %7199 = vst [vmem:[#allocation62_spill] sm:$0xff] %v5545_v44  ;;  %7205 = vst [vmem:[#allocation60_spill] sm:$0xff] %v5568_v7  ;;  %v1195_v22 = vshra.s32 %v5568_v7, 16  ;;  %v5589_v44 = vsel %vm1210_vm11, %v1209_v43, %v1117_v58  ;;  %vm1075_vm12 = vcmp.eq.f32.partialorder %v7211_v42, %v5027_v63  ;;  %vm1079_vm13 = vcmp.eq.f32.partialorder %v7212_v28, %v5039_v37 }
 0x2c6   :  { %7210 = vst [vmem:[#allocation70_spill] sm:$0xff] %v5589_v44  ;;  %vm1228_vm15 = vcmp.lt.s32.totalorder %v1227_v31, %v1120_v5  ;;  %v1245_v43 = vsel %vm1244_vm10, %v1121_v52, %v1122_v62  ;;  %v1213_v58 = vshra.s32 %v5589_v44, 16  ;;  %v1123_v42 = vsel %vm1075_vm12, %v5087_v48, 384  ;;  %v7218_v52 = vld [vmem:[#allocation34_spill] sm:$0xff]  ;;  %v7219_v62 = vld [vmem:[#allocation71_spill] sm:$0xff]  ;;  %v5625_v44 = vpop.permute.xlu0 %2110 }
 0x2c7   :  { %v5605_v63 = vcvt.s32.f32 %v1195_v22  ;;  %v1127_v28 = vsel %vm1079_vm13, %v5053_v23, 384  ;;  %v5614_v61 = vsel %vm1228_vm15, %v1227_v31, %v1120_v5  ;;  %vm1082_vm2 = vcmp.eq.f32.partialorder %v7219_v62, %v7218_v52  ;;  %v7220_v22 = vld [vmem:[#allocation72_spill] sm:$0xff]  ;;  %7222 = vst [vmem:[#allocation74_spill] sm:$0xff] %v5625_v44  ;;  %v7223_v44 = vld [vmem:[#allocation102_spill] sm:$0xff] }
 0x2c8   :  { %2344 = vrot.lane.b32.xlu1 %v2309_v17, %s3487_s4  ;;  %v5566_v36 = vpop.permute.xlu1 %1924  ;;  %v5578_v17 = vcvt.s32.f32 %v1177_v12  ;;  %v1959_v12 = vmul.f32 %v5391_v4, %v7214_v60  ;;  %7216 = vst [vmem:[#allocation65_spill] sm:$0xff] %v5614_v61  ;;  %vm1083_vm3 = vcmp.eq.f32.partialorder %v7220_v22, %v7218_v52  ;;  %vm1246_vm4 = vcmp.lt.s32.totalorder %v1245_v43, %v1123_v42 }
 0x2c9   :  { %1162 = vmin.xlane.f32.xlu0 %v5559_v47  ;;  %7215 = vst [vmem:[#allocation53_spill] sm:$0xff] %v5605_v63  ;;  %v1263_v31 = vsel %vm1262_vm0, %v1124_v35, %v1125_v16  ;;  %vm1280_vm5 = vcmp.lt.s32.totalorder %v1127_v28, %v1128_v49  ;;  %v5628_v5 = vcvt.s32.f32 %v1213_v58  ;;  %v1130_v62 = vsel %vm1082_vm2, %v5053_v23, 384  ;;  %v7225_v35 = vld [vmem:[#allocation79_spill] sm:$0xff] }
 0x2ca   :  { %v1131_v22 = vsel %vm1083_vm3, %v5071_v11, 384  ;;  %vm1095_vm7 = vcmp.eq.f32.partialorder %v7225_v35, %v7223_v44  ;;  %v7226_v16 = vld [vmem:[#allocation87_spill] sm:$0xff]  ;;  %v5653_v7 = vpop.permute.xlu0 %2190 }
 0x2cb   :  { %vm1081_vm8 = vcmp.eq.f32.partialorder %v7226_v16, %v5039_v37  ;;  %vm1298_vm11 = vcmp.lt.s32.totalorder %v1130_v62, %v1131_v22  ;;  %7227 = vst [vmem:[#allocation75_spill] sm:$0xff] %v5653_v7 }
 0x2cc   :  { %2536 = vrot.lane.b32.xlu1 %v2149_v13, %s3490_s0  ;;  %v5587_v34 = vpop.permute.xlu1 %1988  ;;  %v5602_v13 = vmul.f32 %v5400_v1, %v7214_v60  ;;  %v7217_v1 = vld [vmem:[#allocation73_spill] sm:$0xff]  ;;  %v1129_v35 = vsel %vm1081_vm8, %v5087_v48, 384  ;;  %vm2933_vm8 = vcmask 48128  }
 0x2cd   :  { %1180 = vmin.xlane.f32.xlu0 %v5578_v17  ;;  %vm1078_vm1 = vcmp.eq.f32.partialorder %v7217_v1, %v4988_v2  ;;  %v7221_v60 = vld [vmem:[#allocation93_spill] sm:$0xff]  ;;  %v1231_v2 = vshra.s32 %v5614_v61, 16  ;;  %v1281_v61 = vsel %vm1280_vm5, %v1127_v28, %v1128_v49  ;;  %v1299_v28 = vsel %vm1298_vm11, %v1130_v62, %v1131_v22 }
 0x2ce   :  { %v2311_v14 = vmul.f32 %v7221_v60, %v1959_v12  ;;  %v2071_v29 = vsub.f32 0.0, %v5602_v13  ;;  %v1126_v1 = vsel %vm1078_vm1, %v5087_v48, 384  ;;  %v5637_v60 = vsel %vm1246_vm4, %v1245_v43, %v1123_v42  ;;  %v5682_v22 = vpop.permute.xlu0 %2254 }
 0x2cf   :  { %vm1264_vm9 = vcmp.lt.s32.totalorder %v1263_v31, %v1126_v1  ;;  %v1249_v43 = vshra.s32 %v5637_v60, 16  ;;  %vm1282_vm12 = vcmp.lt.s32.totalorder %v1281_v61, %v1129_v35  ;;  %7233 = vst [vmem:[#allocation63_spill] sm:$0xff] %v5682_v22  ;;  %vm2882_vm5 = vcmask 23552  }
 0x2d0   :  { %2604 = vrot.lane.b32.xlu1 %v1959_v12, %s3492_s16  ;;  %v5612_v4 = vpop.permute.xlu1 %2116  ;;  %v2151_v58 = vmul.f32 %v5411_v8, %v2071_v29  ;;  %v5658_v16 = vsel %vm1264_vm9, %v1263_v31, %v1126_v1  ;;  %v7229_v29 = vld [vmem:[#allocation77_spill] sm:$0xff]  ;;  %v7230_v8 = vld [vmem:[#allocation28_spill] sm:$0xff]  ;;  %v5676_v1 = vsel %vm1282_vm12, %v1281_v61, %v1129_v35  ;;  %vm2950_vm9 = vcmask 56320  }
 0x2d1   :  { %1198 = vmin.xlane.f32.xlu0 %v5605_v63  ;;  %v7224_v63 = vld [vmem:[#allocation78_spill] sm:$0xff]  ;;  %vm1084_vm10 = vcmp.eq.f32.partialorder %v7229_v29, %v7218_v52  ;;  %v5669_v49 = vcvt.s32.f32 %v1249_v43  ;;  %v1267_v31 = vshra.s32 %v5658_v16, 16  ;;  %vm2967_vm11 = vcmask 64512  }
 0x2d2   :  { %vm1094_vm6 = vcmp.eq.f32.partialorder %v7224_v63, %v7223_v44  ;;  %v1143_v63 = vsel %vm1095_vm7, %v5071_v11, 384  ;;  %v5667_v11 = vmul.f32 %v5466_v0, %v7230_v8  ;;  %v7232_v0 = vld [vmem:[#allocation103_spill] sm:$0xff]  ;;  %vm2916_vm7 = vcmask 39936  }
 0x2d3   :  { %v1142_v42 = vsel %vm1094_vm6, %v5053_v23, 384  ;;  %v1961_v23 = vmul.f32 %v5457_v15, %v7230_v8  ;;  %v7231_v15 = vld [vmem:[#allocation83_spill] sm:$0xff]  ;;  %v5685_v29 = vcvt.s32.f32 %v1267_v31  ;;  %v1285_v8 = vshra.s32 %v5676_v1, 16 }
 0x2d4   :  { %2348 = vrot.lane.b32.xlu1 %v2311_v14, %s3487_s4  ;;  %v5635_v12 = vpop.permute.xlu1 %2196  ;;  %v5647_v14 = vcvt.s32.f32 %v1231_v2  ;;  %vm1370_vm13 = vcmp.lt.s32.totalorder %v1142_v42, %v1143_v63  ;;  %v1132_v2 = vsel %vm1084_vm10, %v5087_v48, 384  ;;  %vm1096_vm14 = vcmp.eq.f32.partialorder %v7231_v15, %v7223_v44 }
 0x2d5   :  { %1216 = vmin.xlane.f32.xlu0 %v5628_v5  ;;  %vm1300_vm15 = vcmp.lt.s32.totalorder %v1299_v28, %v1132_v2  ;;  %v2313_v62 = vmul.f32 %v7232_v0, %v1961_v23  ;;  %v1371_v43 = vsel %vm1370_vm13, %v1142_v42, %v1143_v63  ;;  %v1144_v61 = vsel %vm1096_vm14, %v5087_v48, 384  ;;  %v5699_v63 = vpop.permute.xlu0 %2430 }
 0x2d6   :  { %v5692_v44 = vsel %vm1300_vm15, %v1299_v28, %v1132_v2  ;;  %vm1372_vm0 = vcmp.lt.s32.totalorder %v1371_v43, %v1144_v61  ;;  %v5696_v15 = vcvt.s32.f32 %v1285_v8  ;;  %7234 = vst [vmem:[#allocation64_spill] sm:$0xff] %v5699_v63  ;;  %v1963_v28 = vmul.f32 %v5566_v36, %v7090_v40 }
 0x2d7   :  { %v1303_v42 = vshra.s32 %v5692_v44, 16  ;;  %v5702_v31 = vsel %vm1372_vm0, %v1371_v43, %v1144_v61  ;;  %v5709_v2 = vmul.f32 %v5587_v34, %v7090_v40  ;;  %vm2899_vm6 = vcmask 31744  }
 0x2d8   :  { %2540 = vrot.lane.b32.xlu1 %v2151_v58, %s3490_s0  ;;  %v5656_v37 = vpop.permute.xlu1 %2260  ;;  %v2073_v58 = vsub.f32 0.0, %v5667_v11  ;;  %7235 = vst [vmem:[#allocation76_spill] sm:$0xff] %v5702_v31  ;;  %v1375_v0 = vshra.s32 %v5702_v31, 16  ;;  %v2315_v43 = vmul.f32 %v5124_v39, %v1963_v28  ;;  %v7248_v31 = vld [vmem:[#allocation25_spill] sm:$0xff]  ;;  %vm2984_vm10 = vcmask 72704  }
 0x2d9   :  { %7228 = vst [vmem:[#allocation98_spill] sm:$0xff] %v5656_v37  ;;  %1234 = vmin.xlane.f32.xlu0 %v5647_v14  ;;  %v2075_v8 = vsub.f32 0.0, %v5709_v2 }
 0x2da   :  { %v5720_v36 = vcvt.s32.f32 %v1375_v0 }
 0x2db   :  { %v2155_v34 = vmul.f32 %v5612_v4, %v2075_v8 }
 0x2dc   :  { %2608 = vrot.lane.b32.xlu1 %v1961_v23, %s3492_s16  ;;  %v5674_v52 = vpop.permute.xlu1 %2436  ;;  %v2153_v23 = vmul.f32 %v5478_v27, %v2073_v58  ;;  %v5711_v27 = vcvt.s32.f32 %v1303_v42  ;;  %v5716_v58 = vpop.permute.xlu0 %2478  ;;  %7237 = vst [vmem:[#allocation82_spill] sm:$0xff] %v5720_v36 }
 0x2dd   :  { %1252 = vmin.xlane.f32.xlu0 %v5669_v49  ;;  %7236 = vst [vmem:[#allocation11_spill] sm:$0xff] %v5716_v58 }
 0x2e0   :  { %2352 = vrot.lane.b32.xlu1 %v2313_v62, %s3487_s4  ;;  %v5690_v35 = vpop.permute.xlu1 %2484  ;;  %v5725_v61 = vpop.permute.xlu0 %1922 }
 0x2e1   :  { %1270 = vmin.xlane.f32.xlu0 %v5685_v29 }
 0x2e4   :  { %2544 = vrot.lane.b32.xlu1 %v2153_v23, %s3490_s0  ;;  %v1929_v48 = vpop.permute.xlu1 %1928  ;;  %v5737_v0 = vpop.permute.xlu0 %1986 }
 0x2e5   :  { %1288 = vmin.xlane.f32.xlu0 %v5696_v15  ;;  %v1965_v42 = vmul.f32 %v1929_v48, %v7103_v50 }
 0x2e8   :  { %2612 = vrot.lane.b32.xlu1 %v1963_v28, %s3492_s16  ;;  %v1993_v62 = vpop.permute.xlu1 %1992  ;;  %v5744_v22 = vpop.permute.xlu0 %2114 }
 0x2e9   :  { %1306 = vmin.xlane.f32.xlu0 %v5711_v27  ;;  %v5732_v39 = vmul.f32 %v1993_v62, %v7103_v50  ;;  %v7239_v62 = vld [vmem:[#allocation3_spill] sm:$0xff] }
 0x2eb   :  { %v2077_v4 = vsub.f32 0.0, %v5732_v39 }
 0x2ec   :  { %2356 = vrot.lane.b32.xlu1 %v2315_v43, %s3487_s4  ;;  %v2121_v40 = vpop.permute.xlu1 %2120  ;;  %v2317_v43 = vmul.f32 %v5291_v33, %v1965_v42  ;;  %v5752_v33 = vpop.permute.xlu0 %2194 }
 0x2ed   :  { %1378 = vmin.xlane.f32.xlu0 %v5720_v36  ;;  %7241 = vst [vmem:[#allocation81_spill] sm:$0xff] %v5752_v33 }
 0x2f0   :  { %2548 = vrot.lane.b32.xlu1 %v2155_v34, %s3490_s0  ;;  %v5728_v23 = vpop.permute.xlu1 %2200  ;;  %v2157_v34 = vmul.f32 %v2121_v40, %v2077_v4 }
 0x2f4   :  { %2616 = vrot.lane.b32.xlu1 %v1965_v42, %s3492_s16  ;;  %v5735_v28 = vpop.permute.xlu1 %2264 }
 0x2f5   :  { %7238 = vst [vmem:[#allocation80_spill] sm:$0xff] %v5735_v28  ;;  %v7240_v28 = vld [vmem:[#allocation39_spill] sm:$0xff] }
 0x2f6   :  { %v1954_v58 = vmul.f32 %v7240_v28, %v7239_v62 }
 0x2f8   :  { %2360 = vrot.lane.b32.xlu1 %v2317_v43, %s3487_s4  ;;  %v5742_v8 = vpop.permute.xlu1 %2440 }
 0x2fc   :  { %2552 = vrot.lane.b32.xlu1 %v2157_v34, %s3490_s0  ;;  %v5747_v50 = vpop.permute.xlu1 %2488  ;;  %v5762_v34 = vpop.permute.xlu0 %2258 }
 0x2fd   :  { %7242 = vst [vmem:[#allocation59_spill] sm:$0xff] %v5762_v34  ;;  %v1321_v34 = vshra.s32 %v5160_v32, 16 }
 0x300   :  { %v1933_v48 = vpop.permute.xlu1 %1932  ;;  %v5767_v33 = vpop.permute.xlu0 %2434 }
 0x301   :  { %v1967_v63 = vmul.f32 %v1933_v48, %v7135_v3  ;;  %7243 = vst [vmem:[#allocation66_spill] sm:$0xff] %v5767_v33  ;;  %v5784_v33 = vcvt.s32.f32 %v1321_v34 }
 0x303   :  { %2620 = vrot.lane.b32.xlu1 %v1967_v63, %s3492_s16  ;;  %2594 = vrot.lane.b32.xlu0 %v1954_v58, %s3492_s16  ;;  %v2319_v40 = vmul.f32 %v5375_v56, %v1967_v63  ;;  %7246 = vst [vmem:[#allocation85_spill] sm:$0xff] %v5784_v33 }
 0x304   :  { %v1997_v42 = vpop.permute.xlu1 %1996  ;;  %v5771_v56 = vpop.permute.xlu0 %2482 }
 0x305   :  { %v5758_v43 = vmul.f32 %v1997_v42, %v7135_v3  ;;  %7245 = vst [vmem:[#allocation68_spill] sm:$0xff] %v5771_v56  ;;  %v1393_v56 = vshra.s32 %v5175_v20, 16  ;;  %v7249_v20 = vld [vmem:[#allocation100_spill] sm:$0xff] }
 0x307   :  { %2364 = vrot.lane.b32.xlu1 %v2319_v40, %s3487_s4  ;;  %v2079_v4 = vsub.f32 0.0, %v5758_v43  ;;  %v5792_v32 = vcvt.s32.f32 %v1393_v56 }
 0x308   :  { %v2125_v28 = vpop.permute.xlu1 %2124  ;;  %v5777_v42 = vpop.permute.xlu0 %1926 }
 0x309   :  { %v2159_v48 = vmul.f32 %v2125_v28, %v2079_v4  ;;  %7247 = vst [vmem:[#allocation84_spill] sm:$0xff] %v5792_v32 }
 0x30b   :  { %2556 = vrot.lane.b32.xlu1 %v2159_v48, %s3490_s0 }
 0x30c   :  { %v5765_v37 = vpop.permute.xlu1 %2204  ;;  %v5782_v28 = vpop.permute.xlu0 %1990 }
 0x310   :  { %v5769_v7 = vpop.permute.xlu1 %2268 }
 0x311   :  { %7244 = vst [vmem:[#allocation67_spill] sm:$0xff] %v5769_v7 }
 0x314   :  { %v5773_v3 = vpop.permute.xlu1 %2444 }
 0x318   :  { %v5775_v63 = vpop.permute.xlu1 %2492 }
 0x31c   :  { %v1937_v40 = vpop.permute.xlu1 %1936 }
 0x31d   :  { %v1969_v4 = vmul.f32 %v1937_v40, %v7151_v57  ;;  %v5794_v40 = vpop.permute.xlu0 %2118 }
 0x31f   :  { %2624 = vrot.lane.b32.xlu1 %v1969_v4, %s3492_s16  ;;  %v2321_v7 = vmul.f32 %v5445_v41, %v1969_v4 }
 0x320   :  { %v2001_v48 = vpop.permute.xlu1 %2000 }
 0x321   :  { %v5801_v41 = vpop.permute.xlu0 %2198 }
 0x322   :  { %1324 = vmin.xlane.f32.xlu0 %v5784_v33  ;;  %7250 = vst [vmem:[#allocation86_spill] sm:$0xff] %v5801_v41 }
 0x323   :  { %2368 = vrot.lane.b32.xlu1 %v2321_v7, %s3487_s4 }
 0x324   :  { %v5790_v36 = vpop.permute.xlu1 %2128 }
 0x325   :  { %v5809_v56 = vpop.permute.xlu0 %2262 }
 0x326   :  { %1396 = vmin.xlane.f32.xlu0 %v5792_v32  ;;  %7252 = vst [vmem:[#allocation73_spill] sm:$0xff] %v5809_v56 }
 0x327   :  { %2652 = vrot.lane.b32.xlu1 %v7248_v31, %s3491_s15  ;;  %v7253_v31 = vld [vmem:[#allocation105_spill] sm:$0xff] }
 0x328   :  { %v2209_v34 = vpop.permute.xlu1 %2208  ;;  %v5817_v33 = vmul.f32 %v7253_v31, %v7239_v62  ;;  %v2227_v62 = vmul.f32 %v5228_v30, %v5488_v26 }
 0x32a   :  { %7254 = vst [vmem:[#allocation34_spill] sm:$0xff] %v5817_v33  ;;  %v2066_v56 = vsub.f32 0.0, %v5817_v33 }
 0x32b   :  { %2656 = vrot.lane.b32.xlu1 %v7249_v20, %s3491_s15  ;;  %v5821_v20 = vpop.permute.xlu0 %2438 }
 0x32c   :  { %v5803_v4 = vpop.permute.xlu1 %2272  ;;  %7255 = vst [vmem:[#allocation71_spill] sm:$0xff] %v5821_v20 }
 0x32d   :  { %7251 = vst [vmem:[#allocation18_spill] sm:$0xff] %v5803_v4 }
 0x32f   :  { %2660 = vrot.lane.b32.xlu1 %v5118_v6, %s3491_s15  ;;  %v7257_v6 = vld [vmem:[#allocation51_spill] sm:$0xff]  ;;  %v5835_v31 = vpop.permute.xlu0 %2486 }
 0x330   :  { %v5807_v7 = vpop.permute.xlu1 %2448  ;;  %v2306_v41 = vmul.f32 %v7257_v6, %v1954_v58  ;;  %7258 = vst [vmem:[#allocation93_spill] sm:$0xff] %v5835_v31  ;;  %v2033_v31 = vmul.f32 %v2001_v48, %v7151_v57 }
 0x333   :  { %2664 = vrot.lane.b32.xlu1 %v5272_v53, %s3491_s15  ;;  %v5844_v58 = vpop.permute.xlu0 %1930 }
 0x334   :  { %v5813_v32 = vpop.permute.xlu1 %2496 }
 0x337   :  { %2668 = vrot.lane.b32.xlu1 %v5358_v21, %s3491_s15  ;;  %v2146_v21 = vmul.f32 %v5116_v25, %v2066_v56  ;;  %v2231_v25 = vmul.f32 %v5418_v55, %v5602_v13  ;;  %v2233_v56 = vmul.f32 %v5493_v59, %v5667_v11  ;;  %v5855_v6 = vpop.permute.xlu0 %1994 }
 0x338   :  { %v5823_v4 = vpop.permute.xlu1 %2596 }
 0x339   :  { %7256 = vst [vmem:[#allocation72_spill] sm:$0xff] %v5823_v4  ;;  %v2241_v4 = vmul.f32 %v2209_v34, %v2033_v31 }
 0x33b   :  { %2672 = vrot.lane.b32.xlu1 %v5430_v24, %s3491_s15  ;;  %v2229_v24 = vmul.f32 %v5330_v54, %v5538_v10 }
 0x33c   :  { %v5829_v53 = vpop.permute.xlu1 %2340  ;;  %2338 = vrot.lane.b32.xlu0 %v2306_v41, %s3487_s4 }
 0x33f   :  { %2708 = vrot.lane.b32.xlu1 %v2227_v62, %s3491_s15  ;;  %v2235_v62 = vmul.f32 %v5635_v12, %v5709_v2 }
 0x340   :  { %v5838_v20 = vpop.permute.xlu1 %2532  ;;  %2530 = vrot.lane.b32.xlu0 %v2146_v21, %s3490_s0  ;;  %v5863_v21 = vpop.permute.xlu0 %2122 }
 0x341   :  { %7259 = vst [vmem:[#allocation102_spill] sm:$0xff] %v5838_v20 }
 0x343   :  { %2712 = vrot.lane.b32.xlu1 %v2229_v24, %s3491_s15  ;;  %v2237_v24 = vmul.f32 %v5728_v23, %v5732_v39 }
 0x344   :  { %v5846_v41 = vpop.permute.xlu1 %2600 }
 0x347   :  { %2716 = vrot.lane.b32.xlu1 %v2231_v25, %s3491_s15  ;;  %v2239_v25 = vmul.f32 %v5765_v37, %v5758_v43  ;;  %v1411_v37 = vshra.s32 %v5201_v18, 16 }
 0x348   :  { %v5851_v30 = vpop.permute.xlu1 %2344 }
 0x349   :  { %7260 = vst [vmem:[#allocation78_spill] sm:$0xff] %v5851_v30  ;;  %v2081_v30 = vsub.f32 0.0, %v2033_v31 }
 0x34b   :  { %2720 = vrot.lane.b32.xlu1 %v2233_v56, %s3491_s15  ;;  %v5874_v56 = vpop.permute.xlu0 %2202  ;;  %v2161_v48 = vmul.f32 %v5790_v36, %v2081_v30 }
 0x34c   :  { %v5858_v54 = vpop.permute.xlu1 %2536  ;;  %7262 = vst [vmem:[#allocation87_spill] sm:$0xff] %v5874_v56 }
 0x34f   :  { %2724 = vrot.lane.b32.xlu1 %v2235_v62, %s3491_s15  ;;  %v1339_v62 = vshra.s32 %v5199_v45, 16  ;;  %v5882_v23 = vpop.permute.xlu0 %2266 }
 0x350   :  { %v5865_v55 = vpop.permute.xlu1 %2604  ;;  %7263 = vst [vmem:[#allocation77_spill] sm:$0xff] %v5882_v23 }
 0x353   :  { %2728 = vrot.lane.b32.xlu1 %v2237_v24, %s3491_s15  ;;  %v5897_v23 = vpop.permute.xlu0 %2442 }
 0x354   :  { %v5870_v59 = vpop.permute.xlu1 %2348  ;;  %7267 = vst [vmem:[#allocation3_spill] sm:$0xff] %v5897_v23 }
 0x355   :  { %7261 = vst [vmem:[#allocation79_spill] sm:$0xff] %v5870_v59  ;;  %v5887_v59 = vcvt.s32.f32 %v1339_v62 }
 0x357   :  { %2732 = vrot.lane.b32.xlu1 %v2239_v25, %s3491_s15  ;;  %7264 = vst [vmem:[#allocation28_spill] sm:$0xff] %v5887_v59 }
 0x358   :  { %v5877_v12 = vpop.permute.xlu1 %2540 }
 0x35b   :  { %2772 = vrot.lane.b32.xlu1 %v5488_v26, %s3493_s3  ;;  %v5895_v26 = vcvt.s32.f32 %v1411_v37 }
 0x35c   :  { %v5884_v24 = vpop.permute.xlu1 %2608 }
 0x35d   :  { %7266 = vst [vmem:[#allocation103_spill] sm:$0xff] %v5895_v26 }
 0x35f   :  { %2776 = vrot.lane.b32.xlu1 %v5538_v10, %s3493_s3  ;;  %1342 = vmin.xlane.f32.xlu0 %v5887_v59  ;;  %v5905_v10 = vpop.permute.xlu0 %2490 }
 0x360   :  { %v5893_v25 = vpop.permute.xlu1 %2352  ;;  %7268 = vst [vmem:[#allocation39_spill] sm:$0xff] %v5905_v10 }
 0x361   :  { %7265 = vst [vmem:[#allocation83_spill] sm:$0xff] %v5893_v25 }
 0x363   :  { %2736 = vrot.lane.b32.xlu1 %v2241_v4, %s3491_s15  ;;  %1414 = vmin.xlane.f32.xlu0 %v5895_v26  ;;  %v5913_v37 = vpop.permute.xlu0 %1934 }
 0x364   :  { %v5901_v57 = vpop.permute.xlu1 %2544 }
 0x367   :  { %2560 = vrot.lane.b32.xlu1 %v2161_v48, %s3490_s0  ;;  %v5921_v36 = vpop.permute.xlu0 %1998  ;;  %v7270_v48 = vld [vmem:[#allocation8_spill] sm:$0xff] }
 0x368   :  { %v5907_v62 = vpop.permute.xlu1 %2612  ;;  %v1956_v10 = vmul.f32 %v5277_v9, %v7270_v48 }
 0x36b   :  { %2780 = vrot.lane.b32.xlu1 %v5602_v13, %s3493_s3 }
 0x36c   :  { %v5911_v34 = vpop.permute.xlu1 %2356 }
 0x36d   :  { %7269 = vst [vmem:[#allocation25_spill] sm:$0xff] %v5911_v34 }
 0x36f   :  { %2784 = vrot.lane.b32.xlu1 %v5667_v11, %s3493_s3  ;;  %v5932_v11 = vpop.permute.xlu0 %2126 }
 0x370   :  { %v5917_v4 = vpop.permute.xlu1 %2548  ;;  %7272 = vst [vmem:[#allocation105_spill] sm:$0xff] %v5932_v11 }
 0x373   :  { %2788 = vrot.lane.b32.xlu1 %v5709_v2, %s3493_s3  ;;  %v5939_v23 = vpop.permute.xlu0 %2206 }
 0x374   :  { %v5923_v30 = vpop.permute.xlu1 %2616  ;;  %7273 = vst [vmem:[#allocation51_spill] sm:$0xff] %v5939_v23 }
 0x377   :  { %2792 = vrot.lane.b32.xlu1 %v5732_v39, %s3493_s3  ;;  %v5943_v9 = vpop.permute.xlu0 %2270 }
 0x378   :  { %v5929_v13 = vpop.permute.xlu1 %2360  ;;  %7274 = vst [vmem:[#allocation8_spill] sm:$0xff] %v5943_v9  ;;  %v1429_v9 = vshra.s32 %v5214_v38, 16 }
 0x379   :  { %7271 = vst [vmem:[#allocation100_spill] sm:$0xff] %v5929_v13  ;;  %2598 = vrot.lane.b32.xlu0 %v1956_v10, %s3492_s16 }
 0x37b   :  { %2796 = vrot.lane.b32.xlu1 %v5758_v43, %s3493_s3  ;;  %v5947_v13 = vpop.permute.xlu0 %2446  ;;  %v1357_v43 = vshra.s32 %v5207_v19, 16 }
 0x37c   :  { %v5936_v2 = vpop.permute.xlu1 %2552  ;;  %7276 = vst [vmem:[#allocation137_spill] sm:$0xff] %v5947_v13  ;;  %v5964_v13 = vcvt.s32.f32 %v1429_v9 }
 0x37d   :  { %v5960_v23 = vcvt.s32.f32 %v1357_v43  ;;  %v1176_v43 = vand.u32 65535, %v5547_v46 }
 0x37e   :  { %7281 = vst [vmem:[#allocation142_spill] sm:$0xff] %v5964_v13 }
 0x37f   :  { %2800 = vrot.lane.b32.xlu1 %v2033_v31, %s3493_s3  ;;  %v5953_v56 = vpop.permute.xlu0 %2494  ;;  %7280 = vst [vmem:[#allocation141_spill] sm:$0xff] %v5960_v23  ;;  %v1178_v9 = vcvt.s32.f32 %v1176_v43 }
 0x380   :  { %v5941_v34 = vpop.permute.xlu1 %2620  ;;  %7277 = vst [vmem:[#allocation138_spill] sm:$0xff] %v5953_v56  ;;  %v1158_v56 = vand.u32 65535, %v5526_v51 }
 0x383   :  { %v5958_v31 = vpop.xlane.xlu0 %1162 }
 0x384   :  { %v5945_v39 = vpop.permute.xlu1 %2364  ;;  %7279 = vst [vmem:[#allocation140_spill] sm:$0xff] %v5958_v31  ;;  %vm1164_vm1 = vcmp.eq.f32.partialorder %v5559_v47, %v5958_v31  ;;  %v7285_v47 = vld [vmem:[#allocation53_spill] sm:$0xff]  ;;  %v7287_v31 = vld [vmem:[#allocation70_spill] sm:$0xff] }
 0x385   :  { %7275 = vst [vmem:[#allocation136_spill] sm:$0xff] %v5945_v39  ;;  %v1212_v11 = vand.u32 65535, %v7287_v31 }
 0x387   :  { %v5966_v26 = vpop.xlane.xlu0 %1180 }
 0x388   :  { %v5949_v25 = vpop.permute.xlu1 %2556  ;;  %7282 = vst [vmem:[#allocation143_spill] sm:$0xff] %v5966_v26  ;;  %vm1182_vm2 = vcmp.eq.f32.partialorder %v5578_v17, %v5966_v26  ;;  %v7288_v17 = vld [vmem:[#allocation45_spill] sm:$0xff]  ;;  %v7298_v26 = vld [vmem:[#allocation27_spill] sm:$0xff] }
 0x389   :  { %v1183_v45 = vsel %vm1182_vm2, %v1178_v9, inf }
 0x38b   :  { %v5975_v38 = vpop.xlane.xlu0 %1198 }
 0x38c   :  { %7283 = vst [vmem:[#allocation144_spill] sm:$0xff] %v5975_v38  ;;  %vm1200_vm3 = vcmp.eq.f32.partialorder %v7285_v47, %v5975_v38  ;;  %v7289_v47 = vld [vmem:[#allocation9_spill] sm:$0xff] }
 0x38f   :  { %v5984_v46 = vpop.xlane.xlu0 %1216 }
 0x390   :  { %vm1218_vm4 = vcmp.eq.f32.partialorder %v5628_v5, %v5984_v46  ;;  %v7291_v5 = vld [vmem:[#allocation130_spill] sm:$0xff] }
 0x391   :  { %v5951_v20 = vpop.permute.xlu1 %2624 }
 0x395   :  { %v5956_v33 = vpop.permute.xlu1 %2368 }
 0x396   :  { %7278 = vst [vmem:[#allocation139_spill] sm:$0xff] %v5956_v33  ;;  %v1160_v33 = vcvt.s32.f32 %v1158_v56 }
 0x398   :  { %1360 = vmin.xlane.f32.xlu0 %v5960_v23  ;;  %v1165_v23 = vsel %vm1164_vm1, %v1160_v33, inf }
 0x399   :  { %v2653_v39 = vpop.permute.xlu1 %2652 }
 0x39c   :  { %1432 = vmin.xlane.f32.xlu0 %v5964_v13  ;;  %v7284_v13 = vld [vmem:[#allocation60_spill] sm:$0xff] }
 0x39d   :  { %v2657_v19 = vpop.permute.xlu1 %2656  ;;  %v1194_v59 = vand.u32 65535, %v7284_v13  ;;  %7286 = vst [vmem:[#allocation60_spill] sm:$0xff] %v5984_v46  ;;  %v5993_v13 = vmul.f32 %v7288_v17, %v7270_v48  ;;  %v7294_v17 = vld [vmem:[#allocation133_spill] sm:$0xff] }
 0x39f   :  { %v1196_v56 = vcvt.s32.f32 %v1194_v59  ;;  %v2308_v59 = vmul.f32 %v7289_v47, %v1956_v10  ;;  %v2068_v31 = vsub.f32 0.0, %v5993_v13  ;;  %v7295_v47 = vld [vmem:[#allocation13_spill] sm:$0xff] }
 0x3a1   :  { %v5973_v18 = vpop.permute.xlu1 %2660 }
 0x3a3   :  { %1166 = vmin.xlane.f32.xlu1 %v1165_v23  ;;  %v1201_v23 = vsel %vm1200_vm3, %v1196_v56, inf  ;;  %v7292_v56 = vld [vmem:[#allocation17_spill] sm:$0xff] }
 0x3a4   :  { %v2888_v48 = vsel %vm2882_vm5, %v7292_v56, %v7291_v5 }
 0x3a5   :  { %v5980_v51 = vpop.permute.xlu1 %2664 }
 0x3a7   :  { %1184 = vmin.xlane.f32.xlu1 %v1183_v45  ;;  %v1214_v45 = vcvt.s32.f32 %v1212_v11 }
 0x3a9   :  { %v5987_v33 = vpop.permute.xlu1 %2668  ;;  %v1219_v9 = vsel %vm1218_vm4, %v1214_v45, inf  ;;  %v2905_v45 = vsel %vm2899_vm6, %v2888_v48, %v7294_v17  ;;  %v7300_v48 = vld [vmem:[#allocation62_spill] sm:$0xff] }
 0x3aa   :  { %v2922_v10 = vsel %vm2916_vm7, %v2905_v45, %v5877_v12 }
 0x3ab   :  { %1202 = vmin.xlane.f32.xlu1 %v1201_v23  ;;  %v7293_v23 = vld [vmem:[#allocation119_spill] sm:$0xff]  ;;  %v2939_v12 = vsel %vm2933_vm8, %v2922_v10, %v5865_v55  ;;  %v7304_v10 = vld [vmem:[#allocation90_spill] sm:$0xff] }
 0x3ac   :  { %v2148_v11 = vmul.f32 %v7293_v23, %v2068_v31  ;;  %v7299_v31 = vld [vmem:[#allocation92_spill] sm:$0xff]  ;;  %v2956_v17 = vsel %vm2950_vm9, %v2939_v12, %v2653_v39 }
 0x3ad   :  { %v5995_v43 = vpop.permute.xlu1 %2672  ;;  %v6020_v56 = vmul.f32 %v7299_v31, %v7295_v47 }
 0x3af   :  { %1220 = vmin.xlane.f32.xlu1 %v1219_v9 }
 0x3b1   :  { %v5999_v38 = vpop.permute.xlu1 %2708 }
 0x3b2   :  { %7290 = vst [vmem:[#allocation53_spill] sm:$0xff] %v5999_v38  ;;  %2342 = vrot.lane.b32.xlu0 %v2308_v59, %s3487_s4  ;;  %v7296_v59 = vld [vmem:[#allocation127_spill] sm:$0xff]  ;;  %v7297_v38 = vld [vmem:[#allocation61_spill] sm:$0xff] }
 0x3b3   :  { %v1958_v46 = vmul.f32 %v7296_v59, %v7295_v47  ;;  %v2890_v5 = vsel %vm2882_vm5, %v7298_v26, %v7297_v38  ;;  %v7301_v26 = vld [vmem:[#allocation47_spill] sm:$0xff]  ;;  %v7302_v47 = vld [vmem:[#allocation114_spill] sm:$0xff] }
 0x3b4   :  { %v2907_v23 = vsel %vm2899_vm6, %v2890_v5, %v7300_v48  ;;  %v2291_v59 = vmul.f32 %v7302_v47, %v7301_v26  ;;  %v7303_v5 = vld [vmem:[#allocation16_spill] sm:$0xff] }
 0x3b5   :  { %v6010_v9 = vpop.permute.xlu1 %2712  ;;  %v2892_v55 = vsel %vm2882_vm5, %v7303_v5, %v5674_v52  ;;  %v2310_v31 = vmul.f32 %v7304_v10, %v1958_v46  ;;  %v7309_v10 = vld [vmem:[#allocation5_spill] sm:$0xff] }
 0x3b6   :  { %2534 = vrot.lane.b32.xlu0 %v2148_v11, %s3490_s0  ;;  %v2924_v11 = vsel %vm2916_vm7, %v2907_v23, %v5901_v57  ;;  %v2070_v57 = vsub.f32 0.0, %v6020_v56  ;;  %v2909_v39 = vsel %vm2899_vm6, %v2892_v55, %v5690_v35  ;;  %v6044_v23 = vpop.xlane.xlu0 %1234  ;;  %v2387_v52 = vsub.f32 %v2291_v59, %v5829_v53  ;;  %v7305_v35 = vld [vmem:[#allocation21_spill] sm:$0xff]  ;;  %v7308_v55 = vld [vmem:[#allocation22_spill] sm:$0xff] }
 0x3b7   :  { %v2941_v48 = vsel %vm2933_vm8, %v2924_v11, %v5884_v24  ;;  %v2926_v12 = vsel %vm2916_vm7, %v2909_v39, %v5917_v4  ;;  %v2894_v26 = vsel %vm2882_vm5, %v7305_v35, %v5742_v8  ;;  %v7306_v24 = vld [vmem:[#allocation132_spill] sm:$0xff]  ;;  %vm1236_vm12 = vcmp.eq.f32.partialorder %v5647_v14, %v6044_v23 }
 0x3b8   :  { %v2150_v11 = vmul.f32 %v7306_v24, %v2070_v57  ;;  %v2911_v47 = vsel %vm2899_vm6, %v2894_v26, %v5747_v50  ;;  %v7307_v50 = vld [vmem:[#allocation26_spill] sm:$0xff]  ;;  %v7314_v24 = vld [vmem:[#allocation48_spill] sm:$0xff] }
 0x3b9   :  { %v2717_v45 = vpop.permute.xlu1 %2716  ;;  %v2928_v53 = vsel %vm2916_vm7, %v2911_v47, %v5936_v2  ;;  %v2896_v5 = vsel %vm2882_vm5, %v7307_v50, %v5773_v3  ;;  %v7310_v2 = vld [vmem:[#allocation69_spill] sm:$0xff] }
 0x3ba   :  { %v6030_v38 = vsel %vm2967_vm11, %v2956_v17, %v2717_v45  ;;  %2602 = vrot.lane.b32.xlu0 %v1958_v46, %s3492_s16  ;;  %v2958_v17 = vsel %vm2950_vm9, %v2941_v48, %v2657_v19  ;;  %v2943_v19 = vsel %vm2933_vm8, %v2926_v12, %v5907_v62  ;;  %v6074_v62 = vpop.xlane.xlu0 %1252  ;;  %v6080_v57 = vmul.f32 %v7310_v2, %v7308_v55 }
 0x3bb   :  { %v2960_v4 = vsel %vm2950_vm9, %v2943_v19, %v5973_v18  ;;  %v2913_v18 = vsel %vm2899_vm6, %v2896_v5, %v5775_v63  ;;  %v2945_v39 = vsel %vm2933_vm8, %v2928_v53, %v5923_v30  ;;  %v7313_v63 = vld [vmem:[#allocation99_spill] sm:$0xff]  ;;  %vm1254_vm13 = vcmp.eq.f32.partialorder %v5669_v49, %v6074_v62 }
 0x3bc   :  { %v2930_v48 = vsel %vm2916_vm7, %v2913_v18, %v5949_v25  ;;  %v2962_v3 = vsel %vm2950_vm9, %v2945_v39, %v5980_v51  ;;  %v2072_v30 = vsub.f32 0.0, %v6080_v57 }
 0x3bd   :  { %v2721_v45 = vpop.permute.xlu1 %2720  ;;  %v2947_v25 = vsel %vm2933_vm8, %v2930_v48, %v5941_v34  ;;  %v7318_v48 = vld [vmem:[#allocation38_spill] sm:$0xff] }
 0x3be   :  { %v6051_v46 = vsel %vm2967_vm11, %v2958_v17, %v2721_v45  ;;  %2346 = vrot.lane.b32.xlu0 %v2310_v31, %s3487_s4  ;;  %v1960_v31 = vmul.f32 %v7309_v10, %v7308_v55  ;;  %v7311_v45 = vld [vmem:[#allocation123_spill] sm:$0xff]  ;;  %v2964_v47 = vsel %vm2950_vm9, %v2947_v25, %v5987_v33  ;;  %v7316_v33 = vld [vmem:[#allocation32_spill] sm:$0xff] }
 0x3bf   :  { %v1962_v10 = vmul.f32 %v5725_v61, %v7316_v33 }
 0x3c0   :  { %2836 = vrot.lane.b32.xlu1 %v2387_v52, %s3494_s17  ;;  %v7312_v52 = vld [vmem:[#allocation10_spill] sm:$0xff]  ;;  %v2312_v26 = vmul.f32 %v7313_v63, %v1960_v31 }
 0x3c1   :  { %v2725_v59 = vpop.permute.xlu1 %2724  ;;  %v2886_v35 = vsel %vm2882_vm5, %v7312_v52, %v7311_v45 }
 0x3c2   :  { %v6068_v8 = vsel %vm2967_vm11, %v2960_v4, %v2725_v59  ;;  %2538 = vrot.lane.b32.xlu0 %v2150_v11, %s3490_s0  ;;  %v2903_v51 = vsel %vm2899_vm6, %v2886_v35, %v7314_v24  ;;  %v6103_v11 = vpop.xlane.xlu0 %1270  ;;  %v7315_v59 = vld [vmem:[#allocation74_spill] sm:$0xff]  ;;  %v7320_v24 = vld [vmem:[#allocation36_spill] sm:$0xff] }
 0x3c3   :  { %v2920_v53 = vsel %vm2916_vm7, %v2903_v51, %v5858_v54  ;;  %v2152_v50 = vmul.f32 %v7315_v59, %v2072_v30  ;;  %v6125_v54 = vmul.f32 %v5737_v0, %v7316_v33  ;;  %v6156_v51 = vmul.f32 %v5782_v28, %v7320_v24 }
 0x3c4   :  { %v2937_v34 = vsel %vm2933_vm8, %v2920_v53, %v5846_v41  ;;  %v1248_v33 = vand.u32 65535, %v5637_v60  ;;  %vm1272_vm14 = vcmp.eq.f32.partialorder %v5685_v29, %v6103_v11 }
 0x3c5   :  { %v2729_v12 = vpop.permute.xlu1 %2728  ;;  %v2074_v61 = vsub.f32 0.0, %v6125_v54 }
 0x3c6   :  { %v6091_v17 = vsel %vm2967_vm11, %v2962_v3, %v2729_v12  ;;  %2606 = vrot.lane.b32.xlu0 %v1960_v31, %s3492_s16  ;;  %v6119_v55 = vpop.xlane.xlu0 %1288  ;;  %v7317_v31 = vld [vmem:[#allocation52_spill] sm:$0xff]  ;;  %v2314_v3 = vmul.f32 %v7318_v48, %v1962_v10 }
 0x3c7   :  { %v2954_v2 = vsel %vm2950_vm9, %v2937_v34, %v7317_v31  ;;  %v2154_v45 = vmul.f32 %v5744_v22, %v2074_v61  ;;  %v1964_v22 = vmul.f32 %v5777_v42, %v7320_v24  ;;  %v7323_v48 = vld [vmem:[#allocation40_spill] sm:$0xff]  ;;  %v1284_v61 = vand.u32 65535, %v5676_v1 }
 0x3c8   :  { %v2971_v18 = vsel %vm2967_vm11, %v2954_v2, %v6010_v9  ;;  %v7319_v9 = vld [vmem:[#allocation31_spill] sm:$0xff]  ;;  %vm1290_vm15 = vcmp.eq.f32.partialorder %v5696_v15, %v6119_v55  ;;  %v1302_v1 = vand.u32 65535, %v5692_v44  ;;  %v7325_v24 = vld [vmem:[#allocation76_spill] sm:$0xff] }
 0x3c9   :  { %v2733_v19 = vpop.permute.xlu1 %2732  ;;  %v2898_v52 = vsel %vm2882_vm5, %v7319_v9, %v5807_v7 }
 0x3ca   :  { %v6110_v4 = vsel %vm2967_vm11, %v2964_v47, %v2733_v19  ;;  %2350 = vrot.lane.b32.xlu0 %v2312_v26, %s3487_s4  ;;  %v6137_v12 = vpop.xlane.xlu0 %1306  ;;  %v2915_v35 = vsel %vm2899_vm6, %v2898_v52, %v5813_v32  ;;  %v7321_v47 = vld [vmem:[#allocation65_spill] sm:$0xff]  ;;  %v1286_v52 = vcvt.s32.f32 %v1284_v61  ;;  %v7335_v61 = vld [vmem:[#allocation28_spill] sm:$0xff] }
 0x3cb   :  { %v1230_v19 = vand.u32 65535, %v7321_v47  ;;  %vm1308_vm0 = vcmp.eq.f32.partialorder %v5711_v27, %v6137_v12  ;;  %v7327_v27 = vld [vmem:[#allocation82_spill] sm:$0xff] }
 0x3cd   :  { %v6116_v5 = vpop.permute.xlu1 %2772  ;;  %v1232_v34 = vcvt.s32.f32 %v1230_v19  ;;  %v7328_v19 = vld [vmem:[#allocation88_spill] sm:$0xff] }
 0x3ce   :  { %2542 = vrot.lane.b32.xlu0 %v2152_v50, %s3490_s0  ;;  %v6148_v30 = vpop.xlane.xlu0 %1378  ;;  %v2076_v50 = vsub.f32 0.0, %v6156_v51 }
 0x3cf   :  { %vm1380_vm1 = vcmp.eq.f32.partialorder %v7327_v27, %v6148_v30 }
 0x3d0   :  { %v2156_v31 = vmul.f32 %v5794_v40, %v2076_v50  ;;  %v1966_v40 = vmul.f32 %v5844_v58, %v7323_v48  ;;  %v7329_v50 = vld [vmem:[#allocation128_spill] sm:$0xff] }
 0x3d1   :  { %v2777_v41 = vpop.permute.xlu1 %2776 }
 0x3d2   :  { %v6132_v39 = vsel %vm2984_vm10, %v2971_v18, %v2777_v41  ;;  %2610 = vrot.lane.b32.xlu0 %v1962_v10, %s3492_s16  ;;  %v6171_v28 = vpop.permute.xlu0 %2594  ;;  %v1250_v18 = vcvt.s32.f32 %v1248_v33  ;;  %v1266_v41 = vand.u32 65535, %v5658_v16  ;;  %v7331_v33 = vld [vmem:[#allocation56_spill] sm:$0xff] }
 0x3d4   :  { %v1268_v16 = vcvt.s32.f32 %v1266_v41 }
 0x3d5   :  { %v2737_v0 = vpop.permute.xlu1 %2736 }
 0x3d6   :  { %2354 = vrot.lane.b32.xlu0 %v2314_v3, %s3487_s4  ;;  %v6182_v14 = vpop.xlane.xlu0 %1324  ;;  %v6194_v3 = vmul.f32 %v5855_v6, %v7323_v48  ;;  %v1273_v58 = vsel %vm1272_vm14, %v1268_v16, inf }
 0x3d8   :  { %v2078_v9 = vsub.f32 0.0, %v6194_v3 }
 0x3d9   :  { %v2561_v63 = vpop.permute.xlu1 %2560 }
 0x3da   :  { %v2932_v26 = vsel %vm2916_vm7, %v2915_v35, %v2561_v63  ;;  %2546 = vrot.lane.b32.xlu0 %v2154_v45, %s3490_s0  ;;  %v7324_v45 = vld [vmem:[#allocation122_spill] sm:$0xff]  ;;  %v1291_v35 = vsel %vm1290_vm15, %v1286_v52, inf  ;;  %v2158_v63 = vmul.f32 %v5863_v21, %v2078_v9  ;;  %vm3001_vm15 = vcmask 80896  }
 0x3db   :  { %v2949_v25 = vsel %vm2933_vm8, %v2932_v26, %v5951_v20  ;;  %v7322_v20 = vld [vmem:[#allocation116_spill] sm:$0xff]  ;;  %v2318_v6 = vmul.f32 %v7324_v45, %v1966_v40 }
 0x3dc   :  { %v2966_v32 = vsel %vm2950_vm9, %v2949_v25, %v5995_v43  ;;  %v2316_v42 = vmul.f32 %v7322_v20, %v1964_v22  ;;  %v1304_v25 = vcvt.s32.f32 %v1302_v1  ;;  %v1320_v20 = vand.u32 65535, %v7328_v19  ;;  %v7338_v1 = vld [vmem:[#allocation103_spill] sm:$0xff] }
 0x3dd   :  { %v2781_v7 = vpop.permute.xlu1 %2780  ;;  %v2983_v53 = vsel %vm2967_vm11, %v2966_v32, %v2737_v0  ;;  %v6204_v0 = vpop.xlane.xlu0 %1396  ;;  %v7326_v32 = vld [vmem:[#allocation44_spill] sm:$0xff] }
 0x3de   :  { %v6164_v59 = vsel %vm2984_vm10, %v6030_v38, %v2781_v7  ;;  %2614 = vrot.lane.b32.xlu0 %v1964_v22, %s3492_s16  ;;  %v1237_v38 = vsel %vm1236_vm12, %v1232_v34, inf  ;;  %v1374_v22 = vand.u32 65535, %v7325_v24  ;;  %v1968_v7 = vmul.f32 %v5913_v37, %v7326_v32  ;;  %v7341_v24 = vld [vmem:[#allocation54_spill] sm:$0xff] }
 0x3df   :  { %v6230_v21 = vmul.f32 %v5921_v36, %v7326_v32  ;;  %v7330_v36 = vld [vmem:[#allocation85_spill] sm:$0xff]  ;;  %v1322_v34 = vcvt.s32.f32 %v1320_v20  ;;  %v7344_v32 = vld [vmem:[#allocation34_spill] sm:$0xff] }
 0x3e0   :  { %v1376_v47 = vcvt.s32.f32 %v1374_v22  ;;  %vm1326_vm2 = vcmp.eq.f32.partialorder %v7330_v36, %v6182_v14  ;;  %v7342_v22 = vld [vmem:[#allocation14_spill] sm:$0xff]  ;;  %v7349_v36 = vld [vmem:[#allocation75_spill] sm:$0xff] }
 0x3e1   :  { %v2785_v43 = vpop.permute.xlu1 %2784  ;;  %v6219_v26 = vpop.permute.xlu0 %2338  ;;  %v2080_v37 = vsub.f32 0.0, %v6230_v21  ;;  %v7347_v20 = vld [vmem:[#allocation134_spill] sm:$0xff] }
 0x3e2   :  { %v6176_v10 = vsel %vm2984_vm10, %v6051_v46, %v2785_v43  ;;  %2358 = vrot.lane.b32.xlu0 %v2316_v42, %s3487_s4  ;;  %v1255_v46 = vsel %vm1254_vm13, %v1250_v18, inf  ;;  %v1381_v42 = vsel %vm1380_vm1, %v1376_v47, inf  ;;  %v2320_v43 = vmul.f32 %v7329_v50, %v1968_v7  ;;  %v7332_v18 = vld [vmem:[#allocation105_spill] sm:$0xff]  ;;  %v7346_v47 = vld [vmem:[#allocation120_spill] sm:$0xff] }
 0x3e3   :  { %v2160_v41 = vmul.f32 %v7332_v18, %v2080_v37  ;;  %v2228_v19 = vmul.f32 %v7346_v47, %v5993_v13  ;;  %vm3035_vm1 = vcmask 97280  }
 0x3e4   :  { %1238 = vmin.xlane.f32.xlu1 %v1237_v38  ;;  %v1392_v38 = vand.u32 65535, %v7331_v33 }
 0x3e5   :  { %v2789_v2 = vpop.permute.xlu1 %2788 }
 0x3e6   :  { %v6187_v60 = vsel %vm2984_vm10, %v6068_v8, %v2789_v2  ;;  %2550 = vrot.lane.b32.xlu0 %v2156_v31, %s3490_s0  ;;  %v1327_v2 = vsel %vm1326_vm2, %v1322_v34, inf  ;;  %v1394_v48 = vcvt.s32.f32 %v1392_v38  ;;  %v2232_v34 = vmul.f32 %v7349_v36, %v6080_v57  ;;  %v7362_v36 = vld [vmem:[#allocation72_spill] sm:$0xff] }
 0x3e7   :  { %vm3052_vm2 = vcmask 105472  }
 0x3e8   :  { %1256 = vmin.xlane.f32.xlu1 %v1255_v46  ;;  %v7333_v46 = vld [vmem:[#allocation84_spill] sm:$0xff] }
 0x3e9   :  { %v2793_v49 = vpop.permute.xlu1 %2792  ;;  %vm1398_vm3 = vcmp.eq.f32.partialorder %v7333_v46, %v6204_v0 }
 0x3ea   :  { %v6201_v8 = vsel %vm2984_vm10, %v6091_v17, %v2793_v49  ;;  %2618 = vrot.lane.b32.xlu0 %v1966_v40, %s3492_s16  ;;  %v7334_v40 = vld [vmem:[#allocation50_spill] sm:$0xff]  ;;  %v1399_v16 = vsel %vm1398_vm3, %v1394_v48, inf  ;;  %v7352_v48 = vld [vmem:[#allocation81_spill] sm:$0xff]  ;;  %vm3069_vm3 = vcmask 113664  }
 0x3eb   :  { %v1338_v49 = vand.u32 65535, %v7334_v40  ;;  %v2234_v40 = vmul.f32 %v7352_v48, %v6125_v54 }
 0x3ec   :  { %1274 = vmin.xlane.f32.xlu1 %v1273_v58 }
 0x3ed   :  { %v2797_v29 = vpop.permute.xlu1 %2796  ;;  %v1340_v45 = vcvt.s32.f32 %v1338_v49 }
 0x3ee   :  { %v6213_v17 = vsel %vm2984_vm10, %v6110_v4, %v2797_v29  ;;  %2362 = vrot.lane.b32.xlu0 %v2318_v6, %s3487_s4  ;;  %v1309_v4 = vsel %vm1308_vm0, %v1304_v25, inf  ;;  %v7336_v6 = vld [vmem:[#allocation108_spill] sm:$0xff]  ;;  %v7337_v29 = vld [vmem:[#allocation89_spill] sm:$0xff]  ;;  %vm3018_vm0 = vcmask 89088  }
 0x3ef   :  { %v1410_v9 = vand.u32 65535, %v7336_v6  ;;  %v7340_v25 = vld [vmem:[#allocation104_spill] sm:$0xff]  ;;  %v7354_v6 = vld [vmem:[#allocation86_spill] sm:$0xff] }
 0x3f0   :  { %1292 = vmin.xlane.f32.xlu1 %v1291_v35 }
 0x3f1   :  { %v2801_v15 = vpop.permute.xlu1 %2800  ;;  %v1412_v35 = vcvt.s32.f32 %v1410_v9  ;;  %v2236_v9 = vmul.f32 %v7354_v6, %v6156_v51 }
 0x3f2   :  { %v6223_v44 = vsel %vm2984_vm10, %v2983_v53, %v2801_v15  ;;  %2554 = vrot.lane.b32.xlu0 %v2158_v63, %s3490_s0  ;;  %v6236_v53 = vpop.permute.xlu0 %2530  ;;  %v7339_v63 = vld [vmem:[#allocation97_spill] sm:$0xff] }
 0x3f4   :  { %1310 = vmin.xlane.f32.xlu1 %v1309_v4  ;;  %v7343_v4 = vld [vmem:[#allocation23_spill] sm:$0xff] }
 0x3f6   :  { %2622 = vrot.lane.b32.xlu0 %v1968_v7, %s3492_s16  ;;  %v6244_v31 = vpop.xlane.xlu0 %1342  ;;  %v7345_v7 = vld [vmem:[#allocation107_spill] sm:$0xff] }
 0x3f7   :  { %vm1344_vm4 = vcmp.eq.f32.partialorder %v7335_v61, %v6244_v31  ;;  %v2226_v27 = vmul.f32 %v7345_v7, %v7344_v32  ;;  %v7353_v61 = vld [vmem:[#allocation142_spill] sm:$0xff]  ;;  %v7359_v7 = vld [vmem:[#allocation51_spill] sm:$0xff] }
 0x3f8   :  { %1382 = vmin.xlane.f32.xlu1 %v1381_v42  ;;  %v1345_v52 = vsel %vm1344_vm4, %v1340_v45, inf  ;;  %v2230_v42 = vmul.f32 %v7347_v20, %v6020_v56  ;;  %vm3086_vm4 = vcmask 121856  }
 0x3fa   :  { %2366 = vrot.lane.b32.xlu0 %v2320_v43, %s3487_s4  ;;  %v6253_v58 = vpop.xlane.xlu0 %1414  ;;  %v7348_v43 = vld [vmem:[#allocation109_spill] sm:$0xff] }
 0x3fb   :  { %vm1416_vm12 = vcmp.eq.f32.partialorder %v7338_v1, %v6253_v58  ;;  %v1356_v37 = vand.u32 65535, %v7348_v43  ;;  %v7361_v43 = vld [vmem:[#allocation143_spill] sm:$0xff] }
 0x3fc   :  { %1328 = vmin.xlane.f32.xlu1 %v1327_v2  ;;  %v1417_v15 = vsel %vm1416_vm12, %v1412_v35, inf  ;;  %v7350_v2 = vld [vmem:[#allocation110_spill] sm:$0xff]  ;;  %vm3103_vm12 = vcmask 130048  }
 0x3fd   :  { %v1358_v38 = vcvt.s32.f32 %v1356_v37  ;;  %v1428_v18 = vand.u32 65535, %v7350_v2  ;;  %v1187_v37 = vcvt.f32.s32 %v7361_v43 }
 0x3fe   :  { %2558 = vrot.lane.b32.xlu0 %v2160_v41, %s3490_s0  ;;  %v6278_v50 = vpop.permute.xlu0 %2598  ;;  %v7351_v41 = vld [vmem:[#allocation141_spill] sm:$0xff] }
 0x400   :  { %1400 = vmin.xlane.f32.xlu1 %v1399_v16  ;;  %v1430_v16 = vcvt.s32.f32 %v1428_v18  ;;  %v7363_v18 = vld [vmem:[#allocation15_spill] sm:$0xff] }
 0x402   :  { %2650 = vrot.lane.b32.xlu0 %v7337_v29, %s3491_s15 }
 0x404   :  { %1346 = vmin.xlane.f32.xlu1 %v1345_v52  ;;  %v7355_v52 = vld [vmem:[#allocation87_spill] sm:$0xff] }
 0x405   :  { %v2238_v1 = vmul.f32 %v7355_v52, %v6194_v3  ;;  %v7368_v52 = vld [vmem:[#allocation12_spill] sm:$0xff] }
 0x406   :  { %2654 = vrot.lane.b32.xlu0 %v7339_v63, %s3491_s15 }
 0x408   :  { %1418 = vmin.xlane.f32.xlu1 %v1417_v15  ;;  %v7356_v15 = vld [vmem:[#allocation115_spill] sm:$0xff] }
 0x40a   :  { %2658 = vrot.lane.b32.xlu0 %v7340_v25, %s3491_s15  ;;  %v7357_v25 = vld [vmem:[#allocation4_spill] sm:$0xff] }
 0x40e   :  { %2662 = vrot.lane.b32.xlu0 %v7341_v24, %s3491_s15  ;;  %v2884_v24 = vsel %vm2882_vm5, %v7357_v25, %v7356_v15  ;;  %v7369_v15 = vld [vmem:[#allocation53_spill] sm:$0xff] }
 0x412   :  { %2666 = vrot.lane.b32.xlu0 %v7342_v22, %s3491_s15  ;;  %v7358_v22 = vld [vmem:[#allocation117_spill] sm:$0xff] }
 0x416   :  { %2670 = vrot.lane.b32.xlu0 %v7343_v4, %s3491_s15  ;;  %v2901_v4 = vsel %vm2899_vm6, %v2884_v24, %v7358_v22 }
 0x41a   :  { %2706 = vrot.lane.b32.xlu0 %v2226_v27, %s3491_s15  ;;  %v2240_v27 = vmul.f32 %v7359_v7, %v6230_v21 }
 0x41e   :  { %2710 = vrot.lane.b32.xlu0 %v2228_v19, %s3491_s15  ;;  %v7360_v19 = vld [vmem:[#allocation102_spill] sm:$0xff] }
 0x41f   :  { %v2918_v20 = vsel %vm2916_vm7, %v2901_v4, %v7360_v19  ;;  %v7370_v4 = vld [vmem:[#allocation95_spill] sm:$0xff] }
 0x422   :  { %2714 = vrot.lane.b32.xlu0 %v2230_v42, %s3491_s15 }
 0x425   :  { %v6284_v33 = vpop.xlane.xlu0 %1360 }
 0x426   :  { %2718 = vrot.lane.b32.xlu0 %v2232_v34, %s3491_s15  ;;  %vm1362_vm13 = vcmp.eq.f32.partialorder %v7351_v41, %v6284_v33  ;;  %v2935_v34 = vsel %vm2933_vm8, %v2918_v20, %v7362_v36  ;;  %v7364_v41 = vld [vmem:[#allocation121_spill] sm:$0xff] }
 0x427   :  { %v1363_v46 = vsel %vm1362_vm13, %v1358_v38, inf }
 0x428   :  { %1364 = vmin.xlane.f32.xlu1 %v1363_v46  ;;  %v2293_v46 = vmul.f32 %v7364_v41, %v7363_v18  ;;  %v7374_v41 = vld [vmem:[#allocation37_spill] sm:$0xff] }
 0x429   :  { %v6292_v49 = vpop.xlane.xlu0 %1432 }
 0x42a   :  { %2722 = vrot.lane.b32.xlu0 %v2234_v40, %s3491_s15  ;;  %vm1434_vm14 = vcmp.eq.f32.partialorder %v7353_v61, %v6292_v49  ;;  %v1188_v40 = vshll.u32 %v1187_v37, 16  ;;  %v7373_v37 = vld [vmem:[#allocation79_spill] sm:$0xff] }
 0x42b   :  { %v1435_v45 = vsel %vm1434_vm14, %v1430_v16, inf  ;;  %v7365_v16 = vld [vmem:[#allocation78_spill] sm:$0xff] }
 0x42c   :  { %1436 = vmin.xlane.f32.xlu1 %v1435_v45  ;;  %v2389_v61 = vsub.f32 %v2293_v46, %v7365_v16  ;;  %v7366_v45 = vld [vmem:[#allocation49_spill] sm:$0xff]  ;;  %v7375_v46 = vld [vmem:[#allocation58_spill] sm:$0xff] }
 0x42d   :  { %v6299_v29 = vpop.permute.xlu0 %2342  ;;  %v2952_v6 = vsel %vm2950_vm9, %v2935_v34, %v7366_v45 }
 0x42e   :  { %2726 = vrot.lane.b32.xlu0 %v2236_v9, %s3491_s15  ;;  %v7367_v9 = vld [vmem:[#allocation57_spill] sm:$0xff]  ;;  %v2969_v25 = vsel %vm2967_vm11, %v2952_v6, %v7369_v15 }
 0x42f   :  { %v2986_v19 = vsel %vm2984_vm10, %v2969_v25, %v6116_v5 }
 0x430   :  { %v6304_v35 = vpop.xlane.xlu1 %1166 }
 0x431   :  { %v6306_v63 = vpop.permute.xlu0 %2534 }
 0x432   :  { %2730 = vrot.lane.b32.xlu0 %v2238_v1, %s3491_s15  ;;  %v2887_v1 = vsel %vm2882_vm5, %v7368_v52, %v7367_v9  ;;  %v7377_v52 = vld [vmem:[#allocation112_spill] sm:$0xff] }
 0x433   :  { %v2904_v7 = vsel %vm2899_vm6, %v2887_v1, %v7370_v4  ;;  %v7378_v1 = vld [vmem:[#allocation98_spill] sm:$0xff] }
 0x434   :  { %v1185_v47 = vpop.xlane.xlu1 %1184  ;;  %v2299_v15 = vmul.f32 %v7378_v1, %v7377_v52  ;;  %v7392_v1 = vld [vmem:[#allocation66_spill] sm:$0xff] }
 0x435   :  { %v2603_v42 = vpop.permute.xlu0 %2602  ;;  %v1186_v38 = vcvt.f32.s32 %v1185_v47 }
 0x436   :  { %2734 = vrot.lane.b32.xlu0 %v2240_v27, %s3491_s15  ;;  %v7371_v27 = vld [vmem:[#allocation94_spill] sm:$0xff] }
 0x437   :  { %v1189_v24 = vadd.s32 %v1188_v40, %v1186_v38  ;;  %v3003_v38 = vsel %vm3001_vm15, %v2986_v19, 0.0  ;;  %v2297_v40 = vmul.f32 %v7375_v46, %v7374_v41  ;;  %v7386_v41 = vld [vmem:[#allocation35_spill] sm:$0xff] }
 0x438   :  { %v6322_v2 = vpop.xlane.xlu1 %1202  ;;  %v7387_v46 = vld [vmem:[#allocation67_spill] sm:$0xff] }
 0x439   :  { %v6326_v48 = vpop.permute.xlu0 %2346  ;;  %v1443_v18 = vcvt.s32.f32 %v1189_v24 }
 0x43a   :  { %2770 = vrot.lane.b32.xlu0 %v7344_v32, %s3493_s3  ;;  %v7372_v32 = vld [vmem:[#allocation129_spill] sm:$0xff] }
 0x43b   :  { %v2295_v47 = vmul.f32 %v7372_v32, %v7371_v27  ;;  %v7381_v27 = vld [vmem:[#allocation19_spill] sm:$0xff] }
 0x43c   :  { %v6338_v22 = vpop.xlane.xlu1 %1220 }
 0x43d   :  { %2840 = vrot.lane.b32.xlu1 %v2389_v61, %s3494_s17  ;;  %v2539_v20 = vpop.permute.xlu0 %2538  ;;  %v2391_v36 = vsub.f32 %v2295_v47, %v7373_v37  ;;  %v7382_v47 = vld [vmem:[#allocation11_spill] sm:$0xff] }
 0x43e   :  { %v2921_v43 = vsel %vm2916_vm7, %v2904_v7, %v2539_v20  ;;  %2774 = vrot.lane.b32.xlu0 %v5993_v13, %s3493_s3  ;;  %v7380_v7 = vld [vmem:[#allocation64_spill] sm:$0xff]  ;;  %v7383_v20 = vld [vmem:[#allocation118_spill] sm:$0xff] }
 0x43f   :  { %v6352_v34 = vsel %vm2933_vm8, %v2921_v43, %v2603_v42  ;;  %v7376_v42 = vld [vmem:[#allocation83_spill] sm:$0xff]  ;;  %v2889_v32 = vsel %vm2882_vm5, %v7381_v27, %v7380_v7  ;;  %v7384_v43 = vld [vmem:[#allocation80_spill] sm:$0xff]  ;;  %v7395_v7 = vld [vmem:[#allocation6_spill] sm:$0xff] }
 0x440   :  { %v2837_v5 = vpop.permute.xlu1 %2836  ;;  %v2393_v45 = vsub.f32 %v2297_v40, %v7376_v42  ;;  %v2906_v19 = vsel %vm2899_vm6, %v2889_v32, %v7382_v47  ;;  %v2301_v37 = vmul.f32 %v7384_v43, %v7383_v20  ;;  %v2303_v40 = vmul.f32 %v7387_v46, %v7386_v41  ;;  %v7396_v27 = vld [vmem:[#allocation41_spill] sm:$0xff]  ;;  %v7397_v43 = vld [vmem:[#allocation55_spill] sm:$0xff] }
 0x441   :  { %v3020_v16 = vsel %vm3018_vm0, %v3003_v38, %v2837_v5  ;;  %2844 = vrot.lane.b32.xlu1 %v2391_v36, %s3494_s17  ;;  %v2607_v13 = vpop.permute.xlu0 %2606  ;;  %v2290_v32 = vmul.f32 %v7396_v27, %v7395_v7  ;;  %v7400_v41 = vld [vmem:[#allocation33_spill] sm:$0xff]  ;;  %v7408_v7 = vld [vmem:[#allocation43_spill] sm:$0xff] }
 0x442   :  { %v3037_v61 = vsel %vm3035_vm1, %v3020_v16, %v1443_v18  ;;  %2778 = vrot.lane.b32.xlu0 %v6020_v56, %s3493_s3  ;;  %v7379_v56 = vld [vmem:[#allocation25_spill] sm:$0xff] }
 0x443   :  { %v3054_v6 = vsel %vm3052_vm2, %v3037_v61, 0.0  ;;  %v2395_v4 = vsub.f32 %v2299_v15, %v7379_v56  ;;  %v7388_v61 = vld [vmem:[#allocation136_spill] sm:$0xff]  ;;  %v7393_v15 = vld [vmem:[#allocation29_spill] sm:$0xff] }
 0x444   :  { %v3071_v9 = vsel %vm3069_vm3, %v3054_v6, 0.0  ;;  %v2399_v42 = vsub.f32 %v2303_v40, %v7388_v61  ;;  %v7390_v6 = vld [vmem:[#allocation18_spill] sm:$0xff]  ;;  %v7394_v56 = vld [vmem:[#allocation68_spill] sm:$0xff]  ;;  %v7401_v40 = vld [vmem:[#allocation71_spill] sm:$0xff] }
 0x445   :  { %v3088_v25 = vsel %vm3086_vm4, %v3071_v9, 0.0  ;;  %2848 = vrot.lane.b32.xlu1 %v2393_v45, %s3494_s17  ;;  %v2351_v24 = vpop.permute.xlu0 %2350  ;;  %v7389_v45 = vld [vmem:[#allocation135_spill] sm:$0xff]  ;;  %v7403_v61 = vld [vmem:[#allocation93_spill] sm:$0xff] }
 0x446   :  { %3105 = vst.msk [vmem:[%s6779_s7 + $0x8] sm:$0xff] %vm3103_vm12, %v3088_v25  ;;  %2782 = vrot.lane.b32.xlu0 %v6080_v57, %s3493_s3  ;;  %v7385_v57 = vld [vmem:[#allocation100_spill] sm:$0xff]  ;;  %v2305_v9 = vmul.f32 %v7390_v6, %v7389_v45  ;;  %v2891_v25 = vsel %vm2882_vm5, %v7393_v15, %v7392_v1  ;;  %v7404_v6 = vld [vmem:[#allocation101_spill] sm:$0xff] }
 0x447   :  { %v2397_v18 = vsub.f32 %v2301_v37, %v7385_v57  ;;  %v7398_v37 = vld [vmem:[#allocation46_spill] sm:$0xff]  ;;  %v7409_v27 = vld [vmem:[#allocation73_spill] sm:$0xff] }
 0x449   :  { %2852 = vrot.lane.b32.xlu1 %v2395_v4, %s3494_s17  ;;  %v2543_v36 = vpop.permute.xlu0 %2542 }
 0x44a   :  { %v2923_v38 = vsel %vm2916_vm7, %v2906_v19, %v2543_v36  ;;  %2786 = vrot.lane.b32.xlu0 %v6125_v54, %s3493_s3  ;;  %v2386_v19 = vsub.f32 %v2290_v32, %v6219_v26  ;;  %v2292_v36 = vmul.f32 %v7398_v37, %v7397_v43  ;;  %v2300_v32 = vmul.f32 %v7409_v27, %v7408_v7 }
 0x44b   :  { %v6389_v5 = vsel %vm2933_vm8, %v2923_v38, %v2607_v13  ;;  %v7391_v13 = vld [vmem:[#allocation139_spill] sm:$0xff] }
 0x44c   :  { %v2401_v52 = vsub.f32 %v2305_v9, %v7391_v13  ;;  %v2388_v38 = vsub.f32 %v2292_v36, %v6299_v29  ;;  %v7405_v9 = vld [vmem:[#allocation63_spill] sm:$0xff] }
 0x44d   :  { %2856 = vrot.lane.b32.xlu1 %v2397_v18, %s3494_s17  ;;  %v2611_v16 = vpop.permute.xlu0 %2610  ;;  %v7399_v18 = vld [vmem:[#allocation91_spill] sm:$0xff]  ;;  %v2296_v13 = vmul.f32 %v7405_v9, %v7404_v6  ;;  %v7418_v6 = vld [vmem:[#allocation30_spill] sm:$0xff] }
 0x44e   :  { %2790 = vrot.lane.b32.xlu0 %v6156_v51, %s3493_s3  ;;  %v2908_v51 = vsel %vm2899_vm6, %v2891_v25, %v7394_v56  ;;  %v2294_v46 = vmul.f32 %v7400_v41, %v7399_v18  ;;  %v7406_v25 = vld [vmem:[#allocation106_spill] sm:$0xff]  ;;  %v7407_v56 = vld [vmem:[#allocation59_spill] sm:$0xff]  ;;  %v7414_v18 = vld [vmem:[#allocation77_spill] sm:$0xff] }
 0x44f   :  { %v2392_v1 = vsub.f32 %v2296_v13, %v2351_v24  ;;  %v7419_v13 = vld [vmem:[#allocation138_spill] sm:$0xff] }
 0x450   :  { %v2390_v26 = vsub.f32 %v2294_v46, %v6326_v48 }
 0x451   :  { %2860 = vrot.lane.b32.xlu1 %v2399_v42, %s3494_s17  ;;  %v2355_v54 = vpop.permute.xlu0 %2354 }
 0x452   :  { %2794 = vrot.lane.b32.xlu0 %v6194_v3, %s3493_s3 }
 0x455   :  { %2864 = vrot.lane.b32.xlu1 %v2401_v52, %s3494_s17  ;;  %v2547_v4 = vpop.permute.xlu0 %2546 }
 0x456   :  { %v2925_v47 = vsel %vm2916_vm7, %v2908_v51, %v2547_v4  ;;  %2798 = vrot.lane.b32.xlu0 %v6230_v21, %s3493_s3  ;;  %v7402_v21 = vld [vmem:[#allocation20_spill] sm:$0xff]  ;;  %v2298_v51 = vmul.f32 %v7407_v56, %v7406_v25 }
 0x457   :  { %v2942_v3 = vsel %vm2933_vm8, %v2925_v47, %v2611_v16  ;;  %v2893_v16 = vsel %vm2882_vm5, %v7402_v21, %v7401_v40  ;;  %v7410_v47 = vld [vmem:[#allocation3_spill] sm:$0xff] }
 0x458   :  { %v2910_v42 = vsel %vm2899_vm6, %v2893_v16, %v7403_v61  ;;  %v2394_v48 = vsub.f32 %v2298_v51, %v2355_v54  ;;  %v7415_v16 = vld [vmem:[#allocation131_spill] sm:$0xff] }
 0x459   :  { %v2615_v20 = vpop.permute.xlu0 %2614 }
 0x45a   :  { %2834 = vrot.lane.b32.xlu0 %v2386_v19, %s3494_s17  ;;  %v7411_v19 = vld [vmem:[#allocation24_spill] sm:$0xff] }
 0x45b   :  { %v2895_v43 = vsel %vm2882_vm5, %v7411_v19, %v7410_v47 }
 0x45d   :  { %v2359_v57 = vpop.permute.xlu0 %2358 }
 0x45e   :  { %2838 = vrot.lane.b32.xlu0 %v2388_v38, %s3494_s17  ;;  %v2396_v37 = vsub.f32 %v2300_v32, %v2359_v57  ;;  %v7413_v38 = vld [vmem:[#allocation124_spill] sm:$0xff] }
 0x45f   :  { %v2302_v41 = vmul.f32 %v7414_v18, %v7413_v38 }
 0x461   :  { %v2551_v45 = vpop.permute.xlu0 %2550 }
 0x462   :  { %v2927_v29 = vsel %vm2916_vm7, %v2910_v42, %v2551_v45  ;;  %2842 = vrot.lane.b32.xlu0 %v2390_v26, %s3494_s17  ;;  %v7416_v26 = vld [vmem:[#allocation8_spill] sm:$0xff]  ;;  %v7417_v45 = vld [vmem:[#allocation137_spill] sm:$0xff] }
 0x463   :  { %v2944_v52 = vsel %vm2933_vm8, %v2927_v29, %v2615_v20  ;;  %v7412_v20 = vld [vmem:[#allocation39_spill] sm:$0xff]  ;;  %v2304_v57 = vmul.f32 %v7416_v26, %v7415_v16  ;;  %v2897_v9 = vsel %vm2882_vm5, %v7418_v6, %v7417_v45  ;;  %v7423_v45 = vld [vmem:[#allocation60_spill] sm:$0xff] }
 0x464   :  { %v2912_v24 = vsel %vm2899_vm6, %v2895_v43, %v7412_v20  ;;  %v2914_v29 = vsel %vm2899_vm6, %v2897_v9, %v7419_v13  ;;  %v1223_v6 = vcvt.f32.s32 %v7423_v45  ;;  %v1222_v9 = vcvt.f32.s32 %v6338_v22 }
 0x465   :  { %v2619_v15 = vpop.permute.xlu0 %2618 }
 0x466   :  { %2846 = vrot.lane.b32.xlu0 %v2392_v1, %s3494_s17 }
 0x469   :  { %v2363_v4 = vpop.permute.xlu0 %2362 }
 0x46a   :  { %2850 = vrot.lane.b32.xlu0 %v2394_v48, %s3494_s17  ;;  %v2398_v40 = vsub.f32 %v2302_v41, %v2363_v4 }
 0x46d   :  { %v2555_v36 = vpop.permute.xlu0 %2554 }
 0x46e   :  { %v2929_v54 = vsel %vm2916_vm7, %v2912_v24, %v2555_v36  ;;  %2854 = vrot.lane.b32.xlu0 %v2396_v37, %s3494_s17 }
 0x46f   :  { %v2946_v46 = vsel %vm2933_vm8, %v2929_v54, %v2619_v15 }
 0x471   :  { %v2623_v21 = vpop.permute.xlu0 %2622  ;;  %v6460_v25 = vpop.xlane.xlu1 %1238 }
 0x472   :  { %2858 = vrot.lane.b32.xlu0 %v2398_v40, %s3494_s17 }
 0x475   :  { %v2367_v61 = vpop.permute.xlu0 %2366  ;;  %v1257_v4 = vpop.xlane.xlu1 %1256 }
 0x476   :  { %v2400_v42 = vsub.f32 %v2304_v57, %v2367_v61 }
 0x478   :  { %2862 = vrot.lane.b32.xlu0 %v2400_v42, %s3494_s17 }
 0x479   :  { %v2559_v1 = vpop.permute.xlu0 %2558  ;;  %v6474_v19 = vpop.xlane.xlu1 %1274 }
 0x47a   :  { %v2931_v15 = vsel %vm2916_vm7, %v2914_v29, %v2559_v1  ;;  %v1224_v1 = vshll.u32 %v1223_v6, 16 }
 0x47b   :  { %v2948_v56 = vsel %vm2933_vm8, %v2931_v15, %v2623_v21  ;;  %v1259_v15 = vcvt.f32.s32 %v6074_v62 }
 0x47d   :  { %v2651_v51 = vpop.permute.xlu0 %2650  ;;  %v1293_v20 = vpop.xlane.xlu1 %1292 }
 0x47e   :  { %v6465_v48 = vsel %vm2950_vm9, %v6352_v34, %v2651_v51  ;;  %v1258_v51 = vcvt.f32.s32 %v1257_v4  ;;  %v1331_v4 = vcvt.f32.s32 %v6182_v14 }
 0x480   :  { %v1332_v14 = vshll.u32 %v1331_v4, 16 }
 0x481   :  { %v2655_v7 = vpop.permute.xlu0 %2654 }
 0x482   :  { %v6469_v27 = vsel %vm2950_vm9, %v6389_v5, %v2655_v7  ;;  %v6485_v5 = vpop.xlane.xlu1 %1310 }
 0x485   :  { %v2659_v32 = vpop.permute.xlu0 %2658 }
 0x486   :  { %v6472_v47 = vsel %vm2950_vm9, %v2942_v3, %v2659_v32  ;;  %v6489_v3 = vpop.xlane.xlu1 %1382 }
 0x489   :  { %v2663_v43 = vpop.permute.xlu0 %2662 }
 0x48a   :  { %v6477_v37 = vsel %vm2950_vm9, %v2944_v52, %v2663_v43  ;;  %v1329_v52 = vpop.xlane.xlu1 %1328  ;;  %v1260_v43 = vshll.u32 %v1259_v15, 16 }
 0x48c   :  { %v1261_v22 = vadd.s32 %v1260_v43, %v1258_v51 }
 0x48d   :  { %v2667_v24 = vpop.permute.xlu0 %2666 }
 0x48e   :  { %v6480_v34 = vsel %vm2950_vm9, %v2946_v46, %v2667_v24  ;;  %v6497_v21 = vpop.xlane.xlu1 %1400  ;;  %v1295_v24 = vcvt.f32.s32 %v6119_v55  ;;  %v1447_v15 = vcvt.s32.f32 %v1261_v22  ;;  %v3009_v22 = vsel %vm3001_vm15, %v6176_v10, 0.0  ;;  %v7428_v10 = vld [vmem:[#allocation125_spill] sm:$0xff] }
 0x48f   :  { %7420 = vst [vmem:[#allocation70_spill] sm:$0xff] %v6480_v34 }
 0x490   :  { %v1296_v6 = vshll.u32 %v1295_v24, 16 }
 0x491   :  { %v2671_v36 = vpop.permute.xlu0 %2670 }
 0x492   :  { %v6483_v38 = vsel %vm2950_vm9, %v2948_v56, %v2671_v36  ;;  %v6503_v26 = vpop.xlane.xlu1 %1346  ;;  %v1225_v56 = vadd.s32 %v1224_v1, %v1222_v9  ;;  %v3005_v36 = vsel %vm3001_vm15, %v6132_v39, 0.0  ;;  %v3007_v1 = vsel %vm3001_vm15, %v6164_v59, 0.0 }
 0x493   :  { %7421 = vst [vmem:[#allocation45_spill] sm:$0xff] %v6483_v38  ;;  %v1294_v38 = vcvt.f32.s32 %v1293_v20 }
 0x494   :  { %v1445_v45 = vcvt.s32.f32 %v1225_v56  ;;  %v1330_v56 = vcvt.f32.s32 %v1329_v52  ;;  %v7425_v52 = vld [vmem:[#allocation2_spill] sm:$0xff] }
 0x495   :  { %v6487_v18 = vpop.permute.xlu0 %2706  ;;  %v1297_v39 = vadd.s32 %v1296_v6, %v1294_v38  ;;  %v7424_v38 = vld [vmem:[#allocation111_spill] sm:$0xff] }
 0x496   :  { %v6507_v61 = vpop.xlane.xlu1 %1418  ;;  %v1333_v4 = vadd.s32 %v1332_v14, %v1330_v56 }
 0x497   :  { %v1449_v6 = vcvt.s32.f32 %v1297_v39 }
 0x499   :  { %v6491_v41 = vpop.permute.xlu0 %2710 }
 0x49d   :  { %v6493_v54 = vpop.permute.xlu0 %2714 }
 0x4a1   :  { %v6495_v40 = vpop.permute.xlu0 %2718 }
 0x4a5   :  { %v6499_v46 = vpop.permute.xlu0 %2722 }
 0x4a9   :  { %v6501_v16 = vpop.permute.xlu0 %2726 }
 0x4ad   :  { %v6505_v57 = vpop.permute.xlu0 %2730 }
 0x4b1   :  { %v6509_v42 = vpop.permute.xlu0 %2734 }
 0x4b2   :  { %7422 = vst [vmem:[#allocation9_spill] sm:$0xff] %v6509_v42 }
 0x4b5   :  { %v1365_v13 = vpop.xlane.xlu1 %1364  ;;  %v6513_v29 = vpop.permute.xlu0 %2770 }
 0x4b9   :  { %v6516_v7 = vpop.xlane.xlu1 %1436  ;;  %v6518_v32 = vpop.permute.xlu0 %2774 }
 0x4bd   :  { %v2841_v42 = vpop.permute.xlu1 %2840  ;;  %v6523_v34 = vpop.permute.xlu0 %2778 }
 0x4be   :  { %v3022_v62 = vsel %vm3018_vm0, %v3005_v36, %v2841_v42  ;;  %v1367_v36 = vcvt.f32.s32 %v6284_v33 }
 0x4bf   :  { %v3039_v9 = vsel %vm3035_vm1, %v3022_v62, %v1445_v45  ;;  %v2883_v45 = vsel %vm2882_vm5, %v7425_v52, %v7424_v38  ;;  %v7429_v52 = vld [vmem:[#allocation7_spill] sm:$0xff] }
 0x4c0   :  { %v3056_v55 = vsel %vm3052_vm2, %v3039_v9, 0.0  ;;  %v1366_v9 = vcvt.f32.s32 %v1365_v13  ;;  %v2885_v39 = vsel %vm2882_vm5, %v7429_v52, %v7428_v10  ;;  %v1403_v13 = vcvt.f32.s32 %v6204_v0 }
 0x4c1   :  { %v3073_v20 = vsel %vm3069_vm3, %v3056_v55, 0.0  ;;  %v2845_v51 = vpop.permute.xlu1 %2844  ;;  %v6532_v43 = vpop.permute.xlu0 %2782  ;;  %v1368_v56 = vshll.u32 %v1367_v36, 16  ;;  %v1451_v0 = vcvt.s32.f32 %v1333_v4  ;;  %v1402_v36 = vcvt.f32.s32 %v6497_v21 }
 0x4c2   :  { %v3090_v42 = vsel %vm3086_vm4, %v3073_v20, 0.0  ;;  %v3024_v24 = vsel %vm3018_vm0, %v3007_v1, %v2845_v51  ;;  %v7426_v20 = vld [vmem:[#allocation113_spill] sm:$0xff]  ;;  %v7427_v51 = vld [vmem:[#allocation140_spill] sm:$0xff]  ;;  %v1439_v4 = vcvt.f32.s32 %v6292_v49  ;;  %v1438_v49 = vcvt.f32.s32 %v6516_v7 }
 0x4c3   :  { %3107 = vst.msk [vmem:[%s6779_s7 + $0x18] sm:$0xff] %vm3103_vm12, %v3090_v42  ;;  %v3041_v59 = vsel %vm3035_vm1, %v3024_v24, %v1447_v15  ;;  %v2900_v15 = vsel %vm2899_vm6, %v2883_v45, %v7426_v20  ;;  %v1169_v42 = vcvt.f32.s32 %v7427_v51 }
 0x4c4   :  { %v3058_v62 = vsel %vm3052_vm2, %v3041_v59, 0.0  ;;  %v7430_v59 = vld [vmem:[#allocation96_spill] sm:$0xff] }
 0x4c5   :  { %v3075_v33 = vsel %vm3069_vm3, %v3058_v62, 0.0  ;;  %v2849_v1 = vpop.permute.xlu1 %2848  ;;  %v6549_v55 = vpop.permute.xlu0 %2786  ;;  %v2902_v45 = vsel %vm2899_vm6, %v2885_v39, %v7430_v59  ;;  %v3011_v62 = vsel %vm3001_vm15, %v6187_v60, 0.0 }
 0x4c6   :  { %v3092_v24 = vsel %vm3086_vm4, %v3075_v33, 0.0  ;;  %v3026_v38 = vsel %vm3018_vm0, %v3009_v22, %v2849_v1  ;;  %v2917_v22 = vsel %vm2916_vm7, %v2900_v15, %v6236_v53  ;;  %v1369_v1 = vadd.s32 %v1368_v56, %v1366_v9 }
 0x4c7   :  { %3109 = vst.msk [vmem:[%s6779_s7 + $0x28] sm:$0xff] %vm3103_vm12, %v3092_v24  ;;  %v3043_v14 = vsel %vm3035_vm1, %v3026_v38, %v1449_v6  ;;  %v1170_v6 = vshll.u32 %v1169_v42, 16  ;;  %v7431_v38 = vld [vmem:[#allocation144_spill] sm:$0xff]  ;;  %v1404_v15 = vshll.u32 %v1403_v13, 16  ;;  %v2934_v60 = vsel %vm2933_vm8, %v2917_v22, %v6171_v28 }
 0x4c8   :  { %v3060_v33 = vsel %vm3052_vm2, %v3043_v14, 0.0  ;;  %v1205_v10 = vcvt.f32.s32 %v7431_v38  ;;  %v3013_v9 = vsel %vm3001_vm15, %v6201_v8, 0.0  ;;  %v1168_v42 = vcvt.f32.s32 %v6304_v35 }
 0x4c9   :  { %v3077_v20 = vsel %vm3069_vm3, %v3060_v33, 0.0  ;;  %v2853_v51 = vpop.permute.xlu1 %2852  ;;  %v6574_v24 = vpop.permute.xlu0 %2790  ;;  %v2919_v39 = vsel %vm2916_vm7, %v2902_v45, %v6306_v63  ;;  %v1405_v28 = vadd.s32 %v1404_v15, %v1402_v36  ;;  %v1453_v56 = vcvt.s32.f32 %v1369_v1  ;;  %v7432_v45 = vld [vmem:[#allocation42_spill] sm:$0xff] }
 0x4ca   :  { %v3094_v52 = vsel %vm3086_vm4, %v3077_v20, 0.0  ;;  %v3028_v53 = vsel %vm3018_vm0, %v3011_v62, %v2853_v51  ;;  %v1206_v62 = vshll.u32 %v1205_v10, 16  ;;  %v1241_v33 = vcvt.f32.s32 %v6044_v23 }
 0x4cb   :  { %3111 = vst.msk [vmem:[%s6779_s7 + $0x38] sm:$0xff] %vm3103_vm12, %v3094_v52  ;;  %v3045_v21 = vsel %vm3035_vm1, %v3028_v53, %v1451_v0  ;;  %v1440_v0 = vshll.u32 %v1439_v4, 16  ;;  %v1204_v63 = vcvt.f32.s32 %v6322_v2  ;;  %v2951_v36 = vsel %vm2950_vm9, %v2934_v60, %v7432_v45 }
 0x4cc   :  { %v3062_v13 = vsel %vm3052_vm2, %v3045_v21, 0.0  ;;  %v3015_v23 = vsel %vm3001_vm15, %v6213_v17, 0.0  ;;  %v1171_v1 = vadd.s32 %v1170_v6, %v1168_v42  ;;  %v2936_v20 = vsel %vm2933_vm8, %v2919_v39, %v6278_v50  ;;  %v7433_v39 = vld [vmem:[#allocation126_spill] sm:$0xff] }
 0x4cd   :  { %v3079_v14 = vsel %vm3069_vm3, %v3062_v13, 0.0  ;;  %v2857_v59 = vpop.permute.xlu1 %2856  ;;  %v6595_v22 = vpop.permute.xlu0 %2794  ;;  %v1455_v2 = vcvt.s32.f32 %v1405_v28  ;;  %v2968_v38 = vsel %vm2967_vm11, %v2951_v36, %v6487_v18  ;;  %v1441_v10 = vadd.s32 %v1440_v0, %v1438_v49 }
 0x4ce   :  { %v3096_v8 = vsel %vm3086_vm4, %v3079_v14, 0.0  ;;  %v3030_v35 = vsel %vm3018_vm0, %v3013_v9, %v2857_v59  ;;  %v1242_v60 = vshll.u32 %v1241_v33, 16  ;;  %v2985_v17 = vsel %vm2984_vm10, %v2968_v38, %v6513_v29 }
 0x4cf   :  { %3113 = vst.msk [vmem:[%s6779_s7 + $0x48] sm:$0xff] %vm3103_vm12, %v3096_v8  ;;  %v3047_v7 = vsel %vm3035_vm1, %v3030_v35, %v1453_v56  ;;  %v1277_v4 = vcvt.f32.s32 %v6103_v11  ;;  %v3017_v21 = vsel %vm3001_vm15, %v6223_v44, 0.0  ;;  %v1207_v18 = vadd.s32 %v1206_v62, %v1204_v63 }
 0x4d0   :  { %v3064_v51 = vsel %vm3052_vm2, %v3047_v7, 0.0  ;;  %v1442_v42 = vcvt.s32.f32 %v1171_v1  ;;  %v1240_v29 = vcvt.f32.s32 %v6460_v25  ;;  %v2953_v13 = vsel %vm2950_vm9, %v2936_v20, %v7433_v39 }
 0x4d1   :  { %v3081_v52 = vsel %vm3069_vm3, %v3064_v51, 0.0  ;;  %v2861_v53 = vpop.permute.xlu1 %2860  ;;  %v6616_v15 = vpop.permute.xlu0 %2798  ;;  %v2970_v11 = vsel %vm2967_vm11, %v2953_v13, %v6491_v41  ;;  %v3002_v44 = vsel %vm3001_vm15, %v2985_v17, 0.0  ;;  %v1457_v56 = vcvt.s32.f32 %v1441_v10 }
 0x4d2   :  { %v3098_v6 = vsel %vm3086_vm4, %v3081_v52, 0.0  ;;  %v3032_v50 = vsel %vm3018_vm0, %v3015_v23, %v2861_v53  ;;  %v2987_v62 = vsel %vm2984_vm10, %v2970_v11, %v6518_v32  ;;  %v1278_v35 = vshll.u32 %v1277_v4, 16 }
 0x4d3   :  { %3115 = vst.msk [vmem:[%s6779_s7 + $0x58] sm:$0xff] %vm3103_vm12, %v3098_v6  ;;  %v3049_v9 = vsel %vm3035_vm1, %v3032_v50, %v1455_v2  ;;  %v1444_v0 = vcvt.s32.f32 %v1207_v18  ;;  %v1243_v45 = vadd.s32 %v1242_v60, %v1240_v29  ;;  %v1276_v32 = vcvt.f32.s32 %v6474_v19 }
 0x4d4   :  { %v3066_v28 = vsel %vm3052_vm2, %v3049_v9, 0.0  ;;  %v2972_v23 = vsel %vm2967_vm11, %v6465_v48, %v6493_v54  ;;  %v3004_v1 = vsel %vm3001_vm15, %v2987_v62, 0.0  ;;  %v1313_v53 = vcvt.f32.s32 %v6137_v12 }
 0x4d5   :  { %v3083_v49 = vsel %vm3069_vm3, %v3066_v28, 0.0  ;;  %v2865_v14 = vpop.permute.xlu1 %2864  ;;  %v2835_v59 = vpop.permute.xlu0 %2834  ;;  %v2989_v38 = vsel %vm2984_vm10, %v2972_v23, %v6523_v34  ;;  %v1446_v34 = vcvt.s32.f32 %v1243_v45  ;;  %v1279_v54 = vadd.s32 %v1278_v35, %v1276_v32 }
 0x4d6   :  { %v3100_v25 = vsel %vm3086_vm4, %v3083_v49, 0.0  ;;  %v3034_v33 = vsel %vm3018_vm0, %v3017_v21, %v2865_v14  ;;  %v3019_v8 = vsel %vm3018_vm0, %v3002_v44, %v2835_v59  ;;  %v1312_v17 = vcvt.f32.s32 %v6485_v5 }
 0x4d7   :  { %3117 = vst.msk [vmem:[%s6779_s7 + $0x68] sm:$0xff] %vm3103_vm12, %v3100_v25  ;;  %v3051_v41 = vsel %vm3035_vm1, %v3034_v33, %v1457_v56  ;;  %v3036_v63 = vsel %vm3035_vm1, %v3019_v8, %v1442_v42  ;;  %v2974_v12 = vsel %vm2967_vm11, %v6469_v27, %v6495_v40  ;;  %v3006_v6 = vsel %vm3001_vm15, %v2989_v38, 0.0 }
 0x4d8   :  { %v3068_v36 = vsel %vm3052_vm2, %v3051_v41, 0.0  ;;  %v3053_v7 = vsel %vm3052_vm2, %v3036_v63, 0.0  ;;  %v1349_v21 = vcvt.f32.s32 %v6244_v31  ;;  %v2991_v18 = vsel %vm2984_vm10, %v2974_v12, %v6532_v43 }
 0x4d9   :  { %v3085_v20 = vsel %vm3069_vm3, %v3068_v36, 0.0  ;;  %v3070_v51 = vsel %vm3069_vm3, %v3053_v7, 0.0  ;;  %v2839_v2 = vpop.permute.xlu0 %2838  ;;  %v1314_v29 = vshll.u32 %v1313_v53, 16  ;;  %v1385_v5 = vcvt.f32.s32 %v6148_v30  ;;  %v7436_v53 = vld [vmem:[#allocation45_spill] sm:$0xff] }
 0x4da   :  { %v3102_v19 = vsel %vm3086_vm4, %v3085_v20, 0.0  ;;  %v3087_v10 = vsel %vm3086_vm4, %v3070_v51, 0.0  ;;  %v3021_v52 = vsel %vm3018_vm0, %v3004_v1, %v2839_v2  ;;  %v1448_v40 = vcvt.s32.f32 %v1279_v54 }
 0x4db   :  { %3119 = vst.msk [vmem:[%s6779_s7 + $0x78] sm:$0xff] %vm3103_vm12, %v3102_v19  ;;  %3104 = vst.msk [vmem:[%s6779_s7] sm:$0xff] %vm3103_vm12, %v3087_v10  ;;  %v3038_v48 = vsel %vm3035_vm1, %v3021_v52, %v1444_v0  ;;  %v1348_v31 = vcvt.f32.s32 %v6503_v26  ;;  %v1315_v43 = vadd.s32 %v1314_v29, %v1312_v17  ;;  %v2976_v13 = vsel %vm2967_vm11, %v6472_v47, %v6499_v46  ;;  %v7435_v52 = vld [vmem:[#allocation9_spill] sm:$0xff] }
 0x4dc   :  { %v3055_v60 = vsel %vm3052_vm2, %v3038_v48, 0.0  ;;  %v3008_v28 = vsel %vm3001_vm15, %v2991_v18, 0.0  ;;  %v1350_v56 = vshll.u32 %v1349_v21, 16  ;;  %v2993_v49 = vsel %vm2984_vm10, %v2976_v13, %v6549_v55 }
 0x4dd   :  { %v3072_v50 = vsel %vm3069_vm3, %v3055_v60, 0.0  ;;  %v2843_v4 = vpop.permute.xlu0 %2842  ;;  %v1384_v46 = vcvt.f32.s32 %v6489_v3  ;;  %v1450_v62 = vcvt.s32.f32 %v1315_v43  ;;  %v2978_v55 = vsel %vm2967_vm11, %v6477_v37, %v6501_v16 }
 0x4de   :  { %v3089_v9 = vsel %vm3086_vm4, %v3072_v50, 0.0  ;;  %v3023_v42 = vsel %vm3018_vm0, %v3006_v6, %v2843_v4  ;;  %v1351_v14 = vadd.s32 %v1350_v56, %v1348_v31  ;;  %v3010_v25 = vsel %vm3001_vm15, %v2993_v49, 0.0 }
 0x4df   :  { %3106 = vst.msk [vmem:[%s6779_s7 + $0x10] sm:$0xff] %vm3103_vm12, %v3089_v9  ;;  %v3040_v27 = vsel %vm3035_vm1, %v3023_v42, %v1446_v34  ;;  %v1386_v35 = vshll.u32 %v1385_v5, 16  ;;  %v2995_v0 = vsel %vm2984_vm10, %v2978_v55, %v6574_v24  ;;  %v1421_v63 = vcvt.f32.s32 %v6253_v58  ;;  %v7434_v24 = vld [vmem:[#allocation70_spill] sm:$0xff] }
 0x4e0   :  { %v3057_v39 = vsel %vm3052_vm2, %v3040_v27, 0.0  ;;  %v1452_v45 = vcvt.s32.f32 %v1351_v14  ;;  %v1420_v36 = vcvt.f32.s32 %v6507_v61  ;;  %v2980_v7 = vsel %vm2967_vm11, %v7434_v24, %v6505_v57 }
 0x4e1   :  { %v3074_v11 = vsel %vm3069_vm3, %v3057_v39, 0.0  ;;  %v2847_v44 = vpop.permute.xlu0 %2846  ;;  %v1387_v16 = vadd.s32 %v1386_v35, %v1384_v46  ;;  %v3012_v23 = vsel %vm3001_vm15, %v2995_v0, 0.0  ;;  %v2997_v20 = vsel %vm2984_vm10, %v2980_v7, %v6595_v22 }
 0x4e2   :  { %v3091_v30 = vsel %vm3086_vm4, %v3074_v11, 0.0  ;;  %v3025_v26 = vsel %vm3018_vm0, %v3008_v28, %v2847_v44  ;;  %v1422_v38 = vshll.u32 %v1421_v63, 16  ;;  %v2982_v22 = vsel %vm2967_vm11, %v7436_v53, %v7435_v52 }
 0x4e3   :  { %3108 = vst.msk [vmem:[%s6779_s7 + $0x20] sm:$0xff] %vm3103_vm12, %v3091_v30  ;;  %v3042_v47 = vsel %vm3035_vm1, %v3025_v26, %v1448_v40  ;;  %v1454_v61 = vcvt.s32.f32 %v1387_v16  ;;  %v3014_v48 = vsel %vm3001_vm15, %v2997_v20, 0.0  ;;  %v2999_v60 = vsel %vm2984_vm10, %v2982_v22, %v6616_v15 }
 0x4e4   :  { %v3059_v59 = vsel %vm3052_vm2, %v3042_v47, 0.0  ;;  %v1423_v10 = vadd.s32 %v1422_v38, %v1420_v36  ;;  %v3016_v21 = vsel %vm3001_vm15, %v2999_v60, 0.0 }
 0x4e5   :  { %v3076_v33 = vsel %vm3069_vm3, %v3059_v59, 0.0  ;;  %v2851_v8 = vpop.permute.xlu0 %2850 }
 0x4e6   :  { %v3093_v41 = vsel %vm3086_vm4, %v3076_v33, 0.0  ;;  %v3027_v3 = vsel %vm3018_vm0, %v3010_v25, %v2851_v8  ;;  %v1456_v4 = vcvt.s32.f32 %v1423_v10 }
 0x4e7   :  { %3110 = vst.msk [vmem:[%s6779_s7 + $0x30] sm:$0xff] %vm3103_vm12, %v3093_v41  ;;  %v3044_v37 = vsel %vm3035_vm1, %v3027_v3, %v1450_v62 }
 0x4e8   :  { %v3061_v32 = vsel %vm3052_vm2, %v3044_v37, 0.0 }
 0x4e9   :  { %v3078_v58 = vsel %vm3069_vm3, %v3061_v32, 0.0  ;;  %v2855_v1 = vpop.permute.xlu0 %2854 }
 0x4ea   :  { %v3095_v51 = vsel %vm3086_vm4, %v3078_v58, 0.0  ;;  %v3029_v2 = vsel %vm3018_vm0, %v3012_v23, %v2855_v1 }
 0x4eb   :  { %3112 = vst.msk [vmem:[%s6779_s7 + $0x40] sm:$0xff] %vm3103_vm12, %v3095_v51  ;;  %v3046_v57 = vsel %vm3035_vm1, %v3029_v2, %v1452_v45 }
 0x4ec   :  { %v3063_v19 = vsel %vm3052_vm2, %v3046_v57, 0.0 }
 0x4ed   :  { %v3080_v34 = vsel %vm3069_vm3, %v3063_v19, 0.0  ;;  %v2859_v54 = vpop.permute.xlu0 %2858 }
 0x4ee   :  { %v3097_v17 = vsel %vm3086_vm4, %v3080_v34, 0.0  ;;  %v3031_v12 = vsel %vm3018_vm0, %v3014_v48, %v2859_v54 }
 0x4ef   :  { %3114 = vst.msk [vmem:[%s6779_s7 + $0x50] sm:$0xff] %vm3103_vm12, %v3097_v17  ;;  %v3048_v6 = vsel %vm3035_vm1, %v3031_v12, %v1454_v61 }
 0x4f0   :  { %v3065_v50 = vsel %vm3052_vm2, %v3048_v6, 0.0 }
 0x4f1   :  { %v3082_v18 = vsel %vm3069_vm3, %v3065_v50, 0.0  ;;  %v2863_v9 = vpop.permute.xlu0 %2862 }
 0x4f2   :  { %v3099_v15 = vsel %vm3086_vm4, %v3082_v18, 0.0  ;;  %v3033_v42 = vsel %vm3018_vm0, %v3016_v21, %v2863_v9 }
 0x4f3   :  { %3116 = vst.msk [vmem:[%s6779_s7 + $0x60] sm:$0xff] %vm3103_vm12, %v3099_v15  ;;  %v3050_v29 = vsel %vm3035_vm1, %v3033_v42, %v1456_v4 }
 0x4f4   :  { %v3067_v27 = vsel %vm3052_vm2, %v3050_v29, 0.0 }
 0x4f5   :  { %v3084_v5 = vsel %vm3069_vm3, %v3067_v27, 0.0 }
 0x4f6   :  { %v3101_v40 = vsel %vm3086_vm4, %v3084_v5, 0.0 }
 0x4f7   :  { %3118 = vst.msk [vmem:[%s6779_s7 + $0x70] sm:$0xff] %vm3103_vm12, %v3101_v40 }

</bundles_post_ra>
